<compile_context>
chip_gen: v6e
topology: v6e:2x2x1
jax: 0.10.0
libtpu: 0.0.40
codegen_flags: <defaults>
</compile_context>

<pallas_src>
import jax
import jax.numpy as jnp
from jax.experimental import pallas as pl
from jax.experimental.pallas import tpu as pltpu

X_DIM = 7
Y_DIM = 3
Z_DIM = 100
H1 = 400
H2 = 200
ZP = 128          # z / mean / logvar padded to a full 128-lane width
XP = 128          # decoder output padded to a full 128-lane width
GROUP = 128       # BN group size == per-grid-step batch tile (MXU M dimension)
BN_EPS = 1e-5
LEAKY_SLOPE = 0.01


def _bn_train(h, gamma, beta):
    """BatchNorm1d (training mode): one-pass stats + affine fused into a single FMA."""
    inv_n = jnp.float32(1.0 / h.shape[0])
    mu = jnp.sum(h, axis=0, keepdims=True) * inv_n
    msq = jnp.sum(h * h, axis=0, keepdims=True) * inv_n
    var = jnp.maximum(msq - mu * mu, 0.0)          # clamp cancellation; never negative
    scale = gamma * jax.lax.rsqrt(var + BN_EPS)
    shift = beta - mu * scale
    return h * scale + shift


def _leaky_relu(h):
    return jnp.where(h >= 0, h, LEAKY_SLOPE * h)


def cvae_kernel(
    # per-group data
    xy_ref, y_ref, eps_ref,
    # encoder
    e1w_ref, e1b_ref, bn1g_ref, bn1b_ref,
    e2w_ref, e2b_ref, bn2g_ref, bn2b_ref,
    # latent heads (padded to ZP lanes)
    mw_ref, mb_ref, lw_ref, lb_ref,
    # decoder (first layer split: z part padded to ZP rows, y part kept f32 for VPU)
    d1wz_ref, d1wy_ref, d1b_ref, bnd1g_ref, bnd1b_ref,
    d2w_ref, d2b_ref, bnd2g_ref, bnd2b_ref,
    d3w_ref, d3b_ref, bnd3g_ref, bnd3b_ref,     # padded to XP lanes
    # outputs (lane-dense, padded)
    z_out_ref, mean_out_ref, logvar_out_ref, dec_out_ref,
):
    xy = xy_ref[...]
    yv = y_ref[...]
    eps = eps_ref[...]

    # ---------------- Encoder (bf16 MXU operands, f32 accumulation) ----------------
    h = jnp.dot(xy.astype(jnp.bfloat16), e1w_ref[...],
                preferred_element_type=jnp.float32) + e1b_ref[...]
    h = _leaky_relu(_bn_train(h, bn1g_ref[...], bn1b_ref[...]))

    h = jnp.dot(h.astype(jnp.bfloat16), e2w_ref[...],
                preferred_element_type=jnp.float32) + e2b_ref[...]
    h = jnp.maximum(_bn_train(h, bn2g_ref[...], bn2b_ref[...]), 0.0)

    # ---------------- Latent heads + reparameterize (f32) ----------------
    # Padded cols (100..127) of mw/lw/mb/lb and of eps are zero -> padded z cols are 0.
    hb = h.astype(jnp.bfloat16)
    mean = jnp.dot(hb, mw_ref[...], preferred_element_type=jnp.float32) + mb_ref[...]
    logvar = jnp.dot(hb, lw_ref[...], preferred_element_type=jnp.float32) + lb_ref[...]
    z = mean + eps * jnp.exp(0.5 * logvar)

    # ---------------- Decoder ----------------
    # cat(z, y) @ W == z @ W[:Z] (MXU, padded z rows of d1wz are zero)
    #               + y @ W[Z:]  (K=3 -> three VPU broadcast-FMAs, no MXU push)
    d = jnp.dot(z.astype(jnp.bfloat16), d1wz_ref[...],
                preferred_element_type=jnp.float32) + d1b_ref[...]
    d1wy = d1wy_ref[...]
    for k in range(Y_DIM):
        d = d + yv[:, k:k + 1] * d1wy[k:k + 1, :]
    d = _leaky_relu(_bn_train(d, bnd1g_ref[...], bnd1b_ref[...]))

    d = jnp.dot(d.astype(jnp.bfloat16), d2w_ref[...],
                preferred_element_type=jnp.float32) + d2b_ref[...]
    d = _leaky_relu(_bn_train(d, bnd2g_ref[...], bnd2b_ref[...]))

    d = jnp.dot(d.astype(jnp.bfloat16), d3w_ref[...],
                preferred_element_type=jnp.float32) + d3b_ref[...]
    d = _bn_train(d, bnd3g_ref[...], bnd3b_ref[...])   # all-zero padded cols stay 0

    # Softmax over the 7 real columns only; padded lanes masked so exp() underflows to 0.
    col = jax.lax.broadcasted_iota(jnp.int32, d.shape, 1)
    d_masked = jnp.where(col < X_DIM, d, jnp.float32(-1e30))
    m = jnp.max(d_masked, axis=-1, keepdims=True)
    e = jnp.exp(d_masked - m)
    dec = e * pl.reciprocal(jnp.sum(e, axis=-1, keepdims=True), approx=False)

    z_out_ref[...] = z
    mean_out_ref[...] = mean
    logvar_out_ref[...] = logvar
    dec_out_ref[...] = dec


# ----------------------------------------------------------------------------
# Parameters: PyTorch-shaped params -> kernel (split / lane-padded / bf16) layout.
# ----------------------------------------------------------------------------
def init_params(key):
    """Deterministic synthetic parameters with the exact shapes of CVAE.__init__."""
    ks = jax.random.split(key, 8)

    def lin(k, fan_in, fan_out):
        bound = 1.0 / jnp.sqrt(fan_in)
        kw, kb = jax.random.split(k)
        w = jax.random.uniform(kw, (fan_in, fan_out), jnp.float32, -bound, bound)
        b = jax.random.uniform(kb, (1, fan_out), jnp.float32, -bound, bound)
        return w, b

    p = {}
    p["e1w"], p["e1b"] = lin(ks[0], X_DIM + Y_DIM, H1)          # (10, 400)
    p["bn1g"], p["bn1b"] = jnp.ones((1, H1)), jnp.zeros((1, H1))
    p["e2w"], p["e2b"] = lin(ks[1], H1, H2)                      # (400, 200)
    p["bn2g"], p["bn2b"] = jnp.ones((1, H2)), jnp.zeros((1, H2))
    p["mw"], p["mb"] = lin(ks[2], H2, Z_DIM)                     # (200, 100)
    p["lw"], p["lb"] = lin(ks[3], H2, Z_DIM)
    p["d1w"], p["d1b"] = lin(ks[4], Z_DIM + Y_DIM, H1)           # (103, 400)
    p["bnd1g"], p["bnd1b"] = jnp.ones((1, H1)), jnp.zeros((1, H1))
    p["d2w"], p["d2b"] = lin(ks[5], H1, H2)
    p["bnd2g"], p["bnd2b"] = jnp.ones((1, H2)), jnp.zeros((1, H2))
    p["d3w"], p["d3b"] = lin(ks[6], H2, X_DIM)                   # (200, 7)
    p["bnd3g"], p["bnd3b"] = jnp.ones((1, X_DIM)), jnp.zeros((1, X_DIM))
    return jax.tree_util.tree_map(lambda a: a.astype(jnp.float32), p)


def prepare_params(p):
    """Split (decoder concat), zero-pad to lane-dense widths, cast MXU weights to bf16."""
    zpad = ZP - Z_DIM
    xpad = XP - X_DIM
    bf16 = lambda a: a.astype(jnp.bfloat16)
    q = {
        "e1w": bf16(p["e1w"]), "e1b": p["e1b"], "bn1g": p["bn1g"], "bn1b": p["bn1b"],
        "e2w": bf16(p["e2w"]), "e2b": p["e2b"], "bn2g": p["bn2g"], "bn2b": p["bn2b"],
        # latent heads padded 100 -> 128 (zero cols => padded outputs are exactly 0)
        "mw": bf16(jnp.pad(p["mw"], ((0, 0), (0, zpad)))),
        "mb": jnp.pad(p["mb"], ((0, 0), (0, zpad))),
        "lw": bf16(jnp.pad(p["lw"], ((0, 0), (0, zpad)))),
        "lb": jnp.pad(p["lb"], ((0, 0), (0, zpad))),
        # decoder first layer: split cat(z, y); pad z rows 100 -> 128 with zeros
        "d1wz": bf16(jnp.pad(p["d1w"][:Z_DIM], ((0, zpad), (0, 0)))),
        "d1wy": p["d1w"][Z_DIM:],          # (3, 400), stays f32: applied on the VPU
        "d1b": p["d1b"], "bnd1g": p["bnd1g"], "bnd1b": p["bnd1b"],
        "d2w": bf16(p["d2w"]), "d2b": p["d2b"], "bnd2g": p["bnd2g"], "bnd2b": p["bnd2b"],
        # final layer padded 7 -> 128 (all-zero cols pass through BN as exactly 0)
        "d3w": bf16(jnp.pad(p["d3w"], ((0, 0), (0, xpad)))),
        "d3b": jnp.pad(p["d3b"], ((0, 0), (0, xpad))),
        "bnd3g": jnp.pad(p["bnd3g"], ((0, 0), (0, xpad)), constant_values=1.0),
        "bnd3b": jnp.pad(p["bnd3b"], ((0, 0), (0, xpad))),
    }
    return q


PARAM_ORDER = [
    "e1w", "e1b", "bn1g", "bn1b",
    "e2w", "e2b", "bn2g", "bn2b",
    "mw", "mb", "lw", "lb",
    "d1wz", "d1wy", "d1b", "bnd1g", "bnd1b",
    "d2w", "d2b", "bnd2g", "bnd2b",
    "d3w", "d3b", "bnd3g", "bnd3b",
]


@jax.jit
def cvae_forward(x, y, eps, kparams):
    """x:(B,7) y:(B,3) eps:(B,100) -> (z, mean, logvar, decoded_zy).

    Grid over B//GROUP independent 128-row BN groups; weights VMEM-resident.
    """
    B = x.shape[0]
    assert B % GROUP == 0, "batch must be a multiple of the BN group size"
    num_groups = B // GROUP

    xy = jnp.concatenate([x, y], axis=1)                 # encoder concat in the wrapper
    eps_p = jnp.pad(eps, ((0, 0), (0, ZP - Z_DIM)))      # keep padded z columns exactly 0
    args = [xy, y, eps_p] + [kparams[k] for k in PARAM_ORDER]

    data_specs = [
        pl.BlockSpec((GROUP, X_DIM + Y_DIM), lambda g: (g, 0)),
        pl.BlockSpec((GROUP, Y_DIM), lambda g: (g, 0)),
        pl.BlockSpec((GROUP, ZP), lambda g: (g, 0)),
    ]
    # Weights: constant block index -> DMA'd once, stay resident in VMEM across groups.
    weight_specs = [pl.BlockSpec(kparams[k].shape, lambda g: (0, 0)) for k in PARAM_ORDER]

    out_specs = (
        pl.BlockSpec((GROUP, ZP), lambda g: (g, 0)),
        pl.BlockSpec((GROUP, ZP), lambda g: (g, 0)),
        pl.BlockSpec((GROUP, ZP), lambda g: (g, 0)),
        pl.BlockSpec((GROUP, XP), lambda g: (g, 0)),
    )
    out_shape = (
        jax.ShapeDtypeStruct((B, ZP), jnp.float32),   # z (padded)
        jax.ShapeDtypeStruct((B, ZP), jnp.float32),   # mean (padded)
        jax.ShapeDtypeStruct((B, ZP), jnp.float32),   # logvar (padded)
        jax.ShapeDtypeStruct((B, XP), jnp.float32),   # decoded_zy (padded)
    )

    flops = 2 * B * ((X_DIM + Y_DIM) * H1 + H1 * H2 + 2 * H2 * Z_DIM
                     + Z_DIM * H1 + Y_DIM * H1 + H1 * H2 + H2 * X_DIM)
    in_bytes = sum(int(a.size) * a.dtype.itemsize for a in args)
    out_bytes = B * (3 * ZP + XP) * 4
    cost = pl.CostEstimate(flops=flops,
                           transcendentals=B * (Z_DIM + X_DIM),
                           bytes_accessed=in_bytes + out_bytes)

    z_p, mean_p, logvar_p, dec_p = pl.pallas_call(
        cvae_kernel,
        out_shape=out_shape,
        grid=(num_groups,),
        in_specs=data_specs + weight_specs,
        out_specs=out_specs,
        compiler_params=pltpu.CompilerParams(dimension_semantics=("parallel",)),
        cost_estimate=cost,
    )(*args)
    return (z_p[:, :Z_DIM], mean_p[:, :Z_DIM], logvar_p[:, :Z_DIM], dec_p[:, :X_DIM])


# ----------------------------------------------------------------------------
# Pure-JAX f32 reference (unpadded PyTorch-shaped params) for correctness checking.
# One call == one module forward() on a minibatch (training-mode BN over that batch).
# ----------------------------------------------------------------------------
def cvae_reference(x, y, eps, p):
    def bn(h, g, b):
        mu = jnp.mean(h, axis=0, keepdims=True)
        var = jnp.mean((h - mu) ** 2, axis=0, keepdims=True)
        return (h - mu) / jnp.sqrt(var + BN_EPS) * g + b

    def lrelu(h):
        return jnp.where(h >= 0, h, LEAKY_SLOPE * h)

    xy = jnp.concatenate([x, y], axis=1)
    h = xy @ p["e1w"] + p["e1b"]
    h = lrelu(bn(h, p["bn1g"], p["bn1b"]))
    h = h @ p["e2w"] + p["e2b"]
    h = jnp.maximum(bn(h, p["bn2g"], p["bn2b"]), 0.0)
    mean = h @ p["mw"] + p["mb"]
    logvar = h @ p["lw"] + p["lb"]
    z = mean + eps * jnp.exp(0.5 * logvar)
    zy = jnp.concatenate([z, y], axis=1)
    d = zy @ p["d1w"] + p["d1b"]
    d = lrelu(bn(d, p["bnd1g"], p["bnd1b"]))
    d = d @ p["d2w"] + p["d2b"]
    d = lrelu(bn(d, p["bnd2g"], p["bnd2b"]))
    d = d @ p["d3w"] + p["d3b"]
    d = bn(d, p["bnd3g"], p["bnd3b"])
    dec = jax.nn.softmax(d, axis=1)
    return z, mean, logvar, dec


def cvae_reference_grouped(x, y, eps, p, group):
    """Module forward applied independently per `group`-row minibatch (matches the grid)."""
    outs = [cvae_reference(x[i:i + group], y[i:i + group], eps[i:i + group], p)
            for i in range(0, x.shape[0], group)]
    return tuple(jnp.concatenate(parts, axis=0) for parts in zip(*outs))


if __name__ == "__main__":
    # Two 128-row BN groups: exercises the grid axis (and megacore sharding on v7x);
    # each group's MXU matmuls have a full M=128 rows.
    B = 2 * GROUP
    key = jax.random.PRNGKey(0)
    kx, ky, keps, kp = jax.random.split(key, 4)

    x = jax.random.normal(kx, (B, X_DIM), jnp.float32)
    y = jax.random.normal(ky, (B, Y_DIM), jnp.float32)
    eps = jax.random.normal(keps, (B, Z_DIM), jnp.float32)   # reparameterization noise

    params = init_params(kp)            # PyTorch-shaped, f32
    kparams = prepare_params(params)    # kernel layout (split + lane-padded + bf16 weights)

    z, mean, logvar, dec = jax.block_until_ready(cvae_forward(x, y, eps, kparams))

    z_r, mean_r, logvar_r, dec_r = cvae_reference_grouped(x, y, eps, params, GROUP)
    assert z.shape == (B, Z_DIM) and dec.shape == (B, X_DIM)
    # bf16 MXU operands (f32 accumulation) -> looser tolerances vs the pure-f32 reference.
    assert jnp.allclose(mean, mean_r, atol=5e-2, rtol=5e-2)
    assert jnp.allclose(logvar, logvar_r, atol=5e-2, rtol=5e-2)
    assert jnp.allclose(z, z_r, atol=5e-2, rtol=5e-2)
    assert jnp.allclose(dec, dec_r, atol=2e-2, rtol=2e-2)
    assert jnp.allclose(jnp.sum(dec, axis=1), 1.0, atol=1e-5)   # softmax rows sum to 1

    print("KERNEL_OK")
</pallas_src>

<mosaic_0001>
module attributes {stable_mosaic.version = 11 : i64} {
  func.func @cvae_kernel(%arg0: i32, %arg1: memref<128x10xf32, #tpu.memory_space<vmem>>, %arg2: memref<128x3xf32, #tpu.memory_space<vmem>>, %arg3: memref<128x128xf32, #tpu.memory_space<vmem>>, %arg4: memref<10x400xbf16, #tpu.memory_space<vmem>>, %arg5: memref<1x400xf32, #tpu.memory_space<vmem>>, %arg6: memref<1x400xf32, #tpu.memory_space<vmem>>, %arg7: memref<1x400xf32, #tpu.memory_space<vmem>>, %arg8: memref<400x200xbf16, #tpu.memory_space<vmem>>, %arg9: memref<1x200xf32, #tpu.memory_space<vmem>>, %arg10: memref<1x200xf32, #tpu.memory_space<vmem>>, %arg11: memref<1x200xf32, #tpu.memory_space<vmem>>, %arg12: memref<200x128xbf16, #tpu.memory_space<vmem>>, %arg13: memref<1x128xf32, #tpu.memory_space<vmem>>, %arg14: memref<200x128xbf16, #tpu.memory_space<vmem>>, %arg15: memref<1x128xf32, #tpu.memory_space<vmem>>, %arg16: memref<128x400xbf16, #tpu.memory_space<vmem>>, %arg17: memref<3x400xf32, #tpu.memory_space<vmem>>, %arg18: memref<1x400xf32, #tpu.memory_space<vmem>>, %arg19: memref<1x400xf32, #tpu.memory_space<vmem>>, %arg20: memref<1x400xf32, #tpu.memory_space<vmem>>, %arg21: memref<400x200xbf16, #tpu.memory_space<vmem>>, %arg22: memref<1x200xf32, #tpu.memory_space<vmem>>, %arg23: memref<1x200xf32, #tpu.memory_space<vmem>>, %arg24: memref<1x200xf32, #tpu.memory_space<vmem>>, %arg25: memref<200x128xbf16, #tpu.memory_space<vmem>>, %arg26: memref<1x128xf32, #tpu.memory_space<vmem>>, %arg27: memref<1x128xf32, #tpu.memory_space<vmem>>, %arg28: memref<1x128xf32, #tpu.memory_space<vmem>>, %arg29: memref<128x128xf32, #tpu.memory_space<vmem>>, %arg30: memref<128x128xf32, #tpu.memory_space<vmem>>, %arg31: memref<128x128xf32, #tpu.memory_space<vmem>>, %arg32: memref<128x128xf32, #tpu.memory_space<vmem>>) attributes {dimension_semantics = [#tpu.dimension_semantics<parallel>], iteration_bounds = array<i64: 2>, scalar_prefetch = 0 : i64, scratch_operands = 0 : i64, tpu.core_type = #tpu.core_type<tc>, window_params = [{transform_indices = @transform_0, window_bounds = array<i64: 128, 10>}, {transform_indices = @transform_1, window_bounds = array<i64: 128, 3>}, {transform_indices = @transform_2, window_bounds = array<i64: 128, 128>}, {pipeline_mode = #tpu.pipeline_mode<synchronous>, transform_indices = @transform_3, window_bounds = array<i64: 10, 400>}, {pipeline_mode = #tpu.pipeline_mode<synchronous>, transform_indices = @transform_4, window_bounds = array<i64: 1, 400>}, {pipeline_mode = #tpu.pipeline_mode<synchronous>, transform_indices = @transform_5, window_bounds = array<i64: 1, 400>}, {pipeline_mode = #tpu.pipeline_mode<synchronous>, transform_indices = @transform_6, window_bounds = array<i64: 1, 400>}, {pipeline_mode = #tpu.pipeline_mode<synchronous>, transform_indices = @transform_7, window_bounds = array<i64: 400, 200>}, {pipeline_mode = #tpu.pipeline_mode<synchronous>, transform_indices = @transform_8, window_bounds = array<i64: 1, 200>}, {pipeline_mode = #tpu.pipeline_mode<synchronous>, transform_indices = @transform_9, window_bounds = array<i64: 1, 200>}, {pipeline_mode = #tpu.pipeline_mode<synchronous>, transform_indices = @transform_10, window_bounds = array<i64: 1, 200>}, {pipeline_mode = #tpu.pipeline_mode<synchronous>, transform_indices = @transform_11, window_bounds = array<i64: 200, 128>}, {pipeline_mode = #tpu.pipeline_mode<synchronous>, transform_indices = @transform_12, window_bounds = array<i64: 1, 128>}, {pipeline_mode = #tpu.pipeline_mode<synchronous>, transform_indices = @transform_13, window_bounds = array<i64: 200, 128>}, {pipeline_mode = #tpu.pipeline_mode<synchronous>, transform_indices = @transform_14, window_bounds = array<i64: 1, 128>}, {pipeline_mode = #tpu.pipeline_mode<synchronous>, transform_indices = @transform_15, window_bounds = array<i64: 128, 400>}, {pipeline_mode = #tpu.pipeline_mode<synchronous>, transform_indices = @transform_16, window_bounds = array<i64: 3, 400>}, {pipeline_mode = #tpu.pipeline_mode<synchronous>, transform_indices = @transform_17, window_bounds = array<i64: 1, 400>}, {pipeline_mode = #tpu.pipeline_mode<synchronous>, transform_indices = @transform_18, window_bounds = array<i64: 1, 400>}, {pipeline_mode = #tpu.pipeline_mode<synchronous>, transform_indices = @transform_19, window_bounds = array<i64: 1, 400>}, {pipeline_mode = #tpu.pipeline_mode<synchronous>, transform_indices = @transform_20, window_bounds = array<i64: 400, 200>}, {pipeline_mode = #tpu.pipeline_mode<synchronous>, transform_indices = @transform_21, window_bounds = array<i64: 1, 200>}, {pipeline_mode = #tpu.pipeline_mode<synchronous>, transform_indices = @transform_22, window_bounds = array<i64: 1, 200>}, {pipeline_mode = #tpu.pipeline_mode<synchronous>, transform_indices = @transform_23, window_bounds = array<i64: 1, 200>}, {pipeline_mode = #tpu.pipeline_mode<synchronous>, transform_indices = @transform_24, window_bounds = array<i64: 200, 128>}, {pipeline_mode = #tpu.pipeline_mode<synchronous>, transform_indices = @transform_25, window_bounds = array<i64: 1, 128>}, {pipeline_mode = #tpu.pipeline_mode<synchronous>, transform_indices = @transform_26, window_bounds = array<i64: 1, 128>}, {pipeline_mode = #tpu.pipeline_mode<synchronous>, transform_indices = @transform_27, window_bounds = array<i64: 1, 128>}, {transform_indices = @transform_28, window_bounds = array<i64: 128, 128>}, {transform_indices = @transform_29, window_bounds = array<i64: 128, 128>}, {transform_indices = @transform_30, window_bounds = array<i64: 128, 128>}, {transform_indices = @transform_31, window_bounds = array<i64: 128, 128>}]} {
    %c0 = arith.constant 0 : index
    %c0_0 = arith.constant 0 : index
    %0 = vector.load %arg1[%c0, %c0_0] : memref<128x10xf32, #tpu.memory_space<vmem>>, vector<128x10xf32>
    %c0_1 = arith.constant 0 : index
    %c0_2 = arith.constant 0 : index
    %1 = vector.load %arg2[%c0_1, %c0_2] : memref<128x3xf32, #tpu.memory_space<vmem>>, vector<128x3xf32>
    %c0_3 = arith.constant 0 : index
    %c0_4 = arith.constant 0 : index
    %2 = vector.load %arg3[%c0_3, %c0_4] : memref<128x128xf32, #tpu.memory_space<vmem>>, vector<128x128xf32>
    %3 = arith.truncf %0 : vector<128x10xf32> to vector<128x10xbf16>
    %c0_5 = arith.constant 0 : index
    %c0_6 = arith.constant 0 : index
    %4 = vector.load %arg4[%c0_5, %c0_6] : memref<10x400xbf16, #tpu.memory_space<vmem>>, vector<10x400xbf16>
    %cst = arith.constant dense<0.000000e+00> : vector<128x400xf32>
    %5 = tpu.matmul %3, %4, %cst {dimension_numbers = #tpu.dot_dimension_numbers<[1], [0], [0], [1], [0, 0, 1, 1], [], []>} : vector<128x10xbf16>, vector<10x400xbf16>, vector<128x400xf32> -> vector<128x400xf32>
    %c0_7 = arith.constant 0 : index
    %c0_8 = arith.constant 0 : index
    %6 = vector.load %arg5[%c0_7, %c0_8] : memref<1x400xf32, #tpu.memory_space<vmem>>, vector<1x400xf32>
    %7 = vector.broadcast %6 : vector<1x400xf32> to vector<128x400xf32>
    %8 = arith.addf %5, %7 : vector<128x400xf32>
    %c0_9 = arith.constant 0 : index
    %c0_10 = arith.constant 0 : index
    %9 = vector.load %arg6[%c0_9, %c0_10] : memref<1x400xf32, #tpu.memory_space<vmem>>, vector<1x400xf32>
    %c0_11 = arith.constant 0 : index
    %c0_12 = arith.constant 0 : index
    %10 = vector.load %arg7[%c0_11, %c0_12] : memref<1x400xf32, #tpu.memory_space<vmem>>, vector<1x400xf32>
    %cst_13 = arith.constant dense<0.000000e+00> : vector<400xf32>
    %11 = vector.multi_reduction <add>, %8, %cst_13 [0] : vector<128x400xf32> to vector<400xf32>
    %12 = vector.shape_cast %11 : vector<400xf32> to vector<1x400xf32>
    %cst_14 = arith.constant 7.812500e-03 : f32
    %13 = vector.broadcast %cst_14 : f32 to vector<1x400xf32>
    %14 = arith.mulf %12, %13 : vector<1x400xf32>
    %15 = arith.mulf %8, %8 : vector<128x400xf32>
    %cst_15 = arith.constant dense<0.000000e+00> : vector<400xf32>
    %16 = vector.multi_reduction <add>, %15, %cst_15 [0] : vector<128x400xf32> to vector<400xf32>
    %17 = vector.shape_cast %16 : vector<400xf32> to vector<1x400xf32>
    %cst_16 = arith.constant 7.812500e-03 : f32
    %18 = vector.broadcast %cst_16 : f32 to vector<1x400xf32>
    %19 = arith.mulf %17, %18 : vector<1x400xf32>
    %20 = arith.mulf %14, %14 : vector<1x400xf32>
    %21 = arith.subf %19, %20 : vector<1x400xf32>
    %cst_17 = arith.constant 0.000000e+00 : f32
    %22 = vector.broadcast %cst_17 : f32 to vector<1x400xf32>
    %23 = arith.maximumf %21, %22 : vector<1x400xf32>
    %cst_18 = arith.constant 9.99999974E-6 : f32
    %24 = vector.broadcast %cst_18 : f32 to vector<1x400xf32>
    %25 = arith.addf %23, %24 : vector<1x400xf32>
    %26 = math.rsqrt %25 : vector<1x400xf32>
    %27 = arith.mulf %9, %26 : vector<1x400xf32>
    %28 = arith.mulf %14, %27 : vector<1x400xf32>
    %29 = arith.subf %10, %28 : vector<1x400xf32>
    %30 = vector.broadcast %27 : vector<1x400xf32> to vector<128x400xf32>
    %31 = arith.mulf %8, %30 : vector<128x400xf32>
    %32 = vector.broadcast %29 : vector<1x400xf32> to vector<128x400xf32>
    %33 = arith.addf %31, %32 : vector<128x400xf32>
    %cst_19 = arith.constant 0.000000e+00 : f32
    %34 = vector.broadcast %cst_19 : f32 to vector<128x400xf32>
    %35 = arith.cmpf oge, %33, %34 : vector<128x400xf32>
    %cst_20 = arith.constant 0.00999999977 : f32
    %36 = vector.broadcast %cst_20 : f32 to vector<128x400xf32>
    %37 = arith.mulf %36, %33 : vector<128x400xf32>
    %38 = arith.select %35, %33, %37 : vector<128x400xi1>, vector<128x400xf32>
    %39 = arith.truncf %38 : vector<128x400xf32> to vector<128x400xbf16>
    %c0_21 = arith.constant 0 : index
    %c0_22 = arith.constant 0 : index
    %40 = vector.load %arg8[%c0_21, %c0_22] : memref<400x200xbf16, #tpu.memory_space<vmem>>, vector<400x200xbf16>
    %cst_23 = arith.constant dense<0.000000e+00> : vector<128x200xf32>
    %41 = tpu.matmul %39, %40, %cst_23 {dimension_numbers = #tpu.dot_dimension_numbers<[1], [0], [0], [1], [0, 0, 1, 1], [], []>} : vector<128x400xbf16>, vector<400x200xbf16>, vector<128x200xf32> -> vector<128x200xf32>
    %c0_24 = arith.constant 0 : index
    %c0_25 = arith.constant 0 : index
    %42 = vector.load %arg9[%c0_24, %c0_25] : memref<1x200xf32, #tpu.memory_space<vmem>>, vector<1x200xf32>
    %43 = vector.broadcast %42 : vector<1x200xf32> to vector<128x200xf32>
    %44 = arith.addf %41, %43 : vector<128x200xf32>
    %c0_26 = arith.constant 0 : index
    %c0_27 = arith.constant 0 : index
    %45 = vector.load %arg10[%c0_26, %c0_27] : memref<1x200xf32, #tpu.memory_space<vmem>>, vector<1x200xf32>
    %c0_28 = arith.constant 0 : index
    %c0_29 = arith.constant 0 : index
    %46 = vector.load %arg11[%c0_28, %c0_29] : memref<1x200xf32, #tpu.memory_space<vmem>>, vector<1x200xf32>
    %cst_30 = arith.constant dense<0.000000e+00> : vector<200xf32>
    %47 = vector.multi_reduction <add>, %44, %cst_30 [0] : vector<128x200xf32> to vector<200xf32>
    %48 = vector.shape_cast %47 : vector<200xf32> to vector<1x200xf32>
    %cst_31 = arith.constant 7.812500e-03 : f32
    %49 = vector.broadcast %cst_31 : f32 to vector<1x200xf32>
    %50 = arith.mulf %48, %49 : vector<1x200xf32>
    %51 = arith.mulf %44, %44 : vector<128x200xf32>
    %cst_32 = arith.constant dense<0.000000e+00> : vector<200xf32>
    %52 = vector.multi_reduction <add>, %51, %cst_32 [0] : vector<128x200xf32> to vector<200xf32>
    %53 = vector.shape_cast %52 : vector<200xf32> to vector<1x200xf32>
    %cst_33 = arith.constant 7.812500e-03 : f32
    %54 = vector.broadcast %cst_33 : f32 to vector<1x200xf32>
    %55 = arith.mulf %53, %54 : vector<1x200xf32>
    %56 = arith.mulf %50, %50 : vector<1x200xf32>
    %57 = arith.subf %55, %56 : vector<1x200xf32>
    %cst_34 = arith.constant 0.000000e+00 : f32
    %58 = vector.broadcast %cst_34 : f32 to vector<1x200xf32>
    %59 = arith.maximumf %57, %58 : vector<1x200xf32>
    %cst_35 = arith.constant 9.99999974E-6 : f32
    %60 = vector.broadcast %cst_35 : f32 to vector<1x200xf32>
    %61 = arith.addf %59, %60 : vector<1x200xf32>
    %62 = math.rsqrt %61 : vector<1x200xf32>
    %63 = arith.mulf %45, %62 : vector<1x200xf32>
    %64 = arith.mulf %50, %63 : vector<1x200xf32>
    %65 = arith.subf %46, %64 : vector<1x200xf32>
    %66 = vector.broadcast %63 : vector<1x200xf32> to vector<128x200xf32>
    %67 = arith.mulf %44, %66 : vector<128x200xf32>
    %68 = vector.broadcast %65 : vector<1x200xf32> to vector<128x200xf32>
    %69 = arith.addf %67, %68 : vector<128x200xf32>
    %cst_36 = arith.constant 0.000000e+00 : f32
    %70 = vector.broadcast %cst_36 : f32 to vector<128x200xf32>
    %71 = arith.maximumf %69, %70 : vector<128x200xf32>
    %72 = arith.truncf %71 : vector<128x200xf32> to vector<128x200xbf16>
    %c0_37 = arith.constant 0 : index
    %c0_38 = arith.constant 0 : index
    %73 = vector.load %arg12[%c0_37, %c0_38] : memref<200x128xbf16, #tpu.memory_space<vmem>>, vector<200x128xbf16>
    %cst_39 = arith.constant dense<0.000000e+00> : vector<128x128xf32>
    %74 = tpu.matmul %72, %73, %cst_39 {dimension_numbers = #tpu.dot_dimension_numbers<[1], [0], [0], [1], [0, 0, 1, 1], [], []>} : vector<128x200xbf16>, vector<200x128xbf16>, vector<128x128xf32> -> vector<128x128xf32>
    %c0_40 = arith.constant 0 : index
    %c0_41 = arith.constant 0 : index
    %75 = vector.load %arg13[%c0_40, %c0_41] : memref<1x128xf32, #tpu.memory_space<vmem>>, vector<1x128xf32>
    %76 = vector.broadcast %75 : vector<1x128xf32> to vector<128x128xf32>
    %77 = arith.addf %74, %76 : vector<128x128xf32>
    %c0_42 = arith.constant 0 : index
    %c0_43 = arith.constant 0 : index
    %78 = vector.load %arg14[%c0_42, %c0_43] : memref<200x128xbf16, #tpu.memory_space<vmem>>, vector<200x128xbf16>
    %cst_44 = arith.constant dense<0.000000e+00> : vector<128x128xf32>
    %79 = tpu.matmul %72, %78, %cst_44 {dimension_numbers = #tpu.dot_dimension_numbers<[1], [0], [0], [1], [0, 0, 1, 1], [], []>} : vector<128x200xbf16>, vector<200x128xbf16>, vector<128x128xf32> -> vector<128x128xf32>
    %c0_45 = arith.constant 0 : index
    %c0_46 = arith.constant 0 : index
    %80 = vector.load %arg15[%c0_45, %c0_46] : memref<1x128xf32, #tpu.memory_space<vmem>>, vector<1x128xf32>
    %81 = vector.broadcast %80 : vector<1x128xf32> to vector<128x128xf32>
    %82 = arith.addf %79, %81 : vector<128x128xf32>
    %cst_47 = arith.constant 5.000000e-01 : f32
    %83 = vector.broadcast %cst_47 : f32 to vector<128x128xf32>
    %84 = arith.mulf %83, %82 : vector<128x128xf32>
    %85 = math.exp %84 : vector<128x128xf32>
    %86 = arith.mulf %2, %85 : vector<128x128xf32>
    %87 = arith.addf %77, %86 : vector<128x128xf32>
    %88 = arith.truncf %87 : vector<128x128xf32> to vector<128x128xbf16>
    %c0_48 = arith.constant 0 : index
    %c0_49 = arith.constant 0 : index
    %89 = vector.load %arg16[%c0_48, %c0_49] : memref<128x400xbf16, #tpu.memory_space<vmem>>, vector<128x400xbf16>
    %cst_50 = arith.constant dense<0.000000e+00> : vector<128x400xf32>
    %90 = tpu.matmul %88, %89, %cst_50 {dimension_numbers = #tpu.dot_dimension_numbers<[1], [0], [0], [1], [0, 0, 1, 1], [], []>} : vector<128x128xbf16>, vector<128x400xbf16>, vector<128x400xf32> -> vector<128x400xf32>
    %c0_51 = arith.constant 0 : index
    %c0_52 = arith.constant 0 : index
    %91 = vector.load %arg18[%c0_51, %c0_52] : memref<1x400xf32, #tpu.memory_space<vmem>>, vector<1x400xf32>
    %92 = vector.broadcast %91 : vector<1x400xf32> to vector<128x400xf32>
    %93 = arith.addf %90, %92 : vector<128x400xf32>
    %c0_53 = arith.constant 0 : index
    %c0_54 = arith.constant 0 : index
    %94 = vector.load %arg17[%c0_53, %c0_54] : memref<3x400xf32, #tpu.memory_space<vmem>>, vector<3x400xf32>
    %95 = vector.extract_strided_slice %1 {offsets = [0, 0], sizes = [128, 1], strides = [1, 1]} : vector<128x3xf32> to vector<128x1xf32>
    %96 = vector.extract_strided_slice %94 {offsets = [0, 0], sizes = [1, 400], strides = [1, 1]} : vector<3x400xf32> to vector<1x400xf32>
    %97 = vector.broadcast %95 : vector<128x1xf32> to vector<128x400xf32>
    %98 = vector.broadcast %96 : vector<1x400xf32> to vector<128x400xf32>
    %99 = arith.mulf %97, %98 : vector<128x400xf32>
    %100 = arith.addf %93, %99 : vector<128x400xf32>
    %101 = vector.extract_strided_slice %1 {offsets = [0, 1], sizes = [128, 1], strides = [1, 1]} : vector<128x3xf32> to vector<128x1xf32>
    %102 = vector.extract_strided_slice %94 {offsets = [1, 0], sizes = [1, 400], strides = [1, 1]} : vector<3x400xf32> to vector<1x400xf32>
    %103 = vector.broadcast %101 : vector<128x1xf32> to vector<128x400xf32>
    %104 = vector.broadcast %102 : vector<1x400xf32> to vector<128x400xf32>
    %105 = arith.mulf %103, %104 : vector<128x400xf32>
    %106 = arith.addf %100, %105 : vector<128x400xf32>
    %107 = vector.extract_strided_slice %1 {offsets = [0, 2], sizes = [128, 1], strides = [1, 1]} : vector<128x3xf32> to vector<128x1xf32>
    %108 = vector.extract_strided_slice %94 {offsets = [2, 0], sizes = [1, 400], strides = [1, 1]} : vector<3x400xf32> to vector<1x400xf32>
    %109 = vector.broadcast %107 : vector<128x1xf32> to vector<128x400xf32>
    %110 = vector.broadcast %108 : vector<1x400xf32> to vector<128x400xf32>
    %111 = arith.mulf %109, %110 : vector<128x400xf32>
    %112 = arith.addf %106, %111 : vector<128x400xf32>
    %c0_55 = arith.constant 0 : index
    %c0_56 = arith.constant 0 : index
    %113 = vector.load %arg19[%c0_55, %c0_56] : memref<1x400xf32, #tpu.memory_space<vmem>>, vector<1x400xf32>
    %c0_57 = arith.constant 0 : index
    %c0_58 = arith.constant 0 : index
    %114 = vector.load %arg20[%c0_57, %c0_58] : memref<1x400xf32, #tpu.memory_space<vmem>>, vector<1x400xf32>
    %cst_59 = arith.constant dense<0.000000e+00> : vector<400xf32>
    %115 = vector.multi_reduction <add>, %112, %cst_59 [0] : vector<128x400xf32> to vector<400xf32>
    %116 = vector.shape_cast %115 : vector<400xf32> to vector<1x400xf32>
    %cst_60 = arith.constant 7.812500e-03 : f32
    %117 = vector.broadcast %cst_60 : f32 to vector<1x400xf32>
    %118 = arith.mulf %116, %117 : vector<1x400xf32>
    %119 = arith.mulf %112, %112 : vector<128x400xf32>
    %cst_61 = arith.constant dense<0.000000e+00> : vector<400xf32>
    %120 = vector.multi_reduction <add>, %119, %cst_61 [0] : vector<128x400xf32> to vector<400xf32>
    %121 = vector.shape_cast %120 : vector<400xf32> to vector<1x400xf32>
    %cst_62 = arith.constant 7.812500e-03 : f32
    %122 = vector.broadcast %cst_62 : f32 to vector<1x400xf32>
    %123 = arith.mulf %121, %122 : vector<1x400xf32>
    %124 = arith.mulf %118, %118 : vector<1x400xf32>
    %125 = arith.subf %123, %124 : vector<1x400xf32>
    %cst_63 = arith.constant 0.000000e+00 : f32
    %126 = vector.broadcast %cst_63 : f32 to vector<1x400xf32>
    %127 = arith.maximumf %125, %126 : vector<1x400xf32>
    %cst_64 = arith.constant 9.99999974E-6 : f32
    %128 = vector.broadcast %cst_64 : f32 to vector<1x400xf32>
    %129 = arith.addf %127, %128 : vector<1x400xf32>
    %130 = math.rsqrt %129 : vector<1x400xf32>
    %131 = arith.mulf %113, %130 : vector<1x400xf32>
    %132 = arith.mulf %118, %131 : vector<1x400xf32>
    %133 = arith.subf %114, %132 : vector<1x400xf32>
    %134 = vector.broadcast %131 : vector<1x400xf32> to vector<128x400xf32>
    %135 = arith.mulf %112, %134 : vector<128x400xf32>
    %136 = vector.broadcast %133 : vector<1x400xf32> to vector<128x400xf32>
    %137 = arith.addf %135, %136 : vector<128x400xf32>
    %cst_65 = arith.constant 0.000000e+00 : f32
    %138 = vector.broadcast %cst_65 : f32 to vector<128x400xf32>
    %139 = arith.cmpf oge, %137, %138 : vector<128x400xf32>
    %cst_66 = arith.constant 0.00999999977 : f32
    %140 = vector.broadcast %cst_66 : f32 to vector<128x400xf32>
    %141 = arith.mulf %140, %137 : vector<128x400xf32>
    %142 = arith.select %139, %137, %141 : vector<128x400xi1>, vector<128x400xf32>
    %143 = arith.truncf %142 : vector<128x400xf32> to vector<128x400xbf16>
    %c0_67 = arith.constant 0 : index
    %c0_68 = arith.constant 0 : index
    %144 = vector.load %arg21[%c0_67, %c0_68] : memref<400x200xbf16, #tpu.memory_space<vmem>>, vector<400x200xbf16>
    %cst_69 = arith.constant dense<0.000000e+00> : vector<128x200xf32>
    %145 = tpu.matmul %143, %144, %cst_69 {dimension_numbers = #tpu.dot_dimension_numbers<[1], [0], [0], [1], [0, 0, 1, 1], [], []>} : vector<128x400xbf16>, vector<400x200xbf16>, vector<128x200xf32> -> vector<128x200xf32>
    %c0_70 = arith.constant 0 : index
    %c0_71 = arith.constant 0 : index
    %146 = vector.load %arg22[%c0_70, %c0_71] : memref<1x200xf32, #tpu.memory_space<vmem>>, vector<1x200xf32>
    %147 = vector.broadcast %146 : vector<1x200xf32> to vector<128x200xf32>
    %148 = arith.addf %145, %147 : vector<128x200xf32>
    %c0_72 = arith.constant 0 : index
    %c0_73 = arith.constant 0 : index
    %149 = vector.load %arg23[%c0_72, %c0_73] : memref<1x200xf32, #tpu.memory_space<vmem>>, vector<1x200xf32>
    %c0_74 = arith.constant 0 : index
    %c0_75 = arith.constant 0 : index
    %150 = vector.load %arg24[%c0_74, %c0_75] : memref<1x200xf32, #tpu.memory_space<vmem>>, vector<1x200xf32>
    %cst_76 = arith.constant dense<0.000000e+00> : vector<200xf32>
    %151 = vector.multi_reduction <add>, %148, %cst_76 [0] : vector<128x200xf32> to vector<200xf32>
    %152 = vector.shape_cast %151 : vector<200xf32> to vector<1x200xf32>
    %cst_77 = arith.constant 7.812500e-03 : f32
    %153 = vector.broadcast %cst_77 : f32 to vector<1x200xf32>
    %154 = arith.mulf %152, %153 : vector<1x200xf32>
    %155 = arith.mulf %148, %148 : vector<128x200xf32>
    %cst_78 = arith.constant dense<0.000000e+00> : vector<200xf32>
    %156 = vector.multi_reduction <add>, %155, %cst_78 [0] : vector<128x200xf32> to vector<200xf32>
    %157 = vector.shape_cast %156 : vector<200xf32> to vector<1x200xf32>
    %cst_79 = arith.constant 7.812500e-03 : f32
    %158 = vector.broadcast %cst_79 : f32 to vector<1x200xf32>
    %159 = arith.mulf %157, %158 : vector<1x200xf32>
    %160 = arith.mulf %154, %154 : vector<1x200xf32>
    %161 = arith.subf %159, %160 : vector<1x200xf32>
    %cst_80 = arith.constant 0.000000e+00 : f32
    %162 = vector.broadcast %cst_80 : f32 to vector<1x200xf32>
    %163 = arith.maximumf %161, %162 : vector<1x200xf32>
    %cst_81 = arith.constant 9.99999974E-6 : f32
    %164 = vector.broadcast %cst_81 : f32 to vector<1x200xf32>
    %165 = arith.addf %163, %164 : vector<1x200xf32>
    %166 = math.rsqrt %165 : vector<1x200xf32>
    %167 = arith.mulf %149, %166 : vector<1x200xf32>
    %168 = arith.mulf %154, %167 : vector<1x200xf32>
    %169 = arith.subf %150, %168 : vector<1x200xf32>
    %170 = vector.broadcast %167 : vector<1x200xf32> to vector<128x200xf32>
    %171 = arith.mulf %148, %170 : vector<128x200xf32>
    %172 = vector.broadcast %169 : vector<1x200xf32> to vector<128x200xf32>
    %173 = arith.addf %171, %172 : vector<128x200xf32>
    %cst_82 = arith.constant 0.000000e+00 : f32
    %174 = vector.broadcast %cst_82 : f32 to vector<128x200xf32>
    %175 = arith.cmpf oge, %173, %174 : vector<128x200xf32>
    %cst_83 = arith.constant 0.00999999977 : f32
    %176 = vector.broadcast %cst_83 : f32 to vector<128x200xf32>
    %177 = arith.mulf %176, %173 : vector<128x200xf32>
    %178 = arith.select %175, %173, %177 : vector<128x200xi1>, vector<128x200xf32>
    %179 = arith.truncf %178 : vector<128x200xf32> to vector<128x200xbf16>
    %c0_84 = arith.constant 0 : index
    %c0_85 = arith.constant 0 : index
    %180 = vector.load %arg25[%c0_84, %c0_85] : memref<200x128xbf16, #tpu.memory_space<vmem>>, vector<200x128xbf16>
    %cst_86 = arith.constant dense<0.000000e+00> : vector<128x128xf32>
    %181 = tpu.matmul %179, %180, %cst_86 {dimension_numbers = #tpu.dot_dimension_numbers<[1], [0], [0], [1], [0, 0, 1, 1], [], []>} : vector<128x200xbf16>, vector<200x128xbf16>, vector<128x128xf32> -> vector<128x128xf32>
    %c0_87 = arith.constant 0 : index
    %c0_88 = arith.constant 0 : index
    %182 = vector.load %arg26[%c0_87, %c0_88] : memref<1x128xf32, #tpu.memory_space<vmem>>, vector<1x128xf32>
    %183 = vector.broadcast %182 : vector<1x128xf32> to vector<128x128xf32>
    %184 = arith.addf %181, %183 : vector<128x128xf32>
    %c0_89 = arith.constant 0 : index
    %c0_90 = arith.constant 0 : index
    %185 = vector.load %arg27[%c0_89, %c0_90] : memref<1x128xf32, #tpu.memory_space<vmem>>, vector<1x128xf32>
    %c0_91 = arith.constant 0 : index
    %c0_92 = arith.constant 0 : index
    %186 = vector.load %arg28[%c0_91, %c0_92] : memref<1x128xf32, #tpu.memory_space<vmem>>, vector<1x128xf32>
    %cst_93 = arith.constant dense<0.000000e+00> : vector<128xf32>
    %187 = vector.multi_reduction <add>, %184, %cst_93 [0] : vector<128x128xf32> to vector<128xf32>
    %188 = vector.shape_cast %187 : vector<128xf32> to vector<1x128xf32>
    %cst_94 = arith.constant 7.812500e-03 : f32
    %189 = vector.broadcast %cst_94 : f32 to vector<1x128xf32>
    %190 = arith.mulf %188, %189 : vector<1x128xf32>
    %191 = arith.mulf %184, %184 : vector<128x128xf32>
    %cst_95 = arith.constant dense<0.000000e+00> : vector<128xf32>
    %192 = vector.multi_reduction <add>, %191, %cst_95 [0] : vector<128x128xf32> to vector<128xf32>
    %193 = vector.shape_cast %192 : vector<128xf32> to vector<1x128xf32>
    %cst_96 = arith.constant 7.812500e-03 : f32
    %194 = vector.broadcast %cst_96 : f32 to vector<1x128xf32>
    %195 = arith.mulf %193, %194 : vector<1x128xf32>
    %196 = arith.mulf %190, %190 : vector<1x128xf32>
    %197 = arith.subf %195, %196 : vector<1x128xf32>
    %cst_97 = arith.constant 0.000000e+00 : f32
    %198 = vector.broadcast %cst_97 : f32 to vector<1x128xf32>
    %199 = arith.maximumf %197, %198 : vector<1x128xf32>
    %cst_98 = arith.constant 9.99999974E-6 : f32
    %200 = vector.broadcast %cst_98 : f32 to vector<1x128xf32>
    %201 = arith.addf %199, %200 : vector<1x128xf32>
    %202 = math.rsqrt %201 : vector<1x128xf32>
    %203 = arith.mulf %185, %202 : vector<1x128xf32>
    %204 = arith.mulf %190, %203 : vector<1x128xf32>
    %205 = arith.subf %186, %204 : vector<1x128xf32>
    %206 = vector.broadcast %203 : vector<1x128xf32> to vector<128x128xf32>
    %207 = arith.mulf %184, %206 : vector<128x128xf32>
    %208 = vector.broadcast %205 : vector<1x128xf32> to vector<128x128xf32>
    %209 = arith.addf %207, %208 : vector<128x128xf32>
    %210 = tpu.iota {dimensions = array<i32: 1>} : vector<128x128xi32>
    %c7_i32 = arith.constant 7 : i32
    %211 = vector.broadcast %c7_i32 : i32 to vector<128x128xi32>
    %212 = arith.cmpi slt, %210, %211 : vector<128x128xi32>
    %cst_99 = arith.constant -1.000000e+30 : f32
    %213 = vector.broadcast %cst_99 : f32 to vector<128x128xf32>
    %214 = arith.select %212, %209, %213 : vector<128x128xi1>, vector<128x128xf32>
    %cst_100 = arith.constant dense<0xFF800000> : vector<128xf32>
    %215 = vector.multi_reduction <maximumf>, %214, %cst_100 [1] : vector<128x128xf32> to vector<128xf32>
    %216 = vector.shape_cast %215 : vector<128xf32> to vector<128x1xf32>
    %217 = vector.broadcast %216 : vector<128x1xf32> to vector<128x128xf32>
    %218 = arith.subf %214, %217 : vector<128x128xf32>
    %219 = math.exp %218 : vector<128x128xf32>
    %cst_101 = arith.constant dense<0.000000e+00> : vector<128xf32>
    %220 = vector.multi_reduction <add>, %219, %cst_101 [1] : vector<128x128xf32> to vector<128xf32>
    %221 = vector.shape_cast %220 : vector<128xf32> to vector<128x1xf32>
    %222 = tpu.reciprocal %221 : vector<128x1xf32> -> vector<128x1xf32>
    %223 = vector.broadcast %222 : vector<128x1xf32> to vector<128x128xf32>
    %224 = arith.mulf %219, %223 : vector<128x128xf32>
    %c0_102 = arith.constant 0 : index
    %c0_103 = arith.constant 0 : index
    %225 = vector.load %arg29[%c0_102, %c0_103] : memref<128x128xf32, #tpu.memory_space<vmem>>, vector<128x128xf32>
    tpu.vector_store %arg29[%c0_102, %c0_103], %87 {strides = array<i32>} : memref<128x128xf32, #tpu.memory_space<vmem>>, vector<128x128xf32>,
    %c0_104 = arith.constant 0 : index
    %c0_105 = arith.constant 0 : index
    %226 = vector.load %arg30[%c0_104, %c0_105] : memref<128x128xf32, #tpu.memory_space<vmem>>, vector<128x128xf32>
    tpu.vector_store %arg30[%c0_104, %c0_105], %77 {strides = array<i32>} : memref<128x128xf32, #tpu.memory_space<vmem>>, vector<128x128xf32>,
    %c0_106 = arith.constant 0 : index
    %c0_107 = arith.constant 0 : index
    %227 = vector.load %arg31[%c0_106, %c0_107] : memref<128x128xf32, #tpu.memory_space<vmem>>, vector<128x128xf32>
    tpu.vector_store %arg31[%c0_106, %c0_107], %82 {strides = array<i32>} : memref<128x128xf32, #tpu.memory_space<vmem>>, vector<128x128xf32>,
    %c0_108 = arith.constant 0 : index
    %c0_109 = arith.constant 0 : index
    %228 = vector.load %arg32[%c0_108, %c0_109] : memref<128x128xf32, #tpu.memory_space<vmem>>, vector<128x128xf32>
    tpu.vector_store %arg32[%c0_108, %c0_109], %224 {strides = array<i32>} : memref<128x128xf32, #tpu.memory_space<vmem>>, vector<128x128xf32>,
    return
  }
  func.func @transform_0(%arg0: i32) -> (i32, i32) {
    %c0_i32 = arith.constant 0 : i32
    %c0_i32_0 = arith.constant 0 : i32
    return %arg0, %c0_i32 : i32, i32
  }
  func.func @transform_1(%arg0: i32) -> (i32, i32) {
    %c0_i32 = arith.constant 0 : i32
    %c0_i32_0 = arith.constant 0 : i32
    return %arg0, %c0_i32 : i32, i32
  }
  func.func @transform_2(%arg0: i32) -> (i32, i32) {
    %c0_i32 = arith.constant 0 : i32
    %c0_i32_0 = arith.constant 0 : i32
    return %arg0, %c0_i32 : i32, i32
  }
  func.func @transform_3(%arg0: i32) -> (i32, i32) {
    %c0_i32 = arith.constant 0 : i32
    %c0_i32_0 = arith.constant 0 : i32
    %c0_i32_1 = arith.constant 0 : i32
    return %c0_i32, %c0_i32_0 : i32, i32
  }
  func.func @transform_4(%arg0: i32) -> (i32, i32) {
    %c0_i32 = arith.constant 0 : i32
    %c0_i32_0 = arith.constant 0 : i32
    %c0_i32_1 = arith.constant 0 : i32
    return %c0_i32, %c0_i32_0 : i32, i32
  }
  func.func @transform_5(%arg0: i32) -> (i32, i32) {
    %c0_i32 = arith.constant 0 : i32
    %c0_i32_0 = arith.constant 0 : i32
    %c0_i32_1 = arith.constant 0 : i32
    return %c0_i32, %c0_i32_0 : i32, i32
  }
  func.func @transform_6(%arg0: i32) -> (i32, i32) {
    %c0_i32 = arith.constant 0 : i32
    %c0_i32_0 = arith.constant 0 : i32
    %c0_i32_1 = arith.constant 0 : i32
    return %c0_i32, %c0_i32_0 : i32, i32
  }
  func.func @transform_7(%arg0: i32) -> (i32, i32) {
    %c0_i32 = arith.constant 0 : i32
    %c0_i32_0 = arith.constant 0 : i32
    %c0_i32_1 = arith.constant 0 : i32
    return %c0_i32, %c0_i32_0 : i32, i32
  }
  func.func @transform_8(%arg0: i32) -> (i32, i32) {
    %c0_i32 = arith.constant 0 : i32
    %c0_i32_0 = arith.constant 0 : i32
    %c0_i32_1 = arith.constant 0 : i32
    return %c0_i32, %c0_i32_0 : i32, i32
  }
  func.func @transform_9(%arg0: i32) -> (i32, i32) {
    %c0_i32 = arith.constant 0 : i32
    %c0_i32_0 = arith.constant 0 : i32
    %c0_i32_1 = arith.constant 0 : i32
    return %c0_i32, %c0_i32_0 : i32, i32
  }
  func.func @transform_10(%arg0: i32) -> (i32, i32) {
    %c0_i32 = arith.constant 0 : i32
    %c0_i32_0 = arith.constant 0 : i32
    %c0_i32_1 = arith.constant 0 : i32
    return %c0_i32, %c0_i32_0 : i32, i32
  }
  func.func @transform_11(%arg0: i32) -> (i32, i32) {
    %c0_i32 = arith.constant 0 : i32
    %c0_i32_0 = arith.constant 0 : i32
    %c0_i32_1 = arith.constant 0 : i32
    return %c0_i32, %c0_i32_0 : i32, i32
  }
  func.func @transform_12(%arg0: i32) -> (i32, i32) {
    %c0_i32 = arith.constant 0 : i32
    %c0_i32_0 = arith.constant 0 : i32
    %c0_i32_1 = arith.constant 0 : i32
    return %c0_i32, %c0_i32_0 : i32, i32
  }
  func.func @transform_13(%arg0: i32) -> (i32, i32) {
    %c0_i32 = arith.constant 0 : i32
    %c0_i32_0 = arith.constant 0 : i32
    %c0_i32_1 = arith.constant 0 : i32
    return %c0_i32, %c0_i32_0 : i32, i32
  }
  func.func @transform_14(%arg0: i32) -> (i32, i32) {
    %c0_i32 = arith.constant 0 : i32
    %c0_i32_0 = arith.constant 0 : i32
    %c0_i32_1 = arith.constant 0 : i32
    return %c0_i32, %c0_i32_0 : i32, i32
  }
  func.func @transform_15(%arg0: i32) -> (i32, i32) {
    %c0_i32 = arith.constant 0 : i32
    %c0_i32_0 = arith.constant 0 : i32
    %c0_i32_1 = arith.constant 0 : i32
    return %c0_i32, %c0_i32_0 : i32, i32
  }
  func.func @transform_16(%arg0: i32) -> (i32, i32) {
    %c0_i32 = arith.constant 0 : i32
    %c0_i32_0 = arith.constant 0 : i32
    %c0_i32_1 = arith.constant 0 : i32
    return %c0_i32, %c0_i32_0 : i32, i32
  }
  func.func @transform_17(%arg0: i32) -> (i32, i32) {
    %c0_i32 = arith.constant 0 : i32
    %c0_i32_0 = arith.constant 0 : i32
    %c0_i32_1 = arith.constant 0 : i32
    return %c0_i32, %c0_i32_0 : i32, i32
  }
  func.func @transform_18(%arg0: i32) -> (i32, i32) {
    %c0_i32 = arith.constant 0 : i32
    %c0_i32_0 = arith.constant 0 : i32
    %c0_i32_1 = arith.constant 0 : i32
    return %c0_i32, %c0_i32_0 : i32, i32
  }
  func.func @transform_19(%arg0: i32) -> (i32, i32) {
    %c0_i32 = arith.constant 0 : i32
    %c0_i32_0 = arith.constant 0 : i32
    %c0_i32_1 = arith.constant 0 : i32
    return %c0_i32, %c0_i32_0 : i32, i32
  }
  func.func @transform_20(%arg0: i32) -> (i32, i32) {
    %c0_i32 = arith.constant 0 : i32
    %c0_i32_0 = arith.constant 0 : i32
    %c0_i32_1 = arith.constant 0 : i32
    return %c0_i32, %c0_i32_0 : i32, i32
  }
  func.func @transform_21(%arg0: i32) -> (i32, i32) {
    %c0_i32 = arith.constant 0 : i32
    %c0_i32_0 = arith.constant 0 : i32
    %c0_i32_1 = arith.constant 0 : i32
    return %c0_i32, %c0_i32_0 : i32, i32
  }
  func.func @transform_22(%arg0: i32) -> (i32, i32) {
    %c0_i32 = arith.constant 0 : i32
    %c0_i32_0 = arith.constant 0 : i32
    %c0_i32_1 = arith.constant 0 : i32
    return %c0_i32, %c0_i32_0 : i32, i32
  }
  func.func @transform_23(%arg0: i32) -> (i32, i32) {
    %c0_i32 = arith.constant 0 : i32
    %c0_i32_0 = arith.constant 0 : i32
    %c0_i32_1 = arith.constant 0 : i32
    return %c0_i32, %c0_i32_0 : i32, i32
  }
  func.func @transform_24(%arg0: i32) -> (i32, i32) {
    %c0_i32 = arith.constant 0 : i32
    %c0_i32_0 = arith.constant 0 : i32
    %c0_i32_1 = arith.constant 0 : i32
    return %c0_i32, %c0_i32_0 : i32, i32
  }
  func.func @transform_25(%arg0: i32) -> (i32, i32) {
    %c0_i32 = arith.constant 0 : i32
    %c0_i32_0 = arith.constant 0 : i32
    %c0_i32_1 = arith.constant 0 : i32
    return %c0_i32, %c0_i32_0 : i32, i32
  }
  func.func @transform_26(%arg0: i32) -> (i32, i32) {
    %c0_i32 = arith.constant 0 : i32
    %c0_i32_0 = arith.constant 0 : i32
    %c0_i32_1 = arith.constant 0 : i32
    return %c0_i32, %c0_i32_0 : i32, i32
  }
  func.func @transform_27(%arg0: i32) -> (i32, i32) {
    %c0_i32 = arith.constant 0 : i32
    %c0_i32_0 = arith.constant 0 : i32
    %c0_i32_1 = arith.constant 0 : i32
    return %c0_i32, %c0_i32_0 : i32, i32
  }
  func.func @transform_28(%arg0: i32) -> (i32, i32) {
    %c0_i32 = arith.constant 0 : i32
    %c0_i32_0 = arith.constant 0 : i32
    return %arg0, %c0_i32 : i32, i32
  }
  func.func @transform_29(%arg0: i32) -> (i32, i32) {
    %c0_i32 = arith.constant 0 : i32
    %c0_i32_0 = arith.constant 0 : i32
    return %arg0, %c0_i32 : i32, i32
  }
  func.func @transform_30(%arg0: i32) -> (i32, i32) {
    %c0_i32 = arith.constant 0 : i32
    %c0_i32_0 = arith.constant 0 : i32
    return %arg0, %c0_i32 : i32, i32
  }
  func.func @transform_31(%arg0: i32) -> (i32, i32) {
    %c0_i32 = arith.constant 0 : i32
    %c0_i32_0 = arith.constant 0 : i32
    return %arg0, %c0_i32 : i32, i32
  }
}

</mosaic_0001>

<bundles_post_ra>
// kernel: cvae_forward.1
= control target key start
LH: loop header
LB: loop body
LE: loop exit
PB: predicated region body
PF: predicated region fallthrough
CT: control target
= control target key end

     0   :  { %s7965_s6 = smov 1   ;;  %s7966_s10 = smov 2   ;;  %s12634_s0 = inlined_call_operand.smem [shape: u32[32], index: -1, kind: input, shape index: {}] }
   0x1   :  { %s8008_s5 = sld [smem:[%s12634_s0]]   ;;  %s7967_s14 = smov 3  }
   0x2   :  { %s8013_s9 = sld [smem:[%s12634_s0 + %s7965_s6]]   ;;  %s7968_s18 = smov 4  }
   0x3   :  { %s8018_s13 = sld [smem:[%s12634_s0 + %s7966_s10]]   ;;  %s7969_s22 = smov 5  }
   0x4   :  { %s8023_s17 = sld [smem:[%s12634_s0 + %s7967_s14]]   ;;  %s7970_s26 = smov 6  }
   0x5   :  { %s8028_s21 = sld [smem:[%s12634_s0 + %s7968_s18]]   ;;  %s7971_s30 = smov 7  }
   0x6   :  { %s8033_s25 = sld [smem:[%s12634_s0 + %s7969_s22]]   ;;  %s7972_s4 = smov 8  }
   0x7   :  { %s8038_s29 = sld [smem:[%s12634_s0 + %s7970_s26]]   ;;  %s7973_s10 = smov 9  }
   0x8   :  { %s8043_s3 = sld [smem:[%s12634_s0 + %s7971_s30]]   ;;  %s7974_s15 = smov 10  }
   0x9   :  { %12750 = sst [smem:[#allocation2_spill]] %s8018_s13  ;;  %s7975_s20 = smov 11  }
   0xa   :  { %s8048_s8 = sld [smem:[%s12634_s0 + %s7972_s4]]   ;;  %s7976_s26 = smov 12  }
   0xb   :  { %s8053_s14 = sld [smem:[%s12634_s0 + %s7973_s10]]   ;;  %s7977_s1 = smov 13  }
   0xc   :  { %s8058_s19 = sld [smem:[%s12634_s0 + %s7974_s15]]   ;;  %s7978_s7 = smov 14  }
   0xd   :  { %s8063_s24 = sld [smem:[%s12634_s0 + %s7975_s20]]   ;;  %s7979_s15 = smov 15  }
   0xe   :  { %s8068_s30 = sld [smem:[%s12634_s0 + %s7976_s26]]   ;;  %s7980_s22 = smov 16  }
   0xf   :  { %s8073_s6 = sld [smem:[%s12634_s0 + %s7977_s1]]   ;;  %s7981_s28 = smov 17  }
  0x10   :  { %s8078_s12 = sld [smem:[%s12634_s0 + %s7978_s7]]   ;;  %s7982_s7 = smov 18  }
  0x11   :  { %s8083_s20 = sld [smem:[%s12634_s0 + %s7979_s15]]   ;;  %s7983_s15 = smov 19  }
  0x12   :  { %s8088_s27 = sld [smem:[%s12634_s0 + %s7980_s22]]   ;;  %s7984_s22 = smov 20  }
  0x13   :  { %s8093_s4 = sld [smem:[%s12634_s0 + %s7981_s28]]   ;;  %s7985_s28 = smov 21  }
  0x14   :  { %s8098_s13 = sld [smem:[%s12634_s0 + %s7982_s7]]   ;;  %s7986_s7 = smov 22  }
  0x16   :  { %12751 = sst [smem:[#allocation3_spill]] %s8078_s12 }
  0x17   :  { %s8103_s12 = sld [smem:[%s12634_s0 + %s7983_s15]]   ;;  %s7987_s15 = smov 23  }
  0x18   :  { %12752 = sst [smem:[#allocation4_spill]] %s8088_s27 }
  0x19   :  { %12753 = sst [smem:[#allocation5_spill]] %s8093_s4 }
  0x1a   :  { %12754 = sst [smem:[#allocation6_spill]] %s8098_s13 }
  0x1b   :  { %s8108_s27 = sld [smem:[%s12634_s0 + %s7984_s22]]   ;;  %s7988_s22 = smov 24  }
  0x1c   :  { %s8113_s4 = sld [smem:[%s12634_s0 + %s7985_s28]]   ;;  %s7989_s28 = smov 25  }
  0x1d   :  { %12755 = sst [smem:[#allocation7_spill]] %s8103_s12 }
  0x1e   :  { %s8118_s13 = sld [smem:[%s12634_s0 + %s7986_s7]]   ;;  %s7990_s7 = smov 26  }
  0x1f   :  { %s8123_s12 = sld [smem:[%s12634_s0 + %s7987_s15]]   ;;  %s7991_s15 = smov 27  }
  0x21   :  { %12756 = sst [smem:[#allocation8_spill]] %s8108_s27 }
  0x22   :  { %12757 = sst [smem:[#allocation9_spill]] %s8113_s4 }
  0x23   :  { %s8128_s27 = sld [smem:[%s12634_s0 + %s7988_s22]]   ;;  %s7992_s22 = smov 28  }
  0x24   :  { %12758 = sst [smem:[#allocation10_spill]] %s8118_s13 }
  0x25   :  { %12759 = sst [smem:[#allocation11_spill]] %s8123_s12 }
  0x26   :  { %s8133_s4 = sld [smem:[%s12634_s0 + %s7989_s28]]   ;;  %s7993_s28 = smov 29  }
  0x27   :  { %s8138_s13 = sld [smem:[%s12634_s0 + %s7990_s7]]   ;;  %s7994_s7 = smov 30  }
  0x28   :  { %s8143_s12 = sld [smem:[%s12634_s0 + %s7991_s15]]   ;;  %s7995_s15 = smov 31  }
  0x29   :  { %12760 = sst [smem:[#allocation12_spill]] %s8128_s27 }
  0x2a   :  { %s8148_s27 = sld [smem:[%s12634_s0 + %s7992_s22]]   ;;  %s8165_s22 = smov 0  }
  0x2c   :  { %12761 = sst [smem:[#allocation13_spill]] %s8133_s4 }
  0x2d   :  { %12762 = sst [smem:[#allocation14_spill]] %s8138_s13 }
  0x2e   :  { %12763 = sst [smem:[#allocation15_spill]] %s8143_s12 }
  0x2f   :  { %s8153_s4 = sld [smem:[%s12634_s0 + %s7993_s28]]  }
  0x30   :  { %s8158_s13 = sld [smem:[%s12634_s0 + %s7994_s7]]  }
  0x31   :  { %s8163_s12 = sld [smem:[%s12634_s0 + %s7995_s15]]  }
  0x32 LB: > { %s7235_s23 = sadd.s32 4294967295, %s7963_s22   ;;  %p7239_p0 = scmp.ge.s32.totalorder %s7963_s22, 1  ;;  %s7963_s22 = sphi %s8165_s22, %s74_s22  }
  0x33   : > { %p899_p1 = scmp.lt.s32.totalorder %s7963_s22, 3 }
  0x35   : > { %p900_p2 = pnand %p7239_p0, %p899_p1 }
  0x37   : > { %903 = sbr.rel (%p900_p2) target bundleno = 2349 (0x92d), region = 132 }
  0x3c   : > { %v7592_v0 = vld [vmem:[%s8023_s17 + $0x4] ss:$16 sps:$4 sm:$0x1f]   ;;  %vm1170_vm0 = vcmask 1044480   ;;  %s7240_s0 = sshll.u32 %s7235_s23, 4  ;;  %v12639_v3 = vmov 0   ;;  %v12638_v49 = vlaneseq }
  0x3d   : > { %7258 = vmatprep.subr.msk.bf16.mxu0 %vm1170_vm0, %v7592_v0  ;;  %v7594_v1 = vld [vmem:[%s8023_s17 + $0xc] ss:$16 sps:$4 sm:$0x1f]   ;;  %v7596_v2 = vld [vmem:[%s8023_s17] ss:$16 sps:$4 sm:$0x1f]   ;;  %1215 = vmatprep.mubr.bf16.mxu0 %v12639_v3 }
  0x3e   : > { %v7597_v4 = vld [vmem:[%s8023_s17 + $0x8] ss:$16 sps:$4 sm:$0x1f]   ;;  %1328 = vmatprep.mubr.bf16.mxu1 %v12639_v3  ;;  %p1005_p3 = scmp.lt.s32.totalorder %s7240_s0, 31  ;;  %7562 = vset.pattern.permute.xlu1 %v12639_v3  ;;  %v1172_v5 = vsel %vm1170_vm0, %v7596_v2, 0  ;;  %vm1145_vm1 = vcmask 80896  }
  0x3f   : > { %7267 = vmatprep.subr.msk.bf16.mxu1 %vm1170_vm0, %v7594_v1  ;;  %7561 = vset.pattern.permute.xlu0 %v12639_v3  ;;  %v1178_v6 = vsel %vm1170_vm0, %v7597_v4, 0  ;;  %v7600_v31 = vld [vmem:[%s8043_s3 + $0x74] ss:$8 sps:$4 sm:$0xff]   ;;  %v7598_v32 = vld [vmem:[%s8043_s3 + $0x70] ss:$8 sps:$4 sm:$0xff]   ;;  %v8256_v54 = vshrl.u32 %v12638_v49, 7 }
  0x40   : > { %1198 = vmatpush1.bf16.msra.mxu0 %v1172_v5  ;;  %s13285_s0 = smov (!%p1005_p3, %s7240_s0), 31  ;;  %1311 = vmatpush1.bf16.msra.mxu1 %v1178_v6  ;;  %v7606_v33 = vld [vmem:[%s8043_s3 + $0x64] ss:$8 sps:$4 sm:$0xff]   ;;  %v7604_v34 = vld [vmem:[%s8043_s3 + $0x60] ss:$8 sps:$4 sm:$0xff]   ;;  %vm1474_vm2 = vcmask 130048  }
  0x41   : > { %s8181_s26 = sshll.u32 %s13285_s0, 3  ;;  %2498 = vmatprep.subr.bf16.mxu0 %v7600_v31  ;;  %v7609_v35 = vld [vmem:[%s8043_s3 + $0x54] ss:$8 sps:$4 sm:$0xff]   ;;  %v7607_v36 = vld [vmem:[%s8043_s3 + $0x50] ss:$8 sps:$4 sm:$0xff]   ;;  %12764 = vst [vmem:[#allocation16_spill] sm:$0xff] %v8256_v54 }
  0x42   : > { %s8185_s28 = scalar_lea.vmem %s8008_s5, %s8181_s26  ;;  %v7615_v37 = vld [vmem:[%s8043_s3 + $0x44] ss:$8 sps:$4 sm:$0xff]   ;;  %v7613_v38 = vld [vmem:[%s8043_s3 + $0x40] ss:$8 sps:$4 sm:$0xff]   ;;  %v7618_v39 = vld [vmem:[%s8043_s3 + $0x34] ss:$8 sps:$4 sm:$0xff]   ;;  %s9618_s1 = scalar_lea.vmem %s8013_s9, %s8181_s26 }
  0x43   : > { %v1047_v7 = vld [vmem:[%s8185_s28] sm:$0xff]  ;;  %v1048_v8 = vld [vmem:[%s8185_s28 + $0x8] sm:$0xff]  ;;  %v1049_v10 = vld [vmem:[%s8185_s28 + $0x10] sm:$0xff]  ;;  %v8263_v59 = vsub.s32 0, %v8256_v54  ;;  %v8267_v61 = vsub.s32 2, %v8256_v54  ;;  %v8270_v62 = vsub.s32 1, %v8256_v54  ;;  %s9673_s7 = scalar_lea.vmem %s8153_s4, %s8181_s26  ;;  %s9677_s10 = scalar_lea.vmem %s8158_s13, %s8181_s26 }
  0x44   : > { %v1095_v9 = vpack.c.bf16 %v1048_v8, %v1047_v7  ;;  %v1050_v11 = vld [vmem:[%s8185_s28 + $0x18] sm:$0xff]  ;;  %v1051_v13 = vld [vmem:[%s8185_s28 + $0x20] sm:$0xff]  ;;  %v1052_v14 = vld [vmem:[%s8185_s28 + $0x28] sm:$0xff]  ;;  %v8273_v63 = vsub.s32 3, %v8256_v54  ;;  %s12858_s2 = sld [smem:[#allocation3_spill]]  ;;  %s9743_s16 = scalar_lea.vmem %s8148_s27, %s8181_s26 }
  0x45   : > { %v1096_v12 = vpack.c.bf16 %v1050_v11, %v1049_v10  ;;  %v1097_v15 = vpack.c.bf16 %v1052_v14, %v1051_v13  ;;  %v1053_v16 = vld [vmem:[%s8185_s28 + $0x30] sm:$0xff]  ;;  %v1054_v17 = vld [vmem:[%s8185_s28 + $0x38] sm:$0xff]  ;;  %v1055_v19 = vld [vmem:[%s8185_s28 + $0x40] sm:$0xff]  ;;  %12765 = vst [vmem:[#allocation17_spill] sm:$0xff] %v8263_v59  ;;  %s12859_s11 = sld [smem:[#allocation2_spill]] }
  0x46   : > { %7259 = vmatmul.mubr.msk.bf16.vlgmr.msra.gmra.mxu0 %vm1145_vm1, %v1095_v9  ;;  %7268 = vmatmul.mubr.msk.bf16.vlgmr.msra.gmra.mxu1 %vm1145_vm1, %v1095_v9  ;;  %v1098_v18 = vpack.c.bf16 %v1054_v17, %v1053_v16  ;;  %v1056_v20 = vld [vmem:[%s8185_s28 + $0x48] sm:$0xff]  ;;  %v1057_v22 = vld [vmem:[%s8185_s28 + $0x50] sm:$0xff]  ;;  %v1058_v23 = vld [vmem:[%s8185_s28 + $0x58] sm:$0xff]  ;;  %12766 = vst [vmem:[#allocation18_spill] sm:$0xff] %v8267_v61  ;;  %s12860_s18 = sld [smem:[#allocation4_spill]] }
  0x47   : > { %1225 = vmatprep.mubr.bf16.mxu0 %v12639_v3  ;;  %1338 = vmatprep.mubr.bf16.mxu1 %v12639_v3  ;;  %v1099_v21 = vpack.c.bf16 %v1056_v20, %v1055_v19  ;;  %v1100_v24 = vpack.c.bf16 %v1058_v23, %v1057_v22  ;;  %v1059_v25 = vld [vmem:[%s8185_s28 + $0x60] sm:$0xff]  ;;  %v1060_v26 = vld [vmem:[%s8185_s28 + $0x68] sm:$0xff]  ;;  %v1061_v28 = vld [vmem:[%s8185_s28 + $0x70] sm:$0xff]  ;;  %12767 = vst [vmem:[#allocation19_spill] sm:$0xff] %v8270_v62  ;;  %s12862_s23 = sld [smem:[#allocation5_spill]] }
  0x48   : > { %v1101_v27 = vpack.c.bf16 %v1060_v26, %v1059_v25  ;;  %v1062_v29 = vld [vmem:[%s8185_s28 + $0x78] sm:$0xff]  ;;  %2499 = vmatpush1.bf16.msra.mxu0 %v7598_v32  ;;  %v7624_v41 = vld [vmem:[%s8043_s3 + $0x24] ss:$8 sps:$4 sm:$0xff]   ;;  %v7622_v42 = vld [vmem:[%s8043_s3 + $0x20] ss:$8 sps:$4 sm:$0xff]   ;;  %12768 = vst [vmem:[#allocation20_spill] sm:$0xff] %v8273_v63 }
  0x49   : > { %v1102_v30 = vpack.c.bf16 %v1062_v29, %v1061_v28  ;;  %2500 = vmatprep.subr.bf16.mxu0 %v7606_v33  ;;  %v7616_v40 = vld [vmem:[%s8043_s3 + $0x30] ss:$8 sps:$4 sm:$0xff]   ;;  %v7627_v43 = vld [vmem:[%s8043_s3 + $0x14] ss:$8 sps:$4 sm:$0xff]   ;;  %v7633_v46 = vld [vmem:[%s8043_s3 + $0x4] ss:$8 sps:$4 sm:$0xff]  }
  0x4a   : > { %v7625_v44 = vld [vmem:[%s8043_s3 + $0x10] ss:$8 sps:$4 sm:$0xff]   ;;  %v7603_v45 = vld [vmem:[%s8043_s3 + $0x174] ss:$8 sps:$4 sm:$0xff]   ;;  %v7631_v48 = vld [vmem:[%s8043_s3] ss:$8 sps:$4 sm:$0xff]  }
  0x4b   : > { %v7601_v47 = vld [vmem:[%s8043_s3 + $0x170] ss:$8 sps:$4 sm:$0xff]   ;;  %2611 = vmatprep.subr.bf16.mxu1 %v7603_v45  ;;  %v7612_v50 = vld [vmem:[%s8043_s3 + $0x164] ss:$8 sps:$4 sm:$0xff]   ;;  %v7639_v51 = vld [vmem:[%s8043_s3 + $0xf4] ss:$8 sps:$4 sm:$0xff]   ;;  %s9724_s15 = scalar_lea.vmem %s12859_s11, %s8181_s26 }
  0x4c   : > { %2501 = vmatpush1.bf16.msra.mxu0 %v7604_v34  ;;  %2612 = vmatpush1.bf16.msra.mxu1 %v7601_v47  ;;  %v7610_v52 = vld [vmem:[%s8043_s3 + $0x160] ss:$8 sps:$4 sm:$0xff]   ;;  %v7637_v53 = vld [vmem:[%s8043_s3 + $0xf0] ss:$8 sps:$4 sm:$0xff]   ;;  %v7621_v55 = vld [vmem:[%s8043_s3 + $0x154] ss:$8 sps:$4 sm:$0xff]  }
  0x4d   : > { %2502 = vmatprep.subr.bf16.mxu0 %v7609_v35  ;;  %2613 = vmatprep.subr.bf16.mxu1 %v7612_v50  ;;  %v7642_v56 = vld [vmem:[%s8043_s3 + $0xe4] ss:$8 sps:$4 sm:$0xff]   ;;  %v7619_v57 = vld [vmem:[%s8043_s3 + $0x150] ss:$8 sps:$4 sm:$0xff]   ;;  %v7640_v58 = vld [vmem:[%s8043_s3 + $0xe0] ss:$8 sps:$4 sm:$0xff]  }
  0x4e   : > { %7260 = vmatmul.mubr.msk.bf16.gmra.mxu0 %vm1145_vm1, %v1096_v12  ;;  %7269 = vmatmul.mubr.msk.bf16.gmra.mxu1 %vm1145_vm1, %v1096_v12  ;;  %v1107_v60 = vld [vmem:[%s8028_s21] sm:$0xf]  ;;  %v7630_v0 = vld [vmem:[%s8043_s3 + $0x144] ss:$8 sps:$4 sm:$0xff]   ;;  %v7648_v1 = vld [vmem:[%s8043_s3 + $0xd4] ss:$8 sps:$4 sm:$0xff]  }
  0x4f   : > { %1235 = vmatprep.mubr.bf16.mxu0 %v12639_v3  ;;  %1348 = vmatprep.mubr.bf16.mxu1 %v12639_v3  ;;  %v7628_v2 = vld [vmem:[%s8043_s3 + $0x140] ss:$8 sps:$4 sm:$0xff]   ;;  %v7646_v4 = vld [vmem:[%s8043_s3 + $0xd0] ss:$8 sps:$4 sm:$0xff]   ;;  %v8280_v5 = vrot.slane %v1107_v60, %v8263_v59  ;;  %v8283_v6 = vrot.slane %v1107_v60, %v8267_v61  ;;  %v8286_v7 = vrot.slane %v1107_v60, %v8270_v62  ;;  %v7636_v9 = vld [vmem:[%s8043_s3 + $0x134] ss:$8 sps:$4 sm:$0xff]  }
  0x50   : > { %2503 = vmatpush1.bf16.msra.mxu0 %v7607_v36  ;;  %2614 = vmatpush1.bf16.msra.mxu1 %v7610_v52  ;;  %v8289_v8 = vrot.slane %v1107_v60, %v8273_v63  ;;  %v7651_v10 = vld [vmem:[%s8043_s3 + $0xc4] ss:$8 sps:$4 sm:$0xff]   ;;  %v7634_v13 = vld [vmem:[%s8043_s3 + $0x130] ss:$8 sps:$4 sm:$0xff]   ;;  %v7649_v14 = vld [vmem:[%s8043_s3 + $0xc0] ss:$8 sps:$4 sm:$0xff]  }
  0x51   : > { %2504 = vmatprep.subr.bf16.mxu0 %v7615_v37  ;;  %2615 = vmatprep.subr.bf16.mxu1 %v7621_v55  ;;  %v7657_v22 = vld [vmem:[%s8043_s3 + $0xb4] ss:$8 sps:$4 sm:$0xff]   ;;  %v7643_v25 = vld [vmem:[%s8043_s3 + $0x120] ss:$8 sps:$4 sm:$0xff]   ;;  %v7655_v26 = vld [vmem:[%s8043_s3 + $0xb0] ss:$8 sps:$4 sm:$0xff]  }
  0x52   : > { %v7652_v47 = vld [vmem:[%s8043_s3 + $0x110] ss:$8 sps:$4 sm:$0xff]   ;;  %s13030_s0 = sld [smem:[#allocation8_spill]] }
  0x53   : > { %s13215_s28 = sld [smem:[#allocation6_spill]] }
  0x54   : > { %2505 = vmatpush1.bf16.msra.mxu0 %v7613_v38  ;;  %2616 = vmatpush1.bf16.msra.mxu1 %v7619_v57  ;;  %s13279_s11 = sld [smem:[#allocation11_spill]] }
  0x55   : > { %2506 = vmatprep.subr.bf16.mxu0 %v7618_v39  ;;  %2617 = vmatprep.subr.bf16.mxu1 %v7630_v0  ;;  %v7654_v39 = vld [vmem:[%s8043_s3 + $0x114] ss:$8 sps:$4 sm:$0xff]  }
  0x56   : > { %7261 = vmatmul.mubr.msk.bf16.gmra.mxu0 %vm1145_vm1, %v1097_v15  ;;  %7270 = vmatmul.mubr.msk.bf16.gmra.mxu1 %vm1145_vm1, %v1097_v15 }
  0x57   : > { %1245 = vmatprep.mubr.bf16.mxu0 %v12639_v3  ;;  %1358 = vmatprep.mubr.bf16.mxu1 %v12639_v3 }
  0x58   : > { %2507 = vmatpush1.bf16.msra.mxu0 %v7616_v40  ;;  %2618 = vmatpush1.bf16.msra.mxu1 %v7628_v2  ;;  %v7660_v40 = vld [vmem:[%s8043_s3 + $0xa4] ss:$8 sps:$4 sm:$0xff]  }
  0x59   : > { %2508 = vmatprep.subr.bf16.mxu0 %v7624_v41  ;;  %2619 = vmatprep.subr.bf16.mxu1 %v7636_v9 }
  0x5c   : > { %2509 = vmatpush1.bf16.msra.mxu0 %v7622_v42  ;;  %2620 = vmatpush1.bf16.msra.mxu1 %v7634_v13 }
  0x5d   : > { %2510 = vmatprep.subr.bf16.mxu0 %v7627_v43 }
  0x5e   : > { %7262 = vmatmul.mubr.msk.bf16.gmra.mxu0 %vm1145_vm1, %v1098_v18  ;;  %7271 = vmatmul.mubr.msk.bf16.gmra.mxu1 %vm1145_vm1, %v1098_v18 }
  0x5f   : > { %1255 = vmatprep.mubr.bf16.mxu0 %v12639_v3  ;;  %1368 = vmatprep.mubr.bf16.mxu1 %v12639_v3 }
  0x60   : > { %2511 = vmatpush1.bf16.msra.mxu0 %v7625_v44 }
  0x61   : > { %2512 = vmatprep.subr.bf16.mxu0 %v7633_v46 }
  0x64   : > { %2513 = vmatpush1.bf16.msra.mxu0 %v7631_v48  ;;  %v7658_v48 = vld [vmem:[%s8043_s3 + $0xa0] ss:$8 sps:$4 sm:$0xff]  }
  0x65   : > { %2514 = vmatprep.subr.bf16.mxu0 %v7639_v51 }
  0x66   : > { %7263 = vmatmul.mubr.msk.bf16.gmra.mxu0 %vm1145_vm1, %v1099_v21  ;;  %7272 = vmatmul.mubr.msk.bf16.gmra.mxu1 %vm1145_vm1, %v1099_v21  ;;  %v7645_v21 = vld [vmem:[%s8043_s3 + $0x124] ss:$8 sps:$4 sm:$0xff]  }
  0x67   : > { %1265 = vmatprep.mubr.bf16.mxu0 %v12639_v3  ;;  %1378 = vmatprep.mubr.bf16.mxu1 %v12639_v3 }
  0x68   : > { %2515 = vmatpush2.bf16.msra.mxu0 %v7637_v53  ;;  %2621 = vmatprep.subr.bf16.mxu1 %v7645_v21 }
  0x69   : > { %2516 = vmatprep.subr.bf16.mxu0 %v7642_v56  ;;  %2622 = vmatpush1.bf16.msra.mxu1 %v7643_v25 }
  0x6a   : > { %2623 = vmatprep.subr.bf16.mxu1 %v7654_v39 }
  0x6c   : > { %2517 = vmatpush2.bf16.msra.mxu0 %v7640_v58 }
  0x6d   : > { %2518 = vmatprep.subr.bf16.mxu0 %v7648_v1  ;;  %2624 = vmatpush1.bf16.msra.mxu1 %v7652_v47 }
  0x6e   : > { %7264 = vmatmul.mubr.msk.bf16.gmra.mxu0 %vm1145_vm1, %v1100_v24  ;;  %7273 = vmatmul.mubr.msk.bf16.gmra.mxu1 %vm1145_vm1, %v1100_v24 }
  0x6f   : > { %1275 = vmatprep.mubr.bf16.mxu0 %v12639_v3  ;;  %1388 = vmatprep.mubr.bf16.mxu1 %v12639_v3 }
  0x70   : > { %2519 = vmatpush2.bf16.msra.mxu0 %v7646_v4 }
  0x71   : > { %2520 = vmatprep.subr.bf16.mxu0 %v7651_v10  ;;  %v7663_v10 = vld [vmem:[%s8043_s3 + $0x104] ss:$8 sps:$4 sm:$0xff]  }
  0x72   : > { %2625 = vmatprep.subr.bf16.mxu1 %v7663_v10 }
  0x74   : > { %2521 = vmatpush2.bf16.msra.mxu0 %v7649_v14 }
  0x75   : > { %2522 = vmatprep.subr.bf16.mxu0 %v7657_v22  ;;  %v7661_v22 = vld [vmem:[%s8043_s3 + $0x100] ss:$8 sps:$4 sm:$0xff]  }
  0x76   : > { %7265 = vmatmul.mubr.msk.bf16.gmra.mxu0 %vm1145_vm1, %v1101_v27  ;;  %7274 = vmatmul.mubr.msk.bf16.gmra.mxu1 %vm1145_vm1, %v1101_v27 }
  0x77   : > { %1285 = vmatprep.mubr.bf16.mxu0 %v12639_v3  ;;  %1398 = vmatprep.mubr.bf16.mxu1 %v12639_v3 }
  0x78   : > { %2523 = vmatpush2.bf16.msra.mxu0 %v7655_v26  ;;  %2626 = vmatpush1.bf16.msra.mxu1 %v7661_v22 }
  0x79   : > { %2524 = vmatprep.subr.bf16.mxu0 %v7660_v40 }
  0x7c   : > { %2525 = vmatpush2.bf16.msra.mxu0 %v7658_v48 }
  0x7e   : > { %7266 = vmatmul.mubr.msk.bf16.gmra.mxu0 %vm1145_vm1, %v1102_v30  ;;  %7275 = vmatmul.mubr.msk.bf16.gmra.mxu1 %vm1145_vm1, %v1102_v30 }
 0x106   : > { %v1217_v11 = vpop.f32.mrf.mxu0  ;;  %v1330_v12 = vpop.f32.mrf.mxu1 }
 0x107   : > { %v8296_v15 = vadd.f32 %v1217_v11, %v8280_v5  ;;  %v8299_v16 = vadd.f32 %v1330_v12, %v8283_v6  ;;  %v7666_v11 = vld [vmem:[%s8043_s3 + $0x94] ss:$8 sps:$4 sm:$0xff]  }
 0x108   : > { %v1219_v17 = vpop.f32.mrf.mxu0  ;;  %v1332_v18 = vpop.f32.mrf.mxu1  ;;  %2526 = vmatprep.subr.bf16.mxu0 %v7666_v11 }
 0x109   : > { %v8302_v19 = vadd.f32 %v1219_v17, %v8286_v7  ;;  %v8305_v20 = vadd.f32 %v1332_v18, %v8289_v8  ;;  %v1516_v27 = vmul.f32 %v8296_v15, %v8296_v15  ;;  %v1518_v30 = vmul.f32 %v8299_v16, %v8299_v16 }
 0x10a   : > { %v1221_v23 = vpop.f32.mrf.mxu0  ;;  %v1334_v24 = vpop.f32.mrf.mxu1 }
 0x10b   : > { %v1519_v28 = vmul.f32 %v8305_v20, %v8305_v20  ;;  %v8316_v29 = vadd.f32 %v1221_v23, %v8280_v5  ;;  %v1517_v31 = vmul.f32 %v8302_v19, %v8302_v19  ;;  %v8323_v32 = vadd.f32 %v1334_v24, %v8283_v6  ;;  %v7664_v23 = vld [vmem:[%s8043_s3 + $0x90] ss:$8 sps:$4 sm:$0xff]  }
 0x10c   : > { %v1223_v33 = vpop.f32.mrf.mxu0  ;;  %v1336_v34 = vpop.f32.mrf.mxu1  ;;  %v1475_v35 = vsel %vm1474_vm2, %v8305_v20, 0.0  ;;  %2527 = vmatpush2.bf16.msra.mxu0 %v7664_v23 }
 0x10d   : > { %v1643_v36 = vsel %vm1474_vm2, %v1519_v28, 0.0  ;;  %v1520_v37 = vmul.f32 %v8316_v29, %v8316_v29  ;;  %v8331_v38 = vadd.f32 %v1223_v33, %v8286_v7  ;;  %v1411_v41 = vadd.f32 %v8316_v29, %v8296_v15 }
 0x10e   : > { %v1453_v42 = vadd.f32 %v8323_v32, %v8299_v16  ;;  %v1522_v43 = vmul.f32 %v8323_v32, %v8323_v32  ;;  %v8342_v44 = vadd.f32 %v1336_v34, %v8289_v8  ;;  %v1227_v45 = vpop.f32.mrf.mxu0  ;;  %v1340_v46 = vpop.f32.mrf.mxu1 }
 0x10f   : > { %v1580_v50 = vadd.f32 %v1520_v37, %v1516_v27  ;;  %v1432_v51 = vadd.f32 %v8331_v38, %v8302_v19  ;;  %v1521_v52 = vmul.f32 %v8331_v38, %v8331_v38  ;;  %v8351_v53 = vadd.f32 %v1227_v45, %v8280_v5  ;;  %v7669_v37 = vld [vmem:[%s8043_s3 + $0x184] ss:$8 sps:$4 sm:$0xff]  }
 0x110   : > { %v1622_v55 = vadd.f32 %v1522_v43, %v1518_v30  ;;  %v1476_v56 = vsel %vm1474_vm2, %v8342_v44, 0.0  ;;  %v1523_v57 = vmul.f32 %v8342_v44, %v8342_v44  ;;  %v8358_v58 = vadd.f32 %v1340_v46, %v8283_v6  ;;  %v1229_v60 = vpop.f32.mrf.mxu0  ;;  %v1342_v0 = vpop.f32.mrf.mxu1  ;;  %v7672_v43 = vld [vmem:[%s8043_s3 + $0x84] ss:$8 sps:$4 sm:$0xff]   ;;  %2641 = vmatprep.subr.bf16.mxu1 %v7669_v37 }
 0x111   : > { %v1601_v1 = vadd.f32 %v1521_v52, %v1517_v31  ;;  %v1477_v2 = vadd.f32 %v1476_v56, %v1475_v35  ;;  %v1412_v4 = vadd.f32 %v1411_v41, %v8351_v53  ;;  %v1524_v9 = vmul.f32 %v8351_v53, %v8351_v53  ;;  %v7670_v52 = vld [vmem:[%s8043_s3 + $0x80] ss:$8 sps:$4 sm:$0xff]   ;;  %2528 = vmatprep.subr.bf16.mxu0 %v7672_v43 }
 0x112   : > { %v1644_v12 = vsel %vm1474_vm2, %v1523_v57, 0.0  ;;  %v1454_v13 = vadd.f32 %v1453_v42, %v8358_v58  ;;  %v1526_v14 = vmul.f32 %v8358_v58, %v8358_v58  ;;  %v8370_v17 = vadd.f32 %v1229_v60, %v8286_v7  ;;  %v1231_v18 = vpop.f32.mrf.mxu0  ;;  %v1344_v21 = vpop.f32.mrf.mxu1  ;;  %2529 = vmatpush2.bf16.msra.mxu0 %v7670_v52 }
 0x113   : > { %v1645_v24 = vadd.f32 %v1644_v12, %v1643_v36  ;;  %v1581_v25 = vadd.f32 %v1580_v50, %v1524_v9  ;;  %v8375_v26 = vadd.f32 %v1342_v0, %v8289_v8  ;;  %v8378_v27 = vadd.f32 %v1231_v18, %v8280_v5  ;;  %v7667_v36 = vld [vmem:[%s8043_s3 + $0x180] ss:$8 sps:$4 sm:$0xff]   ;;  %3198 = vmatprep.subr.bf16.mxu0 %v12639_v3 }
 0x114   : > { %v1623_v28 = vadd.f32 %v1622_v55, %v1526_v14  ;;  %v1433_v30 = vadd.f32 %v1432_v51, %v8370_v17  ;;  %v1525_v31 = vmul.f32 %v8370_v17, %v8370_v17  ;;  %v8384_v33 = vadd.f32 %v1344_v21, %v8283_v6  ;;  %v1233_v34 = vpop.f32.mrf.mxu0  ;;  %v1346_v35 = vpop.f32.mrf.mxu1  ;;  %2642 = vmatpush2.bf16.msra.mxu1 %v7667_v36 }
 0x115   : > { %v1478_v39 = vsel %vm1474_vm2, %v8375_v26, 0.0  ;;  %v1527_v40 = vmul.f32 %v8375_v26, %v8375_v26  ;;  %v1413_v41 = vadd.f32 %v1412_v4, %v8378_v27  ;;  %v1528_v42 = vmul.f32 %v8378_v27, %v8378_v27  ;;  %3405 = vmatprep.subr.bf16.mxu1 %v12639_v3 }
 0x116   : > { %v1602_v45 = vadd.f32 %v1601_v1, %v1525_v31  ;;  %v1479_v46 = vadd.f32 %v1478_v39, %v1477_v2  ;;  %v1455_v47 = vadd.f32 %v1454_v13, %v8384_v33  ;;  %v1530_v48 = vmul.f32 %v8384_v33, %v8384_v33  ;;  %v1237_v50 = vpop.f32.mrf.mxu0  ;;  %v1350_v51 = vpop.f32.mrf.mxu1 }
 0x117   : > { %v1646_v55 = vsel %vm1474_vm2, %v1527_v40, 0.0  ;;  %v1582_v56 = vadd.f32 %v1581_v25, %v1528_v42  ;;  %v8402_v57 = vadd.f32 %v1233_v34, %v8286_v7  ;;  %v8405_v60 = vadd.f32 %v1346_v35, %v8289_v8 }
 0x118   : > { %v1647_v0 = vadd.f32 %v1646_v55, %v1645_v24  ;;  %v1624_v1 = vadd.f32 %v1623_v28, %v1530_v48  ;;  %v8408_v2 = vadd.f32 %v1237_v50, %v8280_v5  ;;  %v8411_v4 = vadd.f32 %v1350_v51, %v8283_v6  ;;  %v1239_v9 = vpop.f32.mrf.mxu0  ;;  %v1352_v10 = vpop.f32.mrf.mxu1 }
 0x119   : > { %v1434_v11 = vadd.f32 %v1433_v30, %v8402_v57  ;;  %v1529_v12 = vmul.f32 %v8402_v57, %v8402_v57  ;;  %v1480_v13 = vsel %vm1474_vm2, %v8405_v60, 0.0  ;;  %v1531_v14 = vmul.f32 %v8405_v60, %v8405_v60 }
 0x11a   : > { %v1481_v18 = vadd.f32 %v1480_v13, %v1479_v46  ;;  %v1414_v21 = vadd.f32 %v1413_v41, %v8408_v2  ;;  %v1532_v22 = vmul.f32 %v8408_v2, %v8408_v2  ;;  %v1456_v23 = vadd.f32 %v1455_v47, %v8411_v4  ;;  %v1241_v24 = vpop.f32.mrf.mxu0  ;;  %v1354_v25 = vpop.f32.mrf.mxu1 }
 0x11b   : > { %v1603_v28 = vadd.f32 %v1602_v45, %v1529_v12  ;;  %v1648_v30 = vsel %vm1474_vm2, %v1531_v14, 0.0  ;;  %v1534_v31 = vmul.f32 %v8411_v4, %v8411_v4  ;;  %v8429_v34 = vadd.f32 %v1239_v9, %v8286_v7 }
 0x11c   : > { %v1649_v35 = vadd.f32 %v1648_v30, %v1647_v0  ;;  %v1583_v36 = vadd.f32 %v1582_v56, %v1532_v22  ;;  %v8433_v37 = vadd.f32 %v1352_v10, %v8289_v8  ;;  %v8436_v39 = vadd.f32 %v1241_v24, %v8280_v5  ;;  %v1243_v40 = vpop.f32.mrf.mxu0  ;;  %v1356_v41 = vpop.f32.mrf.mxu1 }
 0x11d   : > { %v1625_v42 = vadd.f32 %v1624_v1, %v1534_v31  ;;  %v1435_v43 = vadd.f32 %v1434_v11, %v8429_v34  ;;  %v1533_v45 = vmul.f32 %v8429_v34, %v8429_v34  ;;  %v8442_v46 = vadd.f32 %v1354_v25, %v8283_v6 }
 0x11e   : > { %v1482_v47 = vsel %vm1474_vm2, %v8433_v37, 0.0  ;;  %v1535_v48 = vmul.f32 %v8433_v37, %v8433_v37  ;;  %v1415_v50 = vadd.f32 %v1414_v21, %v8436_v39  ;;  %v1536_v51 = vmul.f32 %v8436_v39, %v8436_v39  ;;  %v1247_v52 = vpop.f32.mrf.mxu0  ;;  %v1360_v55 = vpop.f32.mrf.mxu1 }
 0x11f   : > { %v1604_v56 = vadd.f32 %v1603_v28, %v1533_v45  ;;  %v1483_v0 = vadd.f32 %v1482_v47, %v1481_v18  ;;  %v1457_v1 = vadd.f32 %v1456_v23, %v8442_v46  ;;  %v1538_v9 = vmul.f32 %v8442_v46, %v8442_v46 }
 0x120   : > { %v1650_v10 = vsel %vm1474_vm2, %v1535_v48, 0.0  ;;  %v1584_v11 = vadd.f32 %v1583_v36, %v1536_v51  ;;  %v8456_v12 = vadd.f32 %v1243_v40, %v8286_v7  ;;  %v8459_v13 = vadd.f32 %v1356_v41, %v8289_v8  ;;  %v1249_v14 = vpop.f32.mrf.mxu0  ;;  %v1362_v21 = vpop.f32.mrf.mxu1 }
 0x121   : > { %v1651_v22 = vadd.f32 %v1650_v10, %v1649_v35  ;;  %v1626_v24 = vadd.f32 %v1625_v42, %v1538_v9  ;;  %v8462_v18 = vadd.f32 %v1247_v52, %v8280_v5  ;;  %v8465_v23 = vadd.f32 %v1360_v55, %v8283_v6 }
 0x122   : > { %v1436_v25 = vadd.f32 %v1435_v43, %v8456_v12  ;;  %v1537_v28 = vmul.f32 %v8456_v12, %v8456_v12  ;;  %v1484_v30 = vsel %vm1474_vm2, %v8459_v13, 0.0  ;;  %v1539_v31 = vmul.f32 %v8459_v13, %v8459_v13  ;;  %v1251_v36 = vpop.f32.mrf.mxu0  ;;  %v1364_v35 = vpop.f32.mrf.mxu1 }
 0x123   : > { %12769 = vst [vmem:[#allocation21_spill] sm:$0xff] %v8462_v18  ;;  %12770 = vst [vmem:[#allocation22_spill] sm:$0xff] %v8465_v23  ;;  %v1485_v40 = vadd.f32 %v1484_v30, %v1483_v0  ;;  %v1416_v41 = vadd.f32 %v1415_v50, %v8462_v18  ;;  %v1540_v42 = vmul.f32 %v8462_v18, %v8462_v18 }
 0x124   : > { %v1458_v45 = vadd.f32 %v1457_v1, %v8465_v23  ;;  %v1605_v43 = vadd.f32 %v1604_v56, %v1537_v28  ;;  %v1652_v47 = vsel %vm1474_vm2, %v1539_v31, 0.0  ;;  %v1542_v48 = vmul.f32 %v8465_v23, %v8465_v23  ;;  %v1253_v52 = vpop.f32.mrf.mxu0  ;;  %v1366_v55 = vpop.f32.mrf.mxu1 }
 0x125   : > { %v8482_v51 = vadd.f32 %v1249_v14, %v8286_v7  ;;  %v1653_v9 = vadd.f32 %v1652_v47, %v1651_v22  ;;  %v1585_v0 = vadd.f32 %v1584_v11, %v1540_v42  ;;  %v8485_v50 = vadd.f32 %v1362_v21, %v8289_v8 }
 0x126   : > { %v8488_v10 = vadd.f32 %v1251_v36, %v8280_v5  ;;  %v1627_v1 = vadd.f32 %v1626_v24, %v1542_v48  ;;  %v8494_v30 = vadd.f32 %v1364_v35, %v8283_v6  ;;  %v1257_v14 = vpop.f32.mrf.mxu0  ;;  %v1370_v31 = vpop.f32.mrf.mxu1  ;;  %v8508_v23 = vadd.f32 %v1253_v52, %v8286_v7 }
 0x127   : > { %12771 = vst [vmem:[#allocation23_spill] sm:$0xff] %v8482_v51  ;;  %12772 = vst [vmem:[#allocation24_spill] sm:$0xff] %v8485_v50  ;;  %v1437_v56 = vadd.f32 %v1436_v25, %v8482_v51  ;;  %v1541_v28 = vmul.f32 %v8482_v51, %v8482_v51  ;;  %v1486_v11 = vsel %vm1474_vm2, %v8485_v50, 0.0  ;;  %v1543_v21 = vmul.f32 %v8485_v50, %v8485_v50 }
 0x128   : > { %12773 = vst [vmem:[#allocation25_spill] sm:$0xff] %v8488_v10  ;;  %12774 = vst [vmem:[#allocation26_spill] sm:$0xff] %v8494_v30  ;;  %v1417_v22 = vadd.f32 %v1416_v41, %v8488_v10  ;;  %v1544_v24 = vmul.f32 %v8488_v10, %v8488_v10  ;;  %v1487_v36 = vadd.f32 %v1486_v11, %v1485_v40  ;;  %v1259_v47 = vpop.f32.mrf.mxu0  ;;  %v1372_v48 = vpop.f32.mrf.mxu1 }
 0x129   : > { %v1606_v25 = vadd.f32 %v1605_v43, %v1541_v28  ;;  %v1459_v42 = vadd.f32 %v1458_v45, %v8494_v30  ;;  %v1546_v35 = vmul.f32 %v8494_v30, %v8494_v30  ;;  %v1654_v49 = vsel %vm1474_vm2, %v1543_v21, 0.0  ;;  %12775 = vst [vmem:[#allocation27_spill] sm:$0xff] %v8508_v23 }
 0x12a   : > { %v1586_v3 = vadd.f32 %v1585_v0, %v1544_v24  ;;  %v8511_v41 = vadd.f32 %v1366_v55, %v8289_v8  ;;  %v1655_v18 = vadd.f32 %v1654_v49, %v1653_v9  ;;  %v8514_v40 = vadd.f32 %v1257_v14, %v8280_v5  ;;  %v1261_v43 = vpop.f32.mrf.mxu0  ;;  %v1374_v28 = vpop.f32.mrf.mxu1 }
 0x12b   : > { %v1628_v10 = vadd.f32 %v1627_v1, %v1546_v35  ;;  %v8517_v45 = vadd.f32 %v1370_v31, %v8283_v6  ;;  %v1438_v11 = vadd.f32 %v1437_v56, %v8508_v23  ;;  %v1545_v0 = vmul.f32 %v8508_v23, %v8508_v23 }
 0x12c   : > { %12776 = vst [vmem:[#allocation28_spill] sm:$0xff] %v8511_v41  ;;  %12777 = vst [vmem:[#allocation29_spill] sm:$0xff] %v8514_v40  ;;  %v1488_v52 = vsel %vm1474_vm2, %v8511_v41, 0.0  ;;  %v1547_v49 = vmul.f32 %v8511_v41, %v8511_v41  ;;  %v1418_v9 = vadd.f32 %v1417_v22, %v8514_v40  ;;  %v1548_v1 = vmul.f32 %v8514_v40, %v8514_v40  ;;  %v1263_v31 = vpop.f32.mrf.mxu0  ;;  %v1376_v21 = vpop.f32.mrf.mxu1 }
 0x12d   : > { %12778 = vst [vmem:[#allocation30_spill] sm:$0xff] %v8517_v45  ;;  %v1489_v55 = vadd.f32 %v1488_v52, %v1487_v36  ;;  %v1460_v14 = vadd.f32 %v1459_v42, %v8517_v45  ;;  %v1607_v56 = vadd.f32 %v1606_v25, %v1545_v0  ;;  %v1550_v35 = vmul.f32 %v8517_v45, %v8517_v45 }
 0x12e   : > { %v1656_v24 = vsel %vm1474_vm2, %v1547_v49, 0.0  ;;  %v8534_v30 = vadd.f32 %v1259_v47, %v8286_v7  ;;  %v1587_v36 = vadd.f32 %v1586_v3, %v1548_v1  ;;  %v8537_v22 = vadd.f32 %v1372_v48, %v8289_v8  ;;  %v1267_v42 = vpop.f32.mrf.mxu0  ;;  %v1380_v40 = vpop.f32.mrf.mxu1 }
 0x12f   : > { %v1657_v41 = vadd.f32 %v1656_v24, %v1655_v18  ;;  %v8540_v52 = vadd.f32 %v1261_v43, %v8280_v5  ;;  %v1629_v50 = vadd.f32 %v1628_v10, %v1550_v35  ;;  %v8546_v49 = vadd.f32 %v1374_v28, %v8283_v6 }
 0x130   : > { %12779 = vst [vmem:[#allocation31_spill] sm:$0xff] %v8534_v30  ;;  %12780 = vst [vmem:[#allocation32_spill] sm:$0xff] %v8537_v22  ;;  %v1439_v25 = vadd.f32 %v1438_v11, %v8534_v30  ;;  %v1549_v0 = vmul.f32 %v8534_v30, %v8534_v30  ;;  %v1490_v3 = vsel %vm1474_vm2, %v8537_v22, 0.0  ;;  %v1551_v18 = vmul.f32 %v8537_v22, %v8537_v22  ;;  %v1269_v10 = vpop.f32.mrf.mxu0  ;;  %v1382_v43 = vpop.f32.mrf.mxu1 }
 0x131   : > { %12781 = vst [vmem:[#allocation33_spill] sm:$0xff] %v8540_v52  ;;  %12782 = vst [vmem:[#allocation34_spill] sm:$0xff] %v8546_v49  ;;  %v1419_v47 = vadd.f32 %v1418_v9, %v8540_v52  ;;  %v1552_v48 = vmul.f32 %v8540_v52, %v8540_v52  ;;  %v1491_v1 = vadd.f32 %v1490_v3, %v1489_v55 }
 0x132   : > { %v1608_v11 = vadd.f32 %v1607_v56, %v1549_v0  ;;  %v1461_v24 = vadd.f32 %v1460_v14, %v8546_v49  ;;  %v1554_v28 = vmul.f32 %v8546_v49, %v8546_v49  ;;  %v1658_v35 = vsel %vm1474_vm2, %v1551_v18, 0.0  ;;  %v1271_v22 = vpop.f32.mrf.mxu0  ;;  %v1384_v52 = vpop.f32.mrf.mxu1 }
 0x133   : > { %v1588_v45 = vadd.f32 %v1587_v36, %v1552_v48  ;;  %v8560_v30 = vadd.f32 %v1263_v31, %v8286_v7  ;;  %v8563_v9 = vadd.f32 %v1376_v21, %v8289_v8  ;;  %v1659_v23 = vadd.f32 %v1658_v35, %v1657_v41 }
 0x134   : > { %v1630_v51 = vadd.f32 %v1629_v50, %v1554_v28  ;;  %v8566_v55 = vadd.f32 %v1267_v42, %v8280_v5  ;;  %v8569_v14 = vadd.f32 %v1380_v40, %v8283_v6  ;;  %v1273_v0 = vpop.f32.mrf.mxu0  ;;  %v1386_v41 = vpop.f32.mrf.mxu1  ;;  %v8586_v28 = vadd.f32 %v1269_v10, %v8286_v7 }
 0x135   : > { %12783 = vst [vmem:[#allocation35_spill] sm:$0xff] %v8560_v30  ;;  %12784 = vst [vmem:[#allocation36_spill] sm:$0xff] %v8563_v9  ;;  %v1440_v56 = vadd.f32 %v1439_v25, %v8560_v30  ;;  %v1553_v36 = vmul.f32 %v8560_v30, %v8560_v30  ;;  %v1492_v31 = vsel %vm1474_vm2, %v8563_v9, 0.0  ;;  %v1555_v21 = vmul.f32 %v8563_v9, %v8563_v9 }
 0x136   : > { %12785 = vst [vmem:[#allocation37_spill] sm:$0xff] %v8566_v55  ;;  %12786 = vst [vmem:[#allocation38_spill] sm:$0xff] %v8569_v14  ;;  %v1493_v50 = vadd.f32 %v1492_v31, %v1491_v1  ;;  %v1420_v42 = vadd.f32 %v1419_v47, %v8566_v55  ;;  %v1556_v40 = vmul.f32 %v8566_v55, %v8566_v55  ;;  %v1277_v35 = vpop.f32.mrf.mxu0  ;;  %v1390_v49 = vpop.f32.mrf.mxu1 }
 0x137   : > { %v1462_v3 = vadd.f32 %v1461_v24, %v8569_v14  ;;  %v1609_v25 = vadd.f32 %v1608_v11, %v1553_v36  ;;  %v1660_v18 = vsel %vm1474_vm2, %v1555_v21, 0.0  ;;  %v1558_v48 = vmul.f32 %v8569_v14, %v8569_v14  ;;  %12787 = vst [vmem:[#allocation39_spill] sm:$0xff] %v8586_v28 }
 0x138   : > { %v1661_v9 = vadd.f32 %v1660_v18, %v1659_v23  ;;  %v1589_v1 = vadd.f32 %v1588_v45, %v1556_v40  ;;  %v8589_v47 = vadd.f32 %v1382_v43, %v8289_v8  ;;  %v8592_v31 = vadd.f32 %v1271_v22, %v8280_v5  ;;  %v1279_v10 = vpop.f32.mrf.mxu0  ;;  %v1392_v14 = vpop.f32.mrf.mxu1 }
 0x139   : > { %v1631_v24 = vadd.f32 %v1630_v51, %v1558_v48  ;;  %v1441_v11 = vadd.f32 %v1440_v56, %v8586_v28  ;;  %v1557_v36 = vmul.f32 %v8586_v28, %v8586_v28  ;;  %v8598_v21 = vadd.f32 %v1384_v52, %v8283_v6 }
 0x13a   : > { %12788 = vst [vmem:[#allocation40_spill] sm:$0xff] %v8589_v47  ;;  %12789 = vst [vmem:[#allocation41_spill] sm:$0xff] %v8592_v31  ;;  %v1494_v23 = vsel %vm1474_vm2, %v8589_v47, 0.0  ;;  %v1559_v45 = vmul.f32 %v8589_v47, %v8589_v47  ;;  %v1421_v22 = vadd.f32 %v1420_v42, %v8592_v31  ;;  %v1560_v51 = vmul.f32 %v8592_v31, %v8592_v31  ;;  %v1281_v18 = vpop.f32.mrf.mxu0  ;;  %v1394_v48 = vpop.f32.mrf.mxu1 }
 0x13b   : > { %12790 = vst [vmem:[#allocation42_spill] sm:$0xff] %v8598_v21  ;;  %v1610_v43 = vadd.f32 %v1609_v25, %v1557_v36  ;;  %v1495_v56 = vadd.f32 %v1494_v23, %v1493_v50  ;;  %v1463_v40 = vadd.f32 %v1462_v3, %v8598_v21  ;;  %v1562_v52 = vmul.f32 %v8598_v21, %v8598_v21 }
 0x13c   : > { %v1662_v55 = vsel %vm1474_vm2, %v1559_v45, 0.0  ;;  %v1590_v28 = vadd.f32 %v1589_v1, %v1560_v51  ;;  %v8612_v30 = vadd.f32 %v1273_v0, %v8286_v7  ;;  %v8615_v42 = vadd.f32 %v1386_v41, %v8289_v8  ;;  %v1283_v25 = vpop.f32.mrf.mxu0  ;;  %v1396_v36 = vpop.f32.mrf.mxu1 }
 0x13d   : > { %v1663_v47 = vadd.f32 %v1662_v55, %v1661_v9  ;;  %v1632_v31 = vadd.f32 %v1631_v24, %v1562_v52  ;;  %v8618_v50 = vadd.f32 %v1277_v35, %v8280_v5  ;;  %v8621_v3 = vadd.f32 %v1390_v49, %v8283_v6 }
 0x13e   : > { %12791 = vst [vmem:[#allocation43_spill] sm:$0xff] %v8615_v42  ;;  %v1442_v23 = vadd.f32 %v1441_v11, %v8612_v30  ;;  %v1561_v1 = vmul.f32 %v8612_v30, %v8612_v30  ;;  %v1496_v0 = vsel %vm1474_vm2, %v8615_v42, 0.0  ;;  %v1563_v9 = vmul.f32 %v8615_v42, %v8615_v42  ;;  %v1287_v24 = vpop.f32.mrf.mxu0  ;;  %v1400_v21 = vpop.f32.mrf.mxu1 }
 0x13f   : > { %12792 = vst [vmem:[#allocation44_spill] sm:$0xff] %v8618_v50  ;;  %12793 = vst [vmem:[#allocation45_spill] sm:$0xff] %v8621_v3  ;;  %v1497_v55 = vadd.f32 %v1496_v0, %v1495_v56  ;;  %v1422_v41 = vadd.f32 %v1421_v22, %v8618_v50  ;;  %v1564_v49 = vmul.f32 %v8618_v50, %v8618_v50 }
 0x140   : > { %v1464_v35 = vadd.f32 %v1463_v40, %v8621_v3  ;;  %v1611_v45 = vadd.f32 %v1610_v43, %v1561_v1  ;;  %v1664_v11 = vsel %vm1474_vm2, %v1563_v9, 0.0  ;;  %v1566_v51 = vmul.f32 %v8621_v3, %v8621_v3 }
 0x141   : > { %v8638_v52 = vadd.f32 %v1279_v10, %v8286_v7  ;;  %v1665_v42 = vadd.f32 %v1664_v11, %v1663_v47  ;;  %v1591_v56 = vadd.f32 %v1590_v28, %v1564_v49  ;;  %v8641_v22 = vadd.f32 %v1392_v14, %v8289_v8  ;;  %v1402_v11 = vpop.f32.mrf.mxu1 }
 0x142   : > { %v8644_v0 = vadd.f32 %v1281_v18, %v8280_v5  ;;  %v1633_v40 = vadd.f32 %v1632_v31, %v1566_v51  ;;  %v8650_v9 = vadd.f32 %v1394_v48, %v8283_v6  ;;  %v1289_v31 = vpop.f32.mrf.mxu0  ;;  %v8664_v50 = vadd.f32 %v1283_v25, %v8286_v7 }
 0x143   : > { %12794 = vst [vmem:[#allocation46_spill] sm:$0xff] %v8638_v52  ;;  %12795 = vst [vmem:[#allocation47_spill] sm:$0xff] %v8641_v22  ;;  %v1443_v43 = vadd.f32 %v1442_v23, %v8638_v52  ;;  %v1565_v1 = vmul.f32 %v8638_v52, %v8638_v52  ;;  %v1498_v10 = vsel %vm1474_vm2, %v8641_v22, 0.0  ;;  %v1567_v28 = vmul.f32 %v8641_v22, %v8641_v22 }
 0x144   : > { %12796 = vst [vmem:[#allocation48_spill] sm:$0xff] %v8644_v0  ;;  %12797 = vst [vmem:[#allocation49_spill] sm:$0xff] %v8650_v9  ;;  %v1423_v14 = vadd.f32 %v1422_v41, %v8644_v0  ;;  %v1568_v47 = vmul.f32 %v8644_v0, %v8644_v0  ;;  %v1499_v23 = vadd.f32 %v1498_v10, %v1497_v55  ;;  %v1404_v10 = vpop.f32.mrf.mxu1 }
 0x145   : > { %v1612_v18 = vadd.f32 %v1611_v45, %v1565_v1  ;;  %v1465_v49 = vadd.f32 %v1464_v35, %v8650_v9  ;;  %v1570_v48 = vmul.f32 %v8650_v9, %v8650_v9  ;;  %v1666_v51 = vsel %vm1474_vm2, %v1567_v28, 0.0  ;;  %12798 = vst [vmem:[#allocation50_spill] sm:$0xff] %v8664_v50 }
 0x146   : > { %v1592_v3 = vadd.f32 %v1591_v56, %v1568_v47  ;;  %v8667_v41 = vadd.f32 %v1396_v36, %v8289_v8  ;;  %v1667_v22 = vadd.f32 %v1666_v51, %v1665_v42  ;;  %v8670_v45 = vadd.f32 %v1287_v24, %v8280_v5  ;;  %v1291_v56 = vpop.f32.mrf.mxu0 }
 0x147   : > { %v1634_v0 = vadd.f32 %v1633_v40, %v1570_v48  ;;  %v8673_v55 = vadd.f32 %v1400_v21, %v8283_v6  ;;  %v1444_v35 = vadd.f32 %v1443_v43, %v8664_v50  ;;  %v1569_v1 = vmul.f32 %v8664_v50, %v8664_v50 }
 0x148   : > { %12799 = vst [vmem:[#allocation51_spill] sm:$0xff] %v8667_v41  ;;  %12800 = vst [vmem:[#allocation52_spill] sm:$0xff] %v8670_v45  ;;  %v1500_v25 = vsel %vm1474_vm2, %v8667_v41, 0.0  ;;  %v1571_v36 = vmul.f32 %v8667_v41, %v8667_v41  ;;  %v1424_v40 = vadd.f32 %v1423_v14, %v8670_v45  ;;  %v1572_v24 = vmul.f32 %v8670_v45, %v8670_v45 }
 0x149   : > { %12801 = vst [vmem:[#allocation53_spill] sm:$0xff] %v8673_v55  ;;  %v1501_v42 = vadd.f32 %v1500_v25, %v1499_v23  ;;  %v1466_v21 = vadd.f32 %v1465_v49, %v8673_v55  ;;  %v1613_v43 = vadd.f32 %v1612_v18, %v1569_v1  ;;  %v1574_v47 = vmul.f32 %v8673_v55, %v8673_v55 }
 0x14a   : > { %v1668_v28 = vsel %vm1474_vm2, %v1571_v36, 0.0  ;;  %v8690_v48 = vadd.f32 %v1289_v31, %v8286_v7  ;;  %v1593_v9 = vadd.f32 %v1592_v3, %v1572_v24  ;;  %v8693_v23 = vadd.f32 %v1402_v11, %v8289_v8  ;;  %v1293_v36 = vpop.f32.mrf.mxu0 }
 0x14b   : > { %v1669_v51 = vadd.f32 %v1668_v28, %v1667_v22  ;;  %v8696_v14 = vadd.f32 %v1291_v56, %v8280_v5  ;;  %v1635_v25 = vadd.f32 %v1634_v0, %v1574_v47  ;;  %v8702_v1 = vadd.f32 %v1404_v10, %v8283_v6  ;;  %v1406_v0 = vpop.f32.mrf.mxu1 }
 0x14c   : > { %12802 = vst [vmem:[#allocation54_spill] sm:$0xff] %v8690_v48  ;;  %12803 = vst [vmem:[#allocation55_spill] sm:$0xff] %v8693_v23  ;;  %v1445_v49 = vadd.f32 %v1444_v35, %v8690_v48  ;;  %v1573_v18 = vmul.f32 %v8690_v48, %v8690_v48  ;;  %v1502_v22 = vsel %vm1474_vm2, %v8693_v23, 0.0  ;;  %v1575_v3 = vmul.f32 %v8693_v23, %v8693_v23 }
 0x14d   : > { %12804 = vst [vmem:[#allocation56_spill] sm:$0xff] %v8696_v14  ;;  %12805 = vst [vmem:[#allocation57_spill] sm:$0xff] %v8702_v1  ;;  %v1425_v31 = vadd.f32 %v1424_v40, %v8696_v14  ;;  %v1576_v5 = vmul.f32 %v8696_v14, %v8696_v14  ;;  %v1503_v35 = vadd.f32 %v1502_v22, %v1501_v42 }
 0x14e   : > { %v1614_v11 = vadd.f32 %v1613_v43, %v1573_v18  ;;  %v1467_v56 = vadd.f32 %v1466_v21, %v8702_v1  ;;  %v1578_v6 = vmul.f32 %v8702_v1, %v8702_v1  ;;  %v1670_v24 = vsel %vm1474_vm2, %v1575_v3, 0.0 }
 0x14f   : > { %v1426_v10 = vrot.slane %v1425_v31, 4  ;;  %v1594_v28 = vadd.f32 %v1593_v9, %v1576_v5  ;;  %v8716_v47 = vadd.f32 %v1293_v36, %v8286_v7  ;;  %v1671_v55 = vadd.f32 %v1670_v24, %v1669_v51 }
 0x150   : > { %v1468_v40 = vrot.slane %v1467_v56, 4  ;;  %v1636_v45 = vadd.f32 %v1635_v25, %v1578_v6  ;;  %v8719_v14 = vadd.f32 %v1406_v0, %v8289_v8 }
 0x151   : > { %12806 = vst [vmem:[#allocation58_spill] sm:$0xff] %v8716_v47  ;;  %v1427_v43 = vadd.f32 %v1426_v10, %v1425_v31  ;;  %v1595_v42 = vrot.slane %v1594_v28, 4  ;;  %v1446_v21 = vadd.f32 %v1445_v49, %v8716_v47  ;;  %v1577_v18 = vmul.f32 %v8716_v47, %v8716_v47 }
 0x152   : > { %v1469_v22 = vadd.f32 %v1468_v40, %v1467_v56  ;;  %v1637_v3 = vrot.slane %v1636_v45, 4  ;;  %v1504_v9 = vsel %vm1474_vm2, %v8719_v14, 0.0  ;;  %v1579_v7 = vmul.f32 %v8719_v14, %v8719_v14 }
 0x153   : > { %v1428_v51 = vrot.slane %v1427_v43, 2  ;;  %v1596_v25 = vadd.f32 %v1595_v42, %v1594_v28  ;;  %v1447_v36 = vrot.slane %v1446_v21, 4  ;;  %v1615_v8 = vadd.f32 %v1614_v11, %v1577_v18 }
 0x154   : > { %v1470_v5 = vrot.slane %v1469_v22, 2  ;;  %v1638_v31 = vadd.f32 %v1637_v3, %v1636_v45  ;;  %v1505_v0 = vadd.f32 %v1504_v9, %v1503_v35  ;;  %v1672_v49 = vsel %vm1474_vm2, %v1579_v7, 0.0 }
 0x155   : > { %v1429_v6 = vadd.f32 %v1428_v51, %v1427_v43  ;;  %v1597_v24 = vrot.slane %v1596_v25, 2  ;;  %v1448_v10 = vadd.f32 %v1447_v36, %v1446_v21  ;;  %v1616_v56 = vrot.slane %v1615_v8, 4 }
 0x156   : > { %v1471_v40 = vadd.f32 %v1470_v5, %v1469_v22  ;;  %v1639_v1 = vrot.slane %v1638_v31, 2  ;;  %v1506_v23 = vrot.slane %v1505_v0, 4  ;;  %v1673_v47 = vadd.f32 %v1672_v49, %v1671_v55 }
 0x157   : > { %v1430_v48 = vrot.slane %v1429_v6, 1  ;;  %v1598_v41 = vadd.f32 %v1597_v24, %v1596_v25  ;;  %v1449_v50 = vrot.slane %v1448_v10, 2  ;;  %v1617_v52 = vadd.f32 %v1616_v56, %v1615_v8 }
 0x158   : > { %v1472_v28 = vrot.slane %v1471_v40, 1  ;;  %v1640_v42 = vadd.f32 %v1639_v1, %v1638_v31  ;;  %v1507_v11 = vadd.f32 %v1506_v23, %v1505_v0  ;;  %v1674_v18 = vrot.slane %v1673_v47, 4 }
 0x159   : > { %v1431_v45 = vadd.f32 %v1430_v48, %v1429_v6  ;;  %v1599_v35 = vrot.slane %v1598_v41, 1  ;;  %v1450_v3 = vadd.f32 %v1449_v50, %v1448_v10  ;;  %v1618_v9 = vrot.slane %v1617_v52, 2 }
 0x15a   : > { %v1473_v43 = vadd.f32 %v1472_v28, %v1471_v40  ;;  %v1641_v7 = vrot.slane %v1640_v42, 1  ;;  %v1508_v21 = vrot.slane %v1507_v11, 2  ;;  %v1675_v51 = vadd.f32 %v1674_v18, %v1673_v47 }
 0x15b   : > { %v1512_v22 = vmul.f32 0.0078125, %v1431_v45  ;;  %v1600_v36 = vadd.f32 %v1599_v35, %v1598_v41  ;;  %v1451_v5 = vrot.slane %v1450_v3, 1  ;;  %v1619_v55 = vadd.f32 %v1618_v9, %v1617_v52 }
 0x15c   : > { %v1514_v49 = vmul.f32 0.0078125, %v1473_v43  ;;  %v1642_v25 = vadd.f32 %v1641_v7, %v1640_v42  ;;  %v1509_v24 = vadd.f32 %v1508_v21, %v1507_v11  ;;  %v1676_v8 = vrot.slane %v1675_v51, 2 }
 0x15d   : > { %v1680_v56 = vmul.f32 0.0078125, %v1600_v36  ;;  %v1684_v1 = vmul.f32 %v1512_v22, %v1512_v22  ;;  %v1452_v23 = vadd.f32 %v1451_v5, %v1450_v3  ;;  %v1620_v31 = vrot.slane %v1619_v55, 1 }
 0x15e   : > { %v1682_v48 = vmul.f32 0.0078125, %v1642_v25  ;;  %v1686_v0 = vmul.f32 %v1514_v49, %v1514_v49  ;;  %v1510_v50 = vrot.slane %v1509_v24, 1  ;;  %v1677_v6 = vadd.f32 %v1676_v8, %v1675_v51 }
 0x15f   : > { %v1688_v10 = vsub.f32 %v1680_v56, %v1684_v1  ;;  %v1513_v40 = vmul.f32 0.0078125, %v1452_v23  ;;  %v1621_v28 = vadd.f32 %v1620_v31, %v1619_v55 }
 0x160   : > { %v1690_v47 = vsub.f32 %v1682_v48, %v1686_v0  ;;  %v1511_v18 = vadd.f32 %v1510_v50, %v1509_v24  ;;  %v1678_v41 = vrot.slane %v1677_v6, 1  ;;  %v7997_v24 = vmov 1966171168  }
 0x161   : > { %v1692_v45 = vmax.f32 %v1688_v10, 0.0  ;;  %v1681_v52 = vmul.f32 0.0078125, %v1621_v28  ;;  %v1685_v35 = vmul.f32 %v1513_v40, %v1513_v40  ;;  %v1711_v56 = vunpack.c.l.s4 %v7997_v24 }
 0x162   : > { %v1515_v42 = vmul.f32 0.0078125, %v1511_v18  ;;  %v1679_v11 = vadd.f32 %v1678_v41, %v1677_v6  ;;  %v1694_v9 = vmax.f32 %v1690_v47, 0.0  ;;  %v1409_v41 = vld [vmem:[%s8033_s25] sm:$0xf] }
 0x163   : > { %v1689_v43 = vsub.f32 %v1681_v52, %v1685_v35  ;;  %v1696_v7 = vadd.f32 1e-05, %v1692_v45  ;;  %v1712_v1 = vunpack.c.0.s8 %v1711_v56  ;;  %v1410_v56 = vld [vmem:[%s8038_s29] sm:$0xf] }
 0x164   : > { %v1683_v3 = vmul.f32 0.0078125, %v1679_v11  ;;  %v1687_v21 = vmul.f32 %v1515_v42, %v1515_v42  ;;  %v1698_v25 = vadd.f32 1e-05, %v1694_v9 }
 0x165   : > { %v1693_v36 = vmax.f32 %v1689_v43, 0.0  ;;  %7835 = vrsqrt.f32 %v1696_v7  ;;  %v8730_v48 = vsub.s32 %v1712_v1, %v8256_v54 }
 0x166   : > { %v1691_v5 = vsub.f32 %v1683_v3, %v1687_v21 }
 0x167   : > { %v1697_v51 = vadd.f32 1e-05, %v1693_v36  ;;  %12807 = vst [vmem:[#allocation59_spill] sm:$0xff] %v8730_v48 }
 0x168   : > { %v1695_v8 = vmax.f32 %v1691_v5, 0.0 }
 0x169   : > { %7837 = vrsqrt.f32 %v1697_v51 }
 0x16a   : > { %v1699_v55 = vadd.f32 1e-05, %v1695_v8  ;;  %7839 = vrsqrt.f32 %v1698_v25 }
 0x16c   : > { %7841 = vrsqrt.f32 %v1699_v55 }
 0x172   : > { %v7836_v23 = vpop.eup %7835 }
 0x176   : > { %v7838_v31 = vpop.eup %7837 }
 0x177   : > { %v1708_v0 = vcombine.low %v7836_v23, %v7838_v31  ;;  %v7840_v50 = vpop.eup %7839 }
 0x179   : > { %v7842_v6 = vpop.eup %7841  ;;  %v1716_v10 = vrot.slane %v1708_v0, %v8730_v48 }
 0x17a   : > { %v1709_v28 = vcombine.low %v7840_v50, %v7842_v6  ;;  %v12813_v50 = vld [vmem:[#allocation28_spill] sm:$0xff]  ;;  %v12814_v6 = vld [vmem:[#allocation21_spill] sm:$0xff] }
 0x17c   : > { %v1723_v47 = vrot.slane %v1709_v28, %v8730_v48  ;;  %v12815_v28 = vld [vmem:[#allocation25_spill] sm:$0xff] }
 0x17e   : > { %v1724_v18 = vcombine.low %v1716_v10, %v1723_v47 }
 0x180   : > { %v1731_v45 = vrot.slane %v1724_v18, %v8730_v48  ;;  %v12816_v18 = vld [vmem:[#allocation22_spill] sm:$0xff] }
 0x182   : > { %v1733_v52 = vmul.f32 %v1731_v45, %v1409_v41  ;;  %v12817_v45 = vld [vmem:[#allocation26_spill] sm:$0xff] }
 0x184   : > { %v8737_v35 = vrot.slane %v1733_v52, %v8263_v59  ;;  %v8740_v11 = vrot.slane %v1733_v52, %v8270_v62  ;;  %v8743_v9 = vrot.slane %v1733_v52, %v8267_v61  ;;  %v8746_v43 = vrot.slane %v1733_v52, %v8273_v63 }
 0x186   : > { %12808 = vst [vmem:[#allocation60_spill] sm:$0xff] %v8737_v35  ;;  %12809 = vst [vmem:[#allocation61_spill] sm:$0xff] %v8743_v9  ;;  %v1755_v7 = vmul.f32 %v8737_v35, %v1512_v22  ;;  %v1756_v3 = vmul.f32 %v8740_v11, %v1513_v40  ;;  %v1757_v21 = vmul.f32 %v8743_v9, %v1514_v49 }
 0x187   : > { %v1758_v36 = vmul.f32 %v8746_v43, %v1515_v42  ;;  %v1852_v5 = vmul.f32 %v8746_v43, %v8719_v14  ;;  %v1790_v25 = vmul.f32 %v8740_v11, %v8302_v19  ;;  %v1794_v51 = vmul.f32 %v8740_v11, %v8331_v38 }
 0x188   : > { %v1792_v8 = vmul.f32 %v8746_v43, %v8305_v20  ;;  %v1763_v55 = vcombine.low %v1755_v7, %v1756_v3  ;;  %v1796_v40 = vmul.f32 %v8746_v43, %v8342_v44  ;;  %v1789_v49 = vmul.f32 %v8737_v35, %v8296_v15  ;;  %v12818_v7 = vld [vmem:[#allocation31_spill] sm:$0xff] }
 0x189   : > { %v1764_v22 = vcombine.low %v1757_v21, %v1758_v36  ;;  %v1793_v14 = vmul.f32 %v8737_v35, %v8316_v29  ;;  %v1791_v19 = vmul.f32 %v8743_v9, %v8299_v16  ;;  %v8770_v38 = vmul.f32 %v8743_v9, %v8323_v32  ;;  %v12819_v21 = vld [vmem:[#allocation35_spill] sm:$0xff] }
 0x18a   : > { %v8774_v20 = vmul.f32 %v8740_v11, %v8370_v17  ;;  %v1771_v44 = vrot.slane %v1763_v55, %v8730_v48  ;;  %v8780_v15 = vmul.f32 %v8740_v11, %v8402_v57  ;;  %v8784_v29 = vmul.f32 %v8746_v43, %v8375_v26  ;;  %v12820_v55 = vld [vmem:[#allocation32_spill] sm:$0xff] }
 0x18b   : > { %v1778_v42 = vrot.slane %v1764_v22, %v8730_v48  ;;  %v8788_v16 = vmul.f32 %v8746_v43, %v8405_v60  ;;  %v8792_v32 = vmul.f32 %v8737_v35, %v8351_v53  ;;  %v8796_v17 = vmul.f32 %v8737_v35, %v8378_v27 }
 0x18c   : > { %v8800_v57 = vmul.f32 %v8743_v9, %v8358_v58  ;;  %v8804_v26 = vmul.f32 %v8743_v9, %v8384_v33  ;;  %v8808_v60 = vmul.f32 %v8740_v11, %v8429_v34  ;;  %v8812_v53 = vmul.f32 %v8740_v11, %v8456_v12 }
 0x18d   : > { %v1779_v24 = vcombine.low %v1771_v44, %v1778_v42  ;;  %v8817_v27 = vmul.f32 %v8746_v43, %v8433_v37  ;;  %v8821_v58 = vmul.f32 %v8746_v43, %v8459_v13  ;;  %v8825_v33 = vmul.f32 %v8737_v35, %v8408_v2  ;;  %v12810_v13 = vld [vmem:[#allocation23_spill] sm:$0xff]  ;;  %v12821_v44 = vld [vmem:[#allocation36_spill] sm:$0xff] }
 0x18e   : > { %v8829_v34 = vmul.f32 %v8737_v35, %v8436_v39  ;;  %v8834_v1 = vmul.f32 %v8743_v9, %v8411_v4  ;;  %v8838_v37 = vmul.f32 %v8743_v9, %v8442_v46  ;;  %v8842_v23 = vmul.f32 %v8740_v11, %v12810_v13  ;;  %v12811_v2 = vld [vmem:[#allocation27_spill] sm:$0xff]  ;;  %v12812_v39 = vld [vmem:[#allocation24_spill] sm:$0xff] }
 0x18f   : > { %v1786_v12 = vrot.slane %v1779_v24, %v8730_v48  ;;  %v8846_v31 = vmul.f32 %v8740_v11, %v12811_v2  ;;  %v8850_v0 = vmul.f32 %v8746_v43, %v12812_v39  ;;  %v8854_v4 = vmul.f32 %v8746_v43, %v12813_v50  ;;  %v12822_v2 = vld [vmem:[#allocation29_spill] sm:$0xff] }
 0x190   : > { %v8858_v46 = vmul.f32 %v8737_v35, %v12814_v6  ;;  %v8862_v47 = vmul.f32 %v8737_v35, %v12815_v28  ;;  %v8866_v41 = vmul.f32 %v8743_v9, %v12816_v18  ;;  %v8870_v52 = vmul.f32 %v8743_v9, %v12817_v45  ;;  %v12823_v50 = vld [vmem:[#allocation33_spill] sm:$0xff]  ;;  %v12824_v28 = vld [vmem:[#allocation30_spill] sm:$0xff] }
 0x191   : > { %v1788_v10 = vsub.f32 %v1410_v56, %v1786_v12  ;;  %v8874_v3 = vmul.f32 %v8740_v11, %v12818_v7  ;;  %v8878_v36 = vmul.f32 %v8740_v11, %v12819_v21  ;;  %v8882_v22 = vmul.f32 %v8746_v43, %v12820_v55  ;;  %v12825_v45 = vld [vmem:[#allocation34_spill] sm:$0xff] }
 0x192   : > { %v8886_v42 = vmul.f32 %v8746_v43, %v12821_v44  ;;  %v8902_v39 = vmul.f32 %v8737_v35, %v12822_v2  ;;  %v8906_v6 = vmul.f32 %v8737_v35, %v12823_v50  ;;  %v8910_v18 = vmul.f32 %v8743_v9, %v12824_v28 }
 0x193   : > { %v8889_v24 = vrot.slane %v1788_v10, %v8263_v59  ;;  %v8892_v56 = vrot.slane %v1788_v10, %v8270_v62  ;;  %v8895_v12 = vrot.slane %v1788_v10, %v8267_v61  ;;  %v8898_v13 = vrot.slane %v1788_v10, %v8273_v63 }
 0x194   : > { %v8914_v7 = vmul.f32 %v8743_v9, %v12825_v45 }
 0x195   : > { %v8917_v21 = vadd.f32 %v8898_v13, %v1852_v5  ;;  %v1875_v10 = vadd.f32 %v8892_v56, %v1790_v25  ;;  %v1879_v55 = vadd.f32 %v8892_v56, %v1794_v51  ;;  %v1877_v44 = vadd.f32 %v8898_v13, %v1792_v8 }
 0x196   : > { %v1881_v2 = vadd.f32 %v8898_v13, %v1796_v40  ;;  %v1874_v50 = vadd.f32 %v8889_v24, %v1789_v49  ;;  %v1878_v28 = vadd.f32 %v8889_v24, %v1793_v14  ;;  %v1876_v63 = vadd.f32 %v8895_v12, %v1791_v19 }
 0x197   : > { %12826 = vst [vmem:[#allocation23_spill] sm:$0xff] %v8917_v21  ;;  %v8927_v45 = vmul.f32 0.01, %v8917_v21  ;;  %vm1939_vm3 = vcmp.ge.f32.partialorder %v1875_v10, 0.0  ;;  %vm1943_vm4 = vcmp.ge.f32.partialorder %v1879_v55, 0.0  ;;  %vm1941_vm5 = vcmp.ge.f32.partialorder %v1877_v44, 0.0 }
 0x198   : > { %v2003_v5 = vmul.f32 0.01, %v1875_v10  ;;  %v2007_v61 = vmul.f32 0.01, %v1879_v55  ;;  %vm1945_vm6 = vcmp.ge.f32.partialorder %v1881_v2, 0.0  ;;  %vm1938_vm7 = vcmp.ge.f32.partialorder %v1874_v50, 0.0 }
 0x199   : > { %12827 = vst [vmem:[#allocation27_spill] sm:$0xff] %v8927_v45  ;;  %v2005_v25 = vmul.f32 0.01, %v1877_v44  ;;  %v2009_v8 = vmul.f32 0.01, %v1881_v2  ;;  %vm1942_vm8 = vcmp.ge.f32.partialorder %v1878_v28, 0.0  ;;  %v1880_v59 = vadd.f32 %v8895_v12, %v8770_v38 }
 0x19a   : > { %v2067_v51 = vsel %vm1939_vm3, %v1875_v10, %v2003_v5  ;;  %v2071_v40 = vsel %vm1943_vm4, %v1879_v55, %v2007_v61  ;;  %v2002_v54 = vmul.f32 0.01, %v1874_v50  ;;  %v2006_v14 = vmul.f32 0.01, %v1878_v28 }
 0x19b   : > { %v2069_v49 = vsel %vm1941_vm5, %v1877_v44, %v2005_v25  ;;  %v2131_v48 = vpack.c.bf16 %v2071_v40, %v2067_v51  ;;  %v2073_v19 = vsel %vm1945_vm6, %v1881_v2, %v2009_v8  ;;  %vm1940_vm9 = vcmp.ge.f32.partialorder %v1876_v63, 0.0 }
 0x19c   : > { %v2133_v62 = vpack.c.bf16 %v2073_v19, %v2069_v49  ;;  %v2066_v45 = vsel %vm1938_vm7, %v1874_v50, %v2002_v54  ;;  %v2070_v21 = vsel %vm1942_vm8, %v1878_v28, %v2006_v14  ;;  %v2004_v9 = vmul.f32 0.01, %v1876_v63 }
 0x19d   : > { %2530 = vmatprep.mubr.bf16.mxu0 %v2131_v48  ;;  %v2130_v35 = vpack.c.bf16 %v2070_v21, %v2066_v45  ;;  %vm1944_vm10 = vcmp.ge.f32.partialorder %v1880_v59, 0.0  ;;  %v2008_v10 = vmul.f32 0.01, %v1880_v59  ;;  %v1883_v61 = vadd.f32 %v8892_v56, %v8774_v20 }
 0x19e   : > { %7326 = vmatprep.mubr.msk.bf16.mxu1 %vm1474_vm2, %v2133_v62  ;;  %v2068_v55 = vsel %vm1940_vm9, %v1876_v63, %v2004_v9  ;;  %v1887_v44 = vadd.f32 %v8892_v56, %v8780_v15  ;;  %v1885_v38 = vadd.f32 %v8898_v13, %v8784_v29  ;;  %v1889_v54 = vadd.f32 %v8898_v13, %v8788_v16 }
 0x19f   : > { %2531 = vmatmul.mubr.bf16.vlgmr.msra.gmra.mxu0 %v2130_v35  ;;  %v2072_v48 = vsel %vm1944_vm10, %v1880_v59, %v2008_v10  ;;  %vm1947_vm11 = vcmp.ge.f32.partialorder %v1883_v61, 0.0  ;;  %v2011_v21 = vmul.f32 0.01, %v1883_v61  ;;  %v1882_v2 = vadd.f32 %v8889_v24, %v8792_v32 }
 0x1a0   : > { %v2132_v20 = vpack.c.bf16 %v2072_v48, %v2068_v55  ;;  %vm1951_vm12 = vcmp.ge.f32.partialorder %v1887_v44, 0.0  ;;  %v2015_v62 = vmul.f32 0.01, %v1887_v44  ;;  %vm1949_vm13 = vcmp.ge.f32.partialorder %v1885_v38, 0.0 }
 0x1a1   : > { %v2075_v63 = vsel %vm1947_vm11, %v1883_v61, %v2011_v21  ;;  %vm1953_vm14 = vcmp.ge.f32.partialorder %v1889_v54, 0.0  ;;  %v2013_v9 = vmul.f32 0.01, %v1885_v38  ;;  %v2017_v15 = vmul.f32 0.01, %v1889_v54 }
 0x1a2   : > { %2644 = vmatmul.mubr.bf16.vlgmr.msra.gmra.mxu1 %v2132_v20  ;;  %v2079_v29 = vsel %vm1951_vm12, %v1887_v44, %v2015_v62  ;;  %v1886_v16 = vadd.f32 %v8889_v24, %v8796_v17  ;;  %vm1946_vm15 = vcmp.ge.f32.partialorder %v1882_v2, 0.0  ;;  %v2010_v59 = vmul.f32 0.01, %v1882_v2 }
 0x1a3   : > { %v2135_v35 = vpack.c.bf16 %v2079_v29, %v2075_v63  ;;  %v2077_v50 = vsel %vm1949_vm13, %v1885_v38, %v2013_v9  ;;  %v2081_v28 = vsel %vm1953_vm14, %v1889_v54, %v2017_v15  ;;  %v1884_v32 = vadd.f32 %v8895_v12, %v8800_v57 }
 0x1a4   : > { %v2137_v45 = vpack.c.bf16 %v2081_v28, %v2077_v50  ;;  %vm1950_vm0 = vcmp.ge.f32.partialorder %v1886_v16, 0.0  ;;  %v2014_v5 = vmul.f32 0.01, %v1886_v16  ;;  %v2074_v25 = vsel %vm1946_vm15, %v1882_v2, %v2010_v59 }
 0x1a5   : > { %2540 = vmatprep.mubr.bf16.mxu0 %v2135_v35  ;;  %v1888_v51 = vadd.f32 %v8895_v12, %v8804_v26  ;;  %vm1948_vm1 = vcmp.ge.f32.partialorder %v1884_v32, 0.0  ;;  %v2012_v8 = vmul.f32 0.01, %v1884_v32  ;;  %v1891_v17 = vadd.f32 %v8892_v56, %v8808_v60 }
 0x1a6   : > { %7327 = vmatprep.mubr.msk.bf16.mxu1 %vm1474_vm2, %v2137_v45  ;;  %v2078_v40 = vsel %vm1950_vm0, %v1886_v16, %v2014_v5  ;;  %v1895_v49 = vadd.f32 %v8892_v56, %v8812_v53  ;;  %v1893_v57 = vadd.f32 %v8898_v13, %v8817_v27  ;;  %v1897_v14 = vadd.f32 %v8898_v13, %v8821_v58 }
 0x1a7   : > { %v2134_v19 = vpack.c.bf16 %v2078_v40, %v2074_v25  ;;  %vm1952_vm3 = vcmp.ge.f32.partialorder %v1888_v51, 0.0  ;;  %v2016_v26 = vmul.f32 0.01, %v1888_v51  ;;  %v2076_v10 = vsel %vm1948_vm1, %v1884_v32, %v2012_v8 }
 0x1a8   : > { %vm1955_vm4 = vcmp.ge.f32.partialorder %v1891_v17, 0.0  ;;  %vm1959_vm5 = vcmp.ge.f32.partialorder %v1895_v49, 0.0  ;;  %v2019_v61 = vmul.f32 0.01, %v1891_v17  ;;  %v2023_v60 = vmul.f32 0.01, %v1895_v49 }
 0x1a9   : > { %2541 = vmatmul.mubr.bf16.gmra.mxu0 %v2134_v19  ;;  %v2080_v55 = vsel %vm1952_vm3, %v1888_v51, %v2016_v26  ;;  %vm1957_vm6 = vcmp.ge.f32.partialorder %v1893_v57, 0.0  ;;  %vm1961_vm7 = vcmp.ge.f32.partialorder %v1897_v14, 0.0  ;;  %v2021_v44 = vmul.f32 0.01, %v1893_v57 }
 0x1aa   : > { %v2136_v53 = vpack.c.bf16 %v2080_v55, %v2076_v10  ;;  %v2083_v38 = vsel %vm1955_vm4, %v1891_v17, %v2019_v61  ;;  %v2087_v54 = vsel %vm1959_vm5, %v1895_v49, %v2023_v60  ;;  %v2025_v27 = vmul.f32 0.01, %v1897_v14 }
 0x1ab   : > { %v2139_v48 = vpack.c.bf16 %v2087_v54, %v2083_v38  ;;  %v2085_v21 = vsel %vm1957_vm6, %v1893_v57, %v2021_v44  ;;  %v1890_v58 = vadd.f32 %v8889_v24, %v8825_v33  ;;  %v1894_v2 = vadd.f32 %v8889_v24, %v8829_v34 }
 0x1ac   : > { %2654 = vmatmul.mubr.bf16.gmra.mxu1 %v2136_v53  ;;  %v2089_v20 = vsel %vm1961_vm7, %v1897_v14, %v2025_v27  ;;  %v1892_v62 = vadd.f32 %v8895_v12, %v8834_v1  ;;  %v1896_v63 = vadd.f32 %v8895_v12, %v8838_v37  ;;  %v1899_v9 = vadd.f32 %v8892_v56, %v8842_v23 }
 0x1ad   : > { %2550 = vmatprep.mubr.bf16.mxu0 %v2139_v48  ;;  %v2141_v15 = vpack.c.bf16 %v2089_v20, %v2085_v21  ;;  %vm1954_vm8 = vcmp.ge.f32.partialorder %v1890_v58, 0.0  ;;  %vm1958_vm9 = vcmp.ge.f32.partialorder %v1894_v2, 0.0  ;;  %v2018_v29 = vmul.f32 0.01, %v1890_v58 }
 0x1ae   : > { %v2022_v33 = vmul.f32 0.01, %v1894_v2  ;;  %vm1956_vm10 = vcmp.ge.f32.partialorder %v1892_v62, 0.0  ;;  %vm1960_vm11 = vcmp.ge.f32.partialorder %v1896_v63, 0.0  ;;  %v2020_v34 = vmul.f32 0.01, %v1892_v62 }
 0x1af   : > { %7328 = vmatprep.mubr.msk.bf16.mxu1 %vm1474_vm2, %v2141_v15  ;;  %v2082_v16 = vsel %vm1954_vm8, %v1890_v58, %v2018_v29  ;;  %v2024_v59 = vmul.f32 0.01, %v1896_v63  ;;  %v1903_v1 = vadd.f32 %v8892_v56, %v8846_v31  ;;  %vm1963_vm12 = vcmp.ge.f32.partialorder %v1899_v9, 0.0 }
 0x1b0   : > { %v2086_v37 = vsel %vm1958_vm9, %v1894_v2, %v2022_v33  ;;  %v2084_v35 = vsel %vm1956_vm10, %v1892_v62, %v2020_v34  ;;  %v2027_v23 = vmul.f32 0.01, %v1899_v9  ;;  %v1901_v50 = vadd.f32 %v8898_v13, %v8850_v0  ;;  %v12828_v34 = vld [vmem:[#allocation39_spill] sm:$0xff] }
 0x1b1   : > { %v2138_v28 = vpack.c.bf16 %v2086_v37, %v2082_v16  ;;  %v2088_v32 = vsel %vm1960_vm11, %v1896_v63, %v2024_v59  ;;  %vm1967_vm13 = vcmp.ge.f32.partialorder %v1903_v1, 0.0  ;;  %v2031_v45 = vmul.f32 0.01, %v1903_v1 }
 0x1b2   : > { %v2140_v5 = vpack.c.bf16 %v2088_v32, %v2084_v35  ;;  %v2091_v25 = vsel %vm1963_vm12, %v1899_v9, %v2027_v23  ;;  %v1905_v51 = vadd.f32 %v8898_v13, %v8854_v4  ;;  %vm1965_vm14 = vcmp.ge.f32.partialorder %v1901_v50, 0.0 }
 0x1b3   : > { %2551 = vmatmul.mubr.bf16.gmra.mxu0 %v2138_v28  ;;  %v2095_v8 = vsel %vm1967_vm13, %v1903_v1, %v2031_v45  ;;  %v2029_v31 = vmul.f32 0.01, %v1901_v50  ;;  %v1898_v17 = vadd.f32 %v8889_v24, %v8858_v46  ;;  %v1902_v40 = vadd.f32 %v8889_v24, %v8862_v47  ;;  %v12829_v28 = vld [vmem:[#allocation40_spill] sm:$0xff] }
 0x1b4   : > { %2664 = vmatmul.mubr.bf16.gmra.mxu1 %v2140_v5  ;;  %v2143_v0 = vpack.c.bf16 %v2095_v8, %v2091_v25  ;;  %vm1969_vm15 = vcmp.ge.f32.partialorder %v1905_v51, 0.0  ;;  %v2033_v49 = vmul.f32 0.01, %v1905_v51  ;;  %v1900_v57 = vadd.f32 %v8895_v12, %v8866_v41  ;;  %v12830_v5 = vld [vmem:[#allocation43_spill] sm:$0xff] }
 0x1b5   : > { %v2093_v14 = vsel %vm1965_vm14, %v1901_v50, %v2029_v31  ;;  %vm1962_vm0 = vcmp.ge.f32.partialorder %v1898_v17, 0.0  ;;  %vm1966_vm1 = vcmp.ge.f32.partialorder %v1902_v40, 0.0  ;;  %v2026_v4 = vmul.f32 0.01, %v1898_v17  ;;  %v12833_v31 = vld [vmem:[#allocation41_spill] sm:$0xff] }
 0x1b6   : > { %2560 = vmatprep.mubr.bf16.mxu0 %v2143_v0  ;;  %v2097_v19 = vsel %vm1969_vm15, %v1905_v51, %v2033_v49  ;;  %v2030_v26 = vmul.f32 0.01, %v1902_v40  ;;  %v1904_v46 = vadd.f32 %v8895_v12, %v8870_v52  ;;  %vm1964_vm3 = vcmp.ge.f32.partialorder %v1900_v57, 0.0  ;;  %v12832_v51 = vld [vmem:[#allocation60_spill] sm:$0xff] }
 0x1b7   : > { %v2145_v10 = vpack.c.bf16 %v2097_v19, %v2093_v14  ;;  %v2090_v47 = vsel %vm1962_vm0, %v1898_v17, %v2026_v4  ;;  %v2028_v61 = vmul.f32 0.01, %v1900_v57  ;;  %v1907_v60 = vadd.f32 %v8892_v56, %v8874_v3 }
 0x1b8   : > { %v2094_v55 = vsel %vm1966_vm1, %v1902_v40, %v2030_v26  ;;  %vm1968_vm4 = vcmp.ge.f32.partialorder %v1904_v46, 0.0  ;;  %v2032_v41 = vmul.f32 0.01, %v1904_v46  ;;  %v1911_v44 = vadd.f32 %v8892_v56, %v8878_v36 }
 0x1b9   : > { %7329 = vmatprep.mubr.msk.bf16.mxu1 %vm1474_vm2, %v2145_v10  ;;  %v2142_v53 = vpack.c.bf16 %v2094_v55, %v2090_v47  ;;  %v2092_v38 = vsel %vm1964_vm3, %v1900_v57, %v2028_v61  ;;  %vm1971_vm5 = vcmp.ge.f32.partialorder %v1907_v60, 0.0  ;;  %v2035_v54 = vmul.f32 0.01, %v1907_v60  ;;  %v12834_v10 = vld [vmem:[#allocation38_spill] sm:$0xff]  ;;  %v12835_v47 = vld [vmem:[#allocation61_spill] sm:$0xff] }
 0x1ba   : > { %v2096_v52 = vsel %vm1968_vm4, %v1904_v46, %v2032_v41  ;;  %vm1975_vm6 = vcmp.ge.f32.partialorder %v1911_v44, 0.0  ;;  %v2039_v27 = vmul.f32 0.01, %v1911_v44  ;;  %v1909_v48 = vadd.f32 %v8898_v13, %v8882_v22 }
 0x1bb   : > { %2561 = vmatmul.mubr.bf16.gmra.mxu0 %v2142_v53  ;;  %v2144_v3 = vpack.c.bf16 %v2096_v52, %v2092_v38  ;;  %v2099_v21 = vsel %vm1971_vm5, %v1907_v60, %v2035_v54  ;;  %v1913_v58 = vadd.f32 %v8898_v13, %v8886_v42  ;;  %v1906_v36 = vadd.f32 %v8889_v24, %v8902_v39  ;;  %v12836_v52 = vld [vmem:[#allocation42_spill] sm:$0xff] }
 0x1bc   : > { %v2103_v2 = vsel %vm1975_vm6, %v1911_v44, %v2039_v27  ;;  %vm1973_vm7 = vcmp.ge.f32.partialorder %v1909_v48, 0.0  ;;  %v2037_v20 = vmul.f32 0.01, %v1909_v48  ;;  %v1910_v62 = vadd.f32 %v8889_v24, %v8906_v6 }
 0x1bd   : > { %2674 = vmatmul.mubr.bf16.gmra.mxu1 %v2144_v3  ;;  %v2147_v63 = vpack.c.bf16 %v2103_v2, %v2099_v21  ;;  %vm1977_vm8 = vcmp.ge.f32.partialorder %v1913_v58, 0.0  ;;  %v2041_v9 = vmul.f32 0.01, %v1913_v58  ;;  %vm1970_vm9 = vcmp.ge.f32.partialorder %v1906_v36, 0.0  ;;  %v12837_v21 = vld [vmem:[#allocation46_spill] sm:$0xff] }
 0x1be   : > { %v2101_v22 = vsel %vm1973_vm7, %v1909_v48, %v2037_v20  ;;  %vm1974_vm10 = vcmp.ge.f32.partialorder %v1910_v62, 0.0  ;;  %v2034_v15 = vmul.f32 0.01, %v1906_v36  ;;  %v2038_v29 = vmul.f32 0.01, %v1910_v62 }
 0x1bf   : > { %2570 = vmatprep.mubr.bf16.mxu0 %v2147_v63  ;;  %v2105_v42 = vsel %vm1977_vm8, %v1913_v58, %v2041_v9  ;;  %v1908_v39 = vadd.f32 %v8895_v12, %v8910_v18  ;;  %v1912_v33 = vadd.f32 %v8895_v12, %v8914_v7  ;;  %v1830_v6 = vmul.f32 %v8740_v11, %v12828_v34 }
 0x1c0   : > { %v2149_v16 = vpack.c.bf16 %v2105_v42, %v2101_v22  ;;  %v2098_v59 = vsel %vm1970_vm9, %v1906_v36, %v2034_v15  ;;  %v2102_v1 = vsel %vm1974_vm10, %v1910_v62, %v2038_v29  ;;  %v1834_v37 = vmul.f32 %v8740_v11, %v8612_v30  ;;  %v12831_v30 = vld [vmem:[#allocation37_spill] sm:$0xff]  ;;  %v12838_v36 = vld [vmem:[#allocation50_spill] sm:$0xff] }
 0x1c1   : > { %v2146_v35 = vpack.c.bf16 %v2102_v1, %v2098_v59  ;;  %vm1972_vm11 = vcmp.ge.f32.partialorder %v1908_v39, 0.0  ;;  %vm1976_vm12 = vcmp.ge.f32.partialorder %v1912_v33, 0.0  ;;  %v2036_v23 = vmul.f32 0.01, %v1908_v39  ;;  %v12840_v59 = vld [vmem:[#allocation51_spill] sm:$0xff] }
 0x1c2   : > { %7330 = vmatprep.mubr.msk.bf16.mxu1 %vm1474_vm2, %v2149_v16  ;;  %v2040_v50 = vmul.f32 0.01, %v1912_v33  ;;  %v1915_v18 = vadd.f32 %v8892_v56, %v1830_v6  ;;  %v1919_v7 = vadd.f32 %v8892_v56, %v1834_v37  ;;  %v1832_v32 = vmul.f32 %v8746_v43, %v12829_v28  ;;  %v12841_v28 = vld [vmem:[#allocation44_spill] sm:$0xff] }
 0x1c3   : > { %2571 = vmatmul.mubr.bf16.gmra.mxu0 %v2146_v35  ;;  %v2100_v45 = vsel %vm1972_vm11, %v1908_v39, %v2036_v23  ;;  %v1836_v25 = vmul.f32 %v8746_v43, %v12830_v5  ;;  %v1829_v8 = vmul.f32 %v12832_v51, %v12831_v30  ;;  %v1833_v17 = vmul.f32 %v12832_v51, %v12833_v31 }
 0x1c4   : > { %v2104_v40 = vsel %vm1976_vm12, %v1912_v33, %v2040_v50  ;;  %vm1979_vm13 = vcmp.ge.f32.partialorder %v1915_v18, 0.0  ;;  %vm1983_vm14 = vcmp.ge.f32.partialorder %v1919_v7, 0.0  ;;  %v2043_v0 = vmul.f32 0.01, %v1915_v18  ;;  %v12839_v33 = vld [vmem:[#allocation47_spill] sm:$0xff] }
 0x1c5   : > { %v2148_v49 = vpack.c.bf16 %v2104_v40, %v2100_v45  ;;  %v2047_v57 = vmul.f32 0.01, %v1919_v7  ;;  %v1917_v14 = vadd.f32 %v8898_v13, %v1832_v32  ;;  %v1921_v4 = vadd.f32 %v8898_v13, %v1836_v25  ;;  %v12842_v25 = vld [vmem:[#allocation48_spill] sm:$0xff] }
 0x1c6   : > { %v2107_v19 = vsel %vm1979_vm13, %v1915_v18, %v2043_v0  ;;  %v1914_v26 = vadd.f32 %v8889_v24, %v1829_v8  ;;  %v1918_v46 = vadd.f32 %v8889_v24, %v1833_v17  ;;  %v1831_v61 = vmul.f32 %v12835_v47, %v12834_v10 }
 0x1c7   : > { %2684 = vmatmul.mubr.bf16.gmra.mxu1 %v2148_v49  ;;  %v2111_v60 = vsel %vm1983_vm14, %v1919_v7, %v2047_v57  ;;  %vm1981_vm15 = vcmp.ge.f32.partialorder %v1917_v14, 0.0  ;;  %vm1985_vm0 = vcmp.ge.f32.partialorder %v1921_v4, 0.0  ;;  %v2045_v55 = vmul.f32 0.01, %v1917_v14  ;;  %v12843_v49 = vld [vmem:[#allocation45_spill] sm:$0xff] }
 0x1c8   : > { %v2151_v41 = vpack.c.bf16 %v2111_v60, %v2107_v19  ;;  %v2049_v44 = vmul.f32 0.01, %v1921_v4  ;;  %vm1978_vm1 = vcmp.ge.f32.partialorder %v1914_v26, 0.0  ;;  %vm1982_vm3 = vcmp.ge.f32.partialorder %v1918_v46, 0.0 }
 0x1c9   : > { %v2109_v53 = vsel %vm1981_vm15, %v1917_v14, %v2045_v55  ;;  %v2042_v38 = vmul.f32 0.01, %v1914_v26  ;;  %v2046_v54 = vmul.f32 0.01, %v1918_v46  ;;  %v1835_v27 = vmul.f32 %v12835_v47, %v12836_v52  ;;  %v12844_v14 = vld [vmem:[#allocation49_spill] sm:$0xff] }
 0x1ca   : > { %2580 = vmatprep.mubr.bf16.mxu0 %v2151_v41  ;;  %v2113_v48 = vsel %vm1985_vm0, %v1921_v4, %v2049_v44  ;;  %v1916_v3 = vadd.f32 %v8895_v12, %v1831_v61  ;;  %v1838_v58 = vmul.f32 %v8740_v11, %v12837_v21  ;;  %v1842_v2 = vmul.f32 %v8740_v11, %v12838_v36 }
 0x1cb   : > { %v2153_v20 = vpack.c.bf16 %v2113_v48, %v2109_v53  ;;  %v2106_v62 = vsel %vm1978_vm1, %v1914_v26, %v2042_v38  ;;  %v2110_v63 = vsel %vm1982_vm3, %v1918_v46, %v2046_v54  ;;  %v1920_v9 = vadd.f32 %v8895_v12, %v1835_v27  ;;  %v12845_v46 = vld [vmem:[#allocation54_spill] sm:$0xff]  ;;  %v12847_v48 = vld [vmem:[#allocation55_spill] sm:$0xff] }
 0x1cc   : > { %v2150_v22 = vpack.c.bf16 %v2110_v63, %v2106_v62  ;;  %vm1980_vm4 = vcmp.ge.f32.partialorder %v1916_v3, 0.0  ;;  %v2044_v15 = vmul.f32 0.01, %v1916_v3  ;;  %v1923_v29 = vadd.f32 %v8892_v56, %v1838_v58  ;;  %v12846_v53 = vld [vmem:[#allocation58_spill] sm:$0xff] }
 0x1cd   : > { %7331 = vmatprep.mubr.msk.bf16.mxu1 %vm1474_vm2, %v2153_v20  ;;  %vm1984_vm5 = vcmp.ge.f32.partialorder %v1920_v9, 0.0  ;;  %v2048_v42 = vmul.f32 0.01, %v1920_v9  ;;  %v1927_v39 = vadd.f32 %v8892_v56, %v1842_v2  ;;  %v1840_v34 = vmul.f32 %v8746_v43, %v12839_v33 }
 0x1ce   : > { %2581 = vmatmul.mubr.bf16.gmra.mxu0 %v2150_v22  ;;  %v2108_v6 = vsel %vm1980_vm4, %v1916_v3, %v2044_v15  ;;  %vm1987_vm6 = vcmp.ge.f32.partialorder %v1923_v29, 0.0  ;;  %v2051_v16 = vmul.f32 0.01, %v1923_v29  ;;  %v1844_v1 = vmul.f32 %v8746_v43, %v12840_v59  ;;  %v12852_v59 = vld [vmem:[#allocation53_spill] sm:$0xff] }
 0x1cf   : > { %v2112_v37 = vsel %vm1984_vm5, %v1920_v9, %v2048_v42  ;;  %vm1991_vm7 = vcmp.ge.f32.partialorder %v1927_v39, 0.0  ;;  %v2055_v35 = vmul.f32 0.01, %v1927_v39  ;;  %v1925_v23 = vadd.f32 %v8898_v13, %v1840_v34  ;;  %v12848_v9 = vld [vmem:[#allocation23_spill] sm:$0xff]  ;;  %v12851_v34 = vld [vmem:[#allocation56_spill] sm:$0xff] }
 0x1d0   : > { %v2152_v50 = vpack.c.bf16 %v2112_v37, %v2108_v6  ;;  %v2115_v18 = vsel %vm1987_vm6, %v1923_v29, %v2051_v16  ;;  %v1929_v7 = vadd.f32 %v8898_v13, %v1844_v1  ;;  %v1837_v32 = vmul.f32 %v12832_v51, %v12841_v28  ;;  %v12849_v42 = vld [vmem:[#allocation27_spill] sm:$0xff]  ;;  %v12853_v37 = vld [vmem:[#allocation57_spill] sm:$0xff] }
 0x1d1   : > { %v2119_v45 = vsel %vm1991_vm7, %v1927_v39, %v2055_v35  ;;  %vm1989_vm8 = vcmp.ge.f32.partialorder %v1925_v23, 0.0  ;;  %v2053_v5 = vmul.f32 0.01, %v1925_v23  ;;  %v1841_v30 = vmul.f32 %v12832_v51, %v12842_v25 }
 0x1d2   : > { %2694 = vmatmul.mubr.bf16.gmra.mxu1 %v2152_v50  ;;  %v2155_v8 = vpack.c.bf16 %v2119_v45, %v2115_v18  ;;  %vm1993_vm9 = vcmp.ge.f32.partialorder %v1929_v7, 0.0  ;;  %v2057_v31 = vmul.f32 0.01, %v1929_v7  ;;  %v1922_v17 = vadd.f32 %v8889_v24, %v1837_v32 }
 0x1d3   : > { %v2117_v40 = vsel %vm1989_vm8, %v1925_v23, %v2053_v5  ;;  %v1926_v0 = vadd.f32 %v8889_v24, %v1841_v30  ;;  %v1839_v57 = vmul.f32 %v12835_v47, %v12843_v49  ;;  %v1843_v4 = vmul.f32 %v12835_v47, %v12844_v14 }
 0x1d4   : > { %2590 = vmatprep.mubr.bf16.mxu0 %v2155_v8  ;;  %v2121_v19 = vsel %vm1993_vm9, %v1929_v7, %v2057_v31  ;;  %vm1986_vm10 = vcmp.ge.f32.partialorder %v1922_v17, 0.0  ;;  %v2050_v26 = vmul.f32 0.01, %v1922_v17  ;;  %v1846_v10 = vmul.f32 %v8740_v11, %v12845_v46 }
 0x1d5   : > { %v2157_v61 = vpack.c.bf16 %v2121_v19, %v2117_v40  ;;  %vm1990_vm11 = vcmp.ge.f32.partialorder %v1926_v0, 0.0  ;;  %v2054_v60 = vmul.f32 0.01, %v1926_v0  ;;  %v1924_v55 = vadd.f32 %v8895_v12, %v1839_v57 }
 0x1d6   : > { %v2114_v41 = vsel %vm1986_vm10, %v1922_v17, %v2050_v26  ;;  %v1928_v44 = vadd.f32 %v8895_v12, %v1843_v4  ;;  %v1850_v38 = vmul.f32 %v8740_v11, %v12846_v53  ;;  %v1931_v54 = vadd.f32 %v8892_v56, %v1846_v10 }
 0x1d7   : > { %7332 = vmatprep.mubr.msk.bf16.mxu1 %vm1474_vm2, %v2157_v61  ;;  %v2118_v52 = vsel %vm1990_vm11, %v1926_v0, %v2054_v60  ;;  %vm1988_vm12 = vcmp.ge.f32.partialorder %v1924_v55, 0.0  ;;  %v2052_v27 = vmul.f32 0.01, %v1924_v55  ;;  %v1848_v3 = vmul.f32 %v8746_v43, %v12847_v48 }
 0x1d8   : > { %v2154_v21 = vpack.c.bf16 %v2118_v52, %v2114_v41  ;;  %vm1992_vm13 = vcmp.ge.f32.partialorder %v1928_v44, 0.0  ;;  %v2056_v58 = vmul.f32 0.01, %v1928_v44  ;;  %v1935_v36 = vadd.f32 %v8892_v56, %v1850_v38  ;;  %v12850_v56 = vld [vmem:[#allocation52_spill] sm:$0xff]  ;;  %v7673_v41 = vld [vmem:[%s8073_s6 + $0x38] sm:$0xff]   ;;  %v7674_v38 = vld [vmem:[%s8073_s6 + $0x30] sm:$0xff]  }
 0x1d9   : > { %v2116_v2 = vsel %vm1988_vm12, %v1924_v55, %v2052_v27  ;;  %vm1995_vm14 = vcmp.ge.f32.partialorder %v1931_v54, 0.0  ;;  %v2059_v20 = vmul.f32 0.01, %v1931_v54  ;;  %v1933_v11 = vadd.f32 %v8898_v13, %v1848_v3  ;;  %3406 = vmatpush1.bf16.msra.mxu1 %v7673_v41  ;;  %v7678_v27 = vld [vmem:[%s8063_s24 + $0x30] sm:$0xff]  }
 0x1da   : > { %2591 = vmatmul.mubr.bf16.gmra.mxu0 %v2154_v21  ;;  %v2120_v62 = vsel %vm1992_vm13, %v1928_v44, %v2056_v58  ;;  %vm1999_vm15 = vcmp.ge.f32.partialorder %v1935_v36, 0.0  ;;  %v2063_v63 = vmul.f32 0.01, %v1935_v36  ;;  %vm2001_vm0 = vcmp.ge.f32.partialorder %v12848_v9, 0.0  ;;  %v7676_v44 = vld [vmem:[%s8063_s24 + $0x38] sm:$0xff]  }
 0x1db   : > { %v2156_v22 = vpack.c.bf16 %v2120_v62, %v2116_v2  ;;  %v2123_v15 = vsel %vm1995_vm14, %v1931_v54, %v2059_v20  ;;  %vm1997_vm1 = vcmp.ge.f32.partialorder %v1933_v11, 0.0  ;;  %v2061_v43 = vmul.f32 0.01, %v1933_v11  ;;  %3199 = vmatpush1.bf16.msra.mxu0 %v7676_v44  ;;  %v2212_v21 = vld [vmem:[%s8048_s8] sm:$0x3]  ;;  %v12855_v2 = vld [vmem:[#allocation19_spill] sm:$0xff] }
 0x1dc   : > { %v2127_v29 = vsel %vm1999_vm15, %v1935_v36, %v2063_v63  ;;  %v2129_v39 = vsel %vm2001_vm0, %v12848_v9, %v12849_v42  ;;  %v1845_v33 = vmul.f32 %v12832_v51, %v12850_v56  ;;  %v1849_v13 = vmul.f32 %v12832_v51, %v12851_v34  ;;  %v7675_v36 = vld [vmem:[%s8073_s6 + $0x28] sm:$0xff]   ;;  %v7677_v42 = vld [vmem:[%s8073_s6 + $0x20] sm:$0xff]  }
 0x1dd   : > { %2704 = vmatmul.mubr.bf16.gmra.mxu1 %v2156_v22  ;;  %v2159_v6 = vpack.c.bf16 %v2127_v29, %v2123_v15  ;;  %v2125_v16 = vsel %vm1997_vm1, %v1933_v11, %v2061_v43  ;;  %v1847_v1 = vmul.f32 %v12835_v47, %v12852_v59  ;;  %v1851_v35 = vmul.f32 %v12835_v47, %v12853_v37  ;;  %v7680_v62 = vld [vmem:[%s8063_s24 + $0x28] sm:$0xff]   ;;  %v7679_v37 = vld [vmem:[%s8073_s6 + $0x18] sm:$0xff]  }
 0x1de   : > { %v2161_v23 = vpack.c.bf16 %v2129_v39, %v2125_v16  ;;  %v1930_v50 = vadd.f32 %v8889_v24, %v1845_v33  ;;  %v1934_v18 = vadd.f32 %v8889_v24, %v1849_v13  ;;  %v12854_v52 = vmov 0   ;;  %v12856_v9 = vld [vmem:[#allocation17_spill] sm:$0xff]  ;;  %v7681_v33 = vld [vmem:[%s8063_s24 + $0x20] sm:$0xff]  }
 0x1df   : > { %2600 = vmatprep.mubr.bf16.mxu0 %v2159_v6  ;;  %v1932_v7 = vadd.f32 %v8895_v12, %v1847_v1  ;;  %v1936_v28 = vadd.f32 %v8895_v12, %v1851_v35  ;;  %3407 = vmatprep.subr.bf16.mxu1 %v12854_v52  ;;  %v9098_v20 = vrot.slane %v2212_v21, %v12855_v2  ;;  %vm2747_vm7 = vcmask 588800  }
 0x1e0   : > { %7333 = vmatprep.mubr.msk.bf16.mxu1 %vm1474_vm2, %v2161_v23  ;;  %vm1994_vm3 = vcmp.ge.f32.partialorder %v1930_v50, 0.0  ;;  %vm1998_vm4 = vcmp.ge.f32.partialorder %v1934_v18, 0.0  ;;  %v2058_v51 = vmul.f32 0.01, %v1930_v50  ;;  %v2062_v32 = vmul.f32 0.01, %v1934_v18  ;;  %3200 = vmatprep.subr.bf16.mxu0 %v12854_v52 }
 0x1e1   : > { %vm1996_vm5 = vcmp.ge.f32.partialorder %v1932_v7, 0.0  ;;  %vm2000_vm6 = vcmp.ge.f32.partialorder %v1936_v28, 0.0  ;;  %v2060_v45 = vmul.f32 0.01, %v1932_v7  ;;  %v2064_v47 = vmul.f32 0.01, %v1936_v28  ;;  %3408 = vmatpush1.bf16.msra.mxu1 %v7674_v38  ;;  %3201 = vmatpush1.bf16.msra.mxu0 %v7678_v27 }
 0x1e2   : > { %v2122_v5 = vsel %vm1994_vm3, %v1930_v50, %v2058_v51  ;;  %v2126_v25 = vsel %vm1998_vm4, %v1934_v18, %v2062_v32  ;;  %3409 = vmatprep.subr.bf16.mxu1 %v12854_v52  ;;  %3202 = vmatprep.subr.bf16.mxu0 %v12854_v52  ;;  %v9108_v22 = vrot.slane %v2212_v21, %v12856_v9  ;;  %vm3194_vm8 = vcmask 1043456  }
 0x1e3   : > { %v2158_v30 = vpack.c.bf16 %v2126_v25, %v2122_v5  ;;  %v2124_v8 = vsel %vm1996_vm5, %v1932_v7, %v2060_v45  ;;  %v2128_v24 = vsel %vm2000_vm6, %v1936_v28, %v2064_v47  ;;  %v7683_v7 = vld [vmem:[%s8063_s24 + $0x18] sm:$0xff]  }
 0x1e4   : > { %v2160_v31 = vpack.c.bf16 %v2128_v24, %v2124_v8  ;;  %v7682_v8 = vld [vmem:[%s8073_s6 + $0x10] sm:$0xff]  }
 0x1e5   : > { %2601 = vmatmul.mubr.bf16.gmra.mxu0 %v2158_v30  ;;  %3410 = vmatpush1.bf16.msra.mxu1 %v7675_v36 }
 0x1e6   : > { %2714 = vmatmul.mubr.bf16.gmra.mxu1 %v2160_v31  ;;  %3411 = vmatprep.subr.bf16.mxu1 %v12854_v52 }
 0x1e7   : > { %3203 = vmatpush1.bf16.msra.mxu0 %v7680_v62 }
 0x1e8   : > { %3204 = vmatprep.subr.bf16.mxu0 %v12854_v52 }
 0x1e9   : > { %3412 = vmatpush1.bf16.msra.mxu1 %v7677_v42 }
 0x1ea   : > { %3413 = vmatprep.subr.bf16.mxu1 %v12854_v52 }
 0x1eb   : > { %3205 = vmatpush1.bf16.msra.mxu0 %v7681_v33 }
 0x1ec   : > { %3206 = vmatprep.subr.bf16.mxu0 %v12854_v52 }
 0x1ed   : > { %3414 = vmatpush1.bf16.msra.mxu1 %v7679_v37 }
 0x1ee   : > { %3415 = vmatprep.subr.bf16.mxu1 %v12854_v52 }
 0x1ef   : > { %3207 = vmatpush1.bf16.msra.mxu0 %v7683_v7 }
 0x1f0   : > { %3208 = vmatprep.subr.bf16.mxu0 %v12854_v52 }
 0x1f1   : > { %3416 = vmatpush1.bf16.msra.mxu1 %v7682_v8  ;;  %v7690_v8 = vld [vmem:[%s8063_s24 + $0x60] ss:$0 sps:$4 sm:$0xff]  }
 0x1f2   : > { %3417 = vmatprep.subr.bf16.mxu1 %v12854_v52 }
 0x25f   : > { %v2532_v12 = vpop.f32.mrf.mxu0 }
 0x260   : > { %v2533_v13 = vadd.f32 %v2532_v12, %v9108_v22 }
 0x261   : > { %v2534_v17 = vpop.f32.mrf.mxu0 }
 0x262   : > { %v9075_v40 = vpop.f32.mrf.mxu1  ;;  %v2535_v39 = vadd.f32 %v2534_v17, %v9098_v20 }
 0x263   : > { %v2536_v0 = vpop.f32.mrf.mxu0  ;;  %v9145_v51 = vadd.f32 %v9075_v40, %v2533_v13  ;;  %v7685_v40 = vld [vmem:[%s8063_s24 + $0x10] sm:$0xff]  }
 0x264   : > { %v2647_v49 = vpop.f32.mrf.mxu1  ;;  %v2537_v34 = vadd.f32 %v2536_v0, %v9108_v22  ;;  %3209 = vmatpush1.bf16.msra.mxu0 %v7685_v40 }
 0x265   : > { %v2538_v57 = vpop.f32.mrf.mxu0  ;;  %v9132_v35 = vadd.f32 %v2647_v49, %v2535_v39  ;;  %3210 = vmatprep.subr.bf16.mxu0 %v12854_v52 }
 0x266   : > { %v2649_v14 = vpop.f32.mrf.mxu1  ;;  %v2539_v43 = vadd.f32 %v2538_v57, %v9098_v20  ;;  %v2787_v57 = vmul.f32 %v9145_v51, %v9145_v51 }
 0x267   : > { %v9141_v28 = vadd.f32 %v2649_v14, %v2537_v34  ;;  %v2788_v24 = vmul.f32 %v9132_v35, %v9132_v35  ;;  %v2748_v41 = vsel %vm2747_vm7, %v9132_v35, 0.0 }
 0x268   : > { %v2651_v4 = vpop.f32.mrf.mxu1 }
 0x269   : > { %v2542_v19 = vpop.f32.mrf.mxu0  ;;  %v9128_v59 = vadd.f32 %v2651_v4, %v2539_v43  ;;  %v2789_v0 = vmul.f32 %v9141_v28, %v9141_v28  ;;  %v2840_v44 = vsel %vm2747_vm7, %v2788_v24, 0.0  ;;  %v2726_v38 = vadd.f32 %v9141_v28, %v9145_v51 }
 0x26a   : > { %v2543_v23 = vadd.f32 %v2542_v19, %v9108_v22 }
 0x26b   : > { %v2544_v26 = vpop.f32.mrf.mxu0  ;;  %v2790_v47 = vmul.f32 %v9128_v59, %v9128_v59  ;;  %v2749_v14 = vsel %vm2747_vm7, %v9128_v59, 0.0 }
 0x26c   : > { %v9077_v46 = vpop.f32.mrf.mxu1  ;;  %v2545_v1 = vadd.f32 %v2544_v26, %v9098_v20  ;;  %v2750_v43 = vadd.f32 %v2749_v14, %v2748_v41 }
 0x26d   : > { %v2546_v10 = vpop.f32.mrf.mxu0  ;;  %v9161_v31 = vadd.f32 %v9077_v46, %v2543_v23  ;;  %v2841_v26 = vsel %vm2747_vm7, %v2790_v47, 0.0 }
 0x26e   : > { %v2657_v61 = vpop.f32.mrf.mxu1  ;;  %v2547_v25 = vadd.f32 %v2546_v10, %v9108_v22  ;;  %v2842_v42 = vadd.f32 %v2841_v26, %v2840_v44 }
 0x26f   : > { %v2548_v60 = vpop.f32.mrf.mxu0  ;;  %v9153_v5 = vadd.f32 %v2657_v61, %v2545_v1  ;;  %v2727_v37 = vadd.f32 %v2726_v38, %v9161_v31 }
 0x270   : > { %v9079_v55 = vpop.f32.mrf.mxu1  ;;  %v2549_v30 = vadd.f32 %v2548_v60, %v9098_v20  ;;  %v7684_v60 = vld [vmem:[%s8073_s6 + $0x8] sm:$0xff]  }
 0x271   : > { %v2792_v46 = vmul.f32 %v9153_v5, %v9153_v5  ;;  %v9185_v10 = vadd.f32 %v9079_v55, %v2547_v25  ;;  %v2751_v21 = vsel %vm2747_vm7, %v9153_v5, 0.0  ;;  %3418 = vmatpush1.bf16.msra.mxu1 %v7684_v60  ;;  %v7688_v25 = vld [vmem:[%s8073_s6 + $0x60] ss:$0 sps:$4 sm:$0xff]  }
 0x272   : > { %v9083_v53 = vpop.f32.mrf.mxu1  ;;  %v2752_v7 = vadd.f32 %v2751_v21, %v2750_v43  ;;  %3419 = vmatprep.subr.bf16.mxu1 %v12854_v52 }
 0x273   : > { %v9086_v54 = vpop.f32.mrf.mxu0  ;;  %v9188_v61 = vadd.f32 %v9083_v53, %v2549_v30  ;;  %v7687_v53 = vld [vmem:[%s8063_s24 + $0x8] sm:$0xff]   ;;  %v7689_v30 = vld [vmem:[%s8063_s24] sm:$0xff]  }
 0x274   : > { %v9090_v48 = vpop.f32.mrf.mxu1  ;;  %v2553_v4 = vadd.f32 %v9086_v54, %v9108_v22  ;;  %v2791_v54 = vmul.f32 %v9161_v31, %v9161_v31  ;;  %3211 = vmatpush1.bf16.msra.mxu0 %v7687_v53 }
 0x275   : > { %v2554_v3 = vpop.f32.mrf.mxu0  ;;  %v2794_v13 = vmul.f32 %v9188_v61, %v9188_v61  ;;  %3212 = vmatprep.subr.bf16.mxu0 %v12854_v52 }
 0x276   : > { %v9094_v58 = vpop.f32.mrf.mxu1  ;;  %v2555_v49 = vadd.f32 %v2554_v3, %v9098_v20  ;;  %v2819_v3 = vadd.f32 %v2789_v0, %v2787_v57  ;;  %v9213_v39 = vadd.f32 %v9090_v48, %v2553_v4  ;;  %v2728_v57 = vadd.f32 %v2727_v37, %v9185_v10 }
 0x277   : > { %v9100_v11 = vpop.f32.mrf.mxu0 }
 0x278   : > { %v9104_v63 = vpop.f32.mrf.mxu1  ;;  %v9207_v36 = vadd.f32 %v9094_v58, %v2555_v49  ;;  %v2557_v33 = vadd.f32 %v9100_v11, %v9108_v22  ;;  %v2843_v58 = vsel %vm2747_vm7, %v2792_v46, 0.0  ;;  %v7686_v11 = vld [vmem:[%s8073_s6] sm:$0xff]   ;;  %v2820_v23 = vadd.f32 %v2819_v3, %v2791_v54  ;;  %3213 = vmatpush1.bf16.msra.mxu0 %v7689_v30 }
 0x279   : > { %v9110_v15 = vpop.f32.mrf.mxu0  ;;  %v2844_v49 = vadd.f32 %v2843_v58, %v2842_v42  ;;  %v2795_v14 = vmul.f32 %v9213_v39, %v9213_v39  ;;  %v2845_v46 = vsel %vm2747_vm7, %v2794_v13, 0.0  ;;  %3420 = vmatpush1.bf16.msra.mxu1 %v7686_v11  ;;  %v3196_v54 = vsel %vm3194_vm8, %v7690_v8, 0  ;;  %3220 = vmatprep.subr.bf16.mxu0 %v12854_v52  ;;  %v7691_v11 = vld [vmem:[%s8073_s6 + $0x58] sm:$0xff]  }
 0x27a   : > { %v9113_v29 = vpop.f32.mrf.mxu1  ;;  %v2559_v62 = vadd.f32 %v9110_v15, %v9098_v20  ;;  %v2793_v15 = vmul.f32 %v9185_v10, %v9185_v10  ;;  %v2796_v24 = vmul.f32 %v9207_v36, %v9207_v36  ;;  %v9250_v4 = vadd.f32 %v9104_v63, %v2557_v33  ;;  %3427 = vmatprep.subr.bf16.mxu1 %v12854_v52 }
 0x27b   : > { %v9117_v56 = vpop.f32.mrf.mxu0  ;;  %v2755_v38 = vsel %vm2747_vm7, %v9207_v36, 0.0  ;;  %v3403_v63 = vsel %vm3194_vm8, %v7688_v25, 0  ;;  %v2729_v43 = vadd.f32 %v2728_v57, %v9213_v39  ;;  %v7692_v25 = vld [vmem:[%s8063_s24 + $0x58] sm:$0xff]  }
 0x27c   : > { %v9241_v40 = vadd.f32 %v9113_v29, %v2559_v62  ;;  %v2563_v0 = vadd.f32 %v9117_v56, %v9108_v22  ;;  %v2821_v26 = vadd.f32 %v2820_v23, %v2793_v15  ;;  %v2846_v62 = vadd.f32 %v2845_v46, %v2844_v49  ;;  %3221 = vmatpush2.bf16.msra.mxu0 %v3196_v54  ;;  %v7694_v54 = vld [vmem:[%s8063_s24 + $0x50] sm:$0xff]  }
 0x27d   : > { %v9124_v6 = vpop.f32.mrf.mxu1  ;;  %v9126_v16 = vpop.f32.mrf.mxu0  ;;  %v2797_v33 = vmul.f32 %v9250_v4, %v9250_v4  ;;  %3428 = vmatpush2.bf16.msra.mxu1 %v3403_v63  ;;  %v2730_v30 = vadd.f32 %v2729_v43, %v9250_v4  ;;  %3222 = vmatprep.subr.bf16.mxu0 %v12854_v52 }
 0x27e   : > { %v2565_v48 = vadd.f32 %v9126_v16, %v9098_v20  ;;  %v2753_v16 = vsel %vm2747_vm7, %v9188_v61, 0.0  ;;  %v9269_v53 = vadd.f32 %v9124_v6, %v2563_v0  ;;  %v2822_v42 = vadd.f32 %v2821_v26, %v2795_v14  ;;  %3429 = vmatprep.subr.bf16.mxu1 %v12854_v52 }
 0x27f   : > { %v9135_v50 = vpop.f32.mrf.mxu1  ;;  %v9137_v18 = vpop.f32.mrf.mxu0  ;;  %v2754_v44 = vadd.f32 %v2753_v16, %v2752_v7  ;;  %v2757_v58 = vsel %vm2747_vm7, %v9241_v40, 0.0 }
 0x280   : > { %v9254_v29 = vadd.f32 %v9135_v50, %v2565_v48  ;;  %v2847_v50 = vsel %vm2747_vm7, %v2796_v24, 0.0  ;;  %v2567_v3 = vadd.f32 %v9137_v18, %v9108_v22  ;;  %v2823_v24 = vadd.f32 %v2822_v42, %v2797_v33  ;;  %3223 = vmatpush2.bf16.msra.mxu0 %v7692_v25 }
 0x281   : > { %v9147_v32 = vpop.f32.mrf.mxu1  ;;  %v9149_v45 = vpop.f32.mrf.mxu0  ;;  %v2756_v37 = vadd.f32 %v2755_v38, %v2754_v44  ;;  %v2848_v23 = vadd.f32 %v2847_v50, %v2846_v62  ;;  %3430 = vmatpush2.bf16.msra.mxu1 %v7691_v11  ;;  %v7693_v44 = vld [vmem:[%s8073_s6 + $0x50] sm:$0xff]   ;;  %v2731_v63 = vadd.f32 %v2730_v30, %v9269_v53  ;;  %3224 = vmatprep.subr.bf16.mxu0 %v12854_v52 }
 0x282   : > { %v2569_v56 = vadd.f32 %v9149_v45, %v9098_v20  ;;  %v2798_v45 = vmul.f32 %v9241_v40, %v9241_v40  ;;  %v2800_v6 = vmul.f32 %v9254_v29, %v9254_v29  ;;  %v9296_v8 = vadd.f32 %v9147_v32, %v2567_v3  ;;  %3431 = vmatprep.subr.bf16.mxu1 %v12854_v52 }
 0x283   : > { %v9163_v12 = vpop.f32.mrf.mxu1  ;;  %v9165_v17 = vpop.f32.mrf.mxu0  ;;  %v2759_v0 = vsel %vm2747_vm7, %v9254_v29, 0.0 }
 0x284   : > { %v9282_v15 = vadd.f32 %v9163_v12, %v2569_v56  ;;  %v2573_v18 = vadd.f32 %v9165_v17, %v9108_v22  ;;  %v2849_v12 = vsel %vm2747_vm7, %v2798_v45, 0.0  ;;  %v2799_v17 = vmul.f32 %v9269_v53, %v9269_v53  ;;  %3225 = vmatpush2.bf16.msra.mxu0 %v7694_v54 }
 0x285   : > { %v9179_v19 = vpop.f32.mrf.mxu0  ;;  %v2851_v57 = vsel %vm2747_vm7, %v2800_v6, 0.0  ;;  %v2850_v38 = vadd.f32 %v2849_v12, %v2848_v23  ;;  %v2732_v33 = vadd.f32 %v2731_v63, %v9296_v8  ;;  %3432 = vmatpush2.bf16.msra.mxu1 %v7693_v44  ;;  %3226 = vmatprep.subr.bf16.mxu0 %v12854_v52 }
 0x286   : > { %v2575_v7 = vadd.f32 %v9179_v19, %v9098_v20  ;;  %v2758_v19 = vadd.f32 %v2757_v58, %v2756_v37  ;;  %v2802_v14 = vmul.f32 %v9282_v15, %v9282_v15  ;;  %v2824_v50 = vadd.f32 %v2823_v24, %v2799_v17  ;;  %3433 = vmatprep.subr.bf16.mxu1 %v12854_v52 }
 0x287   : > { %v9198_v27 = vpop.f32.mrf.mxu1  ;;  %v9200_v55 = vpop.f32.mrf.mxu0  ;;  %v2852_v62 = vadd.f32 %v2851_v57, %v2850_v38 }
 0x288   : > { %v9307_v32 = vadd.f32 %v9198_v27, %v2573_v18  ;;  %v2577_v26 = vadd.f32 %v9200_v55, %v9108_v22  ;;  %v2801_v27 = vmul.f32 %v9296_v8, %v9296_v8  ;;  %v2760_v3 = vadd.f32 %v2759_v0, %v2758_v19  ;;  %v7695_v18 = vld [vmem:[%s8073_s6 + $0x48] sm:$0xff]  }
 0x289   : > { %v9217_v34 = vpop.f32.mrf.mxu1  ;;  %v9226_v1 = vpop.f32.mrf.mxu0  ;;  %v2853_v58 = vsel %vm2747_vm7, %v2802_v14, 0.0  ;;  %3434 = vmatpush2.bf16.msra.mxu1 %v7695_v18 }
 0x28a   : > { %v2579_v49 = vadd.f32 %v9226_v1, %v9098_v20  ;;  %v9314_v1 = vadd.f32 %v9217_v34, %v2575_v7  ;;  %v2761_v34 = vsel %vm2747_vm7, %v9282_v15, 0.0  ;;  %v7696_v7 = vld [vmem:[%s8063_s24 + $0x48] sm:$0xff]   ;;  %v2825_v25 = vadd.f32 %v2824_v50, %v2801_v27  ;;  %3435 = vmatprep.subr.bf16.mxu1 %v12854_v52  ;;  %v7698_v27 = vld [vmem:[%s8063_s24 + $0x40] sm:$0xff]  }
 0x28b   : > { %v9230_v47 = vpop.f32.mrf.mxu1  ;;  %v2854_v24 = vadd.f32 %v2853_v58, %v2852_v62  ;;  %v2733_v57 = vadd.f32 %v2732_v33, %v9307_v32  ;;  %3227 = vmatpush2.bf16.msra.mxu0 %v7696_v7 }
 0x28c   : > { %v2763_v11 = vsel %vm2747_vm7, %v9314_v1, 0.0  ;;  %3228 = vmatprep.subr.bf16.mxu0 %v12854_v52 }
 0x28d   : > { %v9258_v60 = vpop.f32.mrf.mxu1 }
 0x28e   : > { %v2582_v41 = vpop.f32.mrf.mxu0  ;;  %v9326_v43 = vadd.f32 %v9258_v60, %v2579_v49  ;;  %v2804_v60 = vmul.f32 %v9314_v1, %v9314_v1 }
 0x28f   : > { %v2583_v55 = vadd.f32 %v2582_v41, %v9108_v22  ;;  %v2803_v41 = vmul.f32 %v9307_v32, %v9307_v32  ;;  %3229 = vmatpush2.bf16.msra.mxu0 %v7698_v27 }
 0x290   : > { %v2584_v21 = vpop.f32.mrf.mxu0  ;;  %v2855_v44 = vsel %vm2747_vm7, %v2804_v60, 0.0  ;;  %v2765_v38 = vsel %vm2747_vm7, %v9326_v43, 0.0 }
 0x291   : > { %v2585_v45 = vadd.f32 %v2584_v21, %v9098_v20  ;;  %v9333_v21 = vadd.f32 %v9230_v47, %v2577_v26  ;;  %v2762_v47 = vadd.f32 %v2761_v34, %v2760_v3  ;;  %v2826_v14 = vadd.f32 %v2825_v25, %v2803_v41 }
 0x292   : > { %v2695_v13 = vpop.f32.mrf.mxu1  ;;  %v2586_v48 = vpop.f32.mrf.mxu0 }
 0x293   : > { %v2587_v37 = vadd.f32 %v2586_v48, %v9108_v22  ;;  %v9344_v30 = vadd.f32 %v2695_v13, %v2583_v55  ;;  %v2806_v48 = vmul.f32 %v9326_v43, %v9326_v43  ;;  %v2764_v13 = vadd.f32 %v2763_v11, %v2762_v47 }
 0x294   : > { %v2697_v16 = vpop.f32.mrf.mxu1  ;;  %v2588_v56 = vpop.f32.mrf.mxu0  ;;  %v2734_v55 = vadd.f32 %v2733_v57, %v9333_v21 }
 0x295   : > { %v2589_v23 = vadd.f32 %v2588_v56, %v9098_v20  ;;  %v9346_v12 = vadd.f32 %v2697_v16, %v2585_v45  ;;  %v2805_v16 = vmul.f32 %v9333_v21, %v9333_v21  ;;  %v7697_v56 = vld [vmem:[%s8073_s6 + $0x40] sm:$0xff]   ;;  %v2807_v45 = vmul.f32 %v9344_v30, %v9344_v30 }
 0x296   : > { %v2699_v46 = vpop.f32.mrf.mxu1  ;;  %v2766_v11 = vadd.f32 %v2765_v38, %v2764_v13  ;;  %3436 = vmatpush2.bf16.msra.mxu1 %v7697_v56  ;;  %v2735_v60 = vadd.f32 %v2734_v55, %v9344_v30 }
 0x297   : > { %v9360_v63 = vadd.f32 %v2699_v46, %v2587_v37  ;;  %v2808_v3 = vmul.f32 %v9346_v12, %v9346_v12  ;;  %v2857_v46 = vsel %vm2747_vm7, %v2806_v48, 0.0  ;;  %v2827_v18 = vadd.f32 %v2826_v14, %v2805_v16 }
 0x298   : > { %v2701_v42 = vpop.f32.mrf.mxu1  ;;  %v2767_v37 = vsel %vm2747_vm7, %v9346_v12, 0.0 }
 0x299   : > { %v9362_v54 = vadd.f32 %v2701_v42, %v2589_v23  ;;  %v2809_v23 = vmul.f32 %v9360_v63, %v9360_v63  ;;  %v2768_v13 = vadd.f32 %v2767_v37, %v2766_v11 }
 0x29a   : > { %v2592_v6 = vpop.f32.mrf.mxu0 }
 0x29b   : > { %v2593_v19 = vadd.f32 %v2592_v6, %v9108_v22  ;;  %v2856_v6 = vadd.f32 %v2855_v44, %v2854_v24  ;;  %v2810_v7 = vmul.f32 %v9362_v54, %v9362_v54  ;;  %v2859_v24 = vsel %vm2747_vm7, %v2808_v3, 0.0 }
 0x29c   : > { %v2594_v17 = vpop.f32.mrf.mxu0  ;;  %v2769_v16 = vsel %vm2747_vm7, %v9362_v54, 0.0 }
 0x29d   : > { %v2705_v0 = vpop.f32.mrf.mxu1  ;;  %v2595_v49 = vadd.f32 %v2594_v17, %v9098_v20  ;;  %v2858_v47 = vadd.f32 %v2857_v46, %v2856_v6  ;;  %v2828_v17 = vadd.f32 %v2827_v18, %v2807_v45 }
 0x29e   : > { %v2596_v26 = vpop.f32.mrf.mxu0  ;;  %v9374_v42 = vadd.f32 %v2705_v0, %v2593_v19  ;;  %v2736_v19 = vadd.f32 %v2735_v60, %v9360_v63 }
 0x29f   : > { %v2707_v50 = vpop.f32.mrf.mxu1  ;;  %v2597_v62 = vadd.f32 %v2596_v26, %v9108_v22  ;;  %v2860_v44 = vadd.f32 %v2859_v24, %v2858_v47  ;;  %v2829_v38 = vadd.f32 %v2828_v17, %v2809_v23 }
 0x2a0   : > { %v2598_v34 = vpop.f32.mrf.mxu0  ;;  %v9376_v33 = vadd.f32 %v2707_v50, %v2595_v49  ;;  %v2811_v0 = vmul.f32 %v9374_v42, %v9374_v42  ;;  %v2861_v50 = vsel %vm2747_vm7, %v2810_v7, 0.0  ;;  %v2737_v27 = vadd.f32 %v2736_v19, %v9374_v42 }
 0x2a1   : > { %v2709_v58 = vpop.f32.mrf.mxu1  ;;  %v2599_v41 = vadd.f32 %v2598_v34, %v9098_v20  ;;  %v2862_v47 = vadd.f32 %v2861_v50, %v2860_v44  ;;  %v7701_v44 = vld [vmem:[%s8083_s20 + $0xec] ss:$16 sps:$4 sm:$0xff]  }
 0x2a2   : > { %v9387_v48 = vadd.f32 %v2709_v58, %v2597_v62  ;;  %v2812_v49 = vmul.f32 %v9376_v33, %v9376_v33  ;;  %v2771_v45 = vsel %vm2747_vm7, %v9376_v33, 0.0  ;;  %v2770_v58 = vadd.f32 %v2769_v16, %v2768_v13  ;;  %3917 = vmatprep.subr.bf16.mxu1 %v7701_v44 }
 0x2a3   : > { %v2711_v25 = vpop.f32.mrf.mxu1 }
 0x2a4   : > { %v9394_v57 = vadd.f32 %v2711_v25, %v2599_v41  ;;  %v2813_v3 = vmul.f32 %v9387_v48, %v9387_v48  ;;  %v2830_v41 = vadd.f32 %v2829_v38, %v2811_v0  ;;  %v2863_v6 = vsel %vm2747_vm7, %v2812_v49, 0.0 }
 0x2a5   : > { %v2602_v14 = vpop.f32.mrf.mxu0  ;;  %v2738_v60 = vadd.f32 %v2737_v27, %v9387_v48  ;;  %v2772_v17 = vadd.f32 %v2771_v45, %v2770_v58  ;;  %v2864_v16 = vadd.f32 %v2863_v6, %v2862_v47 }
 0x2a6   : > { %v2603_v26 = vadd.f32 %v2602_v14, %v9108_v22  ;;  %v2715_v56 = vpop.f32.mrf.mxu1  ;;  %v2814_v18 = vmul.f32 %v9394_v57, %v9394_v57  ;;  %v2773_v24 = vsel %vm2747_vm7, %v9394_v57, 0.0  ;;  %v2831_v0 = vadd.f32 %v2830_v41, %v2813_v3  ;;  %v7704_v3 = vld [vmem:[%s8083_s20 + $0xe4] ss:$16 sps:$4 sm:$0xff]  }
 0x2a7   : > { %v2604_v55 = vpop.f32.mrf.mxu0  ;;  %v2774_v38 = vadd.f32 %v2773_v24, %v2772_v17  ;;  %3804 = vmatprep.subr.bf16.mxu0 %v7704_v3 }
 0x2a8   : > { %v9405_v62 = vadd.f32 %v2715_v56, %v2603_v26  ;;  %v2605_v34 = vadd.f32 %v2604_v55, %v9098_v20  ;;  %v2717_v46 = vpop.f32.mrf.mxu1  ;;  %v2865_v26 = vsel %vm2747_vm7, %v2814_v18, 0.0 }
 0x2a9   : > { %v2606_v11 = vpop.f32.mrf.mxu0  ;;  %v2866_v58 = vadd.f32 %v2865_v26, %v2864_v16 }
 0x2aa   : > { %v2815_v37 = vmul.f32 %v9405_v62, %v9405_v62  ;;  %v9414_v23 = vadd.f32 %v2717_v46, %v2605_v34  ;;  %v2607_v7 = vadd.f32 %v2606_v11, %v9108_v22  ;;  %v2719_v25 = vpop.f32.mrf.mxu1  ;;  %v2739_v49 = vadd.f32 %v2738_v60, %v9405_v62 }
 0x2ab   : > { %v2608_v19 = vpop.f32.mrf.mxu0 }
 0x2ac   : > { %v2816_v14 = vmul.f32 %v9414_v23, %v9414_v23  ;;  %v9422_v13 = vadd.f32 %v2719_v25, %v2607_v7  ;;  %v2775_v22 = vsel %vm2747_vm7, %v9414_v23, 0.0  ;;  %v2609_v56 = vadd.f32 %v2608_v19, %v9098_v20  ;;  %v2721_v45 = vpop.f32.mrf.mxu1 }
 0x2ad   : > { %v2832_v50 = vadd.f32 %v2831_v0, %v2815_v37  ;;  %v2776_v41 = vadd.f32 %v2775_v22, %v2774_v38 }
 0x2ae   : > { %v2740_v27 = vadd.f32 %v2739_v49, %v9422_v13  ;;  %v2817_v55 = vmul.f32 %v9422_v13, %v9422_v13  ;;  %v2867_v34 = vsel %vm2747_vm7, %v2816_v14, 0.0  ;;  %v9434_v46 = vadd.f32 %v2721_v45, %v2609_v56 }
 0x2af   : > { %v2868_v60 = vadd.f32 %v2867_v34, %v2866_v58 }
 0x2b0   : > { %v2741_v6 = vrot.slane %v2740_v27, 4  ;;  %v2833_v18 = vadd.f32 %v2832_v50, %v2817_v55  ;;  %v2777_v20 = vsel %vm2747_vm7, %v9434_v46, 0.0  ;;  %v2818_v11 = vmul.f32 %v9434_v46, %v9434_v46 }
 0x2b1   : > { %v2778_v25 = vadd.f32 %v2777_v20, %v2776_v41 }
 0x2b2   : > { %v2742_v37 = vadd.f32 %v2741_v6, %v2740_v27  ;;  %v2834_v7 = vrot.slane %v2833_v18, 4  ;;  %v2869_v47 = vsel %vm2747_vm7, %v2818_v11, 0.0 }
 0x2b3   : > { %v2779_v19 = vrot.slane %v2778_v25, 4  ;;  %v2870_v0 = vadd.f32 %v2869_v47, %v2868_v60 }
 0x2b4   : > { %v2743_v17 = vrot.slane %v2742_v37, 2  ;;  %v2835_v24 = vadd.f32 %v2834_v7, %v2833_v18 }
 0x2b5   : > { %v2780_v16 = vadd.f32 %v2779_v19, %v2778_v25  ;;  %v2871_v26 = vrot.slane %v2870_v0, 4 }
 0x2b6   : > { %v2744_v49 = vadd.f32 %v2743_v17, %v2742_v37  ;;  %v2836_v14 = vrot.slane %v2835_v24, 2 }
 0x2b7   : > { %v2781_v44 = vrot.slane %v2780_v16, 2  ;;  %v2872_v38 = vadd.f32 %v2871_v26, %v2870_v0 }
 0x2b8   : > { %v2745_v22 = vrot.slane %v2744_v49, 1  ;;  %v2837_v56 = vadd.f32 %v2836_v14, %v2835_v24 }
 0x2b9   : > { %v2782_v45 = vadd.f32 %v2781_v44, %v2780_v16  ;;  %v2873_v27 = vrot.slane %v2872_v38, 2  ;;  %v2724_v44 = vld [vmem:[%s8053_s14] sm:$0x3] }
 0x2ba   : > { %v2746_v50 = vadd.f32 %v2745_v22, %v2744_v49  ;;  %v2838_v55 = vrot.slane %v2837_v56, 1  ;;  %v12857_v22 = vld [vmem:[#allocation59_spill] sm:$0xff] }
 0x2bb   : > { %v2783_v58 = vrot.slane %v2782_v45, 1  ;;  %v2874_v41 = vadd.f32 %v2873_v27, %v2872_v38 }
 0x2bc   : > { %v2785_v3 = vmul.f32 0.0078125, %v2746_v50  ;;  %v2839_v34 = vadd.f32 %v2838_v55, %v2837_v56 }
 0x2bd   : > { %v2784_v20 = vadd.f32 %v2783_v58, %v2782_v45  ;;  %v2875_v11 = vrot.slane %v2874_v41, 1 }
 0x2be   : > { %v2877_v6 = vmul.f32 0.0078125, %v2839_v34  ;;  %v2879_v18 = vmul.f32 %v2785_v3, %v2785_v3 }
 0x2bf   : > { %v2786_v37 = vmul.f32 0.0078125, %v2784_v20  ;;  %v2876_v7 = vadd.f32 %v2875_v11, %v2874_v41 }
 0x2c0   : > { %v2881_v60 = vsub.f32 %v2877_v6, %v2879_v18  ;;  %v2725_v6 = vld [vmem:[%s8058_s19] sm:$0x3] }
 0x2c1   : > { %v2878_v47 = vmul.f32 0.0078125, %v2876_v7  ;;  %v2880_v17 = vmul.f32 %v2786_v37, %v2786_v37 }
 0x2c2   : > { %v2883_v25 = vmax.f32 %v2881_v60, 0.0 }
 0x2c3   : > { %v2882_v24 = vsub.f32 %v2878_v47, %v2880_v17 }
 0x2c4   : > { %v2885_v19 = vadd.f32 1e-05, %v2883_v25 }
 0x2c5   : > { %v2884_v0 = vmax.f32 %v2882_v24, 0.0 }
 0x2c6   : > { %7843 = vrsqrt.f32 %v2885_v19 }
 0x2c7   : > { %v2886_v49 = vadd.f32 1e-05, %v2884_v0 }
 0x2c9   : > { %7845 = vrsqrt.f32 %v2886_v49 }
 0x2d3   : > { %v7844_v14 = vpop.eup %7843 }
 0x2d6   : > { %v7846_v16 = vpop.eup %7845 }
 0x2d7   : > { %v2891_v26 = vcombine.low %v7844_v14, %v7846_v16 }
 0x2d9   : > { %v2898_v56 = vrot.slane %v2891_v26, %v12857_v22 }
 0x2db   : > { %v2905_v38 = vrot.slane %v2898_v56, %v12857_v22 }
 0x2dd   : > { %v2907_v50 = vmul.f32 %v2905_v38, %v2724_v44 }
 0x2df   : > { %v9445_v55 = vrot.slane %v2907_v50, %v12856_v9  ;;  %v9448_v45 = vrot.slane %v2907_v50, %v12855_v2 }
 0x2e1   : > { %v2919_v27 = vmul.f32 %v9445_v55, %v2785_v3  ;;  %v2920_v34 = vmul.f32 %v9448_v45, %v2786_v37  ;;  %v2941_v11 = vmul.f32 %v9448_v45, %v9132_v35  ;;  %v9459_v60 = vmul.f32 %v9445_v55, %v9422_v13 }
 0x2e2   : > { %v2943_v37 = vmul.f32 %v9448_v45, %v9128_v59  ;;  %v2940_v25 = vmul.f32 %v9445_v55, %v9145_v51  ;;  %v2942_v47 = vmul.f32 %v9445_v55, %v9141_v28  ;;  %v2945_v35 = vmul.f32 %v9448_v45, %v9153_v5 }
 0x2e3   : > { %v2923_v58 = vcombine.low %v2919_v27, %v2920_v34  ;;  %v2947_v13 = vmul.f32 %v9448_v45, %v9188_v61  ;;  %v2944_v61 = vmul.f32 %v9445_v55, %v9161_v31  ;;  %v2946_v56 = vmul.f32 %v9445_v55, %v9185_v10 }
 0x2e4   : > { %v2949_v38 = vmul.f32 %v9448_v45, %v9207_v36  ;;  %v2951_v50 = vmul.f32 %v9448_v45, %v9241_v40  ;;  %v7710_v40 = vld [vmem:[%s8083_s20 + $0xc4] ss:$16 sps:$4 sm:$0xff]  }
 0x2e5   : > { %v2930_v41 = vrot.slane %v2923_v58, %v12857_v22  ;;  %v7699_v58 = vld [vmem:[%s8083_s20 + $0xe8] ss:$16 sps:$4 sm:$0xff]  }
 0x2e7   : > { %v2937_v18 = vrot.slane %v2930_v41, %v12857_v22  ;;  %v7702_v41 = vld [vmem:[%s8083_s20 + $0xe0] ss:$16 sps:$4 sm:$0xff]  }
 0x2e9   : > { %v2939_v20 = vsub.f32 %v2725_v6, %v2937_v18  ;;  %v7707_v18 = vld [vmem:[%s8083_s20 + $0xcc] ss:$16 sps:$4 sm:$0xff]  }
 0x2eb   : > { %v9462_v7 = vrot.slane %v2939_v20, %v12856_v9  ;;  %v9465_v3 = vrot.slane %v2939_v20, %v12855_v2 }
 0x2ed   : > { %v2984_v17 = vadd.f32 %v9465_v3, %v2941_v11  ;;  %v2986_v24 = vadd.f32 %v9465_v3, %v2943_v37  ;;  %v2983_v19 = vadd.f32 %v9462_v7, %v2940_v25  ;;  %v2985_v59 = vadd.f32 %v9462_v7, %v2942_v47  ;;  %v7705_v37 = vld [vmem:[%s8083_s20 + $0xc8] ss:$16 sps:$4 sm:$0xff]   ;;  %v7708_v25 = vld [vmem:[%s8083_s20 + $0xc0] ss:$16 sps:$4 sm:$0xff]  }
 0x2ee   : > { %v2988_v0 = vadd.f32 %v9465_v3, %v2945_v35  ;;  %v2990_v51 = vadd.f32 %v9465_v3, %v2947_v13  ;;  %v2987_v34 = vadd.f32 %v9462_v7, %v2944_v61  ;;  %v2989_v31 = vadd.f32 %v9462_v7, %v2946_v56  ;;  %v7714_v61 = vld [vmem:[%s8083_s20 + $0xa0] ss:$16 sps:$4 sm:$0xff]  }
 0x2ef   : > { %v3016_v28 = vmax.f32 %v2984_v17, 0.0  ;;  %v3018_v49 = vmax.f32 %v2986_v24, 0.0  ;;  %v3015_v5 = vmax.f32 %v2983_v19, 0.0  ;;  %v3017_v14 = vmax.f32 %v2985_v59, 0.0  ;;  %v7713_v17 = vld [vmem:[%s8083_s20 + $0xac] ss:$16 sps:$4 sm:$0xff]  }
 0x2f0   : > { %v3020_v16 = vmax.f32 %v2988_v0, 0.0  ;;  %v3022_v26 = vmax.f32 %v2990_v51, 0.0  ;;  %v2992_v6 = vadd.f32 %v9465_v3, %v2949_v38  ;;  %v2994_v36 = vadd.f32 %v9465_v3, %v2951_v50  ;;  %v7716_v24 = vld [vmem:[%s8083_s20 + $0xa4] ss:$16 sps:$4 sm:$0xff]   ;;  %v7717_v38 = vld [vmem:[%s8083_s20 + $0x88] ss:$16 sps:$4 sm:$0xff]  }
 0x2f1   : > { %v3048_v44 = vpack.c.bf16 %v3018_v49, %v3016_v28  ;;  %v3047_v27 = vpack.c.bf16 %v3017_v14, %v3015_v5  ;;  %v3019_v20 = vmax.f32 %v2987_v34, 0.0  ;;  %v3021_v11 = vmax.f32 %v2989_v31, 0.0 }
 0x2f2   : > { %v3050_v10 = vpack.c.bf16 %v3022_v26, %v3020_v16  ;;  %v2971_v47 = vmul.f32 %v9448_v45, %v9434_v46  ;;  %v3024_v35 = vmax.f32 %v2992_v6, 0.0  ;;  %v3026_v13 = vmax.f32 %v2994_v36, 0.0 }
 0x2f3   : > { %7348 = vmatprep.mubr.msk.bf16.mxu0 %vm2747_vm7, %v3048_v44  ;;  %7370 = vmatprep.mubr.msk.bf16.mxu1 %vm2747_vm7, %v3048_v44  ;;  %v2948_v19 = vmul.f32 %v9445_v55, %v9213_v39  ;;  %v2950_v59 = vmul.f32 %v9445_v55, %v9250_v4  ;;  %v2953_v46 = vmul.f32 %v9448_v45, %v9254_v29  ;;  %v7711_v4 = vld [vmem:[%s8083_s20 + $0xa8] ss:$16 sps:$4 sm:$0xff]  }
 0x2f4   : > { %3231 = vmatmul.mubr.bf16.vlgmr.msra.gmra.mxu0 %v3047_v27  ;;  %3438 = vmatmul.mubr.bf16.vlgmr.msra.gmra.mxu1 %v3047_v27  ;;  %v3014_v0 = vadd.f32 %v9465_v3, %v2971_v47  ;;  %v2955_v51 = vmul.f32 %v9448_v45, %v9282_v15  ;;  %v2969_v28 = vmul.f32 %v9448_v45, %v9414_v23  ;;  %v7719_v15 = vld [vmem:[%s8083_s20 + $0x8c] ss:$16 sps:$4 sm:$0xff]   ;;  %v7722_v23 = vld [vmem:[%s8083_s20 + $0x84] ss:$16 sps:$4 sm:$0xff]  }
 0x2f5   : > { %7349 = vmatprep.mubr.msk.bf16.mxu0 %vm2747_vm7, %v3050_v10  ;;  %7371 = vmatprep.mubr.msk.bf16.mxu1 %vm2747_vm7, %v3050_v10  ;;  %v3049_v49 = vpack.c.bf16 %v3021_v11, %v3019_v20  ;;  %v2991_v5 = vadd.f32 %v9462_v7, %v2948_v19  ;;  %v2993_v39 = vadd.f32 %v9462_v7, %v2950_v59 }
 0x2f6   : > { %3918 = vmatpush1.bf16.msra.mxu1 %v7699_v58  ;;  %3805 = vmatpush1.bf16.msra.mxu0 %v7702_v41  ;;  %v3052_v14 = vpack.c.bf16 %v3026_v13, %v3024_v35  ;;  %v2996_v29 = vadd.f32 %v9465_v3, %v2953_v46  ;;  %v2998_v16 = vadd.f32 %v9465_v3, %v2955_v51  ;;  %v3046_v56 = vmax.f32 %v3014_v0, 0.0  ;;  %v7720_v58 = vld [vmem:[%s8083_s20 + $0x80] ss:$16 sps:$4 sm:$0xff]  }
 0x2f7   : > { %3919 = vmatprep.subr.bf16.mxu1 %v7707_v18  ;;  %3806 = vmatprep.subr.bf16.mxu0 %v7710_v40  ;;  %v2968_v26 = vmul.f32 %v9445_v55, %v9405_v62  ;;  %v3012_v44 = vadd.f32 %v9465_v3, %v2969_v28  ;;  %v3023_v50 = vmax.f32 %v2991_v5, 0.0  ;;  %v3025_v27 = vmax.f32 %v2993_v39, 0.0  ;;  %v7725_v62 = vld [vmem:[%s8083_s20 + $0x6c] ss:$16 sps:$4 sm:$0xff]   ;;  %v7728_v18 = vld [vmem:[%s8083_s20 + $0x64] ss:$16 sps:$4 sm:$0xff]  }
 0x2f8   : > { %v2952_v34 = vmul.f32 %v9445_v55, %v9269_v53  ;;  %v3028_v41 = vmax.f32 %v2996_v29, 0.0  ;;  %v3030_v10 = vmax.f32 %v2998_v16, 0.0  ;;  %v3013_v36 = vadd.f32 %v9462_v7, %v9459_v60 }
 0x2f9   : > { %v3011_v31 = vadd.f32 %v9462_v7, %v2968_v26  ;;  %v3044_v6 = vmax.f32 %v3012_v44, 0.0  ;;  %v2954_v53 = vmul.f32 %v9445_v55, %v9296_v8  ;;  %v2957_v40 = vmul.f32 %v9448_v45, %v9314_v1  ;;  %v7723_v8 = vld [vmem:[%s8083_s20 + $0x68] ss:$16 sps:$4 sm:$0xff]  }
 0x2fa   : > { %3920 = vmatpush1.bf16.msra.mxu1 %v7705_v37  ;;  %3807 = vmatpush1.bf16.msra.mxu0 %v7708_v25  ;;  %v2995_v11 = vadd.f32 %v9462_v7, %v2952_v34  ;;  %v2959_v37 = vmul.f32 %v9448_v45, %v9326_v43  ;;  %v3045_v60 = vmax.f32 %v3013_v36, 0.0  ;;  %v3051_v47 = vpack.c.bf16 %v3025_v27, %v3023_v50 }
 0x2fb   : > { %3921 = vmatprep.subr.bf16.mxu1 %v7713_v17  ;;  %3808 = vmatprep.subr.bf16.mxu0 %v7716_v24  ;;  %v3043_v20 = vmax.f32 %v3011_v31, 0.0  ;;  %v9549_v25 = vpack.c.bf16 %v3046_v56, %v3044_v6  ;;  %v2997_v35 = vadd.f32 %v9462_v7, %v2954_v53  ;;  %v3000_v13 = vadd.f32 %v9465_v3, %v2957_v40  ;;  %v7726_v17 = vld [vmem:[%s8083_s20 + $0x60] ss:$16 sps:$4 sm:$0xff]   ;;  %v7735_v53 = vld [vmem:[%s8083_s20 + $0x28] ss:$16 sps:$4 sm:$0xff]  }
 0x2fc   : > { %3239 = vmatmul.mubr.bf16.gmra.mxu0 %v3049_v49  ;;  %3446 = vmatmul.mubr.bf16.gmra.mxu1 %v3049_v49  ;;  %v3054_v24 = vpack.c.bf16 %v3030_v10, %v3028_v41  ;;  %v3002_v1 = vadd.f32 %v9465_v3, %v2959_v37  ;;  %v3027_v43 = vmax.f32 %v2995_v11, 0.0  ;;  %v2956_v51 = vmul.f32 %v9445_v55, %v9307_v32  ;;  %v7737_v40 = vld [vmem:[%s8083_s20 + $0x2c] ss:$16 sps:$4 sm:$0xff]   ;;  %v7740_v11 = vld [vmem:[%s8083_s20 + $0x24] ss:$16 sps:$4 sm:$0xff]  }
 0x2fd   : > { %7350 = vmatprep.mubr.msk.bf16.mxu0 %vm2747_vm7, %v3052_v14  ;;  %7372 = vmatprep.mubr.msk.bf16.mxu1 %vm2747_vm7, %v3052_v14  ;;  %v9556_v19 = vpack.c.bf16 %v3045_v60, %v3043_v20  ;;  %v3029_v59 = vmax.f32 %v2997_v35, 0.0  ;;  %v3032_v0 = vmax.f32 %v3000_v13, 0.0  ;;  %v2958_v28 = vmul.f32 %v9445_v55, %v9333_v21  ;;  %v7738_v20 = vld [vmem:[%s8083_s20 + $0x20] ss:$16 sps:$4 sm:$0xff]   ;;  %v7741_v37 = vld [vmem:[%s8083_s20 + $0x8] ss:$16 sps:$4 sm:$0xff]  }
 0x2fe   : > { %3922 = vmatpush1.bf16.msra.mxu1 %v7711_v4  ;;  %3809 = vmatpush1.bf16.msra.mxu0 %v7714_v61  ;;  %v3034_v46 = vmax.f32 %v3002_v1, 0.0  ;;  %v2961_v49 = vmul.f32 %v9448_v45, %v9346_v12  ;;  %v2963_v5 = vmul.f32 %v9448_v45, %v9362_v54  ;;  %v2999_v4 = vadd.f32 %v9462_v7, %v2956_v51  ;;  %v7744_v60 = vld [vmem:[%s8083_s20] ss:$16 sps:$4 sm:$0xff]  }
 0x2ff   : > { %3923 = vmatprep.subr.bf16.mxu1 %v7719_v15  ;;  %3810 = vmatprep.subr.bf16.mxu0 %v7722_v23  ;;  %v3053_v39 = vpack.c.bf16 %v3029_v59, %v3027_v43  ;;  %v3001_v61 = vadd.f32 %v9462_v7, %v2958_v28  ;;  %v2960_v15 = vmul.f32 %v9445_v55, %v9344_v30  ;;  %v1065_v35 = vld [vmem:[%s9618_s1 + $0x10] sm:$0xff]  ;;  %v1063_v13 = vld [vmem:[%s9618_s1] sm:$0xff]  ;;  %v7999_v1 = vmov 2   ;;  %v1068_v43 = vld [vmem:[%s9618_s1 + $0x28] sm:$0xff] }
 0x300   : > { %v3056_v14 = vpack.c.bf16 %v3034_v46, %v3032_v0  ;;  %v3004_v29 = vadd.f32 %v9465_v3, %v2961_v49  ;;  %v3006_v16 = vadd.f32 %v9465_v3, %v2963_v5  ;;  %v3031_v32 = vmax.f32 %v2999_v4, 0.0  ;;  %4044 = vperm.xlu1 %7562, %v1065_v35   ;;  %4034 = vperm.xlu0 %7561, %v1063_v13   ;;  %v1069_v59 = vld [vmem:[%s9618_s1 + $0x30] sm:$0xff]  ;;  %v1070_v0 = vld [vmem:[%s9618_s1 + $0x38] sm:$0xff]  ;;  %v9642_v51 = vld [vmem:[%s9618_s1 + $0x60] sm:$0xff] }
 0x301   : > { %v3033_v21 = vmax.f32 %v3001_v61, 0.0  ;;  %v2962_v23 = vmul.f32 %v9445_v55, %v9360_v63  ;;  %v2965_v26 = vmul.f32 %v9448_v45, %v9376_v33  ;;  %v2967_v56 = vmul.f32 %v9448_v45, %v9394_v57  ;;  %v9637_v46 = vld [vmem:[%s9618_s1 + $0x58] sm:$0xff]  ;;  %v1071_v28 = vld [vmem:[%s9618_s1 + $0x40] sm:$0xff]  ;;  %v1073_v49 = vld [vmem:[%s9618_s1 + $0x50] sm:$0xff] }
 0x302   : > { %3924 = vmatpush1.bf16.msra.mxu1 %v7717_v38  ;;  %3811 = vmatpush1.bf16.msra.mxu0 %v7720_v58  ;;  %v3036_v12 = vmax.f32 %v3004_v29, 0.0  ;;  %v3038_v54 = vmax.f32 %v3006_v16, 0.0  ;;  %v3003_v38 = vadd.f32 %v9462_v7, %v2960_v15  ;;  %v2964_v45 = vmul.f32 %v9445_v55, %v9374_v42  ;;  %v1072_v5 = vld [vmem:[%s9618_s1 + $0x48] sm:$0xff]  ;;  %v9664_v4 = vld [vmem:[%s8068_s30] ss:$0 sm:$0xff]  ;;  %v9680_v16 = vld [vmem:[%s9618_s1 + $0x70] sm:$0xff] }
 0x303   : > { %3925 = vmatprep.subr.bf16.mxu1 %v7725_v62  ;;  %3812 = vmatprep.subr.bf16.mxu0 %v7728_v18  ;;  %v3055_v44 = vpack.c.bf16 %v3033_v21, %v3031_v32  ;;  %v3005_v50 = vadd.f32 %v9462_v7, %v2962_v23  ;;  %v3008_v34 = vadd.f32 %v9465_v3, %v2965_v26  ;;  %v7734_v18 = vld [vmem:[%s8083_s20 + $0x44] ss:$16 sps:$4 sm:$0xff]   ;;  %v9667_v61 = vld [vmem:[%s12858_s2] ss:$0 sm:$0xff]  ;;  %s13272_s2 = sld [smem:[#allocation12_spill]] }
 0x304   : > { %3247 = vmatmul.mubr.bf16.gmra.mxu0 %v3051_v47  ;;  %3454 = vmatmul.mubr.bf16.gmra.mxu1 %v3051_v47  ;;  %v3058_v27 = vpack.c.bf16 %v3038_v54, %v3036_v12  ;;  %v3010_v31 = vadd.f32 %v9465_v3, %v2967_v56  ;;  %v3035_v30 = vmax.f32 %v3003_v38, 0.0  ;;  %v2966_v58 = vmul.f32 %v9445_v55, %v9387_v48  ;;  %v7729_v48 = vld [vmem:[%s8083_s20 + $0x48] ss:$16 sps:$4 sm:$0xff]   ;;  %v7731_v55 = vld [vmem:[%s8083_s20 + $0x4c] ss:$16 sps:$4 sm:$0xff]  }
 0x305   : > { %7351 = vmatprep.mubr.msk.bf16.mxu0 %vm2747_vm7, %v3054_v24  ;;  %7373 = vmatprep.mubr.msk.bf16.mxu1 %vm2747_vm7, %v3054_v24  ;;  %v3037_v63 = vmax.f32 %v3005_v50, 0.0  ;;  %v3040_v33 = vmax.f32 %v3008_v34, 0.0  ;;  %v3007_v41 = vadd.f32 %v9462_v7, %v2964_v45  ;;  %v7746_v47 = vld [vmem:[%s8083_s20 + $0x4] ss:$16 sps:$4 sm:$0xff]   ;;  %v1064_v24 = vld [vmem:[%s9618_s1 + $0x8] sm:$0xff]  ;;  %v9692_v56 = vld [vmem:[%s9618_s1 + $0x78] sm:$0xff] }
 0x306   : > { %3926 = vmatpush1.bf16.msra.mxu1 %v7723_v8  ;;  %3813 = vmatpush1.bf16.msra.mxu0 %v7726_v17  ;;  %v3042_v57 = vmax.f32 %v3010_v31, 0.0  ;;  %v3009_v3 = vadd.f32 %v9462_v7, %v2966_v58  ;;  %v7732_v7 = vld [vmem:[%s8083_s20 + $0x40] ss:$16 sps:$4 sm:$0xff]   ;;  %v7998_v8 = vmov 1   ;;  %v1066_v17 = vld [vmem:[%s9618_s1 + $0x18] sm:$0xff] }
 0x307   : > { %v3057_v62 = vpack.c.bf16 %v3037_v63, %v3035_v30  ;;  %v3039_v42 = vmax.f32 %v3007_v41, 0.0  ;;  %3927 = vmatprep.subr.bf16.mxu1 %v7731_v55  ;;  %3814 = vmatprep.subr.bf16.mxu0 %v7734_v18 }
 0x308   : > { %v3060_v10 = vpack.c.bf16 %v3042_v57, %v3040_v33  ;;  %v3041_v6 = vmax.f32 %v3009_v3, 0.0  ;;  %7563 = vset.pattern.permute.xlu1 %v7998_v8  ;;  %4039 = vperm.xlu0 %7561, %v1064_v24  }
 0x309   : > { %4279 = vperm.xlu1 %7563, %v1063_v13  }
 0x30a   : > { %v3059_v36 = vpack.c.bf16 %v3041_v6, %v3039_v42  ;;  %3928 = vmatpush1.bf16.msra.mxu1 %v7729_v48  ;;  %3815 = vmatpush1.bf16.msra.mxu0 %v7732_v7 }
 0x30b   : > { %3929 = vmatprep.subr.bf16.mxu1 %v7737_v40  ;;  %3816 = vmatprep.subr.bf16.mxu0 %v7740_v11 }
 0x30c   : > { %3255 = vmatmul.mubr.bf16.gmra.mxu0 %v3053_v39  ;;  %3462 = vmatmul.mubr.bf16.gmra.mxu1 %v3053_v39  ;;  %v9661_v39 = vld [vmem:[%s9618_s1 + $0x68] sm:$0xff] }
 0x30d   : > { %7352 = vmatprep.mubr.msk.bf16.mxu0 %vm2747_vm7, %v3056_v14  ;;  %7374 = vmatprep.mubr.msk.bf16.mxu1 %vm2747_vm7, %v3056_v14 }
 0x30e   : > { %3930 = vmatpush1.bf16.msra.mxu1 %v7735_v53  ;;  %3817 = vmatpush1.bf16.msra.mxu0 %v7738_v20 }
 0x30f   : > { %3818 = vmatprep.subr.bf16.mxu0 %v7746_v47  ;;  %7564 = vset.pattern.permute.xlu1 %v12854_v52 }
 0x310   : > { %4049 = vperm.xlu1 %7564, %v1066_v17   ;;  %4064 = vperm.xlu0 %7561, %v1069_v59  }
 0x312   : > { %3819 = vmatpush1.bf16.msra.mxu0 %v7744_v60  ;;  %v1079_v60 = vld [vmem:[%s9724_s15] sm:$0xff] }
 0x314   : > { %3263 = vmatmul.mubr.bf16.gmra.mxu0 %v3055_v44  ;;  %3470 = vmatmul.mubr.bf16.gmra.mxu1 %v3055_v44 }
 0x315   : > { %7353 = vmatprep.mubr.msk.bf16.mxu0 %vm2747_vm7, %v3058_v27  ;;  %7375 = vmatprep.mubr.msk.bf16.mxu1 %vm2747_vm7, %v3058_v27 }
 0x316   : > { %7565 = vset.pattern.permute.xlu1 %v7998_v8  ;;  %4069 = vperm.xlu0 %7561, %v1070_v0  }
 0x317   : > { %4287 = vperm.xlu1 %7565, %v1065_v35  }
 0x31a   : > { %4089 = vperm.xlu0 %7561, %v9637_v46  }
 0x31b   : > { %7566 = vset.pattern.permute.xlu1 %v7999_v1 }
 0x31c   : > { %3271 = vmatmul.mubr.bf16.gmra.mxu0 %v3057_v62  ;;  %3478 = vmatmul.mubr.bf16.gmra.mxu1 %v3057_v62 }
 0x31d   : > { %7354 = vmatprep.mubr.msk.bf16.mxu0 %vm2747_vm7, %v3060_v10  ;;  %7376 = vmatprep.mubr.msk.bf16.mxu1 %vm2747_vm7, %v3060_v10 }
 0x31e   : > { %4511 = vperm.xlu1 %7566, %v1064_v24   ;;  %4094 = vperm.xlu0 %7561, %v9642_v51  }
 0x322   : > { %7567 = vset.pattern.permute.xlu1 %v12854_v52  ;;  %7582 = vset.pattern.permute.xlu0 %v7999_v1 }
 0x323   : > { %4507 = vperm.xlu0 %7582, %v1063_v13  }
 0x324   : > { %3279 = vmatmul.mubr.bf16.gmra.mxu0 %v3059_v36  ;;  %3486 = vmatmul.mubr.bf16.gmra.mxu1 %v3059_v36 }
 0x325   : > { %7355 = vmatprep.mubr.msk.bf16.mxu0 %vm2747_vm7, %v9549_v25  ;;  %7377 = vmatprep.mubr.msk.bf16.mxu1 %vm2747_vm7, %v9549_v25  ;;  %v7743_v25 = vld [vmem:[%s8083_s20 + $0xc] ss:$16 sps:$4 sm:$0xff]  }
 0x326   : > { %3931 = vmatprep.subr.bf16.mxu1 %v7743_v25 }
 0x327   : > { %3932 = vmatpush1.bf16.msra.mxu1 %v7741_v37  ;;  %4527 = vperm.xlu0 %7582, %v1068_v43  }
 0x32b   : > { %4531 = vperm.xlu0 %7582, %v1069_v59  }
 0x32c   : > { %3287 = vmatmul.mubr.bf16.gmra.mxu0 %v9556_v19  ;;  %3494 = vmatmul.mubr.bf16.gmra.mxu1 %v9556_v19  ;;  %v1067_v19 = vld [vmem:[%s9618_s1 + $0x20] sm:$0xff]  ;;  %s13229_s1 = sld [smem:[#allocation7_spill]] }
 0x32d   : > { %3836 = vmatprep.mubr.bf16.mxu0 %v12854_v52  ;;  %3949 = vmatprep.mubr.bf16.mxu1 %v12854_v52 }
 0x32e   : > { %4054 = vperm.xlu1 %7567, %v1067_v19  }
 0x32f   : > { %4547 = vperm.xlu0 %7582, %v1073_v49  }
 0x332   : > { %7568 = vset.pattern.permute.xlu1 %v7999_v1 }
 0x333   : > { %4515 = vperm.xlu1 %7568, %v1065_v35   ;;  %4551 = vperm.xlu0 %7582, %v9637_v46  }
 0x337   : > { %7569 = vset.pattern.permute.xlu1 %v12854_v52  ;;  %7586 = vset.pattern.permute.xlu0 %v7998_v8 }
 0x338   : > { %4059 = vperm.xlu1 %7569, %v1068_v43   ;;  %4283 = vperm.xlu0 %7586, %v1064_v24  }
 0x33c   : > { %7570 = vset.pattern.permute.xlu1 %v7999_v1  ;;  %4291 = vperm.xlu0 %7586, %v1066_v17  }
 0x33d   : > { %4519 = vperm.xlu1 %7570, %v1066_v17  }
 0x340   : > { %4295 = vperm.xlu0 %7586, %v1067_v19  }
 0x341   : > { %7571 = vset.pattern.permute.xlu1 %v7998_v8 }
 0x342   : > { %4299 = vperm.xlu1 %7571, %v1068_v43  }
 0x344   : > { %4311 = vperm.xlu0 %7586, %v1071_v28  }
 0x346   : > { %7572 = vset.pattern.permute.xlu1 %v7999_v1 }
 0x347   : > { %4523 = vperm.xlu1 %7572, %v1067_v19  }
 0x348   : > { %4315 = vperm.xlu0 %7586, %v1072_v5  }
 0x34b   : > { %7573 = vset.pattern.permute.xlu1 %v7998_v8 }
 0x34c   : > { %4303 = vperm.xlu1 %7573, %v1069_v59   ;;  %4331 = vperm.xlu0 %7586, %v9661_v39  }
 0x350   : > { %7574 = vset.pattern.permute.xlu1 %v12854_v52  ;;  %4335 = vperm.xlu0 %7586, %v9680_v16  }
 0x351   : > { %4074 = vperm.xlu1 %7574, %v1071_v28  }
 0x354   : > { %4339 = vperm.xlu0 %7586, %v9692_v56  }
 0x355   : > { %7575 = vset.pattern.permute.xlu1 %v7998_v8 }
 0x356   : > { %4307 = vperm.xlu1 %7575, %v1070_v0  }
 0x358   : > { %7591 = vset.pattern.permute.xlu0 %v7999_v1 }
 0x359   : > { %4567 = vperm.xlu0 %7591, %v9692_v56  }
 0x35a   : > { %7576 = vset.pattern.permute.xlu1 %v12854_v52 }
 0x35b   : > { %4079 = vperm.xlu1 %7576, %v1072_v5  }
 0x35f   : > { %7577 = vset.pattern.permute.xlu1 %v7999_v1 }
 0x360   : > { %4535 = vperm.xlu1 %7577, %v1070_v0  }
 0x364   : > { %7578 = vset.pattern.permute.xlu1 %v12854_v52 }
 0x365   : > { %4084 = vperm.xlu1 %7578, %v1073_v49  }
 0x369   : > { %7579 = vset.pattern.permute.xlu1 %v7999_v1 }
 0x36a   : > { %4539 = vperm.xlu1 %7579, %v1071_v28  }
 0x36e   : > { %7580 = vset.pattern.permute.xlu1 %v7998_v8 }
 0x36f   : > { %4319 = vperm.xlu1 %7580, %v1073_v49  }
 0x373   : > { %7581 = vset.pattern.permute.xlu1 %v7999_v1 }
 0x374   : > { %4543 = vperm.xlu1 %7581, %v1072_v5  }
 0x378   : > { %7583 = vset.pattern.permute.xlu1 %v7998_v8 }
 0x379   : > { %4323 = vperm.xlu1 %7583, %v9637_v46   ;;  %v1080_v46 = vld [vmem:[%s9724_s15 + $0x8] sm:$0xff] }
 0x37d   : > { %7584 = vset.pattern.permute.xlu1 %v12854_v52 }
 0x37e   : > { %4099 = vperm.xlu1 %7584, %v9661_v39  }
 0x382   : > { %7585 = vset.pattern.permute.xlu1 %v7998_v8 }
 0x383   : > { %4327 = vperm.xlu1 %7585, %v9642_v51  }
 0x387   : > { %7587 = vset.pattern.permute.xlu1 %v12854_v52 }
 0x388   : > { %4104 = vperm.xlu1 %7587, %v9680_v16  }
 0x38c   : > { %7588 = vset.pattern.permute.xlu1 %v7999_v1 }
 0x38d   : > { %4555 = vperm.xlu1 %7588, %v9642_v51  }
 0x391   : > { %7589 = vset.pattern.permute.xlu1 %v12854_v52 }
 0x392   : > { %4109 = vperm.xlu1 %7589, %v9692_v56  }
 0x396   : > { %7590 = vset.pattern.permute.xlu1 %v7999_v1 }
 0x397   : > { %4559 = vperm.xlu1 %7590, %v9661_v39  }
 0x39b   : > { %4563 = vperm.xlu1 %7590, %v9680_v16  }
 0x3b4   : > { %v3232_v14 = vpop.f32.mrf.mxu0  ;;  %v3439_v29 = vpop.f32.mrf.mxu1 }
 0x3b5   : > { %v9683_v32 = vadd.f32 %v9664_v4, %v3232_v14  ;;  %v3440_v21 = vadd.f32 %v9667_v61, %v3439_v29 }
 0x3b6   : > { %v3234_v12 = vpop.f32.mrf.mxu0  ;;  %v3441_v54 = vpop.f32.mrf.mxu1 }
 0x3b7   : > { %6974 = vst [vmem:[%s9673_s7] sm:$0xff] %v9683_v32  ;;  %v3502_v15 = vmul.f32 0.5, %v3440_v21  ;;  %6990 = vst [vmem:[%s9677_s10] sm:$0xff] %v3440_v21 }
 0x3b8   : > { %v3235_v23 = vpop.f32.mrf.mxu0  ;;  %v3442_v26 = vpop.f32.mrf.mxu1 }
 0x3b9   : > { %v3518_v44 = vmul.f32 1.442695, %v3502_v15  ;;  %v9695_v38 = vadd.f32 %v9664_v4, %v3235_v23  ;;  %v3443_v50 = vadd.f32 %v9667_v61, %v3442_v26 }
 0x3ba   : > { %v3237_v27 = vpop.f32.mrf.mxu0  ;;  %v3444_v34 = vpop.f32.mrf.mxu1 }
 0x3bb   : > { %7847 = vpow2.f32 %v3518_v44  ;;  %6975 = vst [vmem:[%s9673_s7 + $0x8] sm:$0xff] %v9695_v38  ;;  %v3503_v31 = vmul.f32 0.5, %v3443_v50  ;;  %6991 = vst [vmem:[%s9677_s10 + $0x8] sm:$0xff] %v3443_v50  ;;  %v1081_v50 = vld [vmem:[%s9724_s15 + $0x10] sm:$0xff] }
 0x3bc   : > { %v3240_v30 = vpop.f32.mrf.mxu0  ;;  %v3447_v63 = vpop.f32.mrf.mxu1 }
 0x3bd   : > { %v3520_v33 = vmul.f32 1.442695, %v3503_v31  ;;  %v9704_v57 = vadd.f32 %v9664_v4, %v3240_v30  ;;  %v3448_v45 = vadd.f32 %v9667_v61, %v3447_v63 }
 0x3be   : > { %v3242_v58 = vpop.f32.mrf.mxu0  ;;  %v3449_v62 = vpop.f32.mrf.mxu1 }
 0x3bf   : > { %7849 = vpow2.f32 %v3520_v33  ;;  %6976 = vst [vmem:[%s9673_s7 + $0x10] sm:$0xff] %v9704_v57  ;;  %v3504_v41 = vmul.f32 0.5, %v3448_v45  ;;  %6992 = vst [vmem:[%s9677_s10 + $0x10] sm:$0xff] %v3448_v45  ;;  %v1082_v62 = vld [vmem:[%s9724_s15 + $0x18] sm:$0xff] }
 0x3c0   : > { %v3243_v3 = vpop.f32.mrf.mxu0  ;;  %v3450_v10 = vpop.f32.mrf.mxu1 }
 0x3c1   : > { %v3522_v42 = vmul.f32 1.442695, %v3504_v41  ;;  %v9715_v6 = vadd.f32 %v9664_v4, %v3243_v3  ;;  %v3451_v36 = vadd.f32 %v9667_v61, %v3450_v10 }
 0x3c2   : > { %v3245_v48 = vpop.f32.mrf.mxu0  ;;  %v3452_v55 = vpop.f32.mrf.mxu1 }
 0x3c3   : > { %7851 = vpow2.f32 %v3522_v42  ;;  %6977 = vst [vmem:[%s9673_s7 + $0x18] sm:$0xff] %v9715_v6  ;;  %v3505_v7 = vmul.f32 0.5, %v3451_v36  ;;  %6993 = vst [vmem:[%s9677_s10 + $0x18] sm:$0xff] %v3451_v36 }
 0x3c4   : > { %v3248_v18 = vpop.f32.mrf.mxu0  ;;  %v3455_v53 = vpop.f32.mrf.mxu1 }
 0x3c5   : > { %v3524_v40 = vmul.f32 1.442695, %v3505_v7  ;;  %v9728_v20 = vadd.f32 %v9664_v4, %v3248_v18  ;;  %v3456_v11 = vadd.f32 %v9667_v61, %v3455_v53 }
 0x3c6   : > { %v3250_v37 = vpop.f32.mrf.mxu0  ;;  %v3457_v25 = vpop.f32.mrf.mxu1 }
 0x3c7   : > { %7853 = vpow2.f32 %v3524_v40  ;;  %6978 = vst [vmem:[%s9673_s7 + $0x20] sm:$0xff] %v9728_v20  ;;  %v3506_v47 = vmul.f32 0.5, %v3456_v11  ;;  %6994 = vst [vmem:[%s9677_s10 + $0x20] sm:$0xff] %v3456_v11  ;;  %v1083_v11 = vld [vmem:[%s9724_s15 + $0x20] sm:$0xff] }
 0x3c8   : > { %v7848_v35 = vpop.eup %7847  ;;  %v3251_v13 = vpop.f32.mrf.mxu0 }
 0x3c9   : > { %v3458_v8 = vpop.f32.mrf.mxu1  ;;  %v3526_v17 = vmul.f32 1.442695, %v3506_v47  ;;  %v9738_v24 = vadd.f32 %v9664_v4, %v3251_v13  ;;  %v3550_v43 = vmul.f32 %v7848_v35, %v1079_v60 }
 0x3ca   : > { %v3459_v19 = vadd.f32 %v9667_v61, %v3458_v8  ;;  %v3253_v59 = vpop.f32.mrf.mxu0 }
 0x3cb   : > { %v3460_v0 = vpop.f32.mrf.mxu1  ;;  %7855 = vpow2.f32 %v3526_v17  ;;  %6979 = vst [vmem:[%s9673_s7 + $0x28] sm:$0xff] %v9738_v24  ;;  %v3566_v49 = vadd.f32 %v3550_v43, %v9683_v32 }
 0x3cc   : > { %v3507_v28 = vmul.f32 0.5, %v3459_v19  ;;  %6995 = vst [vmem:[%s9677_s10 + $0x28] sm:$0xff] %v3459_v19  ;;  %v7850_v5 = vpop.eup %7849  ;;  %v3256_v14 = vpop.f32.mrf.mxu0  ;;  %v1084_v19 = vld [vmem:[%s9724_s15 + $0x28] sm:$0xff] }
 0x3cd   : > { %v3463_v29 = vpop.f32.mrf.mxu1  ;;  %v9752_v12 = vadd.f32 %v9664_v4, %v3256_v14  ;;  %v3551_v15 = vmul.f32 %v7850_v5, %v1080_v46  ;;  %6958 = vst [vmem:[%s9743_s16] sm:$0xff] %v3566_v49 }
 0x3ce   : > { %v3528_v21 = vmul.f32 1.442695, %v3507_v28  ;;  %v3464_v54 = vadd.f32 %v9667_v61, %v3463_v29  ;;  %v3258_v23 = vpop.f32.mrf.mxu0 }
 0x3cf   : > { %v3465_v32 = vpop.f32.mrf.mxu1  ;;  %6980 = vst [vmem:[%s9673_s7 + $0x30] sm:$0xff] %v9752_v12  ;;  %v3567_v44 = vadd.f32 %v3551_v15, %v9695_v38  ;;  %v1085_v15 = vld [vmem:[%s9724_s15 + $0x30] sm:$0xff] }
 0x3d0   : > { %7857 = vpow2.f32 %v3528_v21  ;;  %v3508_v26 = vmul.f32 0.5, %v3464_v54  ;;  %6996 = vst [vmem:[%s9677_s10 + $0x30] sm:$0xff] %v3464_v54  ;;  %v7852_v27 = vpop.eup %7851  ;;  %v3259_v34 = vpop.f32.mrf.mxu0 }
 0x3d1   : > { %v3466_v31 = vpop.f32.mrf.mxu1  ;;  %v9763_v51 = vadd.f32 %v9664_v4, %v3259_v34  ;;  %v3582_v33 = vpack.c.bf16 %v3567_v44, %v3566_v49  ;;  %6959 = vst [vmem:[%s9743_s16 + $0x8] sm:$0xff] %v3567_v44  ;;  %v3552_v38 = vmul.f32 %v7852_v27, %v1081_v50 }
 0x3d2   : > { %v3530_v30 = vmul.f32 1.442695, %v3508_v26  ;;  %v3467_v63 = vadd.f32 %v9667_v61, %v3466_v31  ;;  %v3261_v45 = vpop.f32.mrf.mxu0 }
 0x3d3   : > { %v3468_v58 = vpop.f32.mrf.mxu1  ;;  %6981 = vst [vmem:[%s9673_s7 + $0x38] sm:$0xff] %v9763_v51  ;;  %3837 = vmatmul.mubr.bf16.vlgmr.msra.gmra.mxu0 %v3582_v33  ;;  %3950 = vmatmul.mubr.bf16.vlgmr.msra.gmra.mxu1 %v3582_v33  ;;  %v3568_v56 = vadd.f32 %v3552_v38, %v9704_v57 }
 0x3d4   : > { %7859 = vpow2.f32 %v3530_v30  ;;  %v3509_v41 = vmul.f32 0.5, %v3467_v63  ;;  %6997 = vst [vmem:[%s9677_s10 + $0x38] sm:$0xff] %v3467_v63  ;;  %v7854_v3 = vpop.eup %7853  ;;  %v3264_v10 = vpop.f32.mrf.mxu0  ;;  %3846 = vmatprep.mubr.bf16.mxu0 %v12854_v52  ;;  %3959 = vmatprep.mubr.bf16.mxu1 %v12854_v52  ;;  %v1086_v30 = vld [vmem:[%s9724_s15 + $0x38] sm:$0xff] }
 0x3d5   : > { %v3471_v42 = vpop.f32.mrf.mxu1  ;;  %v9777_v48 = vadd.f32 %v9664_v4, %v3264_v10  ;;  %v3553_v7 = vmul.f32 %v7854_v3, %v1082_v62  ;;  %6960 = vst [vmem:[%s9743_s16 + $0x10] sm:$0xff] %v3568_v56 }
 0x3d6   : > { %v3532_v36 = vmul.f32 1.442695, %v3509_v41  ;;  %v3472_v55 = vadd.f32 %v9667_v61, %v3471_v42  ;;  %v3266_v18 = vpop.f32.mrf.mxu0 }
 0x3d7   : > { %v3473_v53 = vpop.f32.mrf.mxu1  ;;  %6982 = vst [vmem:[%s9673_s7 + $0x40] sm:$0xff] %v9777_v48  ;;  %v3569_v57 = vadd.f32 %v3553_v7, %v9715_v6 }
 0x3d8   : > { %7861 = vpow2.f32 %v3532_v36  ;;  %v3510_v40 = vmul.f32 0.5, %v3472_v55  ;;  %6998 = vst [vmem:[%s9677_s10 + $0x40] sm:$0xff] %v3472_v55  ;;  %v7856_v37 = vpop.eup %7855  ;;  %v3267_v25 = vpop.f32.mrf.mxu0  ;;  %v1087_v55 = vld [vmem:[%s9724_s15 + $0x40] sm:$0xff] }
 0x3d9   : > { %v3474_v60 = vpop.f32.mrf.mxu1  ;;  %v9789_v35 = vadd.f32 %v9664_v4, %v3267_v25  ;;  %v3583_v13 = vpack.c.bf16 %v3569_v57, %v3568_v56  ;;  %6961 = vst [vmem:[%s9743_s16 + $0x18] sm:$0xff] %v3569_v57  ;;  %v3554_v6 = vmul.f32 %v7856_v37, %v1083_v11 }
 0x3da   : > { %v3534_v47 = vmul.f32 1.442695, %v3510_v40  ;;  %v3475_v1 = vadd.f32 %v9667_v61, %v3474_v60  ;;  %v3269_v8 = vpop.f32.mrf.mxu0 }
 0x3db   : > { %v3476_v17 = vpop.f32.mrf.mxu1  ;;  %6983 = vst [vmem:[%s9673_s7 + $0x48] sm:$0xff] %v9789_v35  ;;  %3847 = vmatmul.mubr.bf16.gmra.mxu0 %v3583_v13  ;;  %3960 = vmatmul.mubr.bf16.gmra.mxu1 %v3583_v13  ;;  %v3570_v46 = vadd.f32 %v3554_v6, %v9728_v20 }
 0x3dc   : > { %7863 = vpow2.f32 %v3534_v47  ;;  %v3511_v39 = vmul.f32 0.5, %v3475_v1  ;;  %6999 = vst [vmem:[%s9677_s10 + $0x48] sm:$0xff] %v3475_v1  ;;  %v3272_v59 = vpop.f32.mrf.mxu0  ;;  %3856 = vmatprep.mubr.bf16.mxu0 %v12854_v52  ;;  %3969 = vmatprep.mubr.bf16.mxu1 %v12854_v52  ;;  %v1088_v47 = vld [vmem:[%s9724_s15 + $0x48] sm:$0xff] }
 0x3dd   : > { %v7858_v43 = vpop.eup %7857  ;;  %v3479_v0 = vpop.f32.mrf.mxu1  ;;  %v9801_v49 = vadd.f32 %v9664_v4, %v3272_v59  ;;  %6962 = vst [vmem:[%s9743_s16 + $0x20] sm:$0xff] %v3570_v46 }
 0x3de   : > { %v3536_v28 = vmul.f32 1.442695, %v3511_v39  ;;  %v3480_v5 = vadd.f32 %v9667_v61, %v3479_v0  ;;  %v3555_v14 = vmul.f32 %v7858_v43, %v1084_v19  ;;  %v3274_v29 = vpop.f32.mrf.mxu0 }
 0x3df   : > { %v3481_v21 = vpop.f32.mrf.mxu1  ;;  %6984 = vst [vmem:[%s9673_s7 + $0x50] sm:$0xff] %v9801_v49 }
 0x3e0   : > { %7865 = vpow2.f32 %v3536_v28  ;;  %v3512_v54 = vmul.f32 0.5, %v3480_v5  ;;  %7000 = vst [vmem:[%s9677_s10 + $0x50] sm:$0xff] %v3480_v5  ;;  %v3571_v20 = vadd.f32 %v3555_v14, %v9738_v24  ;;  %v3275_v32 = vpop.f32.mrf.mxu0 }
 0x3e1   : > { %v7860_v23 = vpop.eup %7859  ;;  %v3482_v26 = vpop.f32.mrf.mxu1  ;;  %v9812_v16 = vadd.f32 %v9664_v4, %v3275_v32 }
 0x3e2   : > { %v3538_v44 = vmul.f32 1.442695, %v3512_v54  ;;  %v3483_v50 = vadd.f32 %v9667_v61, %v3482_v26  ;;  %v3584_v27 = vpack.c.bf16 %v3571_v20, %v3570_v46  ;;  %6963 = vst [vmem:[%s9743_s16 + $0x28] sm:$0xff] %v3571_v20  ;;  %v3277_v34 = vpop.f32.mrf.mxu0  ;;  %v3556_v63 = vmul.f32 %v7860_v23, %v1085_v15  ;;  %v9858_v32 = vpop.permute.xlu1 %4044 }
 0x3e3   : > { %v3484_v31 = vpop.f32.mrf.mxu1  ;;  %6985 = vst [vmem:[%s9673_s7 + $0x58] sm:$0xff] %v9812_v16 }
 0x3e4   : > { %7867 = vpow2.f32 %v3538_v44  ;;  %v3513_v24 = vmul.f32 0.5, %v3483_v50  ;;  %7001 = vst [vmem:[%s9677_s10 + $0x58] sm:$0xff] %v3483_v50  ;;  %3857 = vmatmul.mubr.bf16.gmra.mxu0 %v3584_v27  ;;  %3970 = vmatmul.mubr.bf16.gmra.mxu1 %v3584_v27  ;;  %v3280_v45 = vpop.f32.mrf.mxu0  ;;  %v3572_v62 = vadd.f32 %v3556_v63, %v9752_v12 }
 0x3e5   : > { %v7862_v33 = vpop.eup %7861  ;;  %v3487_v58 = vpop.f32.mrf.mxu1  ;;  %3866 = vmatprep.mubr.bf16.mxu0 %v12854_v52  ;;  %3979 = vmatprep.mubr.bf16.mxu1 %v12854_v52  ;;  %v9824_v41 = vadd.f32 %v9664_v4, %v3280_v45 }
 0x3e6   : > { %v3540_v38 = vmul.f32 1.442695, %v3513_v24  ;;  %v3488_v3 = vadd.f32 %v9667_v61, %v3487_v58  ;;  %v3557_v10 = vmul.f32 %v7862_v33, %v1086_v30  ;;  %v3282_v42 = vpop.f32.mrf.mxu0  ;;  %6964 = vst [vmem:[%s9743_s16 + $0x30] sm:$0xff] %v3572_v62  ;;  %v1091_v30 = vld [vmem:[%s9724_s15 + $0x60] sm:$0xff]  ;;  %v9869_v33 = vpop.permute.xlu1 %4279 }
 0x3e7   : > { %v3489_v56 = vpop.f32.mrf.mxu1  ;;  %6986 = vst [vmem:[%s9673_s7 + $0x60] sm:$0xff] %v9824_v41 }
 0x3e8   : > { %7869 = vpow2.f32 %v3540_v38  ;;  %v3514_v36 = vmul.f32 0.5, %v3488_v3  ;;  %7002 = vst [vmem:[%s9677_s10 + $0x60] sm:$0xff] %v3488_v3  ;;  %v3573_v12 = vadd.f32 %v3557_v10, %v9763_v51  ;;  %v3283_v18 = vpop.f32.mrf.mxu0 }
 0x3e9   : > { %v7864_v7 = vpop.eup %7863  ;;  %v3490_v53 = vpop.f32.mrf.mxu1  ;;  %v9834_v57 = vadd.f32 %v9664_v4, %v3283_v18 }
 0x3ea   : > { %v3542_v40 = vmul.f32 1.442695, %v3514_v36  ;;  %v3491_v11 = vadd.f32 %v9667_v61, %v3490_v53  ;;  %v3585_v37 = vpack.c.bf16 %v3573_v12, %v3572_v62  ;;  %6965 = vst [vmem:[%s9743_s16 + $0x38] sm:$0xff] %v3573_v12  ;;  %v3285_v25 = vpop.f32.mrf.mxu0  ;;  %v3558_v1 = vmul.f32 %v7864_v7, %v1087_v55  ;;  %v1092_v62 = vld [vmem:[%s9724_s15 + $0x68] sm:$0xff]  ;;  %v9878_v10 = vpop.permute.xlu1 %4049  ;;  %v1094_v55 = vld [vmem:[%s9724_s15 + $0x78] sm:$0xff] }
 0x3eb   : > { %v3492_v60 = vpop.f32.mrf.mxu1  ;;  %6987 = vst [vmem:[%s9673_s7 + $0x68] sm:$0xff] %v9834_v57 }
 0x3ec   : > { %7871 = vpow2.f32 %v3542_v40  ;;  %v3515_v51 = vmul.f32 0.5, %v3491_v11  ;;  %7003 = vst [vmem:[%s9677_s10 + $0x68] sm:$0xff] %v3491_v11  ;;  %3867 = vmatmul.mubr.bf16.gmra.mxu0 %v3585_v37  ;;  %3980 = vmatmul.mubr.bf16.gmra.mxu1 %v3585_v37  ;;  %v3288_v8 = vpop.f32.mrf.mxu0  ;;  %v3574_v19 = vadd.f32 %v3558_v1, %v9777_v48  ;;  %v1089_v48 = vld [vmem:[%s9724_s15 + $0x50] sm:$0xff] }
 0x3ed   : > { %v7866_v13 = vpop.eup %7865  ;;  %v3495_v17 = vpop.f32.mrf.mxu1  ;;  %3876 = vmatprep.mubr.bf16.mxu0 %v12854_v52  ;;  %3989 = vmatprep.mubr.bf16.mxu1 %v12854_v52  ;;  %v9846_v39 = vadd.f32 %v9664_v4, %v3288_v8 }
 0x3ee   : > { %v3544_v6 = vmul.f32 1.442695, %v3515_v51  ;;  %v3496_v43 = vadd.f32 %v9667_v61, %v3495_v17  ;;  %v3559_v59 = vmul.f32 %v7866_v13, %v1088_v47  ;;  %v3290_v0 = vpop.f32.mrf.mxu0  ;;  %6966 = vst [vmem:[%s9743_s16 + $0x40] sm:$0xff] %v3574_v19  ;;  %v9886_v18 = vpop.permute.xlu1 %4287 }
 0x3ef   : > { %v3497_v46 = vpop.f32.mrf.mxu1  ;;  %6988 = vst [vmem:[%s9673_s7 + $0x70] sm:$0xff] %v9846_v39  ;;  %v9898_v47 = vpop.permute.xlu0 %4034 }
 0x3f0   : > { %7873 = vpow2.f32 %v3544_v6  ;;  %v3516_v28 = vmul.f32 0.5, %v3496_v43  ;;  %7004 = vst [vmem:[%s9677_s10 + $0x70] sm:$0xff] %v3496_v43  ;;  %v3575_v5 = vadd.f32 %v3559_v59, %v9789_v35  ;;  %v3291_v29 = vpop.f32.mrf.mxu0  ;;  %v1090_v35 = vld [vmem:[%s9724_s15 + $0x58] sm:$0xff] }
 0x3f1   : > { %v7868_v14 = vpop.eup %7867  ;;  %v3498_v21 = vpop.f32.mrf.mxu1  ;;  %v3292_v20 = vadd.f32 %v9664_v4, %v3291_v29 }
 0x3f2   : > { %v3546_v54 = vmul.f32 1.442695, %v3516_v28  ;;  %v3499_v15 = vadd.f32 %v9667_v61, %v3498_v21  ;;  %v3586_v23 = vpack.c.bf16 %v3575_v5, %v3574_v19  ;;  %6967 = vst [vmem:[%s9743_s16 + $0x48] sm:$0xff] %v3575_v5  ;;  %v3293_v26 = vpop.f32.mrf.mxu0  ;;  %v3560_v50 = vmul.f32 %v7868_v14, %v1089_v48  ;;  %v9890_v11 = vpop.permute.xlu1 %4511 }
 0x3f3   : > { %v3500_v44 = vpop.f32.mrf.mxu1  ;;  %6989 = vst [vmem:[%s9673_s7 + $0x78] sm:$0xff] %v3292_v20  ;;  %v9902_v51 = vpop.permute.xlu0 %4039  ;;  %s13273_s7 = sld [smem:[#allocation9_spill]] }
 0x3f4   : > { %7875 = vpow2.f32 %v3546_v54  ;;  %v3517_v27 = vmul.f32 0.5, %v3499_v15  ;;  %7005 = vst [vmem:[%s9677_s10 + $0x78] sm:$0xff] %v3499_v15  ;;  %3877 = vmatmul.mubr.bf16.gmra.mxu0 %v3586_v23  ;;  %3990 = vmatmul.mubr.bf16.gmra.mxu1 %v3586_v23  ;;  %v3576_v61 = vadd.f32 %v3560_v50, %v9801_v49  ;;  %v9943_v44 = vld [vmem:[%s12860_s18] sm:$0x77]  ;;  %s13277_s10 = sld [smem:[#allocation10_spill]] }
 0x3f5   : > { %v7870_v4 = vpop.eup %7869  ;;  %3886 = vmatprep.mubr.bf16.mxu0 %v12854_v52  ;;  %3999 = vmatprep.mubr.bf16.mxu1 %v12854_v52  ;;  %v4345_v50 = vrot.slane %v9943_v44, %v12855_v2 }
 0x3f6   : > { %v3548_v34 = vmul.f32 1.442695, %v3517_v27  ;;  %v3561_v31 = vmul.f32 %v7870_v4, %v1090_v35  ;;  %6968 = vst [vmem:[%s9743_s16 + $0x50] sm:$0xff] %v3576_v61  ;;  %v9892_v37 = vpop.permute.xlu1 %4054  ;;  %v9946_v35 = vld [vmem:[%s12860_s18 + $0x8] sm:$0x77] }
 0x3f7   : > { %v9906_v8 = vpop.permute.xlu0 %4064  ;;  %v4353_v4 = vrot.slane %v9946_v35, %v12855_v2 }
 0x3f8   : > { %7877 = vpow2.f32 %v3548_v34  ;;  %v3577_v63 = vadd.f32 %v3561_v31, %v9812_v16  ;;  %v1093_v16 = vld [vmem:[%s9724_s15 + $0x70] sm:$0xff]  ;;  %s13280_s15 = sld [smem:[#allocation13_spill]] }
 0x3f9   : > { %v7872_v24 = vpop.eup %7871  ;;  %v12863_v31 = vld [vmem:[#allocation18_spill] sm:$0xff] }
 0x3fa   : > { %v3587_v45 = vpack.c.bf16 %v3577_v63, %v3576_v61  ;;  %6969 = vst [vmem:[%s9743_s16 + $0x58] sm:$0xff] %v3577_v63  ;;  %v3562_v58 = vmul.f32 %v7872_v24, %v1091_v30  ;;  %v9894_v25 = vpop.permute.xlu1 %4515  ;;  %v4573_v30 = vrot.slane %v9943_v44, %v12863_v31  ;;  %v4581_v24 = vrot.slane %v9946_v35, %v12863_v31 }
 0x3fb   : > { %v9910_v19 = vpop.permute.xlu0 %4069 }
 0x3fc   : > { %3887 = vmatmul.mubr.bf16.gmra.mxu0 %v3587_v45  ;;  %4000 = vmatmul.mubr.bf16.gmra.mxu1 %v3587_v45  ;;  %v3578_v49 = vadd.f32 %v3562_v58, %v9824_v41  ;;  %v9963_v58 = vrot.slane %v4345_v50, %v12855_v2 }
 0x3fd   : > { %v7874_v38 = vpop.eup %7873  ;;  %3896 = vmatprep.mubr.bf16.mxu0 %v12854_v52  ;;  %4009 = vmatprep.mubr.bf16.mxu1 %v12854_v52 }
 0x3fe   : > { %v3563_v3 = vmul.f32 %v7874_v38, %v1092_v62  ;;  %6970 = vst [vmem:[%s9743_s16 + $0x60] sm:$0xff] %v3578_v49  ;;  %v9896_v60 = vpop.permute.xlu1 %4059 }
 0x400   : > { %v3579_v42 = vadd.f32 %v3563_v3, %v9834_v57 }
 0x401   : > { %v7876_v56 = vpop.eup %7875 }
 0x402   : > { %v3588_v36 = vpack.c.bf16 %v3579_v42, %v3578_v49  ;;  %6971 = vst [vmem:[%s9743_s16 + $0x68] sm:$0xff] %v3579_v42  ;;  %v3564_v12 = vmul.f32 %v7876_v56, %v1093_v16  ;;  %v9900_v1 = vpop.permute.xlu1 %4519  ;;  %v9969_v49 = vrot.slane %v4353_v4, %v12855_v2  ;;  %v9977_v16 = vld [vmem:[%s12862_s23] sm:$0xf]  ;;  %v9980_v42 = vrot.slane %v4573_v30, %v12863_v31  ;;  %s13282_s23 = sld [smem:[#allocation15_spill]] }
 0x404   : > { %3897 = vmatmul.mubr.bf16.gmra.mxu0 %v3588_v36  ;;  %4010 = vmatmul.mubr.bf16.gmra.mxu1 %v3588_v36  ;;  %v3580_v41 = vadd.f32 %v3564_v12, %v9846_v39  ;;  %v9914_v39 = vpop.permute.xlu0 %4089  ;;  %v9986_v36 = vrot.slane %v4581_v24, %v12863_v31  ;;  %v10023_v50 = vmul.f32 %v9969_v49, %v9886_v18 }
 0x405   : > { %v7878_v7 = vpop.eup %7877  ;;  %3906 = vmatprep.mubr.bf16.mxu0 %v12854_v52  ;;  %4019 = vmatprep.mubr.bf16.mxu1 %v12854_v52 }
 0x406   : > { %v3565_v53 = vmul.f32 %v7878_v7, %v1094_v55  ;;  %6972 = vst [vmem:[%s9743_s16 + $0x70] sm:$0xff] %v3580_v41  ;;  %v9904_v13 = vpop.permute.xlu1 %4299  ;;  %12866 = vst [vmem:[#allocation21_spill] sm:$0xff] %v10023_v50 }
 0x408   : > { %v3581_v40 = vadd.f32 %v3565_v53, %v3292_v20  ;;  %v9918_v59 = vpop.permute.xlu0 %4094  ;;  %v12861_v20 = vld [vmem:[#allocation16_spill] sm:$0xff]  ;;  %v10003_v53 = vmul.f32 %v9969_v49, %v9869_v33 }
 0x409   : > { %v4348_v15 = vsub.s32 5, %v12861_v20  ;;  %v4576_v23 = vsub.s32 6, %v12861_v20 }
 0x40a   : > { %v3589_v57 = vpack.c.bf16 %v3581_v40, %v3580_v41  ;;  %6973 = vst [vmem:[%s9743_s16 + $0x78] sm:$0xff] %v3581_v40  ;;  %v9908_v17 = vpop.permute.xlu1 %4523  ;;  %v9995_v41 = vmul.f32 %v9963_v58, %v9869_v33  ;;  %v10007_v40 = vrot.slane %v9977_v16, %v12856_v9  ;;  %s13281_s16 = sld [smem:[#allocation14_spill]] }
 0x40b   : > { %v4349_v27 = vrot.slane %v9943_v44, %v4348_v15  ;;  %v4357_v34 = vrot.slane %v9946_v35, %v4348_v15  ;;  %v4577_v63 = vrot.slane %v9943_v44, %v4576_v23  ;;  %v4585_v45 = vrot.slane %v9946_v35, %v4576_v23 }
 0x40c   : > { %3907 = vmatmul.mubr.bf16.gmra.mxu0 %v3589_v57  ;;  %4020 = vmatmul.mubr.bf16.gmra.mxu1 %v3589_v57  ;;  %v9922_v46 = vpop.permute.xlu0 %4507  ;;  %v10015_v15 = vmul.f32 %v9963_v58, %v9886_v18 }
 0x40d   : > { %v9966_v62 = vrot.slane %v4349_v27, %v12855_v2  ;;  %v9974_v3 = vrot.slane %v4357_v34, %v12855_v2  ;;  %v9983_v56 = vrot.slane %v4577_v63, %v12863_v31  ;;  %v9991_v55 = vrot.slane %v4585_v45, %v12863_v31 }
 0x40e   : > { %v9912_v6 = vpop.permute.xlu1 %4303  ;;  %12864 = vst [vmem:[#allocation24_spill] sm:$0xff] %v10015_v15  ;;  %v10039_v34 = vmul.f32 %v9986_v36, %v9890_v11  ;;  %v10057_v45 = vmul.f32 %v9986_v36, %v9894_v25 }
 0x40f   : > { %v9999_v7 = vmul.f32 %v9966_v62, %v9869_v33  ;;  %v10011_v57 = vmul.f32 %v9974_v3, %v9869_v33  ;;  %v10019_v23 = vmul.f32 %v9966_v62, %v9886_v18  ;;  %v10027_v27 = vmul.f32 %v9974_v3, %v9886_v18 }
 0x410   : > { %v9926_v5 = vpop.permute.xlu0 %4527  ;;  %v10031_v33 = vmul.f32 %v9980_v42, %v9890_v11  ;;  %v10035_v4 = vmul.f32 %v9983_v56, %v9890_v11  ;;  %v10045_v63 = vmul.f32 %v9991_v55, %v9890_v11  ;;  %v10049_v18 = vmul.f32 %v9980_v42, %v9894_v25  ;;  %12872 = vst [vmem:[#allocation32_spill] sm:$0xff] %v10057_v45 }
 0x411   : > { %12865 = vst [vmem:[#allocation28_spill] sm:$0xff] %v10019_v23  ;;  %12867 = vst [vmem:[#allocation25_spill] sm:$0xff] %v10027_v27  ;;  %v10053_v24 = vmul.f32 %v9983_v56, %v9894_v25  ;;  %v10061_v22 = vmul.f32 %v9991_v55, %v9894_v25  ;;  %v10065_v11 = vmul.f32 %v9980_v42, %v9900_v1  ;;  %v4120_v27 = vsub.s32 4, %v12861_v20 }
 0x412   : > { %v9916_v43 = vpop.permute.xlu1 %4074  ;;  %12868 = vst [vmem:[#allocation22_spill] sm:$0xff] %v10035_v4  ;;  %12869 = vst [vmem:[#allocation26_spill] sm:$0xff] %v10045_v63  ;;  %v10069_v52 = vmul.f32 %v9983_v56, %v9900_v1  ;;  %v10080_v25 = vmul.f32 %v9991_v55, %v9900_v1  ;;  %v10092_v20 = vmul.f32 %v9969_v49, %v9904_v13 }
 0x413   : > { %12870 = vst [vmem:[#allocation31_spill] sm:$0xff] %v10049_v18  ;;  %12871 = vst [vmem:[#allocation35_spill] sm:$0xff] %v10053_v24  ;;  %v10076_v24 = vmul.f32 %v9986_v36, %v9900_v1  ;;  %v10100_v1 = vmul.f32 %v9980_v42, %v9908_v17  ;;  %v10140_v45 = vmul.f32 %v9986_v36, %v9922_v46 }
 0x414   : > { %v9930_v14 = vpop.permute.xlu0 %4531  ;;  %12873 = vst [vmem:[#allocation36_spill] sm:$0xff] %v10061_v22  ;;  %12874 = vst [vmem:[#allocation29_spill] sm:$0xff] %v10065_v11  ;;  %v10084_v22 = vmul.f32 %v9963_v58, %v9904_v13  ;;  %v10088_v11 = vmul.f32 %v9966_v62, %v9904_v13  ;;  %v10144_v18 = vmul.f32 %v9991_v55, %v9922_v46 }
 0x415   : > { %12875 = vst [vmem:[#allocation33_spill] sm:$0xff] %v10069_v52  ;;  %12876 = vst [vmem:[#allocation30_spill] sm:$0xff] %v10076_v24  ;;  %v10096_v52 = vmul.f32 %v9974_v3, %v9904_v13  ;;  %v10116_v13 = vmul.f32 %v9980_v42, %v9922_v46  ;;  %v10136_v24 = vmul.f32 %v9966_v62, %v9912_v6 }
 0x416   : > { %v9920_v0 = vpop.permute.xlu1 %4307  ;;  %12877 = vst [vmem:[#allocation34_spill] sm:$0xff] %v10080_v25  ;;  %12878 = vst [vmem:[#allocation39_spill] sm:$0xff] %v10084_v22  ;;  %v10104_v25 = vmul.f32 %v9983_v56, %v9908_v17  ;;  %v10108_v22 = vmul.f32 %v9986_v36, %v9908_v17 }
 0x417   : > { %12879 = vst [vmem:[#allocation40_spill] sm:$0xff] %v10088_v11  ;;  %12880 = vst [vmem:[#allocation43_spill] sm:$0xff] %v10092_v20  ;;  %v10112_v11 = vmul.f32 %v9991_v55, %v9908_v17  ;;  %v10122_v20 = vmul.f32 %v9983_v56, %v9922_v46  ;;  %v10166_v46 = vmul.f32 %v9986_v36, %v9926_v5 }
 0x418   : > { %v9934_v21 = vpop.permute.xlu0 %4547  ;;  %12881 = vst [vmem:[#allocation37_spill] sm:$0xff] %v10096_v52  ;;  %12882 = vst [vmem:[#allocation60_spill] sm:$0xff] %v10100_v1  ;;  %v4117_v52 = vrot.slane %v9943_v44, %v12856_v9  ;;  %v4129_v1 = vrot.slane %v9946_v35, %v4120_v27 }
 0x419   : > { %12883 = vst [vmem:[#allocation41_spill] sm:$0xff] %v10104_v25  ;;  %12884 = vst [vmem:[#allocation38_spill] sm:$0xff] %v10108_v22  ;;  %v4125_v25 = vrot.slane %v9946_v35, %v12856_v9  ;;  %v4121_v22 = vrot.slane %v9943_v44, %v4120_v27  ;;  %v10148_v44 = vmul.f32 %v9969_v49, %v9912_v6 }
 0x41a   : > { %v9924_v28 = vpop.permute.xlu1 %4079  ;;  %12885 = vst [vmem:[#allocation61_spill] sm:$0xff] %v10112_v11  ;;  %v10132_v11 = vmul.f32 %v9963_v58, %v9912_v6  ;;  %12887 = vst [vmem:[#allocation46_spill] sm:$0xff] %v10136_v24  ;;  %v10152_v35 = vmul.f32 %v9974_v3, %v9912_v6  ;;  %v10156_v27 = vmul.f32 %v9980_v42, %v9926_v5 }
 0x41b   : > { %12888 = vst [vmem:[#allocation50_spill] sm:$0xff] %v10148_v44  ;;  %v10160_v24 = vmul.f32 %v9983_v56, %v9926_v5  ;;  %12892 = vst [vmem:[#allocation48_spill] sm:$0xff] %v10166_v46  ;;  %v10170_v44 = vmul.f32 %v9991_v55, %v9926_v5  ;;  %v10174_v6 = vmul.f32 %v9980_v42, %v9930_v14 }
 0x41c   : > { %v9940_v26 = vpop.permute.xlu0 %4551  ;;  %12886 = vst [vmem:[#allocation42_spill] sm:$0xff] %v10132_v11  ;;  %12889 = vst [vmem:[#allocation47_spill] sm:$0xff] %v10152_v35  ;;  %v10177_v35 = vrot.slane %v4117_v52, %v12856_v9  ;;  %v10187_v46 = vrot.slane %v4121_v22, %v12856_v9  ;;  %v10190_v5 = vrot.slane %v4129_v1, %v12856_v9 }
 0x41d   : > { %12890 = vst [vmem:[#allocation51_spill] sm:$0xff] %v10156_v27  ;;  %12891 = vst [vmem:[#allocation44_spill] sm:$0xff] %v10160_v24  ;;  %v10181_v24 = vmul.f32 %v9983_v56, %v9930_v14  ;;  %v10184_v27 = vrot.slane %v4125_v25, %v12856_v9  ;;  %v10198_v52 = vmul.f32 %v9991_v55, %v9930_v14 }
 0x41e   : > { %v9928_v48 = vpop.permute.xlu1 %4535  ;;  %12893 = vst [vmem:[#allocation45_spill] sm:$0xff] %v10170_v44  ;;  %12894 = vst [vmem:[#allocation49_spill] sm:$0xff] %v10174_v6  ;;  %v10194_v44 = vmul.f32 %v9986_v36, %v9930_v14  ;;  %v10206_v25 = vmul.f32 %v9966_v62, %v9920_v0  ;;  %v10210_v22 = vmul.f32 %v9969_v49, %v9920_v0 }
 0x41f   : > { %12895 = vst [vmem:[#allocation54_spill] sm:$0xff] %v10181_v24  ;;  %12897 = vst [vmem:[#allocation55_spill] sm:$0xff] %v10198_v52  ;;  %v10202_v24 = vmul.f32 %v9963_v58, %v9920_v0  ;;  %v10214_v1 = vmul.f32 %v9974_v3, %v9920_v0  ;;  %v10218_v14 = vmul.f32 %v9980_v42, %v9934_v21 }
 0x420   : > { %v9971_v38 = vpop.permute.xlu0 %4283  ;;  %12896 = vst [vmem:[#allocation58_spill] sm:$0xff] %v10194_v44  ;;  %12899 = vst [vmem:[#allocation27_spill] sm:$0xff] %v10206_v25  ;;  %v10222_v9 = vmul.f32 %v9983_v56, %v9934_v21  ;;  %v10226_v25 = vmul.f32 %v9986_v36, %v9934_v21  ;;  %v10234_v0 = vmul.f32 %v10177_v35, %v9898_v47 }
 0x421   : > { %12898 = vst [vmem:[#allocation23_spill] sm:$0xff] %v10202_v24  ;;  %12900 = vst [vmem:[#allocation52_spill] sm:$0xff] %v10210_v22  ;;  %v10230_v22 = vmul.f32 %v9991_v55, %v9934_v21  ;;  %v10250_v21 = vmul.f32 %v10187_v46, %v9858_v32  ;;  %v10260_v24 = vmul.f32 %v10184_v27, %v9898_v47 }
 0x422   : > { %v9932_v29 = vpop.permute.xlu1 %4084  ;;  %12901 = vst [vmem:[#allocation56_spill] sm:$0xff] %v10214_v1  ;;  %12902 = vst [vmem:[#allocation53_spill] sm:$0xff] %v10218_v14  ;;  %v10238_v14 = vmul.f32 %v10177_v35, %v9858_v32  ;;  %v10246_v1 = vmul.f32 %v10184_v27, %v9858_v32  ;;  %v10268_v44 = vrot.slane %v9977_v16, %v12855_v2 }
 0x423   : > { %12903 = vst [vmem:[#allocation57_spill] sm:$0xff] %v10222_v9  ;;  %12904 = vst [vmem:[#allocation16_spill] sm:$0xff] %v10226_v25  ;;  %v10242_v9 = vrot.slane %v9977_v16, %v12863_v31  ;;  %v10264_v31 = vmul.f32 %v9980_v42, %v9940_v26  ;;  %v10272_v6 = vmul.f32 %v10187_v46, %v9898_v47 }
 0x424   : > { %v10041_v30 = vpop.permute.xlu0 %4291  ;;  %12905 = vst [vmem:[#allocation62_spill] sm:$0xff] %v10230_v22  ;;  %12906 = vst [vmem:[#allocation63_spill] sm:$0xff] %v10238_v14  ;;  %v10254_v22 = vmul.f32 %v10190_v5, %v9858_v32  ;;  %v10276_v32 = vmul.f32 %v9983_v56, %v9940_v26  ;;  %v10292_v50 = vmul.f32 %v10190_v5, %v9898_v47 }
 0x425   : > { %12907 = vst [vmem:[#allocation64_spill] sm:$0xff] %v10246_v1  ;;  %12908 = vst [vmem:[#allocation65_spill] sm:$0xff] %v10250_v21  ;;  %v10284_v21 = vmul.f32 %v9991_v55, %v9940_v26  ;;  %v10296_v1 = vmul.f32 %v10177_v35, %v9878_v10  ;;  %v10312_v47 = vmul.f32 %v10184_v27, %v9902_v51 }
 0x426   : > { %v9936_v54 = vpop.permute.xlu1 %4539  ;;  %12909 = vst [vmem:[#allocation66_spill] sm:$0xff] %v10254_v22  ;;  %12910 = vst [vmem:[#allocation67_spill] sm:$0xff] %v10264_v31  ;;  %v10280_v22 = vmul.f32 %v9986_v36, %v9940_v26  ;;  %v12914_v31 = vld [vmem:[#allocation20_spill] sm:$0xff]  ;;  %v10304_v26 = vmul.f32 %v10187_v46, %v9878_v10  ;;  %v10362_v15 = vmul.f32 %v9963_v58, %v10041_v30 }
 0x427   : > { %12911 = vst [vmem:[#allocation68_spill] sm:$0xff] %v10276_v32  ;;  %12913 = vst [vmem:[#allocation70_spill] sm:$0xff] %v10284_v21  ;;  %v10288_v2 = vrot.slane %v9977_v16, %v12914_v31  ;;  %v10300_v32 = vmul.f32 %v10184_v27, %v9878_v10  ;;  %v10308_v16 = vmul.f32 %v10177_v35, %v9902_v51 }
 0x428   : > { %v10128_v17 = vpop.permute.xlu0 %4295  ;;  %12912 = vst [vmem:[#allocation69_spill] sm:$0xff] %v10280_v22  ;;  %12915 = vst [vmem:[#allocation71_spill] sm:$0xff] %v10296_v1  ;;  %v10316_v31 = vmul.f32 %v9980_v42, %v9928_v48  ;;  %v10320_v21 = vmul.f32 %v10190_v5, %v9878_v10  ;;  %v10332_v1 = vmul.f32 %v9991_v55, %v9928_v48 }
 0x429   : > { %12916 = vst [vmem:[#allocation72_spill] sm:$0xff] %v10300_v32  ;;  %12917 = vst [vmem:[#allocation73_spill] sm:$0xff] %v10304_v26  ;;  %v10324_v26 = vmul.f32 %v9983_v56, %v9928_v48  ;;  %v10328_v32 = vmul.f32 %v9986_v36, %v9928_v48  ;;  %v10340_v10 = vmul.f32 %v9966_v62, %v9971_v38 }
 0x42a   : > { %v9953_v61 = vpop.permute.xlu1 %4319  ;;  %12918 = vst [vmem:[#allocation74_spill] sm:$0xff] %v10316_v31  ;;  %12919 = vst [vmem:[#allocation75_spill] sm:$0xff] %v10320_v21  ;;  %v10336_v31 = vmul.f32 %v9963_v58, %v9971_v38  ;;  %v10344_v21 = vmul.f32 %v9969_v49, %v9971_v38  ;;  %v10352_v48 = vmul.f32 %v10187_v46, %v9902_v51 }
 0x42b   : > { %12920 = vst [vmem:[#allocation76_spill] sm:$0xff] %v10324_v26  ;;  %12921 = vst [vmem:[#allocation77_spill] sm:$0xff] %v10328_v32  ;;  %v10348_v26 = vmul.f32 %v9974_v3, %v9971_v38  ;;  %v10366_v4 = vmul.f32 %v9966_v62, %v10041_v30  ;;  %v10370_v38 = vmul.f32 %v9969_v49, %v10041_v30 }
 0x42c   : > { %v4312_v52 = vpop.permute.xlu0 %4311  ;;  %12922 = vst [vmem:[#allocation78_spill] sm:$0xff] %v10332_v1  ;;  %v10358_v1 = vmul.f32 %v10190_v5, %v9902_v51  ;;  %12923 = vst [vmem:[#allocation79_spill] sm:$0xff] %v10362_v15  ;;  %v10374_v63 = vmul.f32 %v9974_v3, %v10041_v30  ;;  %v10378_v51 = vmul.f32 %v10177_v35, %v9892_v37 }
 0x42d   : > { %12924 = vst [vmem:[#allocation80_spill] sm:$0xff] %v10366_v4  ;;  %v10382_v14 = vmul.f32 %v10184_v27, %v9892_v37  ;;  %v10386_v15 = vmul.f32 %v10187_v46, %v9892_v37  ;;  %v10390_v4 = vmul.f32 %v9963_v58, %v10128_v17  ;;  %v10394_v30 = vmul.f32 %v9966_v62, %v10128_v17 }
 0x42e   : > { %v9988_v12 = vpop.permute.xlu1 %4543  ;;  %12925 = vst [vmem:[#allocation81_spill] sm:$0xff] %v10374_v63  ;;  %12926 = vst [vmem:[#allocation82_spill] sm:$0xff] %v10378_v51  ;;  %v10398_v63 = vmul.f32 %v9969_v49, %v10128_v17  ;;  %v10402_v51 = vmul.f32 %v10190_v5, %v9892_v37  ;;  %v10422_v37 = vmul.f32 %v9980_v42, %v9936_v54 }
 0x42f   : > { %12927 = vst [vmem:[#allocation83_spill] sm:$0xff] %v10382_v14  ;;  %12928 = vst [vmem:[#allocation84_spill] sm:$0xff] %v10386_v15  ;;  %v10406_v14 = vmul.f32 %v9974_v3, %v10128_v17  ;;  %v10410_v15 = vmul.f32 %v10177_v35, %v9896_v60  ;;  %v10426_v17 = vmul.f32 %v9983_v56, %v9936_v54 }
 0x430   : > { %v4316_v22 = vpop.permute.xlu0 %4315  ;;  %12929 = vst [vmem:[#allocation85_spill] sm:$0xff] %v10390_v4  ;;  %12930 = vst [vmem:[#allocation86_spill] sm:$0xff] %v10394_v30  ;;  %v10414_v4 = vmul.f32 %v10184_v27, %v9896_v60  ;;  %v10418_v30 = vmul.f32 %v10187_v46, %v9896_v60 }
 0x431   : > { %12931 = vst [vmem:[#allocation87_spill] sm:$0xff] %v10398_v63  ;;  %12932 = vst [vmem:[#allocation88_spill] sm:$0xff] %v10402_v51 }
 0x432   : > { %v10072_v23 = vpop.permute.xlu1 %4323  ;;  %12933 = vst [vmem:[#allocation89_spill] sm:$0xff] %v10406_v14  ;;  %12934 = vst [vmem:[#allocation90_spill] sm:$0xff] %v10410_v15  ;;  %v10430_v14 = vmul.f32 %v9986_v36, %v9936_v54  ;;  %v10441_v15 = vmul.f32 %v9963_v58, %v4312_v52 }
 0x433   : > { %12935 = vst [vmem:[#allocation91_spill] sm:$0xff] %v10414_v4  ;;  %12936 = vst [vmem:[#allocation92_spill] sm:$0xff] %v10418_v30  ;;  %v10434_v4 = vmul.f32 %v10190_v5, %v9896_v60  ;;  %v10438_v30 = vmul.f32 %v9991_v55, %v9936_v54  ;;  %v10456_v60 = vmul.f32 %v9963_v58, %v9953_v61 }
 0x434   : > { %v4332_v63 = vpop.permute.xlu0 %4331  ;;  %12937 = vst [vmem:[#allocation93_spill] sm:$0xff] %v10422_v37  ;;  %12938 = vst [vmem:[#allocation94_spill] sm:$0xff] %v10426_v17  ;;  %v10444_v37 = vmul.f32 %v9966_v62, %v4312_v52  ;;  %v10447_v17 = vmul.f32 %v9969_v49, %v4312_v52  ;;  %v10460_v54 = vmul.f32 %v9966_v62, %v9953_v61 }
 0x435   : > { %12939 = vst [vmem:[#allocation95_spill] sm:$0xff] %v10430_v14  ;;  %12940 = vst [vmem:[#allocation96_spill] sm:$0xff] %v10438_v30  ;;  %v10452_v14 = vmul.f32 %v9974_v3, %v4312_v52  ;;  %v10464_v30 = vmul.f32 %v9969_v49, %v9953_v61  ;;  %v10474_v52 = vmul.f32 %v9966_v62, %v4316_v22 }
 0x436   : > { %v10162_v11 = vpop.permute.xlu1 %4099  ;;  %12941 = vst [vmem:[#allocation97_spill] sm:$0xff] %v10441_v15  ;;  %12942 = vst [vmem:[#allocation98_spill] sm:$0xff] %v10444_v37  ;;  %v10468_v37 = vmul.f32 %v9974_v3, %v9953_v61  ;;  %v10488_v61 = vmul.f32 %v10184_v27, %v9906_v8  ;;  %v10514_v15 = vmul.f32 %v9966_v62, %v4332_v63 }
 0x437   : > { %12943 = vst [vmem:[#allocation99_spill] sm:$0xff] %v10447_v17  ;;  %12944 = vst [vmem:[#allocation100_spill] sm:$0xff] %v10452_v14  ;;  %v10471_v17 = vmul.f32 %v9963_v58, %v4316_v22  ;;  %v10480_v14 = vmul.f32 %v9974_v3, %v4316_v22 }
 0x438   : > { %12945 = vst [vmem:[#allocation101_spill] sm:$0xff] %v10456_v60  ;;  %12946 = vst [vmem:[#allocation102_spill] sm:$0xff] %v10460_v54  ;;  %v10477_v60 = vmul.f32 %v9969_v49, %v4316_v22  ;;  %v10484_v54 = vmul.f32 %v10177_v35, %v9906_v8  ;;  %v10500_v22 = vmul.f32 %v9983_v56, %v9988_v12 }
 0x439   : > { %12947 = vst [vmem:[#allocation103_spill] sm:$0xff] %v10464_v30  ;;  %12948 = vst [vmem:[#allocation104_spill] sm:$0xff] %v10468_v37  ;;  %v10492_v37 = vmul.f32 %v10187_v46, %v9906_v8  ;;  %v10496_v30 = vmul.f32 %v9980_v42, %v9988_v12 }
 0x43a   : > { %v10256_v25 = vpop.permute.xlu1 %4327  ;;  %12949 = vst [vmem:[#allocation105_spill] sm:$0xff] %v10471_v17  ;;  %12950 = vst [vmem:[#allocation106_spill] sm:$0xff] %v10474_v52  ;;  %v10508_v52 = vmul.f32 %v9991_v55, %v9988_v12  ;;  %v10511_v17 = vmul.f32 %v9963_v58, %v4332_v63 }
 0x43b   : > { %12951 = vst [vmem:[#allocation107_spill] sm:$0xff] %v10477_v60  ;;  %12952 = vst [vmem:[#allocation108_spill] sm:$0xff] %v10480_v14  ;;  %v10504_v14 = vmul.f32 %v9986_v36, %v9988_v12  ;;  %v4336_v60 = vpop.permute.xlu0 %4335  ;;  %v10528_v12 = vmul.f32 %v10177_v35, %v9910_v19 }
 0x43c   : > { %12953 = vst [vmem:[#allocation109_spill] sm:$0xff] %v10496_v30  ;;  %12954 = vst [vmem:[#allocation110_spill] sm:$0xff] %v10500_v22  ;;  %v10517_v30 = vmul.f32 %v9969_v49, %v4332_v63  ;;  %v10520_v22 = vmul.f32 %v9974_v3, %v4332_v63  ;;  %v10542_v63 = vmul.f32 %v10190_v5, %v9910_v19 }
 0x43d   : > { %12955 = vst [vmem:[#allocation111_spill] sm:$0xff] %v10504_v14  ;;  %12956 = vst [vmem:[#allocation112_spill] sm:$0xff] %v10508_v52  ;;  %v10524_v14 = vmul.f32 %v10190_v5, %v9906_v8  ;;  %v10546_v8 = vmul.f32 %v10177_v35, %v9914_v39  ;;  %v10554_v52 = vmul.f32 %v10187_v46, %v9914_v39 }
 0x43e   : > { %v10354_v32 = vpop.permute.xlu1 %4104  ;;  %12957 = vst [vmem:[#allocation113_spill] sm:$0xff] %v10511_v17  ;;  %12958 = vst [vmem:[#allocation114_spill] sm:$0xff] %v10514_v15  ;;  %v10532_v17 = vmul.f32 %v10184_v27, %v9910_v19  ;;  %v10536_v15 = vmul.f32 %v10187_v46, %v9910_v19  ;;  %v10562_v19 = vmul.f32 %v10184_v27, %v9916_v43 }
 0x43f   : > { %12959 = vst [vmem:[#allocation115_spill] sm:$0xff] %v10517_v30  ;;  %12960 = vst [vmem:[#allocation116_spill] sm:$0xff] %v10520_v22  ;;  %v10550_v22 = vmul.f32 %v10184_v27, %v9914_v39 }
 0x440   : > { %12961 = vst [vmem:[#allocation117_spill] sm:$0xff] %v10536_v15  ;;  %12962 = vst [vmem:[#allocation118_spill] sm:$0xff] %v10542_v63  ;;  %v10558_v15 = vmul.f32 %v10177_v35, %v9916_v43  ;;  %v10566_v63 = vmul.f32 %v10187_v46, %v9916_v43 }
 0x441   : > { %12963 = vst [vmem:[#allocation119_spill] sm:$0xff] %v10546_v8  ;;  %12964 = vst [vmem:[#allocation120_spill] sm:$0xff] %v10550_v22  ;;  %v10570_v8 = vmul.f32 %v10190_v5, %v9916_v43  ;;  %v10574_v22 = vmul.f32 %v10190_v5, %v9914_v39  ;;  %v10592_v43 = vmul.f32 %v9966_v62, %v4336_v60 }
 0x442   : > { %v10449_v51 = vpop.permute.xlu1 %4555  ;;  %12965 = vst [vmem:[#allocation121_spill] sm:$0xff] %v10554_v52  ;;  %12966 = vst [vmem:[#allocation122_spill] sm:$0xff] %v10558_v15  ;;  %v10578_v52 = vmul.f32 %v10177_v35, %v9918_v59  ;;  %v10582_v15 = vmul.f32 %v10184_v27, %v9918_v59  ;;  %v10595_v39 = vmul.f32 %v9969_v49, %v4336_v60 }
 0x443   : > { %12967 = vst [vmem:[#allocation123_spill] sm:$0xff] %v10562_v19  ;;  %12968 = vst [vmem:[#allocation124_spill] sm:$0xff] %v10566_v63  ;;  %v10586_v19 = vmul.f32 %v10187_v46, %v9918_v59  ;;  %v10589_v63 = vmul.f32 %v9963_v58, %v4336_v60 }
 0x444   : > { %12969 = vst [vmem:[#allocation125_spill] sm:$0xff] %v10574_v22  ;;  %12970 = vst [vmem:[#allocation126_spill] sm:$0xff] %v10578_v52  ;;  %v10598_v22 = vmul.f32 %v9974_v3, %v4336_v60  ;;  %v4340_v52 = vpop.permute.xlu0 %4339  ;;  %v10618_v60 = vmul.f32 %v10177_v35, %v9924_v28 }
 0x445   : > { %12971 = vst [vmem:[#allocation127_spill] sm:$0xff] %v10582_v15  ;;  %12972 = vst [vmem:[#allocation128_spill] sm:$0xff] %v10586_v19  ;;  %v10602_v15 = vmul.f32 %v9963_v58, %v10072_v23  ;;  %v10606_v19 = vmul.f32 %v9966_v62, %v10072_v23 }
 0x446   : > { %v10538_v30 = vpop.permute.xlu1 %4109  ;;  %12973 = vst [vmem:[#allocation129_spill] sm:$0xff] %v10589_v63  ;;  %12974 = vst [vmem:[#allocation130_spill] sm:$0xff] %v10592_v43  ;;  %v10610_v63 = vmul.f32 %v9969_v49, %v10072_v23  ;;  %v10614_v43 = vmul.f32 %v9974_v3, %v10072_v23  ;;  %v10633_v23 = vmul.f32 %v9963_v58, %v4340_v52 }
 0x447   : > { %12975 = vst [vmem:[#allocation131_spill] sm:$0xff] %v10595_v39  ;;  %12976 = vst [vmem:[#allocation132_spill] sm:$0xff] %v10598_v22  ;;  %v10622_v22 = vmul.f32 %v10184_v27, %v9924_v28  ;;  %v10626_v39 = vmul.f32 %v10187_v46, %v9924_v28 }
 0x448   : > { %12977 = vst [vmem:[#allocation133_spill] sm:$0xff] %v10602_v15  ;;  %12978 = vst [vmem:[#allocation134_spill] sm:$0xff] %v10606_v19  ;;  %v10630_v19 = vmul.f32 %v10190_v5, %v9918_v59  ;;  %v10639_v15 = vmul.f32 %v9969_v49, %v4340_v52  ;;  %v10650_v59 = vmul.f32 %v10177_v35, %v9932_v29 }
 0x449   : > { %12979 = vst [vmem:[#allocation135_spill] sm:$0xff] %v10610_v63  ;;  %12980 = vst [vmem:[#allocation136_spill] sm:$0xff] %v10614_v43  ;;  %v10636_v43 = vmul.f32 %v9966_v62, %v4340_v52 }
 0x44a   : > { %12981 = vst [vmem:[#allocation137_spill] sm:$0xff] %v10622_v22  ;;  %12982 = vst [vmem:[#allocation138_spill] sm:$0xff] %v10626_v39  ;;  %v4560_v63 = vpop.permute.xlu1 %4559  ;;  %v10643_v22 = vmul.f32 %v10190_v5, %v9924_v28  ;;  %v10646_v39 = vmul.f32 %v9974_v3, %v4340_v52  ;;  %v10666_v28 = vmul.f32 %v9966_v62, %v10256_v25 }
 0x44b   : > { %12983 = vst [vmem:[#allocation139_spill] sm:$0xff] %v10630_v19  ;;  %12984 = vst [vmem:[#allocation140_spill] sm:$0xff] %v10633_v23  ;;  %v10654_v23 = vmul.f32 %v10184_v27, %v9932_v29  ;;  %v10670_v52 = vmul.f32 %v9969_v49, %v10256_v25  ;;  %v10678_v19 = vmul.f32 %v9974_v3, %v10256_v25 }
 0x44c   : > { %12985 = vst [vmem:[#allocation141_spill] sm:$0xff] %v10636_v43  ;;  %12986 = vst [vmem:[#allocation142_spill] sm:$0xff] %v10639_v15  ;;  %v10658_v43 = vmul.f32 %v10187_v46, %v9932_v29  ;;  %v10662_v15 = vmul.f32 %v9963_v58, %v10256_v25  ;;  %v10682_v58 = vmul.f32 %v9980_v42, %v10449_v51 }
 0x44d   : > { %12987 = vst [vmem:[#allocation143_spill] sm:$0xff] %v10646_v39  ;;  %12990 = vst [vmem:[#allocation146_spill] sm:$0xff] %v10666_v28  ;;  %v10674_v39 = vmul.f32 %v10190_v5, %v9932_v29  ;;  %v10686_v62 = vmul.f32 %v9983_v56, %v10449_v51  ;;  %v10690_v49 = vmul.f32 %v9986_v36, %v10449_v51 }
 0x44e   : > { %12988 = vst [vmem:[#allocation144_spill] sm:$0xff] %v10658_v43  ;;  %12989 = vst [vmem:[#allocation145_spill] sm:$0xff] %v10662_v15  ;;  %v10694_v29 = vmul.f32 %v9991_v55, %v10449_v51  ;;  %v10698_v3 = vmul.f32 %v10177_v35, %v10162_v11  ;;  %v10702_v25 = vmul.f32 %v10184_v27, %v10162_v11 }
 0x44f   : > { %12991 = vst [vmem:[#allocation147_spill] sm:$0xff] %v10670_v52  ;;  %12992 = vst [vmem:[#allocation148_spill] sm:$0xff] %v10674_v39  ;;  %v10712_v51 = vmul.f32 %v10190_v5, %v10162_v11  ;;  %v10721_v39 = vmul.f32 %v9986_v36, %v4560_v63 }
 0x450   : > { %12993 = vst [vmem:[#allocation149_spill] sm:$0xff] %v10678_v19  ;;  %12994 = vst [vmem:[#allocation150_spill] sm:$0xff] %v10682_v58 }
 0x451   : > { %12995 = vst [vmem:[#allocation151_spill] sm:$0xff] %v10686_v62  ;;  %12996 = vst [vmem:[#allocation152_spill] sm:$0xff] %v10690_v49  ;;  %v10706_v62 = vmul.f32 %v10187_v46, %v10162_v11 }
 0x452   : > { %12997 = vst [vmem:[#allocation153_spill] sm:$0xff] %v10694_v29  ;;  %12998 = vst [vmem:[#allocation154_spill] sm:$0xff] %v10698_v3  ;;  %v10715_v29 = vmul.f32 %v9980_v42, %v4560_v63  ;;  %v4564_v3 = vpop.permute.xlu1 %4563 }
 0x453   : > { %12999 = vst [vmem:[#allocation155_spill] sm:$0xff] %v10702_v25  ;;  %13000 = vst [vmem:[#allocation156_spill] sm:$0xff] %v10706_v62  ;;  %v10718_v25 = vmul.f32 %v9983_v56, %v4560_v63 }
 0x454   : > { %13001 = vst [vmem:[#allocation157_spill] sm:$0xff] %v10712_v51  ;;  %13002 = vst [vmem:[#allocation158_spill] sm:$0xff] %v10715_v29 }
 0x455   : > { %13003 = vst [vmem:[#allocation159_spill] sm:$0xff] %v10718_v25  ;;  %13004 = vst [vmem:[#allocation160_spill] sm:$0xff] %v10721_v39  ;;  %v10736_v39 = vmul.f32 %v10184_v27, %v10354_v32 }
 0x457   : > { %13006 = vst [vmem:[#allocation162_spill] sm:$0xff] %v10736_v39 }
 0x493   : > { %v3838_v28 = vpop.f32.mrf.mxu0  ;;  %v3951_v52 = vpop.f32.mrf.mxu1 }
 0x494   : > { %v3839_v49 = vadd.f32 %v3838_v28, %v10007_v40  ;;  %v3952_v58 = vadd.f32 %v3951_v52, %v10242_v9  ;;  %v10724_v28 = vmul.f32 %v9991_v55, %v4560_v63  ;;  %v10728_v52 = vmul.f32 %v10177_v35, %v10354_v32 }
 0x495   : > { %v3840_v19 = vpop.f32.mrf.mxu0  ;;  %v3953_v15 = vpop.f32.mrf.mxu1  ;;  %v10740_v63 = vmul.f32 %v10187_v46, %v10354_v32 }
 0x496   : > { %13005 = vst [vmem:[#allocation161_spill] sm:$0xff] %v10724_v28  ;;  %v4214_v11 = vadd.f32 %v10234_v0, %v3839_v49  ;;  %v4216_v51 = vadd.f32 %v10260_v24, %v3952_v58  ;;  %v3841_v29 = vadd.f32 %v3840_v19, %v10268_v44  ;;  %v3954_v62 = vadd.f32 %v3953_v15, %v10288_v2 }
 0x497   : > { %v3842_v43 = vpop.f32.mrf.mxu0  ;;  %v3955_v25 = vpop.f32.mrf.mxu1  ;;  %13007 = vst [vmem:[#allocation163_spill] sm:$0xff] %v10740_v63  ;;  %v10744_v28 = vmul.f32 %v10190_v5, %v10354_v32  ;;  %v10747_v24 = vmul.f32 %v9980_v42, %v4564_v3  ;;  %v10752_v19 = vmul.f32 %v9983_v56, %v4564_v3  ;;  %v10755_v58 = vmul.f32 %v9986_v36, %v4564_v3 }
 0x498   : > { %v4215_v0 = vadd.f32 %v10272_v6, %v3841_v29  ;;  %v4217_v15 = vadd.f32 %v10292_v50, %v3954_v62  ;;  %v3843_v49 = vadd.f32 %v3842_v43, %v10007_v40  ;;  %v3956_v63 = vadd.f32 %v3955_v25, %v10242_v9  ;;  %v4568_v43 = vpop.permute.xlu0 %4567 }
 0x499   : > { %13008 = vst [vmem:[#allocation164_spill] sm:$0xff] %v10744_v28  ;;  %13009 = vst [vmem:[#allocation165_spill] sm:$0xff] %v10747_v24  ;;  %v3844_v39 = vpop.f32.mrf.mxu0  ;;  %v3957_v32 = vpop.f32.mrf.mxu1  ;;  %v10760_v28 = vmul.f32 %v9991_v55, %v4564_v3  ;;  %v10764_v6 = vmul.f32 %v10177_v35, %v10538_v30  ;;  %v4442_v50 = vadd.f32 %v9995_v41, %v4214_v11 }
 0x49a   : > { %13010 = vst [vmem:[#allocation166_spill] sm:$0xff] %v10752_v19  ;;  %13011 = vst [vmem:[#allocation167_spill] sm:$0xff] %v10755_v58  ;;  %v4444_v62 = vadd.f32 %v10003_v53, %v4216_v51  ;;  %v4443_v29 = vadd.f32 %v9999_v7, %v4215_v0  ;;  %v4445_v58 = vadd.f32 %v10011_v57, %v4217_v15 }
 0x49b   : > { %13012 = vst [vmem:[#allocation168_spill] sm:$0xff] %v10760_v28  ;;  %13013 = vst [vmem:[#allocation169_spill] sm:$0xff] %v10764_v6  ;;  %v4218_v25 = vadd.f32 %v10308_v16, %v3843_v49  ;;  %v4220_v19 = vadd.f32 %v10312_v47, %v3956_v63  ;;  %v3845_v3 = vadd.f32 %v3844_v39, %v10268_v44  ;;  %v3848_v24 = vpop.f32.mrf.mxu0  ;;  %v3961_v35 = vpop.f32.mrf.mxu1  ;;  %v13027_v49 = vld [vmem:[#allocation24_spill] sm:$0xff] }
 0x49c   : > { %v3958_v28 = vadd.f32 %v3957_v32, %v10288_v2  ;;  %v10775_v6 = vadd.f32 %v10144_v18, %v4445_v58  ;;  %v10779_v41 = vmul.f32 %v10184_v27, %v10538_v30  ;;  %v10783_v7 = vmul.f32 %v10187_v46, %v10538_v30  ;;  %v13025_v58 = vld [vmem:[#allocation22_spill] sm:$0xff] }
 0x49d   : > { %v10787_v53 = vmul.f32 %v10190_v5, %v10538_v30  ;;  %v4446_v57 = vadd.f32 %v10336_v31, %v4218_v25  ;;  %v4448_v16 = vadd.f32 %v10344_v21, %v4220_v19  ;;  %v4219_v47 = vadd.f32 %v10352_v48, %v3845_v3  ;;  %v3850_v39 = vpop.f32.mrf.mxu0  ;;  %v3963_v51 = vpop.f32.mrf.mxu1 }
 0x49e   : > { %13014 = vst [vmem:[#allocation170_spill] sm:$0xff] %v10775_v6  ;;  %v4221_v18 = vadd.f32 %v10358_v1, %v3958_v28  ;;  %v10794_v27 = vadd.f32 %v10116_v13, %v4442_v50  ;;  %v10797_v46 = vadd.f32 %v10140_v45, %v4444_v62  ;;  %v3849_v11 = vadd.f32 %v3848_v24, %v10007_v40  ;;  %v13021_v24 = vld [vmem:[#allocation26_spill] sm:$0xff]  ;;  %v13028_v50 = vld [vmem:[#allocation64_spill] sm:$0xff] }
 0x49f   : > { %v10801_v5 = vmul.f32 %v9980_v42, %v4568_v43  ;;  %v10804_v31 = vadd.f32 %v10122_v20, %v4443_v29  ;;  %v4843_v21 = vmul.f32 %v10775_v6, %v10775_v6  ;;  %v4447_v1 = vadd.f32 %v10340_v10, %v4219_v47  ;;  %v3852_v13 = vpop.f32.mrf.mxu0  ;;  %v3965_v30 = vpop.f32.mrf.mxu1  ;;  %v13020_v42 = vld [vmem:[#allocation63_spill] sm:$0xff] }
 0x4a0   : > { %13015 = vst [vmem:[#allocation171_spill] sm:$0xff] %v10794_v27  ;;  %13016 = vst [vmem:[#allocation172_spill] sm:$0xff] %v10797_v46  ;;  %v4449_v48 = vadd.f32 %v10348_v26, %v4221_v18  ;;  %v10811_v45 = vadd.f32 %v10031_v33, %v4446_v57  ;;  %v10814_v28 = vadd.f32 %v10039_v34, %v4448_v16  ;;  %v4799_v3 = vsel %vm1474_vm2, %v10775_v6, 0.0  ;;  %v13031_v16 = vld [vmem:[#allocation21_spill] sm:$0xff]  ;;  %v13036_v6 = vld [vmem:[#allocation32_spill] sm:$0xff] }
 0x4a1   : > { %13017 = vst [vmem:[#allocation173_spill] sm:$0xff] %v10804_v31  ;;  %v4222_v63 = vadd.f32 %v13020_v42, %v3849_v11  ;;  %v3962_v20 = vadd.f32 %v3961_v35, %v10242_v9  ;;  %v3851_v15 = vadd.f32 %v3850_v39, %v10268_v44  ;;  %v3854_v10 = vpop.f32.mrf.mxu0  ;;  %v3967_v19 = vpop.f32.mrf.mxu1  ;;  %v10823_v26 = vmul.f32 %v9983_v56, %v4568_v43 }
 0x4a2   : > { %13018 = vst [vmem:[#allocation174_spill] sm:$0xff] %v10811_v45  ;;  %13019 = vst [vmem:[#allocation175_spill] sm:$0xff] %v10814_v28  ;;  %v10819_v0 = vadd.f32 %v13021_v24, %v4449_v48  ;;  %v10826_v33 = vmul.f32 %v9986_v36, %v4568_v43  ;;  %v10829_v34 = vadd.f32 %v13025_v58, %v4447_v1  ;;  %v4967_v57 = vsel %vm1474_vm2, %v4843_v21, 0.0  ;;  %v13032_v21 = vld [vmem:[#allocation65_spill] sm:$0xff]  ;;  %v13033_v24 = vld [vmem:[#allocation31_spill] sm:$0xff] }
 0x4a3   : > { %13023 = vst [vmem:[#allocation26_spill] sm:$0xff] %v10823_v26  ;;  %v4450_v32 = vadd.f32 %v13027_v49, %v4222_v63  ;;  %v4224_v62 = vadd.f32 %v13028_v50, %v3962_v20  ;;  %v10834_v29 = vmul.f32 %v9991_v55, %v4568_v43  ;;  %v4840_v25 = vmul.f32 %v10794_v27, %v10794_v27  ;;  %v7749_v50 = vld [vmem:[%s13030_s0 + $0x74] ss:$8 sps:$4 sm:$0xff]  }
 0x4a4   : > { %13022 = vst [vmem:[#allocation63_spill] sm:$0xff] %v10819_v0  ;;  %13024 = vst [vmem:[#allocation176_spill] sm:$0xff] %v10826_v33  ;;  %v4842_v56 = vmul.f32 %v10797_v46, %v10797_v46  ;;  %v4841_v36 = vmul.f32 %v10804_v31, %v10804_v31  ;;  %v3858_v35 = vpop.f32.mrf.mxu0  ;;  %v4844_v55 = vmul.f32 %v10811_v45, %v10811_v45  ;;  %v3971_v18 = vpop.f32.mrf.mxu1  ;;  %v4800_v39 = vsel %vm1474_vm2, %v10819_v0, 0.0 }
 0x4a5   : > { %13026 = vst [vmem:[#allocation22_spill] sm:$0xff] %v10829_v34  ;;  %13029 = vst [vmem:[#allocation24_spill] sm:$0xff] %v10834_v29  ;;  %v4846_v43 = vmul.f32 %v10814_v28, %v10814_v28  ;;  %v4452_v47 = vadd.f32 %v13031_v16, %v4224_v62  ;;  %v4736_v11 = vadd.f32 %v10811_v45, %v10794_v27  ;;  %v13035_v62 = vld [vmem:[#allocation28_spill] sm:$0xff]  ;;  %5822 = vmatprep.subr.bf16.mxu0 %v7749_v50 }
 0x4a6   : > { %v4778_v1 = vadd.f32 %v10814_v28, %v10797_v46  ;;  %v4223_v48 = vadd.f32 %v13032_v21, %v3851_v15  ;;  %v4757_v42 = vadd.f32 %v10829_v34, %v10804_v31  ;;  %v4845_v63 = vmul.f32 %v10829_v34, %v10829_v34  ;;  %v10866_v49 = vpop.f32.mrf.mxu0  ;;  %v7747_v46 = vld [vmem:[%s13030_s0 + $0x70] ss:$8 sps:$4 sm:$0xff]   ;;  %v13041_v31 = vld [vmem:[#allocation72_spill] sm:$0xff] }
 0x4a7   : > { %v4847_v20 = vmul.f32 %v10819_v0, %v10819_v0  ;;  %v10864_v58 = vadd.f32 %v13033_v24, %v4450_v32  ;;  %v3964_v28 = vadd.f32 %v3963_v51, %v10288_v2  ;;  %v3853_v15 = vadd.f32 %v3852_v13, %v10007_v40  ;;  %v10878_v24 = vpop.f32.mrf.mxu1  ;;  %v13038_v34 = vld [vmem:[#allocation35_spill] sm:$0xff]  ;;  %v13039_v51 = vld [vmem:[#allocation66_spill] sm:$0xff]  ;;  %5823 = vmatpush1.bf16.msra.mxu0 %v7747_v46  ;;  %v7755_v50 = vld [vmem:[%s13030_s0 + $0x64] ss:$8 sps:$4 sm:$0xff]  }
 0x4a8   : > { %v4451_v16 = vadd.f32 %v13035_v62, %v4223_v48  ;;  %v3966_v21 = vadd.f32 %v3965_v30, %v10242_v9  ;;  %v4801_v45 = vadd.f32 %v4800_v39, %v4799_v3  ;;  %v4904_v27 = vadd.f32 %v4844_v55, %v4840_v25  ;;  %v13040_v62 = vld [vmem:[#allocation71_spill] sm:$0xff]  ;;  %v13042_v55 = vld [vmem:[#allocation73_spill] sm:$0xff]  ;;  %v3862_v39 = vpop.f32.mrf.mxu0  ;;  %5824 = vmatprep.subr.bf16.mxu0 %v7755_v50 }
 0x4a9   : > { %13034 = vst [vmem:[#allocation64_spill] sm:$0xff] %v10864_v58  ;;  %v10875_v0 = vadd.f32 %v13036_v6, %v4452_v47  ;;  %v3855_v32 = vadd.f32 %v3854_v10, %v10268_v44  ;;  %v4225_v13 = vadd.f32 %v13039_v51, %v3964_v28  ;;  %v4226_v30 = vadd.f32 %v13040_v62, %v3853_v15  ;;  %v13043_v28 = vld [vmem:[#allocation25_spill] sm:$0xff]  ;;  %v13044_v15 = vld [vmem:[#allocation79_spill] sm:$0xff] }
 0x4aa   : > { %v10881_v48 = vadd.f32 %v13038_v34, %v4451_v16  ;;  %v4228_v3 = vadd.f32 %v13041_v31, %v3966_v21  ;;  %v4925_v25 = vadd.f32 %v4845_v63, %v4841_v36  ;;  %v3968_v47 = vadd.f32 %v3967_v19, %v10288_v2  ;;  %v7753_v31 = vld [vmem:[%s13030_s0 + $0x60] ss:$8 sps:$4 sm:$0xff]   ;;  %v13046_v63 = vld [vmem:[#allocation75_spill] sm:$0xff]  ;;  %v3864_v50 = vpop.f32.mrf.mxu0 }
 0x4ab   : > { %13037 = vst [vmem:[#allocation21_spill] sm:$0xff] %v10875_v0  ;;  %v4227_v6 = vadd.f32 %v13042_v55, %v3855_v32  ;;  %v3859_v10 = vadd.f32 %v3858_v35, %v10007_v40  ;;  %v4968_v29 = vsel %vm1474_vm2, %v4847_v20, 0.0  ;;  %v4848_v34 = vmul.f32 %v10864_v58, %v10864_v58  ;;  %v13045_v36 = vld [vmem:[#allocation80_spill] sm:$0xff]  ;;  %v3975_v32 = vpop.f32.mrf.mxu1  ;;  %5825 = vmatpush1.bf16.msra.mxu0 %v7753_v31  ;;  %v13055_v31 = vld [vmem:[#allocation85_spill] sm:$0xff] }
 0x4ac   : > { %v4453_v16 = vadd.f32 %v13043_v28, %v4225_v13  ;;  %v4454_v51 = vadd.f32 %v13044_v15, %v4226_v30  ;;  %v4850_v46 = vmul.f32 %v10875_v0, %v10875_v0  ;;  %v4456_v19 = vadd.f32 %v10370_v38, %v4228_v3  ;;  %v13047_v13 = vld [vmem:[#allocation36_spill] sm:$0xff]  ;;  %v13048_v30 = vld [vmem:[#allocation29_spill] sm:$0xff]  ;;  %v13050_v28 = vld [vmem:[#allocation82_spill] sm:$0xff] }
 0x4ad   : > { %v4455_v35 = vadd.f32 %v13045_v36, %v4227_v6  ;;  %v4229_v21 = vadd.f32 %v13046_v63, %v3968_v47  ;;  %v4849_v20 = vmul.f32 %v10881_v48, %v10881_v48  ;;  %v4230_v15 = vadd.f32 %v13050_v28, %v3859_v10  ;;  %v13051_v6 = vld [vmem:[#allocation81_spill] sm:$0xff]  ;;  %v7758_v63 = vld [vmem:[%s13030_s0 + $0x54] ss:$8 sps:$4 sm:$0xff]  }
 0x4ae   : > { %v10904_v62 = vadd.f32 %v13047_v13, %v4453_v16  ;;  %v10907_v55 = vadd.f32 %v13048_v30, %v4454_v51  ;;  %v4969_v38 = vadd.f32 %v4968_v29, %v4967_v57  ;;  %v4946_v3 = vadd.f32 %v4846_v43, %v4842_v56  ;;  %v13052_v13 = vld [vmem:[#allocation30_spill] sm:$0xff]  ;;  %v13054_v57 = vld [vmem:[#allocation33_spill] sm:$0xff]  ;;  %5826 = vmatprep.subr.bf16.mxu0 %v7758_v63 }
 0x4af   : > { %v4457_v36 = vadd.f32 %v13051_v6, %v4229_v21  ;;  %v3972_v47 = vadd.f32 %v3971_v18, %v10242_v9  ;;  %v4737_v26 = vadd.f32 %v4736_v11, %v10864_v58  ;;  %v4905_v33 = vadd.f32 %v4904_v27, %v4848_v34  ;;  %v7756_v30 = vld [vmem:[%s13030_s0 + $0x50] ss:$8 sps:$4 sm:$0xff]   ;;  %v3977_v27 = vpop.f32.mrf.mxu1  ;;  %v7773_v58 = vld [vmem:[%s13030_s0 + $0x24] ss:$8 sps:$4 sm:$0xff]  }
 0x4b0   : > { %13049 = vst [vmem:[#allocation65_spill] sm:$0xff] %v10907_v55  ;;  %v4851_v16 = vmul.f32 %v10904_v62, %v10904_v62  ;;  %v10917_v51 = vadd.f32 %v13052_v13, %v4456_v19  ;;  %v4779_v10 = vadd.f32 %v4778_v1, %v10875_v0  ;;  %v4802_v29 = vsel %vm1474_vm2, %v10904_v62, 0.0  ;;  %5827 = vmatpush1.bf16.msra.mxu0 %v7756_v30  ;;  %v13056_v28 = vld [vmem:[#allocation34_spill] sm:$0xff]  ;;  %v13058_v13 = vld [vmem:[#allocation83_spill] sm:$0xff]  ;;  %v7764_v0 = vld [vmem:[%s13030_s0 + $0x44] ss:$8 sps:$4 sm:$0xff]  }
 0x4b1   : > { %v4852_v56 = vmul.f32 %v10907_v55, %v10907_v55  ;;  %v10926_v43 = vadd.f32 %v13054_v57, %v4455_v35  ;;  %v4947_v18 = vadd.f32 %v4946_v3, %v4850_v46  ;;  %v4758_v11 = vadd.f32 %v4757_v42, %v10881_v48  ;;  %v3868_v57 = vpop.f32.mrf.mxu0  ;;  %5828 = vmatprep.subr.bf16.mxu0 %v7764_v0  ;;  %v13060_v30 = vld [vmem:[#allocation84_spill] sm:$0xff] }
 0x4b2   : > { %13053 = vst [vmem:[#allocation31_spill] sm:$0xff] %v10917_v51  ;;  %v4926_v34 = vadd.f32 %v4925_v25, %v4849_v20  ;;  %v4458_v19 = vadd.f32 %v13055_v31, %v4230_v15  ;;  %v4970_v1 = vsel %vm1474_vm2, %v4851_v16, 0.0  ;;  %v4738_v21 = vadd.f32 %v4737_v26, %v10907_v55  ;;  %v7762_v20 = vld [vmem:[%s13030_s0 + $0x40] ss:$8 sps:$4 sm:$0xff]   ;;  %v13063_v31 = vld [vmem:[#allocation38_spill] sm:$0xff] }
 0x4b3   : > { %v10933_v6 = vadd.f32 %v13056_v28, %v4457_v36  ;;  %v4232_v35 = vadd.f32 %v13058_v13, %v3972_v47  ;;  %v4803_v63 = vadd.f32 %v4802_v29, %v4801_v45  ;;  %v10938_v46 = vadd.f32 %v4779_v10, %v10917_v51  ;;  %v13059_v36 = vld [vmem:[#allocation87_spill] sm:$0xff]  ;;  %v10951_v47 = vpop.f32.mrf.mxu1  ;;  %v13065_v13 = vld [vmem:[#allocation86_spill] sm:$0xff]  ;;  %v13069_v55 = vld [vmem:[#allocation41_spill] sm:$0xff] }
 0x4b4   : > { %v4854_v42 = vmul.f32 %v10917_v51, %v10917_v51  ;;  %v3861_v25 = vadd.f32 %v10866_v49, %v10268_v44  ;;  %v4906_v15 = vadd.f32 %v4905_v33, %v4852_v56  ;;  %v10946_v26 = vadd.f32 %v4758_v11, %v10926_v43  ;;  %5829 = vmatpush1.bf16.msra.mxu0 %v7762_v20  ;;  %v13061_v56 = vld [vmem:[#allocation60_spill] sm:$0xff] }
 0x4b5   : > { %13057 = vst [vmem:[#allocation28_spill] sm:$0xff] %v10933_v6  ;;  %v4853_v3 = vmul.f32 %v10926_v43, %v10926_v43  ;;  %v4460_v45 = vadd.f32 %v13059_v36, %v4232_v35  ;;  %v4971_v16 = vadd.f32 %v4970_v1, %v4969_v38  ;;  %v3974_v49 = vadd.f32 %v10878_v24, %v10288_v2  ;;  %v10966_v38 = vpop.f32.mrf.mxu0  ;;  %v7767_v1 = vld [vmem:[%s13030_s0 + $0x34] ss:$8 sps:$4 sm:$0xff]   ;;  %v13066_v24 = vld [vmem:[#allocation88_spill] sm:$0xff] }
 0x4b6   : > { %v4231_v10 = vadd.f32 %v13060_v30, %v3861_v25  ;;  %v3863_v33 = vadd.f32 %v3862_v39, %v10007_v40  ;;  %v4855_v29 = vmul.f32 %v10933_v6, %v10933_v6  ;;  %v10960_v11 = vadd.f32 %v13061_v56, %v4458_v19  ;;  %v13067_v39 = vld [vmem:[#allocation90_spill] sm:$0xff]  ;;  %5830 = vmatprep.subr.bf16.mxu0 %v7767_v1 }
 0x4b7   : > { %v10963_v28 = vadd.f32 %v13063_v31, %v4460_v45  ;;  %v3976_v0 = vadd.f32 %v3975_v32, %v10242_v9  ;;  %v4233_v25 = vadd.f32 %v13066_v24, %v3974_v49  ;;  %v3865_v36 = vadd.f32 %v3864_v50, %v10268_v44  ;;  %v7765_v30 = vld [vmem:[%s13030_s0 + $0x30] ss:$8 sps:$4 sm:$0xff]   ;;  %v3983_v31 = vpop.f32.mrf.mxu1  ;;  %v13070_v49 = vld [vmem:[#allocation89_spill] sm:$0xff]  ;;  %v13072_v24 = vld [vmem:[#allocation92_spill] sm:$0xff] }
 0x4b8   : > { %13062 = vst [vmem:[#allocation32_spill] sm:$0xff] %v10960_v11  ;;  %v4459_v35 = vadd.f32 %v13065_v13, %v4231_v10  ;;  %v4234_v20 = vadd.f32 %v13067_v39, %v3863_v33  ;;  %v4948_v51 = vadd.f32 %v4947_v18, %v4854_v42  ;;  %v4804_v19 = vsel %vm1474_vm2, %v10933_v6, 0.0  ;;  %v13068_v45 = vld [vmem:[#allocation91_spill] sm:$0xff]  ;;  %5831 = vmatpush1.bf16.msra.mxu0 %v7765_v30 }
 0x4b9   : > { %13064 = vst [vmem:[#allocation35_spill] sm:$0xff] %v10963_v28  ;;  %v4236_v56 = vadd.f32 %v13068_v45, %v3976_v0  ;;  %v3978_v32 = vadd.f32 %v3977_v27, %v10288_v2  ;;  %v4461_v33 = vadd.f32 %v13070_v49, %v4233_v25  ;;  %v13071_v13 = vld [vmem:[#allocation39_spill] sm:$0xff]  ;;  %v4235_v18 = vadd.f32 %v13072_v24, %v3865_v36  ;;  %v3872_v45 = vpop.f32.mrf.mxu0  ;;  %v13074_v25 = vld [vmem:[#allocation61_spill] sm:$0xff] }
 0x4ba   : > { %v10979_v10 = vadd.f32 %v13069_v55, %v4459_v35  ;;  %v4462_v50 = vadd.f32 %v13071_v13, %v4234_v20  ;;  %v4856_v42 = vmul.f32 %v10960_v11, %v10960_v11  ;;  %v13073_v39 = vld [vmem:[#allocation43_spill] sm:$0xff]  ;;  %v3869_v1 = vadd.f32 %v3868_v57, %v10007_v40  ;;  %v7771_v49 = vld [vmem:[%s13030_s0 + $0x20] ss:$8 sps:$4 sm:$0xff]   ;;  %5832 = vmatprep.subr.bf16.mxu0 %v7773_v58 }
 0x4bb   : > { %v4464_v0 = vadd.f32 %v13073_v39, %v4236_v56  ;;  %v4237_v27 = vadd.f32 %v10434_v4, %v3978_v32  ;;  %v4972_v55 = vsel %vm1474_vm2, %v4855_v29, 0.0  ;;  %v4858_v35 = vmul.f32 %v10963_v28, %v10963_v28  ;;  %v13075_v36 = vld [vmem:[#allocation51_spill] sm:$0xff]  ;;  %v13077_v56 = vld [vmem:[#allocation40_spill] sm:$0xff]  ;;  %v13078_v32 = vld [vmem:[#allocation37_spill] sm:$0xff]  ;;  %v3985_v39 = vpop.f32.mrf.mxu1  ;;  %v3874_v58 = vpop.f32.mrf.mxu0 }
 0x4bc   : > { %v10994_v20 = vadd.f32 %v13074_v25, %v4461_v33  ;;  %v10997_v30 = vadd.f32 %v13075_v36, %v4462_v50  ;;  %v4927_v13 = vadd.f32 %v4926_v34, %v4853_v3  ;;  %v4463_v4 = vadd.f32 %v13077_v56, %v4235_v18  ;;  %5833 = vmatpush1.bf16.msra.mxu0 %v7771_v49  ;;  %v7774_v36 = vld [vmem:[%s13030_s0 + $0x10] ss:$8 sps:$4 sm:$0xff]  }
 0x4bd   : > { %v4465_v57 = vadd.f32 %v13078_v32, %v4237_v27  ;;  %v4238_v24 = vadd.f32 %v10484_v54, %v3869_v1  ;;  %v4805_v29 = vadd.f32 %v4804_v19, %v4803_v63  ;;  %v4739_v6 = vadd.f32 %v4738_v21, %v10960_v11  ;;  %v13079_v27 = vld [vmem:[#allocation48_spill] sm:$0xff]  ;;  %v7776_v1 = vld [vmem:[%s13030_s0 + $0x14] ss:$8 sps:$4 sm:$0xff]  }
 0x4be   : > { %13076 = vst [vmem:[#allocation66_spill] sm:$0xff] %v10997_v30  ;;  %v4857_v33 = vmul.f32 %v10979_v10, %v10979_v10  ;;  %v4859_v50 = vmul.f32 %v10994_v20, %v10994_v20  ;;  %v4973_v34 = vadd.f32 %v4972_v55, %v4971_v16  ;;  %v4907_v3 = vadd.f32 %v4906_v15, %v4856_v42  ;;  %v13081_v16 = vld [vmem:[#allocation44_spill] sm:$0xff]  ;;  %v13082_v42 = vld [vmem:[#allocation45_spill] sm:$0xff] }
 0x4bf   : > { %v4806_v18 = vsel %vm1474_vm2, %v10994_v20, 0.0  ;;  %v11011_v54 = vadd.f32 %v13079_v27, %v4464_v0  ;;  %v4781_v21 = vadd.f32 %v10938_v46, %v10963_v28  ;;  %v4949_v63 = vadd.f32 %v4948_v51, %v4858_v35  ;;  %v13083_v0 = vld [vmem:[#allocation42_spill] sm:$0xff]  ;;  %v3987_v51 = vpop.f32.mrf.mxu1  ;;  %5834 = vmatprep.subr.bf16.mxu0 %v7776_v1 }
 0x4c0   : > { %v4974_v19 = vsel %vm1474_vm2, %v4859_v50, 0.0  ;;  %v4860_v25 = vmul.f32 %v10997_v30, %v10997_v30  ;;  %v11021_v15 = vadd.f32 %v13081_v16, %v4463_v4  ;;  %v11024_v55 = vadd.f32 %v13082_v42, %v4465_v57  ;;  %5835 = vmatpush1.bf16.msra.mxu0 %v7774_v36  ;;  %v7750_v1 = vld [vmem:[%s13030_s0 + $0x170] ss:$8 sps:$4 sm:$0xff]  }
 0x4c1   : > { %13080 = vst [vmem:[#allocation71_spill] sm:$0xff] %v11011_v54  ;;  %v4466_v49 = vadd.f32 %v13083_v0, %v4238_v24  ;;  %v3982_v46 = vadd.f32 %v10951_v47, %v10242_v9  ;;  %v4760_v35 = vadd.f32 %v10946_v26, %v10979_v10  ;;  %v4928_v56 = vadd.f32 %v4927_v13, %v4857_v33  ;;  %v11042_v26 = vpop.f32.mrf.mxu0  ;;  %v7752_v13 = vld [vmem:[%s13030_s0 + $0x174] ss:$8 sps:$4 sm:$0xff]   ;;  %v7782_v33 = vld [vmem:[%s13030_s0 + $0x4] ss:$8 sps:$4 sm:$0xff]  }
 0x4c2   : > { %v4807_v4 = vadd.f32 %v4806_v18, %v4805_v29  ;;  %v11032_v32 = vadd.f32 %v4739_v6, %v10997_v30  ;;  %v11035_v57 = vadd.f32 %v4781_v21, %v11011_v54  ;;  %v4862_v24 = vmul.f32 %v11011_v54, %v11011_v54  ;;  %v7780_v21 = vld [vmem:[%s13030_s0] ss:$8 sps:$4 sm:$0xff]   ;;  %v13086_v42 = vld [vmem:[#allocation50_spill] sm:$0xff]  ;;  %5935 = vmatprep.subr.bf16.mxu1 %v7752_v13 }
 0x4c3   : > { %v4240_v47 = vadd.f32 %v10488_v61, %v3982_v46  ;;  %v3871_v50 = vadd.f32 %v10966_v38, %v10268_v44  ;;  %v4975_v29 = vadd.f32 %v4974_v19, %v4973_v34  ;;  %v11046_v18 = vadd.f32 %v4907_v3, %v4860_v25  ;;  %v13084_v38 = vld [vmem:[#allocation49_spill] sm:$0xff]  ;;  %v11060_v3 = vpop.f32.mrf.mxu1  ;;  %5936 = vmatpush1.bf16.msra.mxu1 %v7750_v1  ;;  %v13091_v1 = vld [vmem:[#allocation23_spill] sm:$0xff]  ;;  %v13093_v30 = vld [vmem:[#allocation118_spill] sm:$0xff] }
 0x4c4   : > { %v3984_v6 = vadd.f32 %v3983_v31, %v10288_v2  ;;  %v3873_v27 = vadd.f32 %v3872_v45, %v10007_v40  ;;  %v4861_v36 = vmul.f32 %v11021_v15, %v11021_v15  ;;  %v4863_v61 = vmul.f32 %v11024_v55, %v11024_v55  ;;  %5836 = vmatprep.subr.bf16.mxu0 %v7782_v33  ;;  %v7759_v54 = vld [vmem:[%s13030_s0 + $0x160] ss:$8 sps:$4 sm:$0xff]  }
 0x4c5   : > { %v11057_v16 = vadd.f32 %v13084_v38, %v4466_v49  ;;  %v4468_v34 = vadd.f32 %v13086_v42, %v4240_v47  ;;  %v4239_v31 = vadd.f32 %v10492_v37, %v3871_v50  ;;  %v3986_v25 = vadd.f32 %v3985_v39, %v10242_v9  ;;  %v13087_v49 = vld [vmem:[#allocation58_spill] sm:$0xff]  ;;  %v11073_v37 = vpop.f32.mrf.mxu0  ;;  %v13090_v39 = vld [vmem:[#allocation47_spill] sm:$0xff]  ;;  %5837 = vmatpush1.bf16.msra.mxu0 %v7780_v21  ;;  %v3993_v11 = vpop.f32.mrf.mxu1 }
 0x4c6   : > { %v4241_v45 = vadd.f32 %v10524_v14, %v3984_v6  ;;  %v4242_v19 = vadd.f32 %v10528_v12, %v3873_v27  ;;  %v4808_v0 = vsel %vm1474_vm2, %v11024_v55, 0.0  ;;  %v3875_v47 = vadd.f32 %v3874_v58, %v10268_v44  ;;  %v7761_v14 = vld [vmem:[%s13030_s0 + $0x164] ss:$8 sps:$4 sm:$0xff]   ;;  %v7788_v50 = vld [vmem:[%s13030_s0 + $0xf4] ss:$8 sps:$4 sm:$0xff]  }
 0x4c7   : > { %13085 = vst [vmem:[#allocation72_spill] sm:$0xff] %v11057_v16  ;;  %v11069_v46 = vadd.f32 %v13087_v49, %v4468_v34  ;;  %v3988_v13 = vadd.f32 %v3987_v51, %v10288_v2  ;;  %v13089_v12 = vld [vmem:[#allocation46_spill] sm:$0xff]  ;;  %v4244_v42 = vadd.f32 %v10532_v17, %v3986_v25  ;;  %v4950_v49 = vadd.f32 %v4949_v63, %v4862_v24  ;;  %v13092_v51 = vld [vmem:[#allocation117_spill] sm:$0xff]  ;;  %v13095_v17 = vld [vmem:[#allocation55_spill] sm:$0xff] }
 0x4c8   : > { %v4467_v6 = vadd.f32 %v13089_v12, %v4239_v31  ;;  %v4469_v27 = vadd.f32 %v13090_v39, %v4241_v45  ;;  %v4470_v38 = vadd.f32 %v13091_v1, %v4242_v19  ;;  %v7786_v34 = vld [vmem:[%s13030_s0 + $0xf0] ss:$8 sps:$4 sm:$0xff]   ;;  %v4976_v58 = vsel %vm1474_vm2, %v4863_v61, 0.0  ;;  %5937 = vmatprep.subr.bf16.mxu1 %v7761_v14  ;;  %v3882_v14 = vpop.f32.mrf.mxu0  ;;  %v7770_v12 = vld [vmem:[%s13030_s0 + $0x154] ss:$8 sps:$4 sm:$0xff]   ;;  %5838 = vmatprep.subr.bf16.mxu0 %v7788_v50 }
 0x4c9   : > { %13088 = vst [vmem:[#allocation73_spill] sm:$0xff] %v11069_v46  ;;  %v4243_v28 = vadd.f32 %v13092_v51, %v3875_v47  ;;  %v4245_v33 = vadd.f32 %v13093_v30, %v3988_v13  ;;  %v4864_v31 = vmul.f32 %v11057_v16, %v11057_v16  ;;  %v13094_v45 = vld [vmem:[#allocation54_spill] sm:$0xff]  ;;  %5938 = vmatpush1.bf16.msra.mxu1 %v7759_v54  ;;  %v13098_v47 = vld [vmem:[#allocation56_spill] sm:$0xff] }
 0x4ca   : > { %v11089_v19 = vadd.f32 %v13094_v45, %v4467_v6  ;;  %v11092_v21 = vadd.f32 %v13095_v17, %v4469_v27  ;;  %v13096_v63 = vld [vmem:[#allocation74_spill] sm:$0xff]  ;;  %v4761_v61 = vadd.f32 %v4760_v35, %v11021_v15  ;;  %v4809_v30 = vadd.f32 %v4808_v0, %v4807_v4  ;;  %v7791_v6 = vld [vmem:[%s13030_s0 + $0xe4] ss:$8 sps:$4 sm:$0xff]   ;;  %5839 = vmatpush2.bf16.msra.mxu0 %v7786_v34  ;;  %v7789_v4 = vld [vmem:[%s13030_s0 + $0xe0] ss:$8 sps:$4 sm:$0xff]  }
 0x4cb   : > { %v11095_v24 = vadd.f32 %v13096_v63, %v4470_v38  ;;  %v4866_v25 = vmul.f32 %v11069_v46, %v11069_v46  ;;  %v4473_v13 = vadd.f32 %v13098_v47, %v4245_v33  ;;  %v4929_v39 = vadd.f32 %v4928_v56, %v4861_v36  ;;  %v13099_v54 = vld [vmem:[#allocation52_spill] sm:$0xff]  ;;  %v7768_v35 = vld [vmem:[%s13030_s0 + $0x150] ss:$8 sps:$4 sm:$0xff]   ;;  %v3995_v36 = vpop.f32.mrf.mxu1  ;;  %5939 = vmatprep.subr.bf16.mxu1 %v7770_v12  ;;  %v7797_v63 = vld [vmem:[%s13030_s0 + $0xd4] ss:$8 sps:$4 sm:$0xff]  }
 0x4cc   : > { %v4865_v27 = vmul.f32 %v11089_v19, %v11089_v19  ;;  %v4867_v1 = vmul.f32 %v11092_v21, %v11092_v21  ;;  %v4472_v38 = vadd.f32 %v13099_v54, %v4244_v42  ;;  %v4977_v0 = vadd.f32 %v4976_v58, %v4975_v29  ;;  %v13100_v33 = vld [vmem:[#allocation27_spill] sm:$0xff]  ;;  %5840 = vmatprep.subr.bf16.mxu0 %v7791_v6  ;;  %v13103_v6 = vld [vmem:[#allocation76_spill] sm:$0xff]  ;;  %v13104_v54 = vld [vmem:[#allocation122_spill] sm:$0xff] }
 0x4cd   : > { %13097 = vst [vmem:[#allocation25_spill] sm:$0xff] %v11095_v24  ;;  %v4810_v51 = vsel %vm1474_vm2, %v11092_v21, 0.0  ;;  %v4471_v50 = vadd.f32 %v13100_v33, %v4243_v28  ;;  %v3879_v56 = vadd.f32 %v11042_v26, %v10007_v40  ;;  %v4741_v45 = vadd.f32 %v11032_v32, %v11057_v16  ;;  %5940 = vmatpush1.bf16.msra.mxu1 %v7768_v35  ;;  %v13101_v32 = vld [vmem:[#allocation78_spill] sm:$0xff] }
 0x4ce   : > { %v4909_v42 = vadd.f32 %v11046_v18, %v4864_v31  ;;  %v4978_v29 = vsel %vm1474_vm2, %v4867_v1, 0.0  ;;  %v4868_v34 = vmul.f32 %v11095_v24, %v11095_v24  ;;  %v11123_v28 = vadd.f32 %v11035_v57, %v11069_v46  ;;  %v3884_v18 = vpop.f32.mrf.mxu0  ;;  %v7779_v31 = vld [vmem:[%s13030_s0 + $0x144] ss:$8 sps:$4 sm:$0xff]   ;;  %5841 = vmatpush2.bf16.msra.mxu0 %v7789_v4  ;;  %v7785_v35 = vld [vmem:[%s13030_s0 + $0x134] ss:$8 sps:$4 sm:$0xff]  }
 0x4cf   : > { %v11125_v26 = vadd.f32 %v4950_v49, %v4866_v25  ;;  %v11128_v58 = vadd.f32 %v4761_v61, %v11089_v19  ;;  %v11131_v17 = vadd.f32 %v13101_v32, %v4473_v13  ;;  %v11135_v47 = vadd.f32 %v4929_v39, %v4865_v27  ;;  %v13102_v49 = vld [vmem:[#allocation77_spill] sm:$0xff]  ;;  %v3997_v27 = vpop.f32.mrf.mxu1  ;;  %5941 = vmatprep.subr.bf16.mxu1 %v7779_v31  ;;  %v7795_v33 = vld [vmem:[%s13030_s0 + $0xd0] ss:$8 sps:$4 sm:$0xff]   ;;  %v13107_v32 = vld [vmem:[#allocation124_spill] sm:$0xff] }
 0x4d0   : > { %v11137_v12 = vadd.f32 %v4810_v51, %v4809_v30  ;;  %v11140_v57 = vadd.f32 %v4741_v45, %v11095_v24  ;;  %v11143_v25 = vadd.f32 %v13102_v49, %v4472_v38  ;;  %v7777_v61 = vld [vmem:[%s13030_s0 + $0x140] ss:$8 sps:$4 sm:$0xff]   ;;  %v11146_v13 = vadd.f32 %v4978_v29, %v4977_v0  ;;  %v7783_v0 = vld [vmem:[%s13030_s0 + $0x130] ss:$8 sps:$4 sm:$0xff]   ;;  %5842 = vmatprep.subr.bf16.mxu0 %v7797_v63  ;;  %v7803_v16 = vld [vmem:[%s13030_s0 + $0x114] ss:$8 sps:$4 sm:$0xff]  }
 0x4d1   : > { %v11149_v1 = vadd.f32 %v13103_v6, %v4471_v50  ;;  %v4246_v39 = vadd.f32 %v13104_v54, %v3879_v56  ;;  %v3992_v30 = vadd.f32 %v11060_v3, %v10242_v9  ;;  %v11155_v51 = vadd.f32 %v4909_v42, %v4868_v34  ;;  %5942 = vmatpush1.bf16.msra.mxu1 %v7777_v61  ;;  %v13105_v50 = vld [vmem:[#allocation97_spill] sm:$0xff]  ;;  %v13106_v45 = vld [vmem:[#allocation123_spill] sm:$0xff]  ;;  %v11167_v34 = vpop.f32.mrf.mxu0 }
 0x4d2   : > { %v3881_v38 = vadd.f32 %v11073_v37, %v10268_v44  ;;  %v3994_v4 = vadd.f32 %v3993_v11, %v10288_v2  ;;  %v4871_v3 = vmul.f32 %v11131_v17, %v11131_v17  ;;  %v3883_v42 = vadd.f32 %v3882_v14, %v10007_v40  ;;  %5943 = vmatprep.subr.bf16.mxu1 %v7785_v35  ;;  %v7794_v37 = vld [vmem:[%s13030_s0 + $0x124] ss:$8 sps:$4 sm:$0xff]   ;;  %v7798_v6 = vld [vmem:[%s13030_s0 + $0xc0] ss:$8 sps:$4 sm:$0xff]  }
 0x4d3   : > { %v4474_v56 = vadd.f32 %v13105_v50, %v4246_v39  ;;  %v4248_v29 = vadd.f32 %v13106_v45, %v3992_v30  ;;  %v7800_v11 = vld [vmem:[%s13030_s0 + $0xc4] ss:$8 sps:$4 sm:$0xff]   ;;  %v3996_v63 = vadd.f32 %v3995_v36, %v10242_v9  ;;  %v3885_v61 = vadd.f32 %v3884_v18, %v10268_v44  ;;  %5843 = vmatpush2.bf16.msra.mxu0 %v7795_v33  ;;  %v13110_v30 = vld [vmem:[#allocation99_spill] sm:$0xff]  ;;  %v3890_v24 = vpop.f32.mrf.mxu0 }
 0x4d4   : > { %v4247_v31 = vadd.f32 %v13107_v32, %v3881_v38  ;;  %v4249_v49 = vadd.f32 %v10570_v8, %v3994_v4  ;;  %v4870_v14 = vmul.f32 %v11143_v25, %v11143_v25  ;;  %v13108_v54 = vld [vmem:[#allocation93_spill] sm:$0xff]  ;;  %v4250_v50 = vadd.f32 %v10618_v60, %v3883_v42  ;;  %v11183_v38 = vpop.f32.mrf.mxu1  ;;  %5844 = vmatprep.subr.bf16.mxu0 %v7800_v11  ;;  %v7806_v8 = vld [vmem:[%s13030_s0 + $0xb4] ss:$8 sps:$4 sm:$0xff]   ;;  %v13112_v45 = vld [vmem:[#allocation100_spill] sm:$0xff] }
 0x4d5   : > { %v11179_v39 = vadd.f32 %v13108_v54, %v4474_v56  ;;  %v4476_v35 = vadd.f32 %v13110_v30, %v4248_v29  ;;  %v4869_v36 = vmul.f32 %v11149_v1, %v11149_v1  ;;  %v4812_v18 = vsel %vm1474_vm2, %v11131_v17, 0.0  ;;  %v13111_v4 = vld [vmem:[#allocation98_spill] sm:$0xff]  ;;  %5944 = vmatpush1.bf16.msra.mxu1 %v7783_v0  ;;  %v7792_v29 = vld [vmem:[%s13030_s0 + $0x120] ss:$8 sps:$4 sm:$0xff]   ;;  %v13113_v42 = vld [vmem:[#allocation95_spill] sm:$0xff] }
 0x4d6   : > { %v4475_v33 = vadd.f32 %v13111_v4, %v4247_v31  ;;  %v4477_v56 = vadd.f32 %v13112_v45, %v4249_v49  ;;  %v4980_v60 = vsel %vm1474_vm2, %v4871_v3, 0.0  ;;  %v13115_v11 = vld [vmem:[#allocation105_spill] sm:$0xff]  ;;  %5945 = vmatprep.subr.bf16.mxu1 %v7794_v37  ;;  %v13117_v4 = vld [vmem:[#allocation94_spill] sm:$0xff]  ;;  %v13118_v0 = vld [vmem:[#allocation96_spill] sm:$0xff]  ;;  %v4952_v37 = vadd.f32 %v11125_v26, %v4870_v14 }
 0x4d7   : > { %13109 = vst [vmem:[#allocation79_spill] sm:$0xff] %v11179_v39  ;;  %v11195_v32 = vadd.f32 %v13113_v42, %v4476_v35  ;;  %v4478_v54 = vadd.f32 %v13115_v11, %v4250_v50  ;;  %v13116_v30 = vld [vmem:[#allocation137_spill] sm:$0xff]  ;;  %v4872_v31 = vmul.f32 %v11179_v39, %v11179_v39  ;;  %v13119_v3 = vld [vmem:[#allocation138_spill] sm:$0xff]  ;;  %5845 = vmatpush2.bf16.msra.mxu0 %v7798_v6  ;;  %v13122_v14 = vld [vmem:[#allocation107_spill] sm:$0xff] }
 0x4d8   : > { %v4252_v46 = vadd.f32 %v13116_v30, %v3996_v63  ;;  %v11203_v49 = vadd.f32 %v13117_v4, %v4475_v33  ;;  %v11206_v45 = vadd.f32 %v13118_v0, %v4477_v56  ;;  %v4251_v35 = vadd.f32 %v13119_v3, %v3885_v61  ;;  %v7804_v50 = vld [vmem:[%s13030_s0 + $0xb0] ss:$8 sps:$4 sm:$0xff]   ;;  %v4003_v33 = vpop.f32.mrf.mxu1  ;;  %5846 = vmatprep.subr.bf16.mxu0 %v7806_v8  ;;  %v7809_v56 = vld [vmem:[%s13030_s0 + $0xa4] ss:$8 sps:$4 sm:$0xff]   ;;  %v3892_v8 = vpop.f32.mrf.mxu0  ;;  %v7815_v3 = vld [vmem:[%s13030_s0 + $0x94] ss:$8 sps:$4 sm:$0xff]  }
 0x4d9   : > { %13114 = vst [vmem:[#allocation80_spill] sm:$0xff] %v11195_v32  ;;  %v4784_v63 = vadd.f32 %v11123_v28, %v11143_v25  ;;  %v4763_v42 = vadd.f32 %v11128_v58, %v11149_v1  ;;  %v3998_v11 = vadd.f32 %v3997_v27, %v10288_v2  ;;  %v4931_v30 = vadd.f32 %v11135_v47, %v4869_v36  ;;  %v13120_v4 = vld [vmem:[#allocation109_spill] sm:$0xff]  ;;  %v7801_v26 = vld [vmem:[%s13030_s0 + $0x110] ss:$8 sps:$4 sm:$0xff]  }
 0x4da   : > { %v4813_v61 = vadd.f32 %v4812_v18, %v11137_v12  ;;  %v4874_v6 = vmul.f32 %v11195_v32, %v11195_v32  ;;  %v11222_v28 = vadd.f32 %v13120_v4, %v4478_v54  ;;  %5946 = vmatpush1.bf16.msra.mxu1 %v7792_v29  ;;  %v11226_v58 = vadd.f32 %v4980_v60, %v11146_v13  ;;  %v7812_v36 = vld [vmem:[%s13030_s0 + $0x104] ss:$8 sps:$4 sm:$0xff]   ;;  %v13123_v60 = vld [vmem:[#allocation106_spill] sm:$0xff]  ;;  %v7807_v54 = vld [vmem:[%s13030_s0 + $0xa0] ss:$8 sps:$4 sm:$0xff]   ;;  %v4005_v0 = vpop.f32.mrf.mxu1 }
 0x4db   : > { %v4743_v27 = vadd.f32 %v11140_v57, %v11179_v39  ;;  %v4814_v47 = vsel %vm1474_vm2, %v11206_v45, 0.0  ;;  %v4480_v12 = vadd.f32 %v13122_v14, %v4252_v46  ;;  %5947 = vmatprep.subr.bf16.mxu1 %v7803_v16  ;;  %v11235_v18 = vadd.f32 %v11155_v51, %v4872_v31  ;;  %5847 = vmatpush2.bf16.msra.mxu0 %v7804_v50  ;;  %v7810_v4 = vld [vmem:[%s13030_s0 + $0x100] ss:$8 sps:$4 sm:$0xff]  }
 0x4dc   : > { %13121 = vst [vmem:[#allocation75_spill] sm:$0xff] %v11222_v28  ;;  %v11238_v29 = vadd.f32 %v4784_v63, %v11195_v32  ;;  %v11241_v13 = vadd.f32 %v4763_v42, %v11203_v49  ;;  %v4479_v57 = vadd.f32 %v13123_v60, %v4251_v35  ;;  %v4873_v46 = vmul.f32 %v11203_v49, %v11203_v49  ;;  %v13124_v14 = vld [vmem:[#allocation108_spill] sm:$0xff] }
 0x4dd   : > { %v4875_v16 = vmul.f32 %v11206_v45, %v11206_v45  ;;  %v4253_v51 = vadd.f32 %v10643_v22, %v3998_v11  ;;  %v3889_v31 = vadd.f32 %v11167_v34, %v10007_v40  ;;  %5848 = vmatprep.subr.bf16.mxu0 %v7809_v56  ;;  %v4953_v63 = vadd.f32 %v4952_v37, %v4874_v6  ;;  %v3894_v37 = vpop.f32.mrf.mxu0  ;;  %v13125_v6 = vld [vmem:[#allocation111_spill] sm:$0xff]  ;;  %v13131_v32 = vld [vmem:[#allocation144_spill] sm:$0xff] }
 0x4de   : > { %v4815_v42 = vadd.f32 %v4814_v47, %v4813_v61  ;;  %v11254_v35 = vadd.f32 %v4743_v27, %v11222_v28  ;;  %v4876_v50 = vmul.f32 %v11222_v28, %v11222_v28  ;;  %5948 = vmatpush1.bf16.msra.mxu1 %v7801_v26  ;;  %v4002_v34 = vadd.f32 %v11183_v38, %v10242_v9  ;;  %v7818_v61 = vld [vmem:[%s13030_s0 + $0x184] ss:$8 sps:$4 sm:$0xff]   ;;  %v13127_v47 = vld [vmem:[#allocation110_spill] sm:$0xff] }
 0x4df   : > { %v4481_v22 = vadd.f32 %v13124_v14, %v4253_v51  ;;  %v4254_v11 = vadd.f32 %v10650_v59, %v3889_v31  ;;  %v3891_v56 = vadd.f32 %v3890_v24, %v10268_v44  ;;  %5949 = vmatprep.subr.bf16.mxu1 %v7812_v36  ;;  %v11266_v27 = vadd.f32 %v13125_v6, %v4480_v12  ;;  %v7813_v51 = vld [vmem:[%s13030_s0 + $0x90] ss:$8 sps:$4 sm:$0xff]   ;;  %v13128_v38 = vld [vmem:[#allocation112_spill] sm:$0xff]  ;;  %v13130_v24 = vld [vmem:[#allocation101_spill] sm:$0xff]  ;;  %v4007_v6 = vpop.f32.mrf.mxu1 }
 0x4e0   : > { %v11269_v60 = vadd.f32 %v13127_v47, %v4479_v57  ;;  %v4004_v26 = vadd.f32 %v4003_v33, %v10288_v2  ;;  %v3893_v59 = vadd.f32 %v3892_v8, %v10007_v40  ;;  %5849 = vmatpush2.bf16.msra.mxu0 %v7807_v54  ;;  %v4256_v36 = vadd.f32 %v10654_v23, %v4002_v34  ;;  %v7821_v57 = vld [vmem:[%s13030_s0 + $0x84] ss:$8 sps:$4 sm:$0xff]   ;;  %v13133_v54 = vld [vmem:[#allocation119_spill] sm:$0xff] }
 0x4e1   : > { %13126 = vst [vmem:[#allocation36_spill] sm:$0xff] %v11266_v27  ;;  %v11275_v31 = vadd.f32 %v13128_v38, %v4481_v22  ;;  %v4482_v14 = vadd.f32 %v13130_v24, %v4254_v11  ;;  %v4255_v12 = vadd.f32 %v13131_v32, %v3891_v56  ;;  %5850 = vmatprep.subr.bf16.mxu0 %v7815_v3  ;;  %v4982_v33 = vsel %vm1474_vm2, %v4875_v16, 0.0  ;;  %v13132_v28 = vld [vmem:[#allocation148_spill] sm:$0xff]  ;;  %v13134_v38 = vld [vmem:[#allocation53_spill] sm:$0xff]  ;;  %v13136_v32 = vld [vmem:[#allocation103_spill] sm:$0xff] }
 0x4e2   : > { %v4932_v47 = vadd.f32 %v4931_v30, %v4873_v46  ;;  %v4257_v8 = vadd.f32 %v13132_v28, %v4004_v26  ;;  %v4258_v39 = vadd.f32 %v13133_v54, %v3893_v59  ;;  %5950 = vmatpush1.bf16.msra.mxu1 %v7810_v4  ;;  %v7816_v22 = vld [vmem:[%s13030_s0 + $0x180] ss:$8 sps:$4 sm:$0xff]   ;;  %v4484_v34 = vadd.f32 %v13136_v32, %v4256_v36  ;;  %v3898_v30 = vpop.f32.mrf.mxu0  ;;  %v13137_v16 = vld [vmem:[#allocation102_spill] sm:$0xff]  ;;  %v4011_v54 = vpop.f32.mrf.mxu1 }
 0x4e3   : > { %13129 = vst [vmem:[#allocation29_spill] sm:$0xff] %v11275_v31  ;;  %v4879_v11 = vmul.f32 %v11275_v31, %v11275_v31  ;;  %v11288_v23 = vadd.f32 %v13134_v38, %v4482_v14  ;;  %v4006_v3 = vadd.f32 %v4005_v0, %v10242_v9  ;;  %5965 = vmatprep.subr.bf16.mxu1 %v7818_v61  ;;  %v13138_v56 = vld [vmem:[#allocation104_spill] sm:$0xff]  ;;  %v4816_v14 = vsel %vm1474_vm2, %v11275_v31, 0.0  ;;  %v13139_v61 = vld [vmem:[#allocation133_spill] sm:$0xff] }
 0x4e4   : > { %v4878_v46 = vmul.f32 %v11266_v27, %v11266_v27  ;;  %v4877_v28 = vmul.f32 %v11269_v60, %v11269_v60  ;;  %v4483_v4 = vadd.f32 %v13137_v16, %v4255_v12  ;;  %v4485_v26 = vadd.f32 %v13138_v56, %v4257_v8  ;;  %5851 = vmatpush2.bf16.msra.mxu0 %v7813_v51  ;;  %v7819_v59 = vld [vmem:[%s13030_s0 + $0x80] ss:$8 sps:$4 sm:$0xff]  }
 0x4e5   : > { %13135 = vst [vmem:[#allocation82_spill] sm:$0xff] %v11288_v23  ;;  %v4983_v24 = vadd.f32 %v4982_v33, %v11226_v58  ;;  %v4880_v0 = vmul.f32 %v11288_v23, %v11288_v23  ;;  %v4486_v36 = vadd.f32 %v13139_v61, %v4258_v39  ;;  %5852 = vmatprep.subr.bf16.mxu0 %v7821_v57  ;;  %v4984_v12 = vsel %vm1474_vm2, %v4879_v11, 0.0  ;;  %v13140_v32 = vld [vmem:[#allocation16_spill] sm:$0xff]  ;;  %v13142_v16 = vld [vmem:[#allocation57_spill] sm:$0xff] }
 0x4e6   : > { %v4912_v38 = vadd.f32 %v11235_v18, %v4876_v50  ;;  %v11308_v8 = vadd.f32 %v13140_v32, %v4484_v34  ;;  %v3895_v51 = vadd.f32 %v3894_v37, %v10268_v44  ;;  %5966 = vmatpush2.bf16.msra.mxu1 %v7816_v22  ;;  %v4786_v58 = vadd.f32 %v11238_v29, %v11266_v27  ;;  %v13144_v57 = vld [vmem:[#allocation120_spill] sm:$0xff]  ;;  %v3900_v18 = vpop.f32.mrf.mxu0  ;;  %v13146_v32 = vld [vmem:[#allocation62_spill] sm:$0xff]  ;;  %v13148_v27 = vld [vmem:[#allocation67_spill] sm:$0xff] }
 0x4e7   : > { %v4765_v33 = vadd.f32 %v11241_v13, %v11269_v60  ;;  %v11316_v39 = vadd.f32 %v13142_v16, %v4483_v4  ;;  %v4260_v56 = vadd.f32 %v13144_v57, %v4006_v3  ;;  %v13145_v50 = vmov 0   ;;  %v4013_v16 = vpop.f32.mrf.mxu1 }
 0x4e8   : > { %13141 = vst [vmem:[#allocation81_spill] sm:$0xff] %v11308_v8  ;;  %7492 = vmatprep.subr.bf16.mxu1 %v13145_v50  ;;  %v4954_v11 = vadd.f32 %v4953_v63, %v4878_v46  ;;  %v4933_v34 = vadd.f32 %v4932_v47, %v4877_v28  ;;  %v4817_v61 = vadd.f32 %v4816_v14, %v4815_v42  ;;  %v13150_v42 = vld [vmem:[#allocation135_spill] sm:$0xff]  ;;  %v13151_v46 = vld [vmem:[#allocation121_spill] sm:$0xff] }
 0x4e9   : > { %13143 = vst [vmem:[#allocation30_spill] sm:$0xff] %v11316_v39  ;;  %v11321_v37 = vadd.f32 %v13146_v32, %v4485_v26  ;;  %5853 = vmatpush2.bf16.msra.mxu0 %v7819_v59  ;;  %v4985_v22 = vadd.f32 %v4984_v12, %v4983_v24  ;;  %v4745_v29 = vadd.f32 %v11254_v35, %v11288_v23  ;;  %v3902_v24 = vpop.f32.mrf.mxu0 }
 0x4ea   : > { %v4913_v13 = vadd.f32 %v4912_v38, %v4880_v0  ;;  %v11326_v4 = vadd.f32 %v13148_v27, %v4486_v36  ;;  %6584 = vmatprep.subr.bf16.mxu0 %v13145_v50  ;;  %v4787_v3 = vadd.f32 %v4786_v58, %v11308_v8  ;;  %v4882_v63 = vmul.f32 %v11308_v8, %v11308_v8  ;;  %v13152_v0 = vld [vmem:[#allocation134_spill] sm:$0xff] }
 0x4eb   : > { %13147 = vst [vmem:[#allocation33_spill] sm:$0xff] %v11321_v37  ;;  %v4488_v47 = vadd.f32 %v13150_v42, %v4260_v56  ;;  %v4259_v28 = vadd.f32 %v13151_v46, %v3895_v51  ;;  %v4766_v26 = vadd.f32 %v4765_v33, %v11316_v39  ;;  %v4881_v35 = vmul.f32 %v11316_v39, %v11316_v39  ;;  %v13153_v51 = vld [vmem:[#allocation69_spill] sm:$0xff]  ;;  %v13156_v56 = vld [vmem:[#allocation126_spill] sm:$0xff]  ;;  %v13157_v46 = vld [vmem:[#allocation68_spill] sm:$0xff] }
 0x4ec   : > { %13149 = vst [vmem:[#allocation85_spill] sm:$0xff] %v11326_v4  ;;  %v4008_v27 = vadd.f32 %v4007_v6, %v10288_v2  ;;  %v3899_v59 = vadd.f32 %v3898_v30, %v10007_v40  ;;  %v4883_v14 = vmul.f32 %v11321_v37, %v11321_v37  ;;  %v4012_v38 = vadd.f32 %v4011_v54, %v10242_v9  ;;  %v13155_v33 = vld [vmem:[#allocation125_spill] sm:$0xff]  ;;  %v4015_v30 = vpop.f32.mrf.mxu1 }
 0x4ed   : > { %v4487_v36 = vadd.f32 %v13152_v0, %v4259_v28  ;;  %v3901_v12 = vadd.f32 %v3900_v18, %v10268_v44  ;;  %v11345_v58 = vadd.f32 %v13153_v51, %v4488_v47  ;;  %v4014_v6 = vadd.f32 %v4013_v16, %v10288_v2  ;;  %v13159_v28 = vld [vmem:[#allocation127_spill] sm:$0xff]  ;;  %v13160_v0 = vld [vmem:[#allocation136_spill] sm:$0xff]  ;;  %v13161_v51 = vld [vmem:[#allocation145_spill] sm:$0xff] }
 0x4ee   : > { %v4261_v57 = vadd.f32 %v13155_v33, %v4008_v27  ;;  %v4262_v32 = vadd.f32 %v13156_v56, %v3899_v59  ;;  %v4818_v42 = vsel %vm1474_vm2, %v11321_v37, 0.0  ;;  %v4264_v54 = vadd.f32 %v13159_v28, %v4012_v38  ;;  %v13162_v27 = vld [vmem:[#allocation128_spill] sm:$0xff]  ;;  %v13163_v59 = vld [vmem:[#allocation139_spill] sm:$0xff]  ;;  %v13165_v38 = vld [vmem:[#allocation70_spill] sm:$0xff] }
 0x4ef   : > { %13154 = vst [vmem:[#allocation34_spill] sm:$0xff] %v11345_v58  ;;  %v11353_v50 = vadd.f32 %v13157_v46, %v4487_v36  ;;  %v3903_v18 = vadd.f32 %v3902_v24, %v10007_v40  ;;  %v4263_v33 = vadd.f32 %v13162_v27, %v3901_v12  ;;  %v4265_v56 = vadd.f32 %v13163_v59, %v4014_v6  ;;  %v13164_v36 = vld [vmem:[#allocation147_spill] sm:$0xff]  ;;  %v3904_v12 = vpop.f32.mrf.mxu0  ;;  %v13170_v6 = vld [vmem:[#allocation146_spill] sm:$0xff] }
 0x4f0   : > { %v4489_v47 = vadd.f32 %v13160_v0, %v4261_v57  ;;  %v4490_v8 = vadd.f32 %v13161_v51, %v4262_v32  ;;  %v4955_v16 = vadd.f32 %v4954_v11, %v4882_v63  ;;  %v4986_v23 = vsel %vm1474_vm2, %v4883_v14, 0.0  ;;  %v13167_v32 = vld [vmem:[#allocation149_spill] sm:$0xff]  ;;  %v4017_v0 = vpop.f32.mrf.mxu1  ;;  %v13168_v63 = vld [vmem:[#allocation150_spill] sm:$0xff] }
 0x4f1   : > { %13158 = vst [vmem:[#allocation83_spill] sm:$0xff] %v11353_v50  ;;  %v4884_v37 = vmul.f32 %v11326_v4, %v11326_v4  ;;  %v4492_v46 = vadd.f32 %v13164_v36, %v4264_v54  ;;  %v4819_v39 = vadd.f32 %v4818_v42, %v4817_v61  ;;  %v4886_v24 = vmul.f32 %v11345_v58, %v11345_v58  ;;  %v13171_v54 = vld [vmem:[#allocation154_spill] sm:$0xff] }
 0x4f2   : > { %v11368_v57 = vadd.f32 %v13165_v38, %v4489_v47  ;;  %v4493_v28 = vadd.f32 %v13167_v32, %v4265_v56  ;;  %v4885_v11 = vmul.f32 %v11353_v50, %v11353_v50  ;;  %v11374_v14 = vadd.f32 %v13168_v63, %v4490_v8  ;;  %v13172_v32 = vld [vmem:[#allocation152_spill] sm:$0xff]  ;;  %v13174_v63 = vld [vmem:[#allocation153_spill] sm:$0xff] }
 0x4f3   : > { %v4491_v51 = vadd.f32 %v13170_v6, %v4263_v33  ;;  %v4266_v61 = vadd.f32 %v13171_v54, %v3903_v18  ;;  %v4934_v42 = vadd.f32 %v4933_v34, %v4881_v35  ;;  %v4987_v27 = vadd.f32 %v4986_v23, %v4985_v22  ;;  %v13176_v23 = vld [vmem:[#allocation113_spill] sm:$0xff]  ;;  %v3908_v22 = vpop.f32.mrf.mxu0 }
 0x4f4   : > { %13166 = vst [vmem:[#allocation87_spill] sm:$0xff] %v11368_v57  ;;  %13169 = vst [vmem:[#allocation84_spill] sm:$0xff] %v11374_v14  ;;  %v4746_v59 = vadd.f32 %v4745_v29, %v11326_v4  ;;  %v4016_v47 = vadd.f32 %v4015_v30, %v10242_v9  ;;  %v4914_v36 = vadd.f32 %v4913_v13, %v4884_v37  ;;  %v4820_v38 = vsel %vm1474_vm2, %v11368_v57, 0.0  ;;  %v4021_v29 = vpop.f32.mrf.mxu1 }
 0x4f5   : > { %v4788_v56 = vadd.f32 %v4787_v3, %v11345_v58  ;;  %v11384_v31 = vadd.f32 %v13172_v32, %v4492_v46  ;;  %v4956_v8 = vadd.f32 %v4955_v16, %v4886_v24  ;;  %v4767_v33 = vadd.f32 %v4766_v26, %v11353_v50  ;;  %v13177_v3 = vld [vmem:[#allocation151_spill] sm:$0xff]  ;;  %v13180_v32 = vld [vmem:[#allocation156_spill] sm:$0xff] }
 0x4f6   : > { %v11388_v18 = vadd.f32 %v13174_v63, %v4493_v28  ;;  %v4494_v34 = vadd.f32 %v13176_v23, %v4266_v61  ;;  %v4935_v35 = vadd.f32 %v4934_v42, %v4885_v11  ;;  %v4887_v37 = vmul.f32 %v11368_v57, %v11368_v57  ;;  %v13178_v46 = vld [vmem:[#allocation155_spill] sm:$0xff]  ;;  %v4023_v63 = vpop.f32.mrf.mxu1 }
 0x4f7   : > { %13173 = vst [vmem:[#allocation60_spill] sm:$0xff] %v11384_v31  ;;  %v4888_v13 = vmul.f32 %v11374_v14, %v11374_v14  ;;  %v11396_v30 = vadd.f32 %v13177_v3, %v4491_v51  ;;  %v4821_v16 = vadd.f32 %v4820_v38, %v4819_v39  ;;  %v4747_v26 = vadd.f32 %v4746_v59, %v11374_v14  ;;  %v13179_v42 = vld [vmem:[#allocation115_spill] sm:$0xff]  ;;  %v13181_v38 = vld [vmem:[#allocation158_spill] sm:$0xff] }
 0x4f8   : > { %13175 = vst [vmem:[#allocation38_spill] sm:$0xff] %v11388_v18  ;;  %v4268_v24 = vadd.f32 %v13178_v46, %v4016_v47  ;;  %v3905_v28 = vadd.f32 %v3904_v12, %v10268_v44  ;;  %v4789_v6 = vadd.f32 %v4788_v56, %v11384_v31  ;;  %v4890_v11 = vmul.f32 %v11384_v31, %v11384_v31  ;;  %v3910_v12 = vpop.f32.mrf.mxu0  ;;  %v13183_v46 = vld [vmem:[#allocation157_spill] sm:$0xff]  ;;  %v13195_v57 = vld [vmem:[#allocation131_spill] sm:$0xff]  ;;  %v4025_v50 = vpop.f32.mrf.mxu1 }
 0x4f9   : > { %v4891_v54 = vmul.f32 %v11388_v18, %v11388_v18  ;;  %v4018_v61 = vadd.f32 %v4017_v0, %v10288_v2  ;;  %v11410_v59 = vadd.f32 %v13181_v38, %v4494_v34  ;;  %v3909_v47 = vadd.f32 %v3908_v22, %v10007_v40 }
 0x4fa   : > { %v4496_v51 = vadd.f32 %v13179_v42, %v4268_v24  ;;  %v4267_v39 = vadd.f32 %v13180_v32, %v3905_v28  ;;  %v4988_v56 = vsel %vm1474_vm2, %v4887_v37, 0.0  ;;  %v4915_v23 = vadd.f32 %v4914_v36, %v4888_v13  ;;  %v13184_v24 = vld [vmem:[#allocation114_spill] sm:$0xff]  ;;  %v13185_v32 = vld [vmem:[#allocation116_spill] sm:$0xff]  ;;  %v13186_v13 = vld [vmem:[#allocation159_spill] sm:$0xff] }
 0x4fb   : > { %13182 = vst [vmem:[#allocation86_spill] sm:$0xff] %v11410_v59  ;;  %v4889_v3 = vmul.f32 %v11396_v30, %v11396_v30  ;;  %v4269_v31 = vadd.f32 %v13183_v46, %v4018_v61  ;;  %v4822_v0 = vsel %vm1474_vm2, %v11388_v18, 0.0  ;;  %v4270_v34 = vadd.f32 %v10728_v52, %v3909_v47  ;;  %v13187_v61 = vld [vmem:[#allocation160_spill] sm:$0xff]  ;;  %v13189_v52 = vld [vmem:[#allocation129_spill] sm:$0xff] }
 0x4fc   : > { %v4495_v28 = vadd.f32 %v13184_v24, %v4267_v39  ;;  %v4022_v42 = vadd.f32 %v4021_v29, %v10242_v9  ;;  %v4990_v22 = vsel %vm1474_vm2, %v4891_v54, 0.0  ;;  %v3911_v36 = vadd.f32 %v3910_v12, %v10268_v44  ;;  %v13190_v29 = vld [vmem:[#allocation161_spill] sm:$0xff]  ;;  %v13192_v54 = vld [vmem:[#allocation162_spill] sm:$0xff]  ;;  %v13194_v18 = vld [vmem:[#allocation164_spill] sm:$0xff] }
 0x4fd   : > { %v4497_v38 = vadd.f32 %v13185_v32, %v4269_v31  ;;  %v4024_v37 = vadd.f32 %v4023_v63, %v10288_v2  ;;  %v11430_v46 = vadd.f32 %v13187_v61, %v4496_v51  ;;  %v4892_v39 = vmul.f32 %v11410_v59, %v11410_v59  ;;  %v13193_v32 = vld [vmem:[#allocation163_spill] sm:$0xff] }
 0x4fe   : > { %v11427_v14 = vadd.f32 %v13186_v13, %v4495_v28  ;;  %v4498_v47 = vadd.f32 %v13189_v52, %v4270_v34  ;;  %v4272_v31 = vadd.f32 %v13192_v54, %v4022_v42  ;;  %v4271_v12 = vadd.f32 %v13193_v32, %v3911_v36  ;;  %v13196_v52 = vld [vmem:[#allocation130_spill] sm:$0xff]  ;;  %v4027_v32 = vpop.f32.mrf.mxu1 }
 0x4ff   : > { %13188 = vst [vmem:[#allocation88_spill] sm:$0xff] %v11430_v46  ;;  %v11436_v24 = vadd.f32 %v13190_v29, %v4497_v38  ;;  %v4273_v63 = vadd.f32 %v13194_v18, %v4024_v37  ;;  %v4989_v58 = vadd.f32 %v4988_v56, %v4987_v27  ;;  %v4957_v28 = vadd.f32 %v4956_v8, %v4890_v11  ;;  %v3912_v29 = vpop.f32.mrf.mxu0  ;;  %v13197_v8 = vld [vmem:[#allocation132_spill] sm:$0xff]  ;;  %v13202_v54 = vld [vmem:[#allocation166_spill] sm:$0xff] }
 0x500   : > { %v4768_v13 = vadd.f32 %v4767_v33, %v11396_v30  ;;  %v4936_v51 = vadd.f32 %v4935_v35, %v4889_v3  ;;  %v4823_v61 = vadd.f32 %v4822_v0, %v4821_v16  ;;  %v4500_v34 = vadd.f32 %v13195_v57, %v4272_v31  ;;  %v13198_v57 = vld [vmem:[#allocation165_spill] sm:$0xff] }
 0x501   : > { %13191 = vst [vmem:[#allocation90_spill] sm:$0xff] %v11436_v24  ;;  %v4895_v4 = vmul.f32 %v11436_v24, %v11436_v24  ;;  %v4499_v38 = vadd.f32 %v13196_v52, %v4271_v12  ;;  %v4991_v42 = vadd.f32 %v4990_v22, %v4989_v58  ;;  %v4893_v36 = vmul.f32 %v11427_v14, %v11427_v14  ;;  %v13200_v58 = vld [vmem:[#allocation168_spill] sm:$0xff]  ;;  %v13206_v52 = vld [vmem:[#allocation169_spill] sm:$0xff] }
 0x502   : > { %v4894_v27 = vmul.f32 %v11430_v46, %v11430_v46  ;;  %v4501_v33 = vadd.f32 %v13197_v8, %v4273_v63  ;;  %v4748_v18 = vadd.f32 %v4747_v26, %v11410_v59  ;;  %v4824_v35 = vsel %vm1474_vm2, %v11436_v24, 0.0 }
 0x503   : > { %v4916_v16 = vadd.f32 %v4915_v23, %v4892_v39  ;;  %v11455_v11 = vadd.f32 %v13198_v57, %v4498_v47  ;;  %v4790_v56 = vadd.f32 %v4789_v6, %v11430_v46  ;;  %v3913_v0 = vadd.f32 %v3912_v29, %v10007_v40  ;;  %v13204_v23 = vld [vmem:[#allocation167_spill] sm:$0xff]  ;;  %v3914_v47 = vpop.f32.mrf.mxu0 }
 0x504   : > { %v11459_v3 = vadd.f32 %v13200_v58, %v4501_v33  ;;  %v4026_v22 = vadd.f32 %v4025_v50, %v10242_v9  ;;  %v4769_v37 = vadd.f32 %v4768_v13, %v11427_v14  ;;  %v4992_v26 = vsel %vm1474_vm2, %v4895_v4, 0.0 }
 0x505   : > { %13199 = vst [vmem:[#allocation91_spill] sm:$0xff] %v11455_v11  ;;  %v11466_v31 = vadd.f32 %v13202_v54, %v4499_v38  ;;  %v11469_v39 = vadd.f32 %v13204_v23, %v4500_v34  ;;  %v4825_v6 = vadd.f32 %v4824_v35, %v4823_v61  ;;  %v4937_v12 = vadd.f32 %v4936_v51, %v4893_v36  ;;  %v13207_v34 = vld [vmem:[#allocation140_spill] sm:$0xff] }
 0x506   : > { %13201 = vst [vmem:[#allocation41_spill] sm:$0xff] %v11459_v3  ;;  %v4958_v63 = vadd.f32 %v4957_v28, %v4894_v27  ;;  %v4274_v8 = vadd.f32 %v13206_v52, %v3913_v0  ;;  %v4749_v40 = vadd.f32 %v4748_v18, %v11455_v11  ;;  %v4896_v9 = vmul.f32 %v11455_v11, %v11455_v11  ;;  %v13208_v27 = vld [vmem:[#allocation142_spill] sm:$0xff]  ;;  %v13210_v0 = vld [vmem:[#allocation141_spill] sm:$0xff]  ;;  %v13214_v52 = vld [vmem:[#allocation24_spill] sm:$0xff] }
 0x507   : > { %13203 = vst [vmem:[#allocation89_spill] sm:$0xff] %v11466_v31  ;;  %13205 = vst [vmem:[#allocation39_spill] sm:$0xff] %v11469_v39  ;;  %v4899_v50 = vmul.f32 %v11459_v3, %v11459_v3  ;;  %v4276_v4 = vadd.f32 %v10779_v41, %v4026_v22  ;;  %v4993_v13 = vadd.f32 %v4992_v26, %v4991_v42  ;;  %v4826_v18 = vsel %vm1474_vm2, %v11459_v3, 0.0 }
 0x508   : > { %v4502_v38 = vadd.f32 %v13207_v34, %v4274_v8  ;;  %v3915_v29 = vadd.f32 %v3914_v47, %v10268_v44  ;;  %v4028_v51 = vadd.f32 %v4027_v32, %v10288_v2  ;;  %v4770_v28 = vadd.f32 %v4769_v37, %v11466_v31  ;;  %v13211_v37 = vld [vmem:[#allocation143_spill] sm:$0xff]  ;;  %v13212_v47 = vld [vmem:[#allocation26_spill] sm:$0xff] }
 0x509   : > { %v4791_v61 = vadd.f32 %v4790_v56, %v11469_v39  ;;  %v4898_v36 = vmul.f32 %v11469_v39, %v11469_v39  ;;  %v4504_v33 = vadd.f32 %v13208_v27, %v4276_v4  ;;  %v4897_v2 = vmul.f32 %v11466_v31, %v11466_v31  ;;  %v13209_v56 = vld [vmem:[#allocation176_spill] sm:$0xff] }
 0x50a   : > { %v4275_v41 = vadd.f32 %v10783_v7, %v3915_v29  ;;  %v4277_v42 = vadd.f32 %v10787_v53, %v4028_v51  ;;  %v11491_v44 = vadd.f32 %v10801_v5, %v4502_v38  ;;  %v4917_v35 = vadd.f32 %v4916_v16, %v4896_v9 }
 0x50b   : > { %v4994_v57 = vsel %vm1474_vm2, %v4899_v50, 0.0  ;;  %v11497_v58 = vadd.f32 %v13209_v56, %v4504_v33  ;;  %v4827_v5 = vadd.f32 %v4826_v18, %v4825_v6  ;;  %v4959_v54 = vadd.f32 %v4958_v63, %v4898_v36 }
 0x50c   : > { %v4503_v22 = vadd.f32 %v13210_v0, %v4275_v41  ;;  %v4505_v26 = vadd.f32 %v13211_v37, %v4277_v42  ;;  %v4750_v7 = vadd.f32 %v4749_v40, %v11491_v44  ;;  %v4900_v53 = vmul.f32 %v11491_v44, %v11491_v44 }
 0x50d   : > { %v4792_v23 = vadd.f32 %v4791_v61, %v11497_v58  ;;  %v4902_v16 = vmul.f32 %v11497_v58, %v11497_v58  ;;  %v4938_v4 = vadd.f32 %v4937_v12, %v4897_v2  ;;  %v4995_v40 = vadd.f32 %v4994_v57, %v4993_v13 }
 0x50e   : > { %v11508_v32 = vadd.f32 %v13212_v47, %v4503_v22  ;;  %v11511_v8 = vadd.f32 %v13214_v52, %v4505_v26  ;;  %v4751_v9 = vrot.slane %v4750_v7, 4  ;;  %v4918_v50 = vadd.f32 %v4917_v35, %v4900_v53 }
 0x50f   : > { %v4793_v34 = vrot.slane %v4792_v23, 4  ;;  %v4960_v38 = vadd.f32 %v4959_v54, %v4902_v16 }
 0x510   : > { %13213 = vst [vmem:[#allocation92_spill] sm:$0xff] %v11508_v32  ;;  %v4752_v29 = vadd.f32 %v4751_v9, %v4750_v7  ;;  %v4771_v6 = vadd.f32 %v4770_v28, %v11508_v32  ;;  %v4828_v63 = vsel %vm1474_vm2, %v11511_v8, 0.0  ;;  %v4901_v51 = vmul.f32 %v11508_v32, %v11508_v32 }
 0x511   : > { %v4794_v61 = vadd.f32 %v4793_v34, %v4792_v23  ;;  %v4829_v36 = vadd.f32 %v4828_v63, %v4827_v5  ;;  %v4903_v27 = vmul.f32 %v11511_v8, %v11511_v8  ;;  %v4919_v33 = vrot.slane %v4918_v50, 4 }
 0x512   : > { %v4753_v18 = vrot.slane %v4752_v29, 2  ;;  %v4772_v12 = vrot.slane %v4771_v6, 4  ;;  %v4939_v13 = vadd.f32 %v4938_v4, %v4901_v51  ;;  %v4961_v41 = vrot.slane %v4960_v38, 4 }
 0x513   : > { %v4795_v42 = vrot.slane %v4794_v61, 2  ;;  %v4830_v2 = vrot.slane %v4829_v36, 4  ;;  %v4920_v35 = vadd.f32 %v4919_v33, %v4918_v50  ;;  %v4996_v28 = vsel %vm1474_vm2, %v4903_v27, 0.0 }
 0x514   : > { %v4754_v57 = vadd.f32 %v4753_v18, %v4752_v29  ;;  %v4773_v56 = vadd.f32 %v4772_v12, %v4771_v6  ;;  %v4940_v0 = vrot.slane %v4939_v13, 4  ;;  %v4962_v22 = vadd.f32 %v4961_v41, %v4960_v38 }
 0x515   : > { %v4796_v37 = vadd.f32 %v4795_v42, %v4794_v61  ;;  %v4831_v26 = vadd.f32 %v4830_v2, %v4829_v36  ;;  %v4921_v7 = vrot.slane %v4920_v35, 2  ;;  %v4997_v53 = vadd.f32 %v4996_v28, %v4995_v40 }
 0x516   : > { %v4755_v5 = vrot.slane %v4754_v57, 1  ;;  %v4774_v54 = vrot.slane %v4773_v56, 2  ;;  %v4941_v23 = vadd.f32 %v4940_v0, %v4939_v13  ;;  %v4963_v16 = vrot.slane %v4962_v22, 2 }
 0x517   : > { %v4797_v47 = vrot.slane %v4796_v37, 1  ;;  %v4832_v52 = vrot.slane %v4831_v26, 2  ;;  %v4922_v9 = vadd.f32 %v4921_v7, %v4920_v35  ;;  %v4998_v4 = vrot.slane %v4997_v53, 4 }
 0x518   : > { %v4756_v34 = vadd.f32 %v4755_v5, %v4754_v57  ;;  %v4775_v50 = vadd.f32 %v4774_v54, %v4773_v56  ;;  %v4942_v63 = vrot.slane %v4941_v23, 2  ;;  %v4964_v51 = vadd.f32 %v4963_v16, %v4962_v22 }
 0x519   : > { %v4798_v29 = vadd.f32 %v4797_v47, %v4796_v37  ;;  %v4833_v6 = vadd.f32 %v4832_v52, %v4831_v26  ;;  %v4923_v27 = vrot.slane %v4922_v9, 1  ;;  %v4999_v38 = vadd.f32 %v4998_v4, %v4997_v53 }
 0x51a   : > { %v4776_v61 = vrot.slane %v4775_v50, 1  ;;  %v4836_v36 = vmul.f32 0.0078125, %v4756_v34  ;;  %v4943_v33 = vadd.f32 %v4942_v63, %v4941_v23  ;;  %v4965_v40 = vrot.slane %v4964_v51, 1 }
 0x51b   : > { %v4834_v18 = vrot.slane %v4833_v6, 1  ;;  %v4838_v12 = vmul.f32 0.0078125, %v4798_v29  ;;  %v4924_v13 = vadd.f32 %v4923_v27, %v4922_v9  ;;  %v5000_v41 = vrot.slane %v4999_v38, 2 }
 0x51c   : > { %v4777_v42 = vadd.f32 %v4776_v61, %v4775_v50  ;;  %v4944_v2 = vrot.slane %v4943_v33, 1  ;;  %v4966_v35 = vadd.f32 %v4965_v40, %v4964_v51  ;;  %v5008_v28 = vmul.f32 %v4836_v36, %v4836_v36 }
 0x51d   : > { %v4835_v57 = vadd.f32 %v4834_v18, %v4833_v6  ;;  %v5001_v56 = vadd.f32 %v5000_v41, %v4999_v38  ;;  %v5004_v0 = vmul.f32 0.0078125, %v4924_v13  ;;  %v5010_v22 = vmul.f32 %v4838_v12, %v4838_v12 }
 0x51e   : > { %v4837_v37 = vmul.f32 0.0078125, %v4777_v42  ;;  %v4945_v26 = vadd.f32 %v4944_v2, %v4943_v33  ;;  %v5006_v7 = vmul.f32 0.0078125, %v4966_v35  ;;  %v13216_v35 = vld [vmem:[#allocation59_spill] sm:$0xff] }
 0x51f   : > { %v4839_v53 = vmul.f32 0.0078125, %v4835_v57  ;;  %v5002_v5 = vrot.slane %v5001_v56, 1  ;;  %v5012_v54 = vsub.f32 %v5004_v0, %v5008_v28  ;;  %v4734_v0 = vld [vmem:[%s13215_s28] sm:$0xf]  ;;  %s12597_s28 = scalar_lea.vmem %s8163_s12, %s8181_s26 }
 0x520   : > { %v5005_v23 = vmul.f32 0.0078125, %v4945_v26  ;;  %v5009_v16 = vmul.f32 %v4837_v37, %v4837_v37  ;;  %v5014_v47 = vsub.f32 %v5006_v7, %v5010_v22  ;;  %v13217_v7 = vld [vmem:[#allocation17_spill] sm:$0xff] }
 0x521   : > { %v5003_v52 = vadd.f32 %v5002_v5, %v5001_v56  ;;  %v5011_v9 = vmul.f32 %v4839_v53, %v4839_v53  ;;  %v5016_v4 = vmax.f32 %v5012_v54, 0.0  ;;  %v13218_v54 = vld [vmem:[#allocation19_spill] sm:$0xff] }
 0x522   : > { %v5013_v34 = vsub.f32 %v5005_v23, %v5009_v16  ;;  %v5018_v50 = vmax.f32 %v5014_v47, 0.0  ;;  %v13219_v16 = vld [vmem:[#allocation18_spill] sm:$0xff] }
 0x523   : > { %v5007_v63 = vmul.f32 0.0078125, %v5003_v52  ;;  %v5020_v51 = vadd.f32 1e-05, %v5016_v4  ;;  %v13220_v52 = vld [vmem:[#allocation20_spill] sm:$0xff] }
 0x524   : > { %v5017_v29 = vmax.f32 %v5013_v34, 0.0  ;;  %v5022_v38 = vadd.f32 1e-05, %v5018_v50 }
 0x525   : > { %v5015_v6 = vsub.f32 %v5007_v63, %v5011_v9  ;;  %7879 = vrsqrt.f32 %v5020_v51 }
 0x526   : > { %v5021_v27 = vadd.f32 1e-05, %v5017_v29 }
 0x527   : > { %v5019_v61 = vmax.f32 %v5015_v6, 0.0 }
 0x528   : > { %7881 = vrsqrt.f32 %v5021_v27  ;;  %v13224_v27 = vld [vmem:[#allocation173_spill] sm:$0xff] }
 0x529   : > { %v5023_v33 = vadd.f32 1e-05, %v5019_v61  ;;  %7883 = vrsqrt.f32 %v5022_v38  ;;  %v13226_v61 = vld [vmem:[#allocation170_spill] sm:$0xff] }
 0x52b   : > { %7885 = vrsqrt.f32 %v5023_v33  ;;  %v13227_v33 = vld [vmem:[#allocation63_spill] sm:$0xff] }
 0x532   : > { %v7880_v40 = vpop.eup %7879 }
 0x535   : > { %v7882_v18 = vpop.eup %7881 }
 0x536   : > { %v5032_v13 = vcombine.low %v7880_v40, %v7882_v18  ;;  %v7884_v41 = vpop.eup %7883 }
 0x538   : > { %v7886_v42 = vpop.eup %7885  ;;  %v5040_v28 = vrot.slane %v5032_v13, %v13216_v35 }
 0x539   : > { %v5033_v2 = vcombine.low %v7884_v41, %v7886_v42  ;;  %v13231_v41 = vld [vmem:[#allocation172_spill] sm:$0xff] }
 0x53b   : > { %v5047_v57 = vrot.slane %v5033_v2, %v13216_v35 }
 0x53d   : > { %v5048_v56 = vcombine.low %v5040_v28, %v5047_v57  ;;  %v13232_v57 = vld [vmem:[#allocation175_spill] sm:$0xff] }
 0x53f   : > { %v5055_v22 = vrot.slane %v5048_v56, %v13216_v35 }
 0x541   : > { %v5057_v26 = vmul.f32 %v5055_v22, %v4734_v0 }
 0x543   : > { %v11526_v5 = vrot.slane %v5057_v26, %v13217_v7  ;;  %v11529_v23 = vrot.slane %v5057_v26, %v13218_v54  ;;  %v11532_v47 = vrot.slane %v5057_v26, %v13219_v16  ;;  %v11535_v9 = vrot.slane %v5057_v26, %v13220_v52 }
 0x545   : > { %v5079_v4 = vmul.f32 %v11526_v5, %v4836_v36  ;;  %v5080_v34 = vmul.f32 %v11529_v23, %v4837_v37  ;;  %v5081_v50 = vmul.f32 %v11532_v47, %v4838_v12  ;;  %v5082_v63 = vmul.f32 %v11535_v9, %v4839_v53  ;;  %v13225_v12 = vld [vmem:[#allocation22_spill] sm:$0xff] }
 0x546   : > { %v11543_v51 = vmul.f32 %v11526_v5, %v11491_v44  ;;  %v11547_v29 = vmul.f32 %v11532_v47, %v11497_v58  ;;  %v11551_v6 = vmul.f32 %v11535_v9, %v11511_v8  ;;  %v5114_v36 = vmul.f32 %v11529_v23, %v13224_v27  ;;  %v13228_v58 = vld [vmem:[#allocation171_spill] sm:$0xff]  ;;  %v13230_v8 = vld [vmem:[#allocation174_spill] sm:$0xff] }
 0x547   : > { %v5087_v37 = vcombine.low %v5079_v4, %v5080_v34  ;;  %v5088_v38 = vcombine.low %v5081_v50, %v5082_v63  ;;  %v5118_v53 = vmul.f32 %v11529_v23, %v13225_v12  ;;  %v5116_v44 = vmul.f32 %v11535_v9, %v13226_v61  ;;  %v13233_v4 = vld [vmem:[#allocation28_spill] sm:$0xff]  ;;  %v13237_v12 = vld [vmem:[#allocation31_spill] sm:$0xff] }
 0x548   : > { %13221 = vst [vmem:[#allocation43_spill] sm:$0xff] %v11543_v51  ;;  %13222 = vst [vmem:[#allocation61_spill] sm:$0xff] %v11547_v29  ;;  %v5120_v40 = vmul.f32 %v11535_v9, %v13227_v33  ;;  %v5113_v18 = vmul.f32 %v11526_v5, %v13228_v58  ;;  %v5117_v13 = vmul.f32 %v11526_v5, %v13230_v8  ;;  %v13234_v50 = vld [vmem:[#allocation64_spill] sm:$0xff]  ;;  %v13246_v29 = vld [vmem:[#allocation79_spill] sm:$0xff] }
 0x549   : > { %13223 = vst [vmem:[#allocation51_spill] sm:$0xff] %v11551_v6  ;;  %v5115_v42 = vmul.f32 %v11532_v47, %v13231_v41  ;;  %v5095_v2 = vrot.slane %v5087_v37, %v13216_v35  ;;  %v5102_v28 = vrot.slane %v5088_v38, %v13216_v35  ;;  %v5119_v56 = vmul.f32 %v11532_v47, %v13232_v57  ;;  %v13235_v37 = vld [vmem:[#allocation65_spill] sm:$0xff]  ;;  %v4735_v61 = vld [vmem:[%s13229_s1] sm:$0xf] }
 0x54a   : > { %v11573_v0 = vmul.f32 %v11529_v23, %v10881_v48  ;;  %v11577_v22 = vmul.f32 %v11529_v23, %v10926_v43  ;;  %v11581_v26 = vmul.f32 %v11535_v9, %v10904_v62  ;;  %v11585_v34 = vmul.f32 %v11535_v9, %v13233_v4  ;;  %v13236_v38 = vld [vmem:[#allocation21_spill] sm:$0xff] }
 0x54b   : > { %v11589_v63 = vmul.f32 %v11526_v5, %v13234_v50  ;;  %v5103_v27 = vcombine.low %v5095_v2, %v5102_v28  ;;  %v11593_v48 = vmul.f32 %v11526_v5, %v13235_v37  ;;  %v11597_v43 = vmul.f32 %v11532_v47, %v13236_v38  ;;  %v13238_v28 = vld [vmem:[#allocation32_spill] sm:$0xff] }
 0x54c   : > { %v11601_v62 = vmul.f32 %v11532_v47, %v13237_v12  ;;  %v11606_v33 = vmul.f32 %v11529_v23, %v10979_v10  ;;  %v11610_v58 = vmul.f32 %v11529_v23, %v11021_v15  ;;  %v11614_v8 = vmul.f32 %v11535_v9, %v10994_v20  ;;  %v13239_v10 = vld [vmem:[#allocation66_spill] sm:$0xff]  ;;  %v13240_v15 = vld [vmem:[#allocation35_spill] sm:$0xff] }
 0x54d   : > { %v11618_v41 = vmul.f32 %v11535_v9, %v11024_v55  ;;  %v5110_v2 = vrot.slane %v5103_v27, %v13216_v35  ;;  %v11623_v57 = vmul.f32 %v11526_v5, %v13238_v28  ;;  %v11627_v4 = vmul.f32 %v11526_v5, %v13239_v10  ;;  %v13241_v20 = vld [vmem:[#allocation71_spill] sm:$0xff]  ;;  %v13242_v10 = vld [vmem:[#allocation72_spill] sm:$0xff]  ;;  %v13244_v35 = vld [vmem:[#allocation73_spill] sm:$0xff] }
 0x54e   : > { %v11631_v50 = vmul.f32 %v11532_v47, %v13240_v15  ;;  %v11635_v37 = vmul.f32 %v11532_v47, %v13241_v20  ;;  %v11639_v55 = vmul.f32 %v11529_v23, %v11089_v19  ;;  %v11643_v27 = vmul.f32 %v11529_v23, %v11149_v1  ;;  %v13243_v20 = vld [vmem:[#allocation25_spill] sm:$0xff] }
 0x54f   : > { %v11647_v38 = vmul.f32 %v11535_v9, %v11092_v21  ;;  %v5112_v12 = vsub.f32 %v4735_v61, %v5110_v2  ;;  %v11651_v28 = vmul.f32 %v11535_v9, %v11131_v17  ;;  %v11655_v15 = vmul.f32 %v11526_v5, %v13242_v10 }
 0x550   : > { %v11659_v19 = vmul.f32 %v11526_v5, %v13243_v20  ;;  %v11663_v1 = vmul.f32 %v11532_v47, %v13244_v35  ;;  %v11667_v21 = vmul.f32 %v11532_v47, %v11143_v25  ;;  %v11671_v17 = vmul.f32 %v11529_v23, %v11203_v49  ;;  %v13245_v20 = vld [vmem:[#allocation29_spill] sm:$0xff] }
 0x551   : > { %v11675_v61 = vmul.f32 %v11529_v23, %v11269_v60  ;;  %v11678_v2 = vrot.slane %v5112_v12, %v13217_v7  ;;  %v11681_v10 = vrot.slane %v5112_v12, %v13218_v54  ;;  %v11684_v35 = vrot.slane %v5112_v12, %v13219_v16  ;;  %v13247_v54 = vld [vmem:[#allocation75_spill] sm:$0xff] }
 0x552   : > { %v11687_v25 = vrot.slane %v5112_v12, %v13220_v52  ;;  %v11691_v49 = vmul.f32 %v11535_v9, %v11206_v45  ;;  %v11695_v60 = vmul.f32 %v11535_v9, %v13245_v20  ;;  %v11699_v7 = vmul.f32 %v11526_v5, %v13246_v29 }
 0x553   : > { %v11703_v39 = vmul.f32 %v11526_v5, %v13247_v54  ;;  %v5199_v16 = vadd.f32 %v11681_v10, %v5114_v36  ;;  %v5203_v52 = vadd.f32 %v11681_v10, %v5118_v53  ;;  %v5198_v51 = vadd.f32 %v11678_v2, %v5113_v18 }
 0x554   : > { %v5201_v12 = vadd.f32 %v11687_v25, %v5116_v44  ;;  %v5205_v45 = vadd.f32 %v11687_v25, %v5120_v40  ;;  %v5202_v20 = vadd.f32 %v11678_v2, %v5117_v13  ;;  %v5200_v11 = vadd.f32 %v11684_v35, %v5115_v42 }
 0x555   : > { %v5204_v29 = vadd.f32 %v11684_v35, %v5119_v56  ;;  %vm5263_vm9 = vcmp.ge.f32.partialorder %v5199_v16, 0.0  ;;  %vm5267_vm10 = vcmp.ge.f32.partialorder %v5203_v52, 0.0  ;;  %v5327_v54 = vmul.f32 0.01, %v5199_v16 }
 0x556   : > { %v5331_v6 = vmul.f32 0.01, %v5203_v52  ;;  %vm5265_vm11 = vcmp.ge.f32.partialorder %v5201_v12, 0.0  ;;  %vm5269_vm12 = vcmp.ge.f32.partialorder %v5205_v45, 0.0  ;;  %v5329_v36 = vmul.f32 0.01, %v5201_v12 }
 0x557   : > { %v5333_v53 = vmul.f32 0.01, %v5205_v45  ;;  %v5391_v3 = vsel %vm5263_vm9, %v5199_v16, %v5327_v54  ;;  %vm5262_vm13 = vcmp.ge.f32.partialorder %v5198_v51, 0.0  ;;  %vm5266_vm14 = vcmp.ge.f32.partialorder %v5202_v20, 0.0 }
 0x558   : > { %v5395_v44 = vsel %vm5267_vm10, %v5203_v52, %v5331_v6  ;;  %v5393_v18 = vsel %vm5265_vm11, %v5201_v12, %v5329_v36  ;;  %v5326_v13 = vmul.f32 0.01, %v5198_v51  ;;  %v5330_v42 = vmul.f32 0.01, %v5202_v20 }
 0x559   : > { %v5455_v40 = vpack.c.bf16 %v5395_v44, %v5391_v3  ;;  %v5397_v32 = vsel %vm5269_vm12, %v5205_v45, %v5333_v53  ;;  %vm5264_vm15 = vcmp.ge.f32.partialorder %v5200_v11, 0.0  ;;  %vm5268_vm0 = vcmp.ge.f32.partialorder %v5204_v29, 0.0 }
 0x55a   : > { %v5457_v31 = vpack.c.bf16 %v5397_v32, %v5393_v18  ;;  %v5390_v56 = vsel %vm5262_vm13, %v5198_v51, %v5326_v13  ;;  %v5328_v46 = vmul.f32 0.01, %v5200_v11  ;;  %v5332_v59 = vmul.f32 0.01, %v5204_v29 }
 0x55b   : > { %5854 = vmatprep.mubr.bf16.mxu0 %v5455_v40  ;;  %v5207_v24 = vadd.f32 %v11681_v10, %v11573_v0  ;;  %v5394_v6 = vsel %vm5266_vm14, %v5202_v20, %v5330_v42  ;;  %v5211_v3 = vadd.f32 %v11681_v10, %v11577_v22  ;;  %v5209_v16 = vadd.f32 %v11687_v25, %v11581_v26 }
 0x55c   : > { %7460 = vmatprep.mubr.msk.bf16.mxu1 %vm1474_vm2, %v5457_v31  ;;  %v5213_v32 = vadd.f32 %v11687_v25, %v11585_v34  ;;  %v5454_v52 = vpack.c.bf16 %v5394_v6, %v5390_v56  ;;  %v5392_v12 = vsel %vm5264_vm15, %v5200_v11, %v5328_v46  ;;  %v5396_v51 = vsel %vm5268_vm0, %v5204_v29, %v5332_v59 }
 0x55d   : > { %vm5271_vm1 = vcmp.ge.f32.partialorder %v5207_v24, 0.0  ;;  %v5456_v45 = vpack.c.bf16 %v5396_v51, %v5392_v12  ;;  %vm5275_vm3 = vcmp.ge.f32.partialorder %v5211_v3, 0.0  ;;  %v5335_v54 = vmul.f32 0.01, %v5207_v24 }
 0x55e   : > { %v5339_v0 = vmul.f32 0.01, %v5211_v3  ;;  %5855 = vmatmul.mubr.bf16.vlgmr.msra.gmra.mxu0 %v5454_v52  ;;  %vm5273_vm4 = vcmp.ge.f32.partialorder %v5209_v16, 0.0  ;;  %vm5277_vm5 = vcmp.ge.f32.partialorder %v5213_v32, 0.0  ;;  %v5337_v31 = vmul.f32 0.01, %v5209_v16 }
 0x55f   : > { %v5341_v20 = vmul.f32 0.01, %v5213_v32  ;;  %5968 = vmatmul.mubr.bf16.vlgmr.msra.gmra.mxu1 %v5456_v45  ;;  %v5399_v22 = vsel %vm5271_vm1, %v5207_v24, %v5335_v54  ;;  %v5206_v26 = vadd.f32 %v11678_v2, %v11589_v63  ;;  %v5210_v46 = vadd.f32 %v11678_v2, %v11593_v48 }
 0x560   : > { %v5403_v36 = vsel %vm5275_vm3, %v5211_v3, %v5339_v0  ;;  %v5401_v11 = vsel %vm5273_vm4, %v5209_v16, %v5337_v31  ;;  %v5208_v29 = vadd.f32 %v11684_v35, %v11597_v43  ;;  %v5212_v24 = vadd.f32 %v11684_v35, %v11601_v62 }
 0x561   : > { %v5459_v59 = vpack.c.bf16 %v5403_v36, %v5399_v22  ;;  %v5405_v34 = vsel %vm5277_vm5, %v5213_v32, %v5341_v20  ;;  %vm5270_vm6 = vcmp.ge.f32.partialorder %v5206_v26, 0.0  ;;  %vm5274_vm9 = vcmp.ge.f32.partialorder %v5210_v46, 0.0 }
 0x562   : > { %v5461_v53 = vpack.c.bf16 %v5405_v34, %v5401_v11  ;;  %v5334_v44 = vmul.f32 0.01, %v5206_v26  ;;  %v5338_v40 = vmul.f32 0.01, %v5210_v46  ;;  %vm5272_vm10 = vcmp.ge.f32.partialorder %v5208_v29, 0.0 }
 0x563   : > { %5864 = vmatprep.mubr.bf16.mxu0 %v5459_v59  ;;  %v5336_v63 = vmul.f32 0.01, %v5208_v29  ;;  %v5215_v18 = vadd.f32 %v11681_v10, %v11606_v33  ;;  %v5219_v43 = vadd.f32 %v11681_v10, %v11610_v58  ;;  %v5217_v13 = vadd.f32 %v11687_v25, %v11614_v8 }
 0x564   : > { %7461 = vmatprep.mubr.msk.bf16.mxu1 %vm1474_vm2, %v5461_v53  ;;  %v5398_v48 = vsel %vm5270_vm6, %v5206_v26, %v5334_v44  ;;  %v5402_v42 = vsel %vm5274_vm9, %v5210_v46, %v5338_v40  ;;  %vm5276_vm11 = vcmp.ge.f32.partialorder %v5212_v24, 0.0  ;;  %v5340_v56 = vmul.f32 0.01, %v5212_v24 }
 0x565   : > { %v5400_v6 = vsel %vm5272_vm10, %v5208_v29, %v5336_v63  ;;  %v5458_v3 = vpack.c.bf16 %v5402_v42, %v5398_v48  ;;  %vm5279_vm12 = vcmp.ge.f32.partialorder %v5215_v18, 0.0  ;;  %vm5283_vm13 = vcmp.ge.f32.partialorder %v5219_v43, 0.0 }
 0x566   : > { %v5343_v62 = vmul.f32 0.01, %v5215_v18  ;;  %v5404_v16 = vsel %vm5276_vm11, %v5212_v24, %v5340_v56  ;;  %v5347_v32 = vmul.f32 0.01, %v5219_v43  ;;  %v5221_v52 = vadd.f32 %v11687_v25, %v11618_v41 }
 0x567   : > { %vm5281_vm14 = vcmp.ge.f32.partialorder %v5217_v13, 0.0  ;;  %5865 = vmatmul.mubr.bf16.gmra.mxu0 %v5458_v3  ;;  %v5460_v33 = vpack.c.bf16 %v5404_v16, %v5400_v6  ;;  %v5345_v12 = vmul.f32 0.01, %v5217_v13  ;;  %v5214_v8 = vadd.f32 %v11678_v2, %v11623_v57 }
 0x568   : > { %v5407_v58 = vsel %vm5279_vm12, %v5215_v18, %v5343_v62  ;;  %v5411_v51 = vsel %vm5283_vm13, %v5219_v43, %v5347_v32  ;;  %vm5285_vm15 = vcmp.ge.f32.partialorder %v5221_v52, 0.0  ;;  %v5349_v45 = vmul.f32 0.01, %v5221_v52 }
 0x569   : > { %v5218_v54 = vadd.f32 %v11678_v2, %v11627_v4  ;;  %5978 = vmatmul.mubr.bf16.gmra.mxu1 %v5460_v33  ;;  %v5463_v0 = vpack.c.bf16 %v5411_v51, %v5407_v58  ;;  %v5409_v31 = vsel %vm5281_vm14, %v5217_v13, %v5345_v12  ;;  %vm5278_vm0 = vcmp.ge.f32.partialorder %v5214_v8, 0.0 }
 0x56a   : > { %v5342_v20 = vmul.f32 0.01, %v5214_v8  ;;  %v5413_v41 = vsel %vm5285_vm15, %v5221_v52, %v5349_v45  ;;  %v5216_v36 = vadd.f32 %v11684_v35, %v11631_v50  ;;  %v5220_v46 = vadd.f32 %v11684_v35, %v11635_v37 }
 0x56b   : > { %vm5282_vm1 = vcmp.ge.f32.partialorder %v5218_v54, 0.0  ;;  %v5346_v22 = vmul.f32 0.01, %v5218_v54  ;;  %5874 = vmatprep.mubr.bf16.mxu0 %v5463_v0  ;;  %v5465_v26 = vpack.c.bf16 %v5413_v41, %v5409_v31  ;;  %v5223_v4 = vadd.f32 %v11681_v10, %v11639_v55 }
 0x56c   : > { %v5406_v57 = vsel %vm5278_vm0, %v5214_v8, %v5342_v20  ;;  %vm5280_vm3 = vcmp.ge.f32.partialorder %v5216_v36, 0.0  ;;  %v5344_v11 = vmul.f32 0.01, %v5216_v36  ;;  %v5227_v34 = vadd.f32 %v11681_v10, %v11643_v27 }
 0x56d   : > { %v5410_v59 = vsel %vm5282_vm1, %v5218_v54, %v5346_v22  ;;  %7462 = vmatprep.mubr.msk.bf16.mxu1 %vm1474_vm2, %v5465_v26  ;;  %vm5284_vm4 = vcmp.ge.f32.partialorder %v5220_v46, 0.0  ;;  %v5348_v50 = vmul.f32 0.01, %v5220_v46  ;;  %vm5287_vm5 = vcmp.ge.f32.partialorder %v5223_v4, 0.0 }
 0x56e   : > { %v5462_v29 = vpack.c.bf16 %v5410_v59, %v5406_v57  ;;  %v5408_v53 = vsel %vm5280_vm3, %v5216_v36, %v5344_v11  ;;  %vm5291_vm6 = vcmp.ge.f32.partialorder %v5227_v34, 0.0  ;;  %v5351_v44 = vmul.f32 0.01, %v5223_v4  ;;  %v13248_v57 = vld [vmem:[#allocation80_spill] sm:$0xff]  ;;  %v13250_v11 = vld [vmem:[#allocation30_spill] sm:$0xff] }
 0x56f   : > { %v5355_v40 = vmul.f32 0.01, %v5227_v34  ;;  %v5412_v37 = vsel %vm5284_vm4, %v5220_v46, %v5348_v50  ;;  %v5225_v55 = vadd.f32 %v11687_v25, %v11647_v38  ;;  %v5229_v24 = vadd.f32 %v11687_v25, %v11651_v28 }
 0x570   : > { %5875 = vmatmul.mubr.bf16.gmra.mxu0 %v5462_v29  ;;  %v5222_v27 = vadd.f32 %v11678_v2, %v11655_v15  ;;  %v5464_v63 = vpack.c.bf16 %v5412_v37, %v5408_v53  ;;  %v5415_v48 = vsel %vm5287_vm5, %v5223_v4, %v5351_v44  ;;  %v5226_v43 = vadd.f32 %v11678_v2, %v11659_v19  ;;  %v13249_v4 = vld [vmem:[#allocation36_spill] sm:$0xff] }
 0x571   : > { %v5419_v18 = vsel %vm5291_vm6, %v5227_v34, %v5355_v40  ;;  %vm5289_vm9 = vcmp.ge.f32.partialorder %v5225_v55, 0.0  ;;  %vm5293_vm10 = vcmp.ge.f32.partialorder %v5229_v24, 0.0  ;;  %v5353_v42 = vmul.f32 0.01, %v5225_v55  ;;  %v13251_v40 = vld [vmem:[#allocation83_spill] sm:$0xff] }
 0x572   : > { %v5467_v13 = vpack.c.bf16 %v5419_v18, %v5415_v48  ;;  %5988 = vmatmul.mubr.bf16.gmra.mxu1 %v5464_v63  ;;  %v5357_v56 = vmul.f32 0.01, %v5229_v24  ;;  %vm5286_vm11 = vcmp.ge.f32.partialorder %v5222_v27, 0.0  ;;  %vm5290_vm12 = vcmp.ge.f32.partialorder %v5226_v43, 0.0  ;;  %v13253_v48 = vld [vmem:[#allocation87_spill] sm:$0xff] }
 0x573   : > { %v5350_v38 = vmul.f32 0.01, %v5222_v27  ;;  %v5417_v28 = vsel %vm5289_vm9, %v5225_v55, %v5353_v42  ;;  %v5354_v6 = vmul.f32 0.01, %v5226_v43  ;;  %v5224_v15 = vadd.f32 %v11684_v35, %v11663_v1 }
 0x574   : > { %5884 = vmatprep.mubr.bf16.mxu0 %v5467_v13  ;;  %v5228_v3 = vadd.f32 %v11684_v35, %v11667_v21  ;;  %v5421_v62 = vsel %vm5293_vm10, %v5229_v24, %v5357_v56  ;;  %v5231_v16 = vadd.f32 %v11681_v10, %v11671_v17  ;;  %v5235_v32 = vadd.f32 %v11681_v10, %v11675_v61 }
 0x575   : > { %v5414_v19 = vsel %vm5286_vm11, %v5222_v27, %v5350_v38  ;;  %v5469_v52 = vpack.c.bf16 %v5421_v62, %v5417_v28  ;;  %v5418_v33 = vsel %vm5290_vm12, %v5226_v43, %v5354_v6  ;;  %vm5288_vm13 = vcmp.ge.f32.partialorder %v5224_v15, 0.0  ;;  %v13252_v27 = vld [vmem:[#allocation33_spill] sm:$0xff]  ;;  %v13254_v43 = vld [vmem:[#allocation82_spill] sm:$0xff] }
 0x576   : > { %vm5292_vm14 = vcmp.ge.f32.partialorder %v5228_v3, 0.0  ;;  %v5466_v58 = vpack.c.bf16 %v5418_v33, %v5414_v19  ;;  %v5352_v12 = vmul.f32 0.01, %v5224_v15  ;;  %v5356_v8 = vmul.f32 0.01, %v5228_v3  ;;  %v13255_v19 = vld [vmem:[#allocation85_spill] sm:$0xff] }
 0x577   : > { %vm5295_vm15 = vcmp.ge.f32.partialorder %v5231_v16, 0.0  ;;  %7463 = vmatprep.mubr.msk.bf16.mxu1 %vm1474_vm2, %v5469_v52  ;;  %vm5299_vm0 = vcmp.ge.f32.partialorder %v5235_v32, 0.0  ;;  %v5359_v1 = vmul.f32 0.01, %v5231_v16  ;;  %v5363_v21 = vmul.f32 0.01, %v5235_v32 }
 0x578   : > { %v5233_v51 = vadd.f32 %v11687_v25, %v11691_v49  ;;  %5885 = vmatmul.mubr.bf16.gmra.mxu0 %v5466_v58  ;;  %v5416_v17 = vsel %vm5288_vm13, %v5224_v15, %v5352_v12  ;;  %v5420_v45 = vsel %vm5292_vm14, %v5228_v3, %v5356_v8  ;;  %v5237_v61 = vadd.f32 %v11687_v25, %v11695_v60 }
 0x579   : > { %v5230_v54 = vadd.f32 %v11678_v2, %v11699_v7  ;;  %v5468_v0 = vpack.c.bf16 %v5420_v45, %v5416_v17  ;;  %v5423_v31 = vsel %vm5295_vm15, %v5231_v16, %v5359_v1  ;;  %v5427_v20 = vsel %vm5299_vm0, %v5235_v32, %v5363_v21 }
 0x57a   : > { %vm5297_vm1 = vcmp.ge.f32.partialorder %v5233_v51, 0.0  ;;  %v5471_v41 = vpack.c.bf16 %v5427_v20, %v5423_v31  ;;  %vm5301_vm3 = vcmp.ge.f32.partialorder %v5237_v61, 0.0  ;;  %v5361_v22 = vmul.f32 0.01, %v5233_v51 }
 0x57b   : > { %v5365_v36 = vmul.f32 0.01, %v5237_v61  ;;  %5998 = vmatmul.mubr.bf16.gmra.mxu1 %v5468_v0  ;;  %v5234_v49 = vadd.f32 %v11678_v2, %v11703_v39  ;;  %vm5294_vm4 = vcmp.ge.f32.partialorder %v5230_v54, 0.0  ;;  %v5358_v26 = vmul.f32 0.01, %v5230_v54  ;;  %v13257_v0 = vld [vmem:[#allocation34_spill] sm:$0xff] }
 0x57c   : > { %v5147_v60 = vmul.f32 %v11532_v47, %v13248_v57  ;;  %5894 = vmatprep.mubr.bf16.mxu0 %v5471_v41  ;;  %v5425_v46 = vsel %vm5297_vm1, %v5233_v51, %v5361_v22  ;;  %v5151_v59 = vmul.f32 %v11532_v47, %v13249_v4  ;;  %v5154_v34 = vmul.f32 %v11529_v23, %v13250_v11 }
 0x57d   : > { %v5429_v7 = vsel %vm5301_vm3, %v5237_v61, %v5365_v36  ;;  %vm5298_vm5 = vcmp.ge.f32.partialorder %v5234_v49, 0.0  ;;  %v5362_v50 = vmul.f32 0.01, %v5234_v49  ;;  %v5422_v53 = vsel %vm5294_vm4, %v5230_v54, %v5358_v26  ;;  %v13256_v61 = vld [vmem:[#allocation81_spill] sm:$0xff] }
 0x57e   : > { %v5473_v29 = vpack.c.bf16 %v5429_v7, %v5425_v46  ;;  %v5232_v39 = vadd.f32 %v11684_v35, %v5147_v60  ;;  %v5236_v44 = vadd.f32 %v11684_v35, %v5151_v59  ;;  %v5158_v37 = vmul.f32 %v11529_v23, %v13251_v40  ;;  %v13258_v7 = vld [vmem:[#allocation38_spill] sm:$0xff]  ;;  %v13260_v40 = vld [vmem:[#allocation84_spill] sm:$0xff] }
 0x57f   : > { %v5239_v55 = vadd.f32 %v11681_v10, %v5154_v34  ;;  %v5426_v24 = vsel %vm5298_vm5, %v5234_v49, %v5362_v50  ;;  %v5156_v63 = vmul.f32 %v11535_v9, %v13252_v27  ;;  %v5160_v18 = vmul.f32 %v11535_v9, %v13253_v48 }
 0x580   : > { %7464 = vmatprep.mubr.msk.bf16.mxu1 %vm1474_vm2, %v5473_v29  ;;  %v5153_v13 = vmul.f32 %v11526_v5, %v13254_v43  ;;  %v5470_v42 = vpack.c.bf16 %v5426_v24, %v5422_v53  ;;  %vm5296_vm6 = vcmp.ge.f32.partialorder %v5232_v39, 0.0  ;;  %vm5300_vm9 = vcmp.ge.f32.partialorder %v5236_v44, 0.0 }
 0x581   : > { %v5360_v56 = vmul.f32 0.01, %v5232_v39  ;;  %v5364_v38 = vmul.f32 0.01, %v5236_v44  ;;  %v5243_v28 = vadd.f32 %v11681_v10, %v5158_v37  ;;  %vm5303_vm10 = vcmp.ge.f32.partialorder %v5239_v55, 0.0 }
 0x582   : > { %v5367_v6 = vmul.f32 0.01, %v5239_v55  ;;  %5895 = vmatmul.mubr.bf16.gmra.mxu0 %v5470_v42  ;;  %v5241_v3 = vadd.f32 %v11687_v25, %v5156_v63  ;;  %v5245_v62 = vadd.f32 %v11687_v25, %v5160_v18  ;;  %v5157_v16 = vmul.f32 %v11526_v5, %v13255_v19 }
 0x583   : > { %v5424_v15 = vsel %vm5296_vm6, %v5232_v39, %v5360_v56  ;;  %v5428_v32 = vsel %vm5300_vm9, %v5236_v44, %v5364_v38  ;;  %vm5307_vm11 = vcmp.ge.f32.partialorder %v5243_v28, 0.0  ;;  %v5371_v52 = vmul.f32 0.01, %v5243_v28 }
 0x584   : > { %v5431_v33 = vsel %vm5303_vm10, %v5239_v55, %v5367_v6  ;;  %v5472_v58 = vpack.c.bf16 %v5428_v32, %v5424_v15  ;;  %vm5305_vm12 = vcmp.ge.f32.partialorder %v5241_v3, 0.0  ;;  %vm5309_vm13 = vcmp.ge.f32.partialorder %v5245_v62, 0.0  ;;  %v13262_v6 = vld [vmem:[#allocation60_spill] sm:$0xff] }
 0x585   : > { %v5369_v12 = vmul.f32 0.01, %v5241_v3  ;;  %v5435_v8 = vsel %vm5307_vm11, %v5243_v28, %v5371_v52  ;;  %v5373_v1 = vmul.f32 0.01, %v5245_v62  ;;  %v5238_v21 = vadd.f32 %v11678_v2, %v5153_v13  ;;  %v13261_v13 = vld [vmem:[#allocation86_spill] sm:$0xff]  ;;  %v13263_v52 = vld [vmem:[#allocation88_spill] sm:$0xff] }
 0x586   : > { %v5242_v51 = vadd.f32 %v11678_v2, %v5157_v16  ;;  %6008 = vmatmul.mubr.bf16.gmra.mxu1 %v5472_v58  ;;  %v5475_v17 = vpack.c.bf16 %v5435_v8, %v5431_v33  ;;  %v5155_v54 = vmul.f32 %v11532_v47, %v13256_v61  ;;  %v5159_v31 = vmul.f32 %v11532_v47, %v13257_v0 }
 0x587   : > { %v5433_v45 = vsel %vm5305_vm12, %v5241_v3, %v5369_v12  ;;  %v5437_v20 = vsel %vm5309_vm13, %v5245_v62, %v5373_v1  ;;  %vm5302_vm14 = vcmp.ge.f32.partialorder %v5238_v21, 0.0  ;;  %v5366_v41 = vmul.f32 0.01, %v5238_v21  ;;  %v13264_v1 = vld [vmem:[#allocation89_spill] sm:$0xff] }
 0x588   : > { %vm5306_vm15 = vcmp.ge.f32.partialorder %v5242_v51, 0.0  ;;  %5904 = vmatprep.mubr.bf16.mxu0 %v5475_v17  ;;  %v5477_v22 = vpack.c.bf16 %v5437_v20, %v5433_v45  ;;  %v5370_v36 = vmul.f32 0.01, %v5242_v51  ;;  %v5240_v49 = vadd.f32 %v11684_v35, %v5155_v54  ;;  %v13265_v54 = vld [vmem:[#allocation92_spill] sm:$0xff]  ;;  %v13266_v20 = vld [vmem:[#allocation41_spill] sm:$0xff] }
 0x589   : > { %v5244_v26 = vadd.f32 %v11684_v35, %v5159_v31  ;;  %v5430_v57 = vsel %vm5302_vm14, %v5238_v21, %v5366_v41  ;;  %v5162_v60 = vmul.f32 %v11529_v23, %v11396_v30  ;;  %v5166_v46 = vmul.f32 %v11529_v23, %v11427_v14  ;;  %v13259_v30 = vld [vmem:[#allocation90_spill] sm:$0xff] }
 0x58a   : > { %v5164_v4 = vmul.f32 %v11535_v9, %v13258_v7  ;;  %7465 = vmatprep.mubr.msk.bf16.mxu1 %vm1474_vm2, %v5477_v22  ;;  %v5434_v59 = vsel %vm5306_vm15, %v5242_v51, %v5370_v36  ;;  %vm5304_vm0 = vcmp.ge.f32.partialorder %v5240_v49, 0.0  ;;  %v5368_v11 = vmul.f32 0.01, %v5240_v49  ;;  %v13267_v7 = vld [vmem:[#allocation51_spill] sm:$0xff] }
 0x58b   : > { %vm5308_vm1 = vcmp.ge.f32.partialorder %v5244_v26, 0.0  ;;  %v5474_v34 = vpack.c.bf16 %v5434_v59, %v5430_v57  ;;  %v5372_v29 = vmul.f32 0.01, %v5244_v26  ;;  %v5247_v50 = vadd.f32 %v11681_v10, %v5162_v60 }
 0x58c   : > { %v5251_v53 = vadd.f32 %v11681_v10, %v5166_v46  ;;  %v5432_v39 = vsel %vm5304_vm0, %v5240_v49, %v5368_v11  ;;  %v5168_v44 = vmul.f32 %v11535_v9, %v13259_v30  ;;  %v5249_v14 = vadd.f32 %v11687_v25, %v5164_v4  ;;  %v13268_v4 = vld [vmem:[#allocation91_spill] sm:$0xff] }
 0x58d   : > { %v5161_v37 = vmul.f32 %v11526_v5, %v13260_v40  ;;  %5905 = vmatmul.mubr.bf16.gmra.mxu0 %v5474_v34  ;;  %v5436_v55 = vsel %vm5308_vm1, %v5244_v26, %v5372_v29  ;;  %vm5311_vm3 = vcmp.ge.f32.partialorder %v5247_v50, 0.0  ;;  %v5375_v24 = vmul.f32 0.01, %v5247_v50  ;;  %v13269_v11 = vld [vmem:[#allocation43_spill] sm:$0xff] }
 0x58e   : > { %vm5315_vm4 = vcmp.ge.f32.partialorder %v5251_v53, 0.0  ;;  %v5476_v27 = vpack.c.bf16 %v5436_v55, %v5432_v39  ;;  %v5379_v63 = vmul.f32 0.01, %v5251_v53  ;;  %v5253_v48 = vadd.f32 %v11687_v25, %v5168_v44  ;;  %v13270_v40 = vld [vmem:[#allocation39_spill] sm:$0xff] }
 0x58f   : > { %vm5313_vm5 = vcmp.ge.f32.partialorder %v5249_v14, 0.0  ;;  %v5439_v18 = vsel %vm5311_vm3, %v5247_v50, %v5375_v24  ;;  %v5377_v43 = vmul.f32 0.01, %v5249_v14  ;;  %v5165_v42 = vmul.f32 %v11526_v5, %v13261_v13 }
 0x590   : > { %v5246_v56 = vadd.f32 %v11678_v2, %v5161_v37  ;;  %6018 = vmatmul.mubr.bf16.gmra.mxu1 %v5476_v27  ;;  %v5443_v38 = vsel %vm5315_vm4, %v5251_v53, %v5379_v63  ;;  %vm5317_vm6 = vcmp.ge.f32.partialorder %v5253_v48, 0.0  ;;  %v5381_v28 = vmul.f32 0.01, %v5253_v48 }
 0x591   : > { %v5163_v15 = vmul.f32 %v11532_v47, %v13262_v6  ;;  %v5479_v3 = vpack.c.bf16 %v5443_v38, %v5439_v18  ;;  %v5441_v62 = vsel %vm5313_vm5, %v5249_v14, %v5377_v43  ;;  %v5250_v19 = vadd.f32 %v11678_v2, %v5165_v42 }
 0x592   : > { %vm5310_vm9 = vcmp.ge.f32.partialorder %v5246_v56, 0.0  ;;  %v5445_v16 = vsel %vm5317_vm6, %v5253_v48, %v5381_v28  ;;  %v5374_v32 = vmul.f32 0.01, %v5246_v56  ;;  %v5167_v33 = vmul.f32 %v11532_v47, %v13263_v52  ;;  %v13271_v48 = vld [vmem:[#allocation61_spill] sm:$0xff] }
 0x593   : > { %v5248_v58 = vadd.f32 %v11684_v35, %v5163_v15  ;;  %5914 = vmatprep.mubr.bf16.mxu0 %v5479_v3  ;;  %v5481_v12 = vpack.c.bf16 %v5445_v16, %v5441_v62  ;;  %vm5314_vm10 = vcmp.ge.f32.partialorder %v5250_v19, 0.0  ;;  %v5378_v8 = vmul.f32 0.01, %v5250_v19 }
 0x594   : > { %v5170_v21 = vmul.f32 %v11529_v23, %v13264_v1  ;;  %v5438_v51 = vsel %vm5310_vm9, %v5246_v56, %v5374_v32  ;;  %v5252_v17 = vadd.f32 %v11684_v35, %v5167_v33  ;;  %v5174_v0 = vmul.f32 %v11529_v23, %v13265_v54 }
 0x595   : > { %vm5312_vm11 = vcmp.ge.f32.partialorder %v5248_v58, 0.0  ;;  %v5376_v45 = vmul.f32 0.01, %v5248_v58  ;;  %7466 = vmatprep.mubr.msk.bf16.mxu1 %vm1474_vm2, %v5481_v12  ;;  %v5442_v61 = vsel %vm5314_vm10, %v5250_v19, %v5378_v8  ;;  %v5172_v41 = vmul.f32 %v11535_v9, %v13266_v20  ;;  %v5536_v20 = vld [vmem:[%s13273_s7] sm:$0x3] }
 0x596   : > { %v5255_v31 = vadd.f32 %v11681_v10, %v5170_v21  ;;  %v5478_v22 = vpack.c.bf16 %v5442_v61, %v5438_v51  ;;  %vm5316_vm12 = vcmp.ge.f32.partialorder %v5252_v17, 0.0  ;;  %v5380_v36 = vmul.f32 0.01, %v5252_v17  ;;  %v7822_v21 = vld [vmem:[%s13272_s2 + $0x38] sm:$0xff]  }
 0x597   : > { %v5440_v49 = vsel %vm5312_vm11, %v5248_v58, %v5376_v45  ;;  %v5259_v26 = vadd.f32 %v11681_v10, %v5174_v0  ;;  %v5257_v60 = vadd.f32 %v11687_v25, %v5172_v41  ;;  %v5261_v23 = vadd.f32 %v11687_v25, %v13267_v7  ;;  %6585 = vmatpush1.bf16.msra.mxu0 %v7822_v21  ;;  %v7823_v45 = vld [vmem:[%s13272_s2 + $0x30] sm:$0xff]  }
 0x598   : > { %vm5319_vm13 = vcmp.ge.f32.partialorder %v5255_v31, 0.0  ;;  %v5383_v57 = vmul.f32 0.01, %v5255_v31  ;;  %5915 = vmatmul.mubr.bf16.gmra.mxu0 %v5478_v22  ;;  %v5444_v46 = vsel %vm5316_vm12, %v5252_v17, %v5380_v36  ;;  %v5169_v59 = vmul.f32 %v11526_v5, %v13268_v4  ;;  %7505 = vmatpush1.bf16.msra.mxu1 %v7822_v21  ;;  %v7824_v22 = vld [vmem:[%s13272_s2 + $0x28] sm:$0xff]   ;;  %v13275_v36 = vld [vmem:[#allocation19_spill] sm:$0xff]  ;;  %v7825_v4 = vld [vmem:[%s13272_s2 + $0x20] sm:$0xff]  }
 0x599   : > { %v5258_v9 = vadd.f32 %v11678_v2, %v13269_v11  ;;  %v5480_v34 = vpack.c.bf16 %v5444_v46, %v5440_v49  ;;  %vm5323_vm14 = vcmp.ge.f32.partialorder %v5259_v26, 0.0  ;;  %v5387_v29 = vmul.f32 0.01, %v5259_v26 }
 0x59a   : > { %v5447_v50 = vsel %vm5319_vm13, %v5255_v31, %v5383_v57  ;;  %vm5321_vm15 = vcmp.ge.f32.partialorder %v5257_v60, 0.0  ;;  %vm5325_vm0 = vcmp.ge.f32.partialorder %v5261_v23, 0.0  ;;  %v5385_v10 = vmul.f32 0.01, %v5257_v60 }
 0x59b   : > { %v5389_v53 = vmul.f32 0.01, %v5261_v23  ;;  %6028 = vmatmul.mubr.bf16.gmra.mxu1 %v5480_v34  ;;  %v5451_v39 = vsel %vm5323_vm14, %v5259_v26, %v5387_v29  ;;  %v5254_v30 = vadd.f32 %v11678_v2, %v5169_v59  ;;  %vm5322_vm1 = vcmp.ge.f32.partialorder %v5258_v9, 0.0 }
 0x59c   : > { %v5386_v25 = vmul.f32 0.01, %v5258_v9  ;;  %v5483_v44 = vpack.c.bf16 %v5451_v39, %v5447_v50  ;;  %v5449_v14 = vsel %vm5321_vm15, %v5257_v60, %v5385_v10  ;;  %v5171_v37 = vmul.f32 %v11532_v47, %v13270_v40  ;;  %v13276_v60 = vld [vmem:[#allocation17_spill] sm:$0xff]  ;;  %v7826_v39 = vld [vmem:[%s13272_s2 + $0x18] sm:$0xff]  }
 0x59d   : > { %v5453_v5 = vsel %vm5325_vm0, %v5261_v23, %v5389_v53  ;;  %vm5318_vm3 = vcmp.ge.f32.partialorder %v5254_v30, 0.0  ;;  %v5382_v24 = vmul.f32 0.01, %v5254_v30  ;;  %v5260_v18 = vadd.f32 %v11684_v35, %v13271_v48 }
 0x59e   : > { %v5485_v55 = vpack.c.bf16 %v5453_v5, %v5449_v14  ;;  %v5450_v27 = vsel %vm5322_vm1, %v5258_v9, %v5386_v25  ;;  %5924 = vmatprep.mubr.bf16.mxu0 %v5483_v44  ;;  %v5256_v63 = vadd.f32 %v11684_v35, %v5171_v37  ;;  %v13274_v54 = vmov 0  }
 0x59f   : > { %v5446_v2 = vsel %vm5318_vm3, %v5254_v30, %v5382_v24  ;;  %vm5324_vm5 = vcmp.ge.f32.partialorder %v5260_v18, 0.0  ;;  %v5388_v42 = vmul.f32 0.01, %v5260_v18  ;;  %6586 = vmatprep.subr.bf16.mxu0 %v13274_v54  ;;  %7493 = vmatprep.subr.bf16.mxu1 %v13274_v54  ;;  %v11879_v49 = vrot.slane %v5536_v20, %v13275_v36 }
 0x5a0   : > { %7467 = vmatprep.mubr.msk.bf16.mxu1 %vm1474_vm2, %v5485_v55  ;;  %v5482_v43 = vpack.c.bf16 %v5450_v27, %v5446_v2  ;;  %vm5320_vm4 = vcmp.ge.f32.partialorder %v5256_v63, 0.0  ;;  %v5384_v13 = vmul.f32 0.01, %v5256_v63  ;;  %6587 = vmatpush1.bf16.msra.mxu0 %v7823_v45  ;;  %v11886_v46 = vrot.slane %v5536_v20, %v13276_v60 }
 0x5a1   : > { %v5452_v56 = vsel %vm5324_vm5, %v5260_v18, %v5388_v42  ;;  %7506 = vmatpush1.bf16.msra.mxu1 %v7823_v45  ;;  %6588 = vmatprep.subr.bf16.mxu0 %v13274_v54 }
 0x5a2   : > { %5925 = vmatmul.mubr.bf16.gmra.mxu0 %v5482_v43  ;;  %v5448_v47 = vsel %vm5320_vm4, %v5256_v63, %v5384_v13  ;;  %7494 = vmatprep.subr.bf16.mxu1 %v13274_v54  ;;  %v7827_v63 = vld [vmem:[%s13272_s2 + $0x10] sm:$0xff]  }
 0x5a3   : > { %v5484_v38 = vpack.c.bf16 %v5452_v56, %v5448_v47 }
 0x5a4   : > { %6589 = vmatpush1.bf16.msra.mxu0 %v7824_v22 }
 0x5a5   : > { %6038 = vmatmul.mubr.bf16.gmra.mxu1 %v5484_v38  ;;  %6590 = vmatprep.subr.bf16.mxu0 %v13274_v54 }
 0x5a6   : > { %7507 = vmatpush1.bf16.msra.mxu1 %v7824_v22 }
 0x5a7   : > { %7495 = vmatprep.subr.bf16.mxu1 %v13274_v54 }
 0x5a8   : > { %6591 = vmatpush1.bf16.msra.mxu0 %v7825_v4 }
 0x5a9   : > { %6592 = vmatprep.subr.bf16.mxu0 %v13274_v54 }
 0x5aa   : > { %7508 = vmatpush1.bf16.msra.mxu1 %v7825_v4 }
 0x5ab   : > { %7496 = vmatprep.subr.bf16.mxu1 %v13274_v54 }
 0x5ac   : > { %6593 = vmatpush1.bf16.msra.mxu0 %v7826_v39 }
 0x5ad   : > { %6594 = vmatprep.subr.bf16.mxu0 %v13274_v54 }
 0x5ae   : > { %7509 = vmatpush1.bf16.msra.mxu1 %v7826_v39 }
 0x5af   : > { %7497 = vmatprep.subr.bf16.mxu1 %v13274_v54 }
 0x5b0   : > { %6595 = vmatpush1.bf16.msra.mxu0 %v7827_v63 }
 0x5b1   : > { %6596 = vmatprep.subr.bf16.mxu0 %v13274_v54 }
 0x5b2   : > { %7510 = vmatpush1.bf16.msra.mxu1 %v7827_v63 }
 0x5b3   : > { %7498 = vmatprep.subr.bf16.mxu1 %v13274_v54 }
 0x61e   : > { %v5856_v28 = vpop.f32.mrf.mxu0 }
 0x61f   : > { %v5969_v6 = vpop.f32.mrf.mxu1  ;;  %v5857_v34 = vadd.f32 %v5856_v28, %v11886_v46 }
 0x620   : > { %v5858_v15 = vpop.f32.mrf.mxu0 }
 0x621   : > { %v5971_v3 = vpop.f32.mrf.mxu1  ;;  %v5859_v59 = vadd.f32 %v5858_v15, %v11879_v49  ;;  %v11918_v40 = vadd.f32 %v5969_v6, %v5857_v34 }
 0x622   : > { %v5860_v35 = vpop.f32.mrf.mxu0 }
 0x623   : > { %v5973_v62 = vpop.f32.mrf.mxu1  ;;  %v5861_v29 = vadd.f32 %v5860_v35, %v11886_v46  ;;  %v11907_v30 = vadd.f32 %v5971_v3, %v5859_v59  ;;  %v6110_v47 = vmul.f32 %v11918_v40, %v11918_v40  ;;  %v7828_v35 = vld [vmem:[%s13272_s2 + $0x8] sm:$0xff]   ;;  %v7829_v59 = vld [vmem:[%s13272_s2] sm:$0xff]  }
 0x624   : > { %v5862_v19 = vpop.f32.mrf.mxu0  ;;  %6597 = vmatpush1.bf16.msra.mxu0 %v7828_v35  ;;  %7511 = vmatpush1.bf16.msra.mxu1 %v7828_v35 }
 0x625   : > { %v5975_v16 = vpop.f32.mrf.mxu1  ;;  %v5863_v11 = vadd.f32 %v5862_v19, %v11879_v49  ;;  %v11920_v37 = vadd.f32 %v5973_v62, %v5861_v29  ;;  %v6111_v48 = vmul.f32 %v11907_v30, %v11907_v30  ;;  %v6071_v62 = vsel %vm2747_vm7, %v11907_v30, 0.0  ;;  %6598 = vmatprep.subr.bf16.mxu0 %v13274_v54  ;;  %7499 = vmatprep.subr.bf16.mxu1 %v13274_v54 }
 0x627   : > { %v5866_v32 = vpop.f32.mrf.mxu0  ;;  %v11913_v44 = vadd.f32 %v5975_v16, %v5863_v11  ;;  %v6112_v56 = vmul.f32 %v11920_v37, %v11920_v37  ;;  %v6163_v19 = vsel %vm2747_vm7, %v6111_v48, 0.0 }
 0x628   : > { %v5867_v14 = vadd.f32 %v5866_v32, %v11886_v46  ;;  %6599 = vmatpush1.bf16.msra.mxu0 %v7829_v59  ;;  %7512 = vmatpush1.bf16.msra.mxu1 %v7829_v59 }
 0x629   : > { %v11856_v52 = vpop.f32.mrf.mxu1  ;;  %v5868_v33 = vpop.f32.mrf.mxu0  ;;  %v6113_v18 = vmul.f32 %v11913_v44, %v11913_v44  ;;  %v6072_v16 = vsel %vm2747_vm7, %v11913_v44, 0.0  ;;  %6606 = vmatprep.subr.bf16.mxu0 %v13274_v54  ;;  %7500 = vmatprep.subr.bf16.mxu1 %v13274_v54 }
 0x62a   : > { %v5869_v10 = vadd.f32 %v5868_v33, %v11879_v49  ;;  %v11935_v2 = vadd.f32 %v11856_v52, %v5867_v14  ;;  %v6050_v52 = vadd.f32 %v11920_v37, %v11918_v40  ;;  %v6073_v20 = vadd.f32 %v6072_v16, %v6071_v62 }
 0x62b   : > { %v5981_v58 = vpop.f32.mrf.mxu1  ;;  %v11858_v12 = vpop.f32.mrf.mxu0  ;;  %v6164_v33 = vsel %vm2747_vm7, %v6113_v18, 0.0 }
 0x62c   : > { %v11924_v24 = vadd.f32 %v5981_v58, %v5869_v10  ;;  %v5871_v43 = vadd.f32 %v11858_v12, %v11886_v46  ;;  %v6114_v58 = vmul.f32 %v11935_v2, %v11935_v2  ;;  %v6051_v11 = vadd.f32 %v6050_v52, %v11935_v2  ;;  %v7830_v10 = vld [vmem:[%s13272_s2 + $0x60] ss:$0 sps:$4 sm:$0xff]  }
 0x62d   : > { %v11860_v8 = vpop.f32.mrf.mxu1  ;;  %v5872_v1 = vpop.f32.mrf.mxu0 }
 0x62e   : > { %v5873_v27 = vadd.f32 %v5872_v1, %v11879_v49  ;;  %v6115_v28 = vmul.f32 %v11924_v24, %v11924_v24  ;;  %v11972_v12 = vadd.f32 %v11860_v8, %v5871_v43 }
 0x62f   : > { %v11863_v51 = vpop.f32.mrf.mxu1 }
 0x630   : > { %v11865_v17 = vpop.f32.mrf.mxu0  ;;  %v11951_v6 = vadd.f32 %v11863_v51, %v5873_v27  ;;  %v6142_v51 = vadd.f32 %v6112_v56, %v6110_v47  ;;  %v6166_v22 = vsel %vm2747_vm7, %v6115_v28, 0.0  ;;  %v6116_v14 = vmul.f32 %v11972_v12, %v11972_v12 }
 0x631   : > { %v5877_v15 = vadd.f32 %v11865_v17, %v11886_v46  ;;  %v6074_v17 = vsel %vm2747_vm7, %v11924_v24, 0.0  ;;  %v6052_v28 = vadd.f32 %v6051_v11, %v11972_v12 }
 0x632   : > { %v5878_v61 = vpop.f32.mrf.mxu0  ;;  %v11870_v0 = vpop.f32.mrf.mxu1  ;;  %v6117_v8 = vmul.f32 %v11951_v6, %v11951_v6  ;;  %v6075_v39 = vadd.f32 %v6074_v17, %v6073_v20 }
 0x633   : > { %v5879_v38 = vadd.f32 %v5878_v61, %v11879_v49 }
 0x634   : > { %v11872_v31 = vpop.f32.mrf.mxu0  ;;  %v11875_v41 = vpop.f32.mrf.mxu1  ;;  %v6168_v43 = vsel %vm2747_vm7, %v6117_v8, 0.0 }
 0x635   : > { %v11981_v45 = vadd.f32 %v11875_v41, %v5879_v38  ;;  %v5881_v61 = vadd.f32 %v11872_v31, %v11886_v46  ;;  %v6165_v41 = vadd.f32 %v6164_v33, %v6163_v19 }
 0x636   : > { %v5882_v26 = vpop.f32.mrf.mxu0  ;;  %v11882_v57 = vpop.f32.mrf.mxu1 }
 0x637   : > { %v5883_v32 = vadd.f32 %v5882_v26, %v11879_v49  ;;  %v11989_v26 = vadd.f32 %v11870_v0, %v5877_v15  ;;  %v6143_v0 = vadd.f32 %v6142_v51, %v6114_v58  ;;  %v6119_v48 = vmul.f32 %v11981_v45, %v11981_v45 }
 0x638   : > { %v11888_v7 = vpop.f32.mrf.mxu1  ;;  %v11890_v23 = vpop.f32.mrf.mxu0  ;;  %v12014_v18 = vadd.f32 %v11882_v57, %v5881_v61  ;;  %v6078_v19 = vsel %vm2747_vm7, %v11981_v45, 0.0 }
 0x639   : > { %v11996_v34 = vadd.f32 %v11888_v7, %v5883_v32  ;;  %v5887_v27 = vadd.f32 %v11890_v23, %v11886_v46  ;;  %v6167_v7 = vadd.f32 %v6166_v22, %v6165_v41  ;;  %v6118_v47 = vmul.f32 %v11989_v26, %v11989_v26  ;;  %v7831_v22 = vld [vmem:[%s13272_s2 + $0x58] sm:$0xff]  }
 0x63a   : > { %v11897_v9 = vpop.f32.mrf.mxu0  ;;  %v6170_v52 = vsel %vm2747_vm7, %v6119_v48, 0.0  ;;  %v6120_v33 = vmul.f32 %v12014_v18, %v12014_v18 }
 0x63b   : > { %v11901_v50 = vpop.f32.mrf.mxu1  ;;  %v5889_v31 = vadd.f32 %v11897_v9, %v11879_v49  ;;  %v6076_v9 = vsel %vm2747_vm7, %v11951_v6, 0.0  ;;  %v6121_v57 = vmul.f32 %v11996_v34, %v11996_v34  ;;  %v6169_v32 = vadd.f32 %v6168_v43, %v6167_v7 }
 0x63c   : > { %v11904_v53 = vpop.f32.mrf.mxu0  ;;  %v6077_v62 = vadd.f32 %v6076_v9, %v6075_v39  ;;  %v12037_v16 = vadd.f32 %v11901_v50, %v5887_v27  ;;  %v6080_v17 = vsel %vm2747_vm7, %v11996_v34, 0.0 }
 0x63d   : > { %v11909_v25 = vpop.f32.mrf.mxu1  ;;  %v5891_v23 = vadd.f32 %v11904_v53, %v11886_v46  ;;  %v6582_v53 = vsel %vm3194_vm8, %v7830_v10, 0  ;;  %v6172_v59 = vsel %vm2747_vm7, %v6121_v57, 0.0 }
 0x63e   : > { %v11916_v5 = vpop.f32.mrf.mxu0  ;;  %v12029_v15 = vadd.f32 %v11909_v25, %v5889_v31  ;;  %v6053_v25 = vadd.f32 %v6052_v28, %v11989_v26  ;;  %6607 = vmatpush2.bf16.msra.mxu0 %v6582_v53  ;;  %7513 = vmatpush2.bf16.msra.mxu1 %v6582_v53  ;;  %v6079_v8 = vadd.f32 %v6078_v19, %v6077_v62 }
 0x63f   : > { %v11922_v55 = vpop.f32.mrf.mxu1  ;;  %v5893_v56 = vadd.f32 %v11916_v5, %v11879_v49  ;;  %v6144_v5 = vadd.f32 %v6143_v0, %v6116_v14  ;;  %6608 = vmatprep.subr.bf16.mxu0 %v13274_v54  ;;  %7501 = vmatprep.subr.bf16.mxu1 %v13274_v54 }
 0x640   : > { %v12046_v61 = vadd.f32 %v11922_v55, %v5891_v23  ;;  %v6123_v41 = vmul.f32 %v12029_v15, %v12029_v15  ;;  %v6171_v55 = vadd.f32 %v6170_v52, %v6169_v32  ;;  %v6054_v39 = vadd.f32 %v6053_v25, %v12014_v18 }
 0x641   : > { %v11939_v13 = vpop.f32.mrf.mxu1  ;;  %v6145_v51 = vadd.f32 %v6144_v5, %v6118_v47  ;;  %v6081_v27 = vadd.f32 %v6080_v17, %v6079_v8  ;;  %v6082_v9 = vsel %vm2747_vm7, %v12029_v15, 0.0 }
 0x642   : > { %v11941_v42 = vpop.f32.mrf.mxu0  ;;  %v12049_v20 = vadd.f32 %v11939_v13, %v5893_v56  ;;  %v6122_v13 = vmul.f32 %v12037_v16, %v12037_v16  ;;  %v6173_v7 = vadd.f32 %v6172_v59, %v6171_v55  ;;  %v6124_v48 = vmul.f32 %v12046_v61, %v12046_v61  ;;  %6609 = vmatpush2.bf16.msra.mxu0 %v7831_v22 }
 0x643   : > { %v5897_v11 = vadd.f32 %v11941_v42, %v11886_v46  ;;  %v6146_v14 = vadd.f32 %v6145_v51, %v6120_v33  ;;  %7514 = vmatpush2.bf16.msra.mxu1 %v7831_v22  ;;  %v6055_v56 = vadd.f32 %v6054_v39, %v12037_v16  ;;  %v6174_v28 = vsel %vm2747_vm7, %v6123_v41, 0.0  ;;  %6610 = vmatprep.subr.bf16.mxu0 %v13274_v54 }
 0x644   : > { %v11955_v3 = vpop.f32.mrf.mxu0  ;;  %v6125_v43 = vmul.f32 %v12049_v20, %v12049_v20  ;;  %7502 = vmatprep.subr.bf16.mxu1 %v13274_v54  ;;  %v6084_v5 = vsel %vm2747_vm7, %v12049_v20, 0.0  ;;  %v6083_v32 = vadd.f32 %v6082_v9, %v6081_v27  ;;  %v6175_v52 = vadd.f32 %v6174_v28, %v6173_v7 }
 0x645   : > { %v5899_v10 = vadd.f32 %v11955_v3, %v11879_v49  ;;  %v7832_v3 = vld [vmem:[%s13272_s2 + $0x50] sm:$0xff]   ;;  %v6147_v53 = vadd.f32 %v6146_v14, %v6122_v13 }
 0x646   : > { %v11974_v1 = vpop.f32.mrf.mxu1  ;;  %v11976_v21 = vpop.f32.mrf.mxu0  ;;  %v6176_v51 = vsel %vm2747_vm7, %v6125_v43, 0.0  ;;  %6611 = vmatpush2.bf16.msra.mxu0 %v7832_v3  ;;  %v6085_v8 = vadd.f32 %v6084_v5, %v6083_v32 }
 0x647   : > { %v5901_v57 = vadd.f32 %v11976_v21, %v11886_v46  ;;  %v6148_v33 = vadd.f32 %v6147_v53, %v6124_v48  ;;  %7515 = vmatpush2.bf16.msra.mxu1 %v7832_v3  ;;  %6612 = vmatprep.subr.bf16.mxu0 %v13274_v54  ;;  %v6177_v13 = vadd.f32 %v6176_v51, %v6175_v52 }
 0x648   : > { %v11991_v4 = vpop.f32.mrf.mxu1  ;;  %v5902_v29 = vpop.f32.mrf.mxu0  ;;  %7503 = vmatprep.subr.bf16.mxu1 %v13274_v54 }
 0x649   : > { %v5903_v42 = vadd.f32 %v5902_v29, %v11879_v49  ;;  %v12077_v29 = vadd.f32 %v11974_v1, %v5897_v11  ;;  %v12086_v62 = vadd.f32 %v11991_v4, %v5899_v10  ;;  %v6056_v1 = vadd.f32 %v6055_v56, %v12046_v61  ;;  %v7833_v4 = vld [vmem:[%s13272_s2 + $0x48] sm:$0xff]  }
 0x64a   : > { %v12006_v63 = vpop.f32.mrf.mxu1  ;;  %6613 = vmatpush2.bf16.msra.mxu0 %v7833_v4 }
 0x64b   : > { %v12099_v59 = vadd.f32 %v12006_v63, %v5901_v57  ;;  %v6057_v63 = vadd.f32 %v6056_v1, %v12077_v29  ;;  %7516 = vmatpush2.bf16.msra.mxu1 %v7833_v4  ;;  %6614 = vmatprep.subr.bf16.mxu0 %v13274_v54 }
 0x64c   : > { %v12023_v38 = vpop.f32.mrf.mxu1  ;;  %7504 = vmatprep.subr.bf16.mxu1 %v13274_v54 }
 0x64d   : > { %v5906_v35 = vpop.f32.mrf.mxu0  ;;  %v12091_v25 = vadd.f32 %v12023_v38, %v5903_v42  ;;  %v6086_v38 = vsel %vm2747_vm7, %v12086_v62, 0.0  ;;  %v6128_v43 = vmul.f32 %v12099_v59, %v12099_v59  ;;  %v6058_v53 = vadd.f32 %v6057_v63, %v12099_v59 }
 0x64e   : > { %v5907_v17 = vadd.f32 %v5906_v35, %v11886_v46  ;;  %v6127_v35 = vmul.f32 %v12086_v62, %v12086_v62  ;;  %v6087_v48 = vadd.f32 %v6086_v38, %v6085_v8 }
 0x64f   : > { %v5908_v58 = vpop.f32.mrf.mxu0  ;;  %v6129_v10 = vmul.f32 %v12091_v25, %v12091_v25  ;;  %v6088_v5 = vsel %vm2747_vm7, %v12091_v25, 0.0 }
 0x650   : > { %v12051_v50 = vpop.f32.mrf.mxu1  ;;  %v5909_v19 = vadd.f32 %v5908_v58, %v11879_v49  ;;  %v6126_v58 = vmul.f32 %v12077_v29, %v12077_v29 }
 0x651   : > { %v5910_v31 = vpop.f32.mrf.mxu0  ;;  %v12115_v27 = vadd.f32 %v12051_v50, %v5907_v17  ;;  %v6178_v50 = vsel %vm2747_vm7, %v6127_v35, 0.0  ;;  %v6180_v1 = vsel %vm2747_vm7, %v6129_v10, 0.0 }
 0x652   : > { %v6021_v0 = vpop.f32.mrf.mxu1  ;;  %v5911_v11 = vadd.f32 %v5910_v31, %v11886_v46  ;;  %v7834_v31 = vld [vmem:[%s13272_s2 + $0x40] sm:$0xff]   ;;  %v6149_v9 = vadd.f32 %v6148_v33, %v6126_v58  ;;  %v6179_v51 = vadd.f32 %v6178_v50, %v6177_v13 }
 0x653   : > { %v5912_v23 = vpop.f32.mrf.mxu0  ;;  %v12107_v41 = vadd.f32 %v6021_v0, %v5909_v19  ;;  %v6130_v52 = vmul.f32 %v12115_v27, %v12115_v27  ;;  %6615 = vmatpush2.bf16.msra.mxu0 %v7834_v31  ;;  %7517 = vmatpush2.bf16.msra.mxu1 %v7834_v31 }
 0x654   : > { %v6023_v47 = vpop.f32.mrf.mxu1  ;;  %v5913_v39 = vadd.f32 %v5912_v23, %v11879_v49  ;;  %v6150_v17 = vadd.f32 %v6149_v9, %v6128_v43  ;;  %v6181_v63 = vadd.f32 %v6180_v1, %v6179_v51 }
 0x655   : > { %v6131_v23 = vmul.f32 %v12107_v41, %v12107_v41  ;;  %v12127_v56 = vadd.f32 %v6023_v47, %v5911_v11 }
 0x656   : > { %v6025_v21 = vpop.f32.mrf.mxu1 }
 0x657   : > { %v12133_v19 = vadd.f32 %v6025_v21, %v5913_v39  ;;  %v6090_v21 = vsel %vm2747_vm7, %v12107_v41, 0.0  ;;  %v6182_v8 = vsel %vm2747_vm7, %v6131_v23, 0.0  ;;  %v6132_v58 = vmul.f32 %v12127_v56, %v12127_v56 }
 0x658   : > { %v5916_v22 = vpop.f32.mrf.mxu0  ;;  %v6151_v39 = vadd.f32 %v6150_v17, %v6130_v52  ;;  %v6183_v9 = vadd.f32 %v6182_v8, %v6181_v63 }
 0x659   : > { %v5917_v42 = vadd.f32 %v5916_v22, %v11886_v46  ;;  %v6059_v22 = vadd.f32 %v6058_v53, %v12115_v27  ;;  %v6133_v13 = vmul.f32 %v12133_v19, %v12133_v19 }
 0x65a   : > { %v5918_v55 = vpop.f32.mrf.mxu0 }
 0x65b   : > { %v6029_v14 = vpop.f32.mrf.mxu1  ;;  %v5919_v0 = vadd.f32 %v5918_v55, %v11879_v49  ;;  %v6089_v55 = vadd.f32 %v6088_v5, %v6087_v48  ;;  %v6092_v48 = vsel %vm2747_vm7, %v12133_v19, 0.0  ;;  %v6184_v5 = vsel %vm2747_vm7, %v6133_v13, 0.0 }
 0x65c   : > { %v5920_v7 = vpop.f32.mrf.mxu0  ;;  %v12139_v47 = vadd.f32 %v6029_v14, %v5917_v42  ;;  %v6060_v14 = vadd.f32 %v6059_v22, %v12127_v56  ;;  %v6185_v63 = vadd.f32 %v6184_v5, %v6183_v9 }
 0x65d   : > { %v6031_v3 = vpop.f32.mrf.mxu1  ;;  %v5921_v28 = vadd.f32 %v5920_v7, %v11886_v46  ;;  %v6091_v31 = vadd.f32 %v6090_v21, %v6089_v55 }
 0x65e   : > { %v5922_v57 = vpop.f32.mrf.mxu0  ;;  %v12141_v33 = vadd.f32 %v6031_v3, %v5919_v0  ;;  %v6134_v42 = vmul.f32 %v12139_v47, %v12139_v47  ;;  %v6152_v3 = vadd.f32 %v6151_v39, %v6132_v58  ;;  %v6061_v50 = vadd.f32 %v6060_v14, %v12139_v47 }
 0x65f   : > { %v6033_v32 = vpop.f32.mrf.mxu1  ;;  %v5923_v54 = vadd.f32 %v5922_v57, %v11879_v49  ;;  %v6093_v52 = vadd.f32 %v6092_v48, %v6091_v31 }
 0x660   : > { %v12149_v38 = vadd.f32 %v6033_v32, %v5921_v28  ;;  %v6135_v0 = vmul.f32 %v12141_v33, %v12141_v33  ;;  %v6094_v32 = vsel %vm2747_vm7, %v12141_v33, 0.0  ;;  %v6153_v51 = vadd.f32 %v6152_v3, %v6134_v42 }
 0x661   : > { %v6035_v4 = vpop.f32.mrf.mxu1 }
 0x662   : > { %v12151_v35 = vadd.f32 %v6035_v4, %v5923_v54  ;;  %v5926_v11 = vpop.f32.mrf.mxu0  ;;  %v6136_v23 = vmul.f32 %v12149_v38, %v12149_v38  ;;  %v6186_v17 = vsel %vm2747_vm7, %v6135_v0, 0.0  ;;  %v6062_v22 = vadd.f32 %v6061_v50, %v12149_v38 }
 0x663   : > { %v5927_v10 = vadd.f32 %v5926_v11, %v11886_v46  ;;  %v6187_v31 = vadd.f32 %v6186_v17, %v6185_v63 }
 0x664   : > { %v5928_v7 = vpop.f32.mrf.mxu0  ;;  %v6137_v28 = vmul.f32 %v12151_v35, %v12151_v35  ;;  %v6096_v8 = vsel %vm2747_vm7, %v12151_v35, 0.0  ;;  %v6154_v13 = vadd.f32 %v6153_v51, %v6136_v23 }
 0x665   : > { %v5929_v43 = vadd.f32 %v5928_v7, %v11879_v49  ;;  %v6039_v57 = vpop.f32.mrf.mxu1 }
 0x666   : > { %v5930_v53 = vpop.f32.mrf.mxu0  ;;  %v12172_v54 = vadd.f32 %v6039_v57, %v5927_v10  ;;  %v6188_v10 = vsel %vm2747_vm7, %v6137_v28, 0.0 }
 0x667   : > { %v5931_v1 = vadd.f32 %v5930_v53, %v11886_v46  ;;  %v6041_v21 = vpop.f32.mrf.mxu1  ;;  %v6095_v46 = vadd.f32 %v6094_v32, %v6093_v52  ;;  %v6189_v28 = vadd.f32 %v6188_v10, %v6187_v31 }
 0x668   : > { %v5932_v4 = vpop.f32.mrf.mxu0  ;;  %v6138_v58 = vmul.f32 %v12172_v54, %v12172_v54  ;;  %v12181_v11 = vadd.f32 %v6041_v21, %v5929_v43  ;;  %v6063_v14 = vadd.f32 %v6062_v22, %v12172_v54 }
 0x669   : > { %v5933_v55 = vadd.f32 %v5932_v4, %v11879_v49  ;;  %v6043_v39 = vpop.f32.mrf.mxu1  ;;  %v6097_v48 = vadd.f32 %v6096_v8, %v6095_v46 }
 0x66a   : > { %v6098_v42 = vsel %vm2747_vm7, %v12181_v11, 0.0  ;;  %v6139_v0 = vmul.f32 %v12181_v11, %v12181_v11  ;;  %v12190_v7 = vadd.f32 %v6043_v39, %v5931_v1  ;;  %v6155_v43 = vadd.f32 %v6154_v13, %v6138_v58 }
 0x66b   : > { %v6045_v49 = vpop.f32.mrf.mxu1  ;;  %v6099_v57 = vadd.f32 %v6098_v42, %v6097_v48 }
 0x66c   : > { %v6190_v9 = vsel %vm2747_vm7, %v6139_v0, 0.0  ;;  %v6064_v3 = vadd.f32 %v6063_v14, %v12190_v7  ;;  %v6140_v50 = vmul.f32 %v12190_v7, %v12190_v7  ;;  %v6046_v23 = vadd.f32 %v6045_v49, %v5933_v55 }
 0x66d   : > { %v6191_v52 = vadd.f32 %v6190_v9, %v6189_v28 }
 0x66e   : > { %v6065_v53 = vrot.slane %v6064_v3, 4  ;;  %v6156_v5 = vadd.f32 %v6155_v43, %v6140_v50  ;;  %v6100_v32 = vsel %vm2747_vm7, %v6046_v23, 0.0  ;;  %v6141_v1 = vmul.f32 %v6046_v23, %v6046_v23 }
 0x66f   : > { %v6101_v51 = vadd.f32 %v6100_v32, %v6099_v57 }
 0x670   : > { %v6066_v17 = vadd.f32 %v6065_v53, %v6064_v3  ;;  %v6157_v22 = vrot.slane %v6156_v5, 4  ;;  %v6192_v21 = vsel %vm2747_vm7, %v6141_v1, 0.0 }
 0x671   : > { %v6102_v4 = vrot.slane %v6101_v51, 4  ;;  %v6193_v8 = vadd.f32 %v6192_v21, %v6191_v52 }
 0x672   : > { %v6067_v58 = vrot.slane %v6066_v17, 2  ;;  %v6158_v63 = vadd.f32 %v6157_v22, %v6156_v5 }
 0x673   : > { %v6103_v46 = vadd.f32 %v6102_v4, %v6101_v51  ;;  %v6194_v13 = vrot.slane %v6193_v8, 4 }
 0x674   : > { %v6068_v55 = vadd.f32 %v6067_v58, %v6066_v17  ;;  %v6159_v10 = vrot.slane %v6158_v63, 2 }
 0x675   : > { %v6104_v39 = vrot.slane %v6103_v46, 2  ;;  %v6195_v14 = vadd.f32 %v6194_v13, %v6193_v8 }
 0x676   : > { %v6069_v42 = vrot.slane %v6068_v55, 1  ;;  %v6160_v0 = vadd.f32 %v6159_v10, %v6158_v63  ;;  %v13278_v10 = vld [vmem:[#allocation59_spill] sm:$0xff] }
 0x677   : > { %v6105_v31 = vadd.f32 %v6104_v39, %v6103_v46  ;;  %v6196_v48 = vrot.slane %v6195_v14, 2 }
 0x678   : > { %v6070_v43 = vadd.f32 %v6069_v42, %v6068_v55  ;;  %v6161_v49 = vrot.slane %v6160_v0, 1 }
 0x679   : > { %v6106_v9 = vrot.slane %v6105_v31, 1  ;;  %v6197_v3 = vadd.f32 %v6196_v48, %v6195_v14  ;;  %v6048_v14 = vld [vmem:[%s13277_s10] sm:$0x3] }
 0x67a   : > { %v6108_v50 = vmul.f32 0.0078125, %v6070_v43  ;;  %v6162_v28 = vadd.f32 %v6161_v49, %v6160_v0 }
 0x67b   : > { %v6107_v57 = vadd.f32 %v6106_v9, %v6105_v31  ;;  %v6198_v53 = vrot.slane %v6197_v3, 1 }
 0x67c   : > { %v6200_v32 = vmul.f32 0.0078125, %v6162_v28  ;;  %v6202_v5 = vmul.f32 %v6108_v50, %v6108_v50 }
 0x67d   : > { %v6109_v1 = vmul.f32 0.0078125, %v6107_v57  ;;  %v6199_v52 = vadd.f32 %v6198_v53, %v6197_v3 }
 0x67e   : > { %v6204_v51 = vsub.f32 %v6200_v32, %v6202_v5 }
 0x67f   : > { %v6201_v17 = vmul.f32 0.0078125, %v6199_v52  ;;  %v6203_v22 = vmul.f32 %v6109_v1, %v6109_v1 }
 0x680   : > { %v6206_v21 = vmax.f32 %v6204_v51, 0.0 }
 0x681   : > { %v6205_v4 = vsub.f32 %v6201_v17, %v6203_v22 }
 0x682   : > { %v6208_v8 = vadd.f32 1e-05, %v6206_v21 }
 0x683   : > { %v6207_v58 = vmax.f32 %v6205_v4, 0.0 }
 0x684   : > { %7887 = vrsqrt.f32 %v6208_v8 }
 0x685   : > { %v6209_v63 = vadd.f32 1e-05, %v6207_v58 }
 0x687   : > { %7889 = vrsqrt.f32 %v6209_v63 }
 0x691   : > { %v7888_v46 = vpop.eup %7887 }
 0x694   : > { %v7890_v13 = vpop.eup %7889 }
 0x695   : > { %v6214_v55 = vcombine.low %v7888_v46, %v7890_v13 }
 0x697   : > { %v6221_v39 = vrot.slane %v6214_v55, %v13278_v10 }
 0x699   : > { %v6228_v42 = vrot.slane %v6221_v39, %v13278_v10 }
 0x69b   : > { %v6230_v0 = vmul.f32 %v6228_v42, %v6048_v14 }
 0x69d   : > { %v6235_v31 = vrot.slane %v6230_v0, %v13276_v60  ;;  %v6239_v48 = vrot.slane %v6230_v0, %v13275_v36 }
 0x69f   : > { %v6242_v43 = vmul.f32 %v6235_v31, %v6108_v50  ;;  %v6243_v49 = vmul.f32 %v6239_v48, %v6109_v1  ;;  %v6294_v3 = vmul.f32 %v6239_v48, %v6046_v23  ;;  %v6264_v28 = vmul.f32 %v6239_v48, %v11907_v30  ;;  %v6049_v50 = vld [vmem:[%s13279_s11] sm:$0x3] }
 0x6a0   : > { %v6266_v57 = vmul.f32 %v6239_v48, %v11913_v44  ;;  %v6280_v53 = vmul.f32 %v6239_v48, %v12086_v62  ;;  %v6282_v32 = vmul.f32 %v6239_v48, %v12091_v25  ;;  %v6263_v52 = vmul.f32 %v6235_v31, %v11918_v40 }
 0x6a1   : > { %v6246_v9 = vcombine.low %v6242_v43, %v6243_v49  ;;  %v6265_v51 = vmul.f32 %v6235_v31, %v11920_v37  ;;  %v6279_v17 = vmul.f32 %v6235_v31, %v12077_v29  ;;  %v6281_v1 = vmul.f32 %v6235_v31, %v12099_v59 }
 0x6a2   : > { %v12214_v23 = vmul.f32 %v6239_v48, %v11924_v24  ;;  %v12217_v30 = vmul.f32 %v6239_v48, %v11951_v6  ;;  %v12220_v44 = vmul.f32 %v6239_v48, %v12107_v41  ;;  %v12224_v40 = vmul.f32 %v6239_v48, %v12133_v19 }
 0x6a3   : > { %v6253_v5 = vrot.slane %v6246_v9, %v13278_v10  ;;  %v12227_v37 = vmul.f32 %v6235_v31, %v11935_v2  ;;  %v12230_v29 = vmul.f32 %v6235_v31, %v11972_v12  ;;  %v12233_v24 = vmul.f32 %v6235_v31, %v12115_v27 }
 0x6a4   : > { %v12236_v6 = vmul.f32 %v6235_v31, %v12127_v56  ;;  %v12239_v25 = vmul.f32 %v6239_v48, %v11981_v45  ;;  %v12242_v59 = vmul.f32 %v6239_v48, %v11996_v34  ;;  %v12245_v19 = vmul.f32 %v6239_v48, %v12141_v33 }
 0x6a5   : > { %v6260_v62 = vrot.slane %v6253_v5, %v13278_v10  ;;  %v12248_v2 = vmul.f32 %v6239_v48, %v12151_v35  ;;  %v12251_v12 = vmul.f32 %v6235_v31, %v11989_v26  ;;  %v12254_v27 = vmul.f32 %v6235_v31, %v12014_v18 }
 0x6a6   : > { %v12257_v56 = vmul.f32 %v6235_v31, %v12139_v47  ;;  %v12260_v45 = vmul.f32 %v6235_v31, %v12149_v38  ;;  %v12263_v34 = vmul.f32 %v6239_v48, %v12029_v15  ;;  %v12272_v26 = vmul.f32 %v6239_v48, %v12049_v20 }
 0x6a7   : > { %v6262_v41 = vsub.f32 %v6049_v50, %v6260_v62  ;;  %v12275_v18 = vmul.f32 %v6239_v48, %v12181_v11  ;;  %v12278_v47 = vmul.f32 %v6235_v31, %v12037_v16  ;;  %v12281_v38 = vmul.f32 %v6235_v31, %v12046_v61 }
 0x6a8   : > { %v12284_v15 = vmul.f32 %v6235_v31, %v12172_v54  ;;  %v12287_v22 = vmul.f32 %v6235_v31, %v12190_v7 }
 0x6a9   : > { %v12266_v33 = vrot.slane %v6262_v41, %v13276_v60  ;;  %v12269_v35 = vrot.slane %v6262_v41, %v13275_v36 }
 0x6ab   : > { %v12290_v36 = vadd.f32 %v12269_v35, %v6294_v3  ;;  %v6307_v20 = vadd.f32 %v12269_v35, %v6264_v28  ;;  %v6309_v11 = vadd.f32 %v12269_v35, %v6266_v57  ;;  %v6323_v21 = vadd.f32 %v12269_v35, %v6280_v53 }
 0x6ac   : > { %v6325_v16 = vadd.f32 %v12269_v35, %v6282_v32  ;;  %v6306_v61 = vadd.f32 %v12266_v33, %v6263_v52  ;;  %v6308_v4 = vadd.f32 %v12266_v33, %v6265_v51  ;;  %v6322_v54 = vadd.f32 %v12266_v33, %v6279_v17 }
 0x6ad   : > { %v12300_v7 = vmul.f32 0.01, %v12290_v36  ;;  %vm6339_vm2 = vcmp.ge.f32.partialorder %v6307_v20, 0.0  ;;  %vm6341_vm8 = vcmp.ge.f32.partialorder %v6309_v11, 0.0  ;;  %v6371_v8 = vmul.f32 0.01, %v6307_v20 }
 0x6ae   : > { %v6373_v58 = vmul.f32 0.01, %v6309_v11  ;;  %vm6355_vm6 = vcmp.ge.f32.partialorder %v6323_v21, 0.0  ;;  %vm6357_vm9 = vcmp.ge.f32.partialorder %v6325_v16, 0.0  ;;  %v6387_v63 = vmul.f32 0.01, %v6323_v21 }
 0x6af   : > { %v6403_v46 = vsel %vm6339_vm2, %v6307_v20, %v6371_v8  ;;  %v6389_v13 = vmul.f32 0.01, %v6325_v16  ;;  %vm6338_vm10 = vcmp.ge.f32.partialorder %v6306_v61, 0.0  ;;  %vm6340_vm11 = vcmp.ge.f32.partialorder %v6308_v4, 0.0 }
 0x6b0   : > { %v6405_v55 = vsel %vm6341_vm8, %v6309_v11, %v6373_v58  ;;  %v6419_v10 = vsel %vm6355_vm6, %v6323_v21, %v6387_v63  ;;  %v6370_v39 = vmul.f32 0.01, %v6306_v61  ;;  %v6372_v14 = vmul.f32 0.01, %v6308_v4 }
 0x6b1   : > { %v6435_v42 = vpack.c.bf16 %v6405_v55, %v6403_v46  ;;  %v6421_v0 = vsel %vm6357_vm9, %v6325_v16, %v6389_v13  ;;  %v6324_v31 = vadd.f32 %v12266_v33, %v6281_v1  ;;  %vm6354_vm12 = vcmp.ge.f32.partialorder %v6322_v54, 0.0 }
 0x6b2   : > { %v6443_v48 = vpack.c.bf16 %v6421_v0, %v6419_v10  ;;  %v6402_v43 = vsel %vm6338_vm10, %v6306_v61, %v6370_v39  ;;  %v6404_v49 = vsel %vm6340_vm11, %v6308_v4, %v6372_v14  ;;  %v6386_v9 = vmul.f32 0.01, %v6322_v54 }
 0x6b3   : > { %7482 = vmatprep.mubr.msk.bf16.mxu0 %vm2747_vm7, %v6435_v42  ;;  %v6434_v3 = vpack.c.bf16 %v6404_v49, %v6402_v43  ;;  %vm6356_vm13 = vcmp.ge.f32.partialorder %v6324_v31, 0.0  ;;  %v6388_v28 = vmul.f32 0.01, %v6324_v31  ;;  %v6311_v57 = vadd.f32 %v12269_v35, %v12214_v23 }
 0x6b4   : > { %7486 = vmatprep.mubr.msk.bf16.mxu1 %vm2747_vm7, %v6443_v48  ;;  %v6418_v53 = vsel %vm6354_vm12, %v6322_v54, %v6386_v9  ;;  %v6313_v32 = vadd.f32 %v12269_v35, %v12217_v30  ;;  %v6327_v5 = vadd.f32 %v12269_v35, %v12220_v44  ;;  %v6329_v52 = vadd.f32 %v12269_v35, %v12224_v40 }
 0x6b5   : > { %6617 = vmatmul.mubr.bf16.vlgmr.msra.gmra.mxu0 %v6434_v3  ;;  %v6420_v51 = vsel %vm6356_vm13, %v6324_v31, %v6388_v28  ;;  %vm6343_vm14 = vcmp.ge.f32.partialorder %v6311_v57, 0.0  ;;  %v6375_v17 = vmul.f32 0.01, %v6311_v57  ;;  %v6310_v50 = vadd.f32 %v12266_v33, %v12227_v37 }
 0x6b6   : > { %v6442_v1 = vpack.c.bf16 %v6420_v51, %v6418_v53  ;;  %vm6345_vm15 = vcmp.ge.f32.partialorder %v6313_v32, 0.0  ;;  %v6377_v23 = vmul.f32 0.01, %v6313_v32  ;;  %vm6359_vm0 = vcmp.ge.f32.partialorder %v6327_v5, 0.0 }
 0x6b7   : > { %v6407_v62 = vsel %vm6343_vm14, %v6311_v57, %v6375_v17  ;;  %vm6361_vm1 = vcmp.ge.f32.partialorder %v6329_v52, 0.0  ;;  %v6391_v30 = vmul.f32 0.01, %v6327_v5  ;;  %v6393_v41 = vmul.f32 0.01, %v6329_v52 }
 0x6b8   : > { %6649 = vmatmul.mubr.bf16.vlgmr.msra.gmra.mxu1 %v6442_v1  ;;  %v6409_v44 = vsel %vm6345_vm15, %v6313_v32, %v6377_v23  ;;  %v6312_v40 = vadd.f32 %v12266_v33, %v12230_v29  ;;  %vm6342_vm3 = vcmp.ge.f32.partialorder %v6310_v50, 0.0  ;;  %v6374_v20 = vmul.f32 0.01, %v6310_v50 }
 0x6b9   : > { %v6437_v11 = vpack.c.bf16 %v6409_v44, %v6407_v62  ;;  %v6423_v21 = vsel %vm6359_vm0, %v6327_v5, %v6391_v30  ;;  %v6425_v16 = vsel %vm6361_vm1, %v6329_v52, %v6393_v41  ;;  %v6326_v37 = vadd.f32 %v12266_v33, %v12233_v24 }
 0x6ba   : > { %v6445_v61 = vpack.c.bf16 %v6425_v16, %v6423_v21  ;;  %vm6344_vm4 = vcmp.ge.f32.partialorder %v6312_v40, 0.0  ;;  %v6376_v4 = vmul.f32 0.01, %v6312_v40  ;;  %v6406_v54 = vsel %vm6342_vm3, %v6310_v50, %v6374_v20 }
 0x6bb   : > { %7483 = vmatprep.mubr.msk.bf16.mxu0 %vm2747_vm7, %v6437_v11  ;;  %v6328_v8 = vadd.f32 %v12266_v33, %v12236_v6  ;;  %vm6358_vm5 = vcmp.ge.f32.partialorder %v6326_v37, 0.0  ;;  %v6390_v58 = vmul.f32 0.01, %v6326_v37  ;;  %v6315_v29 = vadd.f32 %v12269_v35, %v12239_v25 }
 0x6bc   : > { %7487 = vmatprep.mubr.msk.bf16.mxu1 %vm2747_vm7, %v6445_v61  ;;  %v6408_v63 = vsel %vm6344_vm4, %v6312_v40, %v6376_v4  ;;  %v6317_v24 = vadd.f32 %v12269_v35, %v12242_v59  ;;  %v6331_v46 = vadd.f32 %v12269_v35, %v12245_v19  ;;  %v6333_v13 = vadd.f32 %v12269_v35, %v12248_v2 }
 0x6bd   : > { %v6436_v55 = vpack.c.bf16 %v6408_v63, %v6406_v54  ;;  %vm6360_vm2 = vcmp.ge.f32.partialorder %v6328_v8, 0.0  ;;  %v6392_v6 = vmul.f32 0.01, %v6328_v8  ;;  %v6422_v10 = vsel %vm6358_vm5, %v6326_v37, %v6390_v58 }
 0x6be   : > { %vm6347_vm8 = vcmp.ge.f32.partialorder %v6315_v29, 0.0  ;;  %vm6349_vm6 = vcmp.ge.f32.partialorder %v6317_v24, 0.0  ;;  %v6379_v39 = vmul.f32 0.01, %v6315_v29  ;;  %v6381_v25 = vmul.f32 0.01, %v6317_v24 }
 0x6bf   : > { %6625 = vmatmul.mubr.bf16.gmra.mxu0 %v6436_v55  ;;  %v6424_v14 = vsel %vm6360_vm2, %v6328_v8, %v6392_v6  ;;  %vm6363_vm9 = vcmp.ge.f32.partialorder %v6331_v46, 0.0  ;;  %vm6365_vm10 = vcmp.ge.f32.partialorder %v6333_v13, 0.0  ;;  %v6395_v42 = vmul.f32 0.01, %v6331_v46 }
 0x6c0   : > { %v6444_v59 = vpack.c.bf16 %v6424_v14, %v6422_v10  ;;  %v6411_v0 = vsel %vm6347_vm8, %v6315_v29, %v6379_v39  ;;  %v6413_v31 = vsel %vm6349_vm6, %v6317_v24, %v6381_v25  ;;  %v6397_v19 = vmul.f32 0.01, %v6333_v13  ;;  %v12361_v14 = vld [vmem:[%s13280_s15] ss:$0 sm:$0xff] }
 0x6c1   : > { %v6439_v48 = vpack.c.bf16 %v6413_v31, %v6411_v0  ;;  %v6427_v43 = vsel %vm6363_vm9, %v6331_v46, %v6395_v42  ;;  %v6314_v2 = vadd.f32 %v12266_v33, %v12251_v12  ;;  %v6316_v49 = vadd.f32 %v12266_v33, %v12254_v27 }
 0x6c2   : > { %6657 = vmatmul.mubr.bf16.gmra.mxu1 %v6444_v59  ;;  %v6429_v9 = vsel %vm6365_vm10, %v6333_v13, %v6397_v19  ;;  %v6330_v3 = vadd.f32 %v12266_v33, %v12257_v56  ;;  %v6332_v28 = vadd.f32 %v12266_v33, %v12260_v45  ;;  %v6319_v57 = vadd.f32 %v12269_v35, %v12263_v34 }
 0x6c3   : > { %7484 = vmatprep.mubr.msk.bf16.mxu0 %vm2747_vm7, %v6439_v48  ;;  %v6447_v53 = vpack.c.bf16 %v6429_v9, %v6427_v43  ;;  %vm6346_vm11 = vcmp.ge.f32.partialorder %v6314_v2, 0.0  ;;  %vm6348_vm12 = vcmp.ge.f32.partialorder %v6316_v49, 0.0  ;;  %v6378_v12 = vmul.f32 0.01, %v6314_v2 }
 0x6c4   : > { %v6380_v32 = vmul.f32 0.01, %v6316_v49  ;;  %vm6362_vm13 = vcmp.ge.f32.partialorder %v6330_v3, 0.0  ;;  %vm6364_vm14 = vcmp.ge.f32.partialorder %v6332_v28, 0.0  ;;  %v6394_v27 = vmul.f32 0.01, %v6330_v3 }
 0x6c5   : > { %7488 = vmatprep.mubr.msk.bf16.mxu1 %vm2747_vm7, %v6447_v53  ;;  %v6410_v5 = vsel %vm6346_vm11, %v6314_v2, %v6378_v12  ;;  %v6396_v56 = vmul.f32 0.01, %v6332_v28  ;;  %v6321_v45 = vadd.f32 %v12269_v35, %v12272_v26  ;;  %vm6351_vm15 = vcmp.ge.f32.partialorder %v6319_v57, 0.0 }
 0x6c6   : > { %v6412_v52 = vsel %vm6348_vm12, %v6316_v49, %v6380_v32  ;;  %v6426_v34 = vsel %vm6362_vm13, %v6330_v3, %v6394_v27  ;;  %v6383_v51 = vmul.f32 0.01, %v6319_v57  ;;  %v6335_v17 = vadd.f32 %v12269_v35, %v12275_v18 }
 0x6c7   : > { %v6438_v50 = vpack.c.bf16 %v6412_v52, %v6410_v5  ;;  %v6428_v1 = vsel %vm6364_vm14, %v6332_v28, %v6396_v56  ;;  %vm6353_vm0 = vcmp.ge.f32.partialorder %v6321_v45, 0.0  ;;  %v6385_v23 = vmul.f32 0.01, %v6321_v45 }
 0x6c8   : > { %v6446_v62 = vpack.c.bf16 %v6428_v1, %v6426_v34  ;;  %v6415_v30 = vsel %vm6351_vm15, %v6319_v57, %v6383_v51  ;;  %vm6367_vm1 = vcmp.ge.f32.partialorder %v6335_v17, 0.0  ;;  %vm6369_vm3 = vcmp.ge.f32.partialorder %v12290_v36, 0.0 }
 0x6c9   : > { %6633 = vmatmul.mubr.bf16.gmra.mxu0 %v6438_v50  ;;  %v6417_v41 = vsel %vm6353_vm0, %v6321_v45, %v6385_v23  ;;  %v6399_v44 = vmul.f32 0.01, %v6335_v17  ;;  %v6433_v26 = vsel %vm6369_vm3, %v12290_v36, %v12300_v7  ;;  %v6318_v40 = vadd.f32 %v12266_v33, %v12278_v47 }
 0x6ca   : > { %6665 = vmatmul.mubr.bf16.gmra.mxu1 %v6446_v62  ;;  %v6441_v35 = vpack.c.bf16 %v6417_v41, %v6415_v30  ;;  %v6320_v18 = vadd.f32 %v12266_v33, %v12281_v38  ;;  %v6334_v20 = vadd.f32 %v12266_v33, %v12284_v15  ;;  %v6336_v11 = vadd.f32 %v12266_v33, %v12287_v22 }
 0x6cb   : > { %v6431_v21 = vsel %vm6367_vm1, %v6335_v17, %v6399_v44  ;;  %vm6350_vm4 = vcmp.ge.f32.partialorder %v6318_v40, 0.0  ;;  %v6382_v16 = vmul.f32 0.01, %v6318_v40 }
 0x6cc   : > { %7485 = vmatprep.mubr.msk.bf16.mxu0 %vm2747_vm7, %v6441_v35  ;;  %v6449_v36 = vpack.c.bf16 %v6433_v26, %v6431_v21  ;;  %vm6352_vm5 = vcmp.ge.f32.partialorder %v6320_v18, 0.0  ;;  %v6384_v7 = vmul.f32 0.01, %v6320_v18  ;;  %vm6366_vm2 = vcmp.ge.f32.partialorder %v6334_v20, 0.0 }
 0x6cd   : > { %v6414_v47 = vsel %vm6350_vm4, %v6318_v40, %v6382_v16  ;;  %vm6368_vm8 = vcmp.ge.f32.partialorder %v6336_v11, 0.0  ;;  %v6398_v37 = vmul.f32 0.01, %v6334_v20  ;;  %v6400_v61 = vmul.f32 0.01, %v6336_v11 }
 0x6ce   : > { %7489 = vmatprep.mubr.msk.bf16.mxu1 %vm2747_vm7, %v6449_v36  ;;  %v6416_v38 = vsel %vm6352_vm5, %v6320_v18, %v6384_v7 }
 0x6cf   : > { %v6440_v15 = vpack.c.bf16 %v6416_v38, %v6414_v47  ;;  %v6430_v4 = vsel %vm6366_vm2, %v6334_v20, %v6398_v37  ;;  %v6432_v54 = vsel %vm6368_vm8, %v6336_v11, %v6400_v61 }
 0x6d0   : > { %v6448_v33 = vpack.c.bf16 %v6432_v54, %v6430_v4 }
 0x6d1   : > { %6641 = vmatmul.mubr.bf16.gmra.mxu0 %v6440_v15 }
 0x6d2   : > { %6673 = vmatmul.mubr.bf16.gmra.mxu1 %v6448_v33 }
 0x775   : > { %v6618_v22 = vpop.f32.mrf.mxu0 }
 0x776   : > { %v12367_v31 = vadd.f32 %v12361_v14, %v6618_v22 }
 0x777   : > { %v6620_v8 = vpop.f32.mrf.mxu0 }
 0x778   : > { %v6650_v58 = vpop.f32.mrf.mxu1  ;;  %v6705_v28 = vmul.f32 %v12367_v31, %v12367_v31 }
 0x779   : > { %v6621_v29 = vpop.f32.mrf.mxu0  ;;  %v12405_v36 = vadd.f32 %v12361_v14, %v6650_v58 }
 0x77a   : > { %v6652_v63 = vpop.f32.mrf.mxu1  ;;  %v12364_v59 = vadd.f32 %v12361_v14, %v6621_v29 }
 0x77b   : > { %v6623_v24 = vpop.f32.mrf.mxu0  ;;  %v6713_v8 = vmul.f32 %v12405_v36, %v12405_v36 }
 0x77c   : > { %v6653_v46 = vpop.f32.mrf.mxu1  ;;  %v6706_v2 = vmul.f32 %v12364_v59, %v12364_v59  ;;  %v6683_v57 = vadd.f32 %v12364_v59, %v12367_v31 }
 0x77d   : > { %v12412_v15 = vadd.f32 %v12361_v14, %v6653_v46 }
 0x77e   : > { %v6655_v13 = vpop.f32.mrf.mxu1  ;;  %v6721_v5 = vadd.f32 %v6706_v2, %v6705_v28 }
 0x77f   : > { %v6626_v55 = vpop.f32.mrf.mxu0  ;;  %v6714_v24 = vmul.f32 %v12412_v15, %v12412_v15 }
 0x780   : > { %v12370_v19 = vadd.f32 %v12361_v14, %v6626_v55 }
 0x781   : > { %v6628_v6 = vpop.f32.mrf.mxu0 }
 0x782   : > { %v6658_v10 = vpop.f32.mrf.mxu1  ;;  %v6707_v53 = vmul.f32 %v12370_v19, %v12370_v19  ;;  %v6684_v56 = vadd.f32 %v6683_v57, %v12370_v19 }
 0x783   : > { %v6629_v39 = vpop.f32.mrf.mxu0  ;;  %v12420_v58 = vadd.f32 %v12361_v14, %v6658_v10 }
 0x784   : > { %v6660_v25 = vpop.f32.mrf.mxu1  ;;  %v12375_v49 = vadd.f32 %v12361_v14, %v6629_v39  ;;  %v6722_v17 = vadd.f32 %v6721_v5, %v6707_v53 }
 0x785   : > { %v6631_v42 = vpop.f32.mrf.mxu0  ;;  %v6715_v6 = vmul.f32 %v12420_v58, %v12420_v58 }
 0x786   : > { %v6661_v0 = vpop.f32.mrf.mxu1  ;;  %v6708_v45 = vmul.f32 %v12375_v49, %v12375_v49  ;;  %v6685_v50 = vadd.f32 %v6684_v56, %v12375_v49 }
 0x787   : > { %v12426_v46 = vadd.f32 %v12361_v14, %v6661_v0 }
 0x788   : > { %v6663_v48 = vpop.f32.mrf.mxu1  ;;  %v6723_v30 = vadd.f32 %v6722_v17, %v6708_v45 }
 0x789   : > { %v6634_v43 = vpop.f32.mrf.mxu0  ;;  %v6716_v42 = vmul.f32 %v12426_v46, %v12426_v46 }
 0x78a   : > { %v6666_v9 = vpop.f32.mrf.mxu1  ;;  %v12384_v12 = vadd.f32 %v12361_v14, %v6634_v43 }
 0x78b   : > { %v6636_v3 = vpop.f32.mrf.mxu0  ;;  %v12432_v39 = vadd.f32 %v12361_v14, %v6666_v9 }
 0x78c   : > { %v6668_v32 = vpop.f32.mrf.mxu1  ;;  %v6709_v1 = vmul.f32 %v12384_v12, %v12384_v12  ;;  %v6686_v41 = vadd.f32 %v6685_v50, %v12384_v12 }
 0x78d   : > { %v6637_v27 = vpop.f32.mrf.mxu0  ;;  %v6717_v2 = vmul.f32 %v12432_v39, %v12432_v39 }
 0x78e   : > { %v12390_v52 = vadd.f32 %v12361_v14, %v6637_v27  ;;  %v6669_v34 = vpop.f32.mrf.mxu1  ;;  %v6724_v18 = vadd.f32 %v6723_v30, %v6709_v1 }
 0x78f   : > { %v6639_v51 = vpop.f32.mrf.mxu0  ;;  %v12438_v48 = vadd.f32 %v12361_v14, %v6669_v34 }
 0x790   : > { %v6671_v23 = vpop.f32.mrf.mxu1  ;;  %v6710_v44 = vmul.f32 %v12390_v52, %v12390_v52  ;;  %v6687_v20 = vadd.f32 %v6686_v41, %v12390_v52 }
 0x791   : > { %v6642_v62 = vpop.f32.mrf.mxu0  ;;  %v6718_v57 = vmul.f32 %v12438_v48, %v12438_v48 }
 0x792   : > { %v12399_v26 = vadd.f32 %v12361_v14, %v6642_v62  ;;  %v6674_v40 = vpop.f32.mrf.mxu1  ;;  %v6725_v7 = vadd.f32 %v6724_v18, %v6710_v44 }
 0x793   : > { %v6644_v35 = vpop.f32.mrf.mxu0  ;;  %v12444_v3 = vadd.f32 %v12361_v14, %v6674_v40 }
 0x794   : > { %v6711_v11 = vmul.f32 %v12399_v26, %v12399_v26  ;;  %v6676_v21 = vpop.f32.mrf.mxu1  ;;  %v6688_v47 = vadd.f32 %v6687_v20, %v12399_v26 }
 0x795   : > { %v6645_v16 = vpop.f32.mrf.mxu0  ;;  %v6719_v5 = vmul.f32 %v12444_v3, %v12444_v3 }
 0x796   : > { %v12409_v37 = vadd.f32 %v12361_v14, %v6645_v16  ;;  %v6677_v61 = vpop.f32.mrf.mxu1  ;;  %v6726_v4 = vadd.f32 %v6725_v7, %v6711_v11 }
 0x797   : > { %v6647_v38 = vpop.f32.mrf.mxu0  ;;  %v12450_v53 = vadd.f32 %v12361_v14, %v6677_v61 }
 0x798   : > { %v6689_v54 = vadd.f32 %v6688_v47, %v12409_v37  ;;  %v6712_v33 = vmul.f32 %v12409_v37, %v12409_v37  ;;  %v6679_v22 = vpop.f32.mrf.mxu1 }
 0x799   : > { %v6720_v51 = vmul.f32 %v12450_v53, %v12450_v53  ;;  %v6682_v22 = vld [vmem:[%s13282_s23] sm:$0x1] }
 0x79a   : > { %v6690_v29 = vadd.f32 %v6689_v54, %v12405_v36  ;;  %v6727_v63 = vadd.f32 %v6726_v4, %v6712_v33  ;;  %v6681_v4 = vld [vmem:[%s13281_s16] sm:$0x1] }
 0x79c   : > { %v6691_v13 = vadd.f32 %v6690_v29, %v12412_v15  ;;  %v6728_v55 = vadd.f32 %v6727_v63, %v6713_v8  ;;  %v13283_v63 = vlaneseq }
 0x79e   : > { %v6692_v10 = vadd.f32 %v6691_v13, %v12420_v58  ;;  %v6729_v25 = vadd.f32 %v6728_v55, %v6714_v24  ;;  %v12463_v24 = vand.u32 127, %v13283_v63 }
 0x7a0   : > { %v6730_v0 = vadd.f32 %v6729_v25, %v6715_v6  ;;  %v6693_v43 = vadd.f32 %v6692_v10, %v12426_v46  ;;  %vm6797_vm7 = vcmp.lt.s32.totalorder %v12463_v24, 7 }
 0x7a2   : > { %v6694_v9 = vadd.f32 %v6693_v43, %v12432_v39  ;;  %v6731_v28 = vadd.f32 %v6730_v0, %v6716_v42 }
 0x7a4   : > { %v6695_v32 = vadd.f32 %v6694_v9, %v12438_v48  ;;  %v6732_v27 = vadd.f32 %v6731_v28, %v6717_v2 }
 0x7a6   : > { %v6696_v56 = vadd.f32 %v6695_v32, %v12444_v3  ;;  %v6733_v45 = vadd.f32 %v6732_v27, %v6718_v57 }
 0x7a8   : > { %v6697_v34 = vadd.f32 %v6696_v56, %v12450_v53  ;;  %v6734_v17 = vadd.f32 %v6733_v45, %v6719_v5 }
 0x7aa   : > { %v6698_v50 = vrot.slane %v6697_v34, 4  ;;  %v6735_v1 = vadd.f32 %v6734_v17, %v6720_v51 }
 0x7ac   : > { %v6699_v23 = vadd.f32 %v6698_v50, %v6697_v34  ;;  %v6736_v14 = vrot.slane %v6735_v1, 4 }
 0x7ae   : > { %v6700_v62 = vrot.slane %v6699_v23, 2  ;;  %v6737_v30 = vadd.f32 %v6736_v14, %v6735_v1 }
 0x7b0   : > { %v6701_v41 = vadd.f32 %v6700_v62, %v6699_v23  ;;  %v6738_v44 = vrot.slane %v6737_v30, 2 }
 0x7b2   : > { %v6702_v40 = vrot.slane %v6701_v41, 1  ;;  %v6739_v35 = vadd.f32 %v6738_v44, %v6737_v30 }
 0x7b4   : > { %v6703_v18 = vadd.f32 %v6702_v40, %v6701_v41  ;;  %v6740_v20 = vrot.slane %v6739_v35, 1 }
 0x7b6   : > { %v6704_v11 = vmul.f32 0.0078125, %v6703_v18  ;;  %v6741_v21 = vadd.f32 %v6740_v20, %v6739_v35 }
 0x7b8   : > { %v6742_v16 = vmul.f32 0.0078125, %v6741_v21  ;;  %v6743_v7 = vmul.f32 %v6704_v11, %v6704_v11 }
 0x7ba   : > { %v6744_v47 = vsub.f32 %v6742_v16, %v6743_v7 }
 0x7bc   : > { %v6745_v61 = vmax.f32 %v6744_v47, 0.0 }
 0x7be   : > { %v6746_v38 = vadd.f32 1e-05, %v6745_v61 }
 0x7c0   : > { %7891 = vrsqrt.f32 %v6746_v38 }
 0x7cd   : > { %v7892_v54 = vpop.eup %7891 }
 0x7ce   : > { %v6748_v33 = vmul.f32 %v7892_v54, %v6681_v4 }
 0x7d0   : > { %v6749_v8 = vmul.f32 %v6748_v33, %v6704_v11  ;;  %v6755_v29 = vrot.slane %v6748_v33, %v13276_v60 }
 0x7d2   : > { %v6750_v13 = vsub.f32 %v6682_v22, %v6749_v8  ;;  %v6758_v6 = vmul.f32 %v6755_v29, %v12364_v59  ;;  %v6757_v10 = vmul.f32 %v6755_v29, %v12367_v31  ;;  %v6760_v0 = vmul.f32 %v6755_v29, %v12375_v49 }
 0x7d3   : > { %v6759_v43 = vmul.f32 %v6755_v29, %v12370_v19  ;;  %v6762_v59 = vmul.f32 %v6755_v29, %v12390_v52  ;;  %v6761_v31 = vmul.f32 %v6755_v29, %v12384_v12  ;;  %v6764_v27 = vmul.f32 %v6755_v29, %v12409_v37 }
 0x7d4   : > { %v6777_v55 = vrot.slane %v6750_v13, %v13276_v60  ;;  %v6763_v5 = vmul.f32 %v6755_v29, %v12399_v26  ;;  %v6766_v34 = vmul.f32 %v6755_v29, %v12412_v15  ;;  %v6765_v51 = vmul.f32 %v6755_v29, %v12405_v36 }
 0x7d5   : > { %v6768_v1 = vmul.f32 %v6755_v29, %v12426_v46  ;;  %v6767_v23 = vmul.f32 %v6755_v29, %v12420_v58  ;;  %v6770_v30 = vmul.f32 %v6755_v29, %v12438_v48  ;;  %v6769_v46 = vmul.f32 %v6755_v29, %v12432_v39 }
 0x7d6   : > { %v6780_v25 = vadd.f32 %v6777_v55, %v6758_v6  ;;  %v6779_v42 = vadd.f32 %v6777_v55, %v6757_v10  ;;  %v6782_v28 = vadd.f32 %v6777_v55, %v6760_v0  ;;  %v6781_v60 = vadd.f32 %v6777_v55, %v6759_v43 }
 0x7d7   : > { %v6784_v49 = vadd.f32 %v6777_v55, %v6762_v59  ;;  %v6783_v32 = vadd.f32 %v6777_v55, %v6761_v31  ;;  %v6786_v52 = vadd.f32 %v6777_v55, %v6764_v27  ;;  %v6785_v45 = vadd.f32 %v6777_v55, %v6763_v5 }
 0x7d8   : > { %v6799_v2 = vsel %vm6797_vm7, %v6780_v25, -1e+30  ;;  %v6798_v9 = vsel %vm6797_vm7, %v6779_v42, -1e+30  ;;  %v6801_v57 = vsel %vm6797_vm7, %v6782_v28, -1e+30  ;;  %v6788_v37 = vadd.f32 %v6777_v55, %v6766_v34 }
 0x7d9   : > { %6816 = vmax.xlane.f32.xlu0 %v6799_v2  ;;  %6814 = vmax.xlane.f32.xlu1 %v6798_v9  ;;  %v6800_v19 = vsel %vm6797_vm7, %v6781_v60, -1e+30  ;;  %v6803_v56 = vsel %vm6797_vm7, %v6784_v49, -1e+30  ;;  %v6802_v12 = vsel %vm6797_vm7, %v6783_v32, -1e+30  ;;  %v6787_v50 = vadd.f32 %v6777_v55, %v6765_v51 }
 0x7da   : > { %v6805_v17 = vsel %vm6797_vm7, %v6786_v52, -1e+30  ;;  %v6804_v26 = vsel %vm6797_vm7, %v6785_v45, -1e+30  ;;  %v12497_v14 = vsel %vm6797_vm7, %v6788_v37, -1e+30  ;;  %v6790_v15 = vadd.f32 %v6777_v55, %v6768_v1 }
 0x7db   : > { %v12501_v36 = vsel %vm6797_vm7, %v6787_v50, -1e+30  ;;  %v6789_v62 = vadd.f32 %v6777_v55, %v6767_v23  ;;  %v6792_v44 = vadd.f32 %v6777_v55, %v6770_v30  ;;  %v6791_v40 = vadd.f32 %v6777_v55, %v6769_v46 }
 0x7dc   : > { %v12509_v58 = vsel %vm6797_vm7, %v6790_v15, -1e+30  ;;  %v6772_v35 = vmul.f32 %v6755_v29, %v12450_v53  ;;  %v6771_v48 = vmul.f32 %v6755_v29, %v12444_v3 }
 0x7dd   : > { %6820 = vmax.xlane.f32.xlu0 %v6801_v57  ;;  %6818 = vmax.xlane.f32.xlu1 %v6800_v19  ;;  %v12513_v41 = vsel %vm6797_vm7, %v6789_v62, -1e+30  ;;  %v12521_v39 = vsel %vm6797_vm7, %v6792_v44, -1e+30  ;;  %v12525_v18 = vsel %vm6797_vm7, %v6791_v40, -1e+30 }
 0x7de   : > { %v6794_v20 = vadd.f32 %v6777_v55, %v6772_v35  ;;  %v6793_v11 = vadd.f32 %v6777_v55, %v6771_v48 }
 0x7e0   : > { %v12531_v21 = vsel %vm6797_vm7, %v6794_v20, -1e+30  ;;  %v12535_v3 = vsel %vm6797_vm7, %v6793_v11, -1e+30 }
 0x7e1   : > { %6824 = vmax.xlane.f32.xlu0 %v6803_v56  ;;  %6822 = vmax.xlane.f32.xlu1 %v6802_v12 }
 0x7e5   : > { %6828 = vmax.xlane.f32.xlu0 %v6805_v17  ;;  %6826 = vmax.xlane.f32.xlu1 %v6804_v26 }
 0x7e9   : > { %6832 = vmax.xlane.f32.xlu0 %v12497_v14  ;;  %6830 = vmax.xlane.f32.xlu1 %v12501_v36 }
 0x7ed   : > { %6836 = vmax.xlane.f32.xlu0 %v12509_v58  ;;  %6834 = vmax.xlane.f32.xlu1 %v12513_v41 }
 0x7f1   : > { %6840 = vmax.xlane.f32.xlu0 %v12521_v39  ;;  %6838 = vmax.xlane.f32.xlu1 %v12525_v18 }
 0x7f5   : > { %6844 = vmax.xlane.f32.xlu0 %v12531_v21  ;;  %6842 = vmax.xlane.f32.xlu1 %v12535_v3 }
 0x862   : > { %v6817_v53 = vpop.xlane.xlu0 %6816  ;;  %v6815_v16 = vpop.xlane.xlu1 %6814 }
 0x863   : > { %v6847_v7 = vsub.f32 %v6799_v2, %v6817_v53  ;;  %v6846_v47 = vsub.f32 %v6798_v9, %v6815_v16 }
 0x865   : > { %v6864_v61 = vmul.f32 1.442695, %v6847_v7  ;;  %v6862_v38 = vmul.f32 1.442695, %v6846_v47 }
 0x866   : > { %v6821_v4 = vpop.xlane.xlu0 %6820  ;;  %v6819_v54 = vpop.xlane.xlu1 %6818 }
 0x867   : > { %7893 = vpow2.f32 %v6864_v61  ;;  %v6849_v33 = vsub.f32 %v6801_v57, %v6821_v4  ;;  %v6848_v22 = vsub.f32 %v6800_v19, %v6819_v54 }
 0x868   : > { %7895 = vpow2.f32 %v6862_v38 }
 0x869   : > { %v6868_v8 = vmul.f32 1.442695, %v6849_v33  ;;  %v6866_v29 = vmul.f32 1.442695, %v6848_v22 }
 0x86a   : > { %v6825_v63 = vpop.xlane.xlu0 %6824  ;;  %v6823_v24 = vpop.xlane.xlu1 %6822 }
 0x86b   : > { %7897 = vpow2.f32 %v6868_v8  ;;  %v6851_v13 = vsub.f32 %v6803_v56, %v6825_v63  ;;  %v6850_v55 = vsub.f32 %v6802_v12, %v6823_v24 }
 0x86c   : > { %7899 = vpow2.f32 %v6866_v29 }
 0x86d   : > { %v6872_v6 = vmul.f32 1.442695, %v6851_v13  ;;  %v6870_v10 = vmul.f32 1.442695, %v6850_v55 }
 0x86e   : > { %v6829_v25 = vpop.xlane.xlu0 %6828  ;;  %v6827_v42 = vpop.xlane.xlu1 %6826 }
 0x86f   : > { %7901 = vpow2.f32 %v6872_v6  ;;  %v6853_v0 = vsub.f32 %v6805_v17, %v6829_v25  ;;  %v6852_v43 = vsub.f32 %v6804_v26, %v6827_v42 }
 0x870   : > { %7903 = vpow2.f32 %v6870_v10 }
 0x871   : > { %v6876_v2 = vmul.f32 1.442695, %v6853_v0  ;;  %v6874_v9 = vmul.f32 1.442695, %v6852_v43 }
 0x872   : > { %v6833_v28 = vpop.xlane.xlu0 %6832  ;;  %v6831_v60 = vpop.xlane.xlu1 %6830 }
 0x873   : > { %7905 = vpow2.f32 %v6876_v2  ;;  %v6855_v59 = vsub.f32 %v12497_v14, %v6833_v28  ;;  %v6854_v31 = vsub.f32 %v12501_v36, %v6831_v60 }
 0x874   : > { %v12541_v57 = vpop.eup %7893  ;;  %7907 = vpow2.f32 %v6874_v9 }
 0x875   : > { %v12543_v19 = vpop.eup %7895  ;;  %v6880_v49 = vmul.f32 1.442695, %v6855_v59  ;;  %v6878_v32 = vmul.f32 1.442695, %v6854_v31  ;;  %6896 = vadd.xlane.f32.xlu0 %v12541_v57 }
 0x876   : > { %6894 = vadd.xlane.f32.xlu1 %v12543_v19  ;;  %v6837_v27 = vpop.xlane.xlu0 %6836  ;;  %v6835_v5 = vpop.xlane.xlu1 %6834 }
 0x877   : > { %7909 = vpow2.f32 %v6880_v49  ;;  %v6857_v56 = vsub.f32 %v12509_v58, %v6837_v27  ;;  %v6856_v12 = vsub.f32 %v12513_v41, %v6835_v5 }
 0x878   : > { %v12549_v52 = vpop.eup %7897  ;;  %7911 = vpow2.f32 %v6878_v32 }
 0x879   : > { %v12551_v45 = vpop.eup %7899  ;;  %v6884_v34 = vmul.f32 1.442695, %v6857_v56  ;;  %v6882_v51 = vmul.f32 1.442695, %v6856_v12  ;;  %6900 = vadd.xlane.f32.xlu0 %v12549_v52 }
 0x87a   : > { %6898 = vadd.xlane.f32.xlu1 %v12551_v45  ;;  %v6841_v17 = vpop.xlane.xlu0 %6840  ;;  %v6839_v26 = vpop.xlane.xlu1 %6838 }
 0x87b   : > { %7913 = vpow2.f32 %v6884_v34  ;;  %v6859_v37 = vsub.f32 %v12521_v39, %v6841_v17  ;;  %v6858_v50 = vsub.f32 %v12525_v18, %v6839_v26 }
 0x87c   : > { %v12557_v1 = vpop.eup %7901  ;;  %7915 = vpow2.f32 %v6882_v51 }
 0x87d   : > { %v12559_v23 = vpop.eup %7903  ;;  %v6888_v14 = vmul.f32 1.442695, %v6859_v37  ;;  %v6886_v36 = vmul.f32 1.442695, %v6858_v50  ;;  %6904 = vadd.xlane.f32.xlu0 %v12557_v1 }
 0x87e   : > { %6902 = vadd.xlane.f32.xlu1 %v12559_v23  ;;  %v6845_v15 = vpop.xlane.xlu0 %6844  ;;  %v6843_v62 = vpop.xlane.xlu1 %6842 }
 0x87f   : > { %7917 = vpow2.f32 %v6888_v14  ;;  %v6861_v30 = vsub.f32 %v12531_v21, %v6845_v15  ;;  %v6860_v46 = vsub.f32 %v12535_v3, %v6843_v62 }
 0x880   : > { %v12565_v58 = vpop.eup %7905  ;;  %7919 = vpow2.f32 %v6886_v36 }
 0x881   : > { %v12567_v41 = vpop.eup %7907  ;;  %v6892_v44 = vmul.f32 1.442695, %v6861_v30  ;;  %v6890_v40 = vmul.f32 1.442695, %v6860_v46  ;;  %6908 = vadd.xlane.f32.xlu0 %v12565_v58 }
 0x882   : > { %6906 = vadd.xlane.f32.xlu1 %v12567_v41 }
 0x883   : > { %7921 = vpow2.f32 %v6892_v44 }
 0x884   : > { %v12571_v35 = vpop.eup %7909  ;;  %7923 = vpow2.f32 %v6890_v40 }
 0x885   : > { %v12573_v48 = vpop.eup %7911  ;;  %6912 = vadd.xlane.f32.xlu0 %v12571_v35 }
 0x886   : > { %6910 = vadd.xlane.f32.xlu1 %v12573_v48 }
 0x888   : > { %v12577_v39 = vpop.eup %7913 }
 0x889   : > { %v12579_v18 = vpop.eup %7915  ;;  %6916 = vadd.xlane.f32.xlu0 %v12577_v39 }
 0x88a   : > { %6914 = vadd.xlane.f32.xlu1 %v12579_v18 }
 0x88c   : > { %v12583_v20 = vpop.eup %7917 }
 0x88d   : > { %v12585_v11 = vpop.eup %7919  ;;  %6920 = vadd.xlane.f32.xlu0 %v12583_v20 }
 0x88e   : > { %6918 = vadd.xlane.f32.xlu1 %v12585_v11 }
 0x890   : > { %v12589_v21 = vpop.eup %7921 }
 0x891   : > { %v12591_v3 = vpop.eup %7923  ;;  %6924 = vadd.xlane.f32.xlu0 %v12589_v21 }
 0x892   : > { %6922 = vadd.xlane.f32.xlu1 %v12591_v3 }
 0x8fe   : > { %v6897_v53 = vpop.xlane.xlu0 %6896 }
 0x8ff   : > { %7925 = vrcp.f32 %v6897_v53  ;;  %v6895_v16 = vpop.xlane.xlu1 %6894 }
 0x900   : > { %7927 = vrcp.f32 %v6895_v16 }
 0x902   : > { %v6901_v7 = vpop.xlane.xlu0 %6900 }
 0x903   : > { %7929 = vrcp.f32 %v6901_v7  ;;  %v6899_v47 = vpop.xlane.xlu1 %6898 }
 0x904   : > { %7931 = vrcp.f32 %v6899_v47 }
 0x906   : > { %v6905_v61 = vpop.xlane.xlu0 %6904 }
 0x907   : > { %7933 = vrcp.f32 %v6905_v61  ;;  %v6903_v38 = vpop.xlane.xlu1 %6902 }
 0x908   : > { %7935 = vrcp.f32 %v6903_v38 }
 0x90a   : > { %v6909_v4 = vpop.xlane.xlu0 %6908 }
 0x90b   : > { %7937 = vrcp.f32 %v6909_v4  ;;  %v6907_v54 = vpop.xlane.xlu1 %6906 }
 0x90c   : > { %v7926_v33 = vpop.eup %7925  ;;  %7939 = vrcp.f32 %v6907_v54 }
 0x90d   : > { %v7928_v22 = vpop.eup %7927  ;;  %v6943_v8 = vmul.f32 %v7926_v33, %v12541_v57 }
 0x90e   : > { %v6942_v29 = vmul.f32 %v7928_v22, %v12543_v19  ;;  %v6913_v63 = vpop.xlane.xlu0 %6912 }
 0x90f   : > { %7007 = vst [vmem:[%s12597_s28 + $0x8] sm:$0xff] %v6943_v8  ;;  %7941 = vrcp.f32 %v6913_v63  ;;  %v6911_v24 = vpop.xlane.xlu1 %6910 }
 0x910   : > { %v7930_v13 = vpop.eup %7929  ;;  %7006 = vst [vmem:[%s12597_s28] sm:$0xff] %v6942_v29  ;;  %7943 = vrcp.f32 %v6911_v24 }
 0x911   : > { %v7932_v55 = vpop.eup %7931  ;;  %v6945_v6 = vmul.f32 %v7930_v13, %v12549_v52 }
 0x912   : > { %v6944_v10 = vmul.f32 %v7932_v55, %v12551_v45  ;;  %v6917_v25 = vpop.xlane.xlu0 %6916 }
 0x913   : > { %7009 = vst [vmem:[%s12597_s28 + $0x18] sm:$0xff] %v6945_v6  ;;  %7945 = vrcp.f32 %v6917_v25  ;;  %v6915_v42 = vpop.xlane.xlu1 %6914 }
 0x914   : > { %v7934_v0 = vpop.eup %7933  ;;  %7008 = vst [vmem:[%s12597_s28 + $0x10] sm:$0xff] %v6944_v10  ;;  %7947 = vrcp.f32 %v6915_v42 }
 0x915   : > { %v7936_v43 = vpop.eup %7935  ;;  %v6947_v2 = vmul.f32 %v7934_v0, %v12557_v1 }
 0x916   : > { %v6946_v9 = vmul.f32 %v7936_v43, %v12559_v23  ;;  %v6921_v28 = vpop.xlane.xlu0 %6920 }
 0x917   : > { %7011 = vst [vmem:[%s12597_s28 + $0x28] sm:$0xff] %v6947_v2  ;;  %7949 = vrcp.f32 %v6921_v28  ;;  %v6919_v60 = vpop.xlane.xlu1 %6918 }
 0x918   : > { %v7938_v59 = vpop.eup %7937  ;;  %7010 = vst [vmem:[%s12597_s28 + $0x20] sm:$0xff] %v6946_v9  ;;  %7951 = vrcp.f32 %v6919_v60 }
 0x919   : > { %v7940_v31 = vpop.eup %7939  ;;  %v6949_v57 = vmul.f32 %v7938_v59, %v12565_v58 }
 0x91a   : > { %v6948_v19 = vmul.f32 %v7940_v31, %v12567_v41  ;;  %v6925_v49 = vpop.xlane.xlu0 %6924 }
 0x91b   : > { %7013 = vst [vmem:[%s12597_s28 + $0x38] sm:$0xff] %v6949_v57  ;;  %7953 = vrcp.f32 %v6925_v49  ;;  %v6923_v32 = vpop.xlane.xlu1 %6922 }
 0x91c   : > { %v7942_v27 = vpop.eup %7941  ;;  %7012 = vst [vmem:[%s12597_s28 + $0x30] sm:$0xff] %v6948_v19  ;;  %7955 = vrcp.f32 %v6923_v32 }
 0x91d   : > { %v7944_v5 = vpop.eup %7943  ;;  %v6951_v56 = vmul.f32 %v7942_v27, %v12571_v35 }
 0x91e   : > { %v6950_v12 = vmul.f32 %v7944_v5, %v12573_v48 }
 0x91f   : > { %7015 = vst [vmem:[%s12597_s28 + $0x48] sm:$0xff] %v6951_v56 }
 0x920   : > { %v7946_v52 = vpop.eup %7945  ;;  %7014 = vst [vmem:[%s12597_s28 + $0x40] sm:$0xff] %v6950_v12 }
 0x921   : > { %v7948_v45 = vpop.eup %7947  ;;  %v6953_v34 = vmul.f32 %v7946_v52, %v12577_v39 }
 0x922   : > { %v6952_v51 = vmul.f32 %v7948_v45, %v12579_v18 }
 0x923   : > { %7017 = vst [vmem:[%s12597_s28 + $0x58] sm:$0xff] %v6953_v34 }
 0x924   : > { %v7950_v17 = vpop.eup %7949  ;;  %7016 = vst [vmem:[%s12597_s28 + $0x50] sm:$0xff] %v6952_v51 }
 0x925   : > { %v7952_v26 = vpop.eup %7951  ;;  %v6955_v37 = vmul.f32 %v7950_v17, %v12583_v20 }
 0x926   : > { %v6954_v50 = vmul.f32 %v7952_v26, %v12585_v11 }
 0x927   : > { %7019 = vst [vmem:[%s12597_s28 + $0x68] sm:$0xff] %v6955_v37 }
 0x928   : > { %v7954_v1 = vpop.eup %7953  ;;  %7018 = vst [vmem:[%s12597_s28 + $0x60] sm:$0xff] %v6954_v50 }
 0x929   : > { %v7956_v23 = vpop.eup %7955  ;;  %v6957_v14 = vmul.f32 %v7954_v1, %v12589_v21 }
 0x92a   : > { %v6956_v36 = vmul.f32 %v7956_v23, %v12591_v3 }
 0x92b   : > { %7021 = vst [vmem:[%s12597_s28 + $0x78] sm:$0xff] %v6957_v14 }
 0x92c   : > { %7020 = vst [vmem:[%s12597_s28 + $0x70] sm:$0xff] %v6956_v36 }
 0x92d PF: > { %s74_s22 = sadd.s32 1, %s7963_s22  }
 0x92e   : > { %p71_p4 = scmp.ge.s32.totalorder %s74_s22, 4  }
 0x930   :  { %73 = sbr.rel (!%p71_p4) target bundleno = 50 (0x32), region = 235 }

</bundles_post_ra>
